<compile_context>
chip_gen: v6e
topology: v6e:2x2x1
jax: 0.10.0
libtpu: 0.0.40
codegen_flags: <defaults>
</compile_context>

<pallas_src>
import functools

import jax
import jax.numpy as jnp
from jax.experimental import pallas as pl
from jax.experimental.pallas import tpu as pltpu

_WOFF = 8  # interior column offset inside the padded conv scratch (sublane aligned)


def _round_up(x, m):
    return ((x + m - 1) // m) * m


# ----------------------------------------------------------------------------
# Kernel 1: fused conv1 -> conv2 -> conv3 (3x3, stride 1, pad 1, ReLU), per image
# ----------------------------------------------------------------------------
def _conv_stack_kernel(x_ref, w1_ref, b1_ref, w2_ref, b2_ref, w3_ref, b3_ref,
                       o_ref, pad_ref, patch_ref):
    # x_ref  : (1, H, W, 4)          one image (NHWC)
    # w*_ref : (Kp, Cout)            im2col conv weights, rows ordered (kh,kw,ci),
    #                                zero-padded to Kp = round_up(9*Cin, 8)
    # b*_ref : (1, Cout)
    # o_ref  : (1, H, W, 64)         conv3 output (post-ReLU), bf16
    # pad_ref   : (H+2, WP, Cmax) f32 shared spatially-padded activation scratch
    # patch_ref : (H*W, Kp_max) f32   shared im2col patch scratch
    _, H, W, c_in0 = x_ref.shape
    M = H * W
    CMAX = pad_ref.shape[-1]
    lo = _WOFF - 1            # left halo column
    hi = _WOFF + W            # right halo column

    # Zero only the halo; the interior is overwritten by every layer and
    # columns outside [lo, hi] are never read.
    zrow = jnp.zeros((1, W + 2, CMAX), jnp.float32)
    zcol = jnp.zeros((H + 2, 1, CMAX), jnp.float32)
    pad_ref[0:1, lo:hi + 1, :] = zrow
    pad_ref[H + 1:H + 2, lo:hi + 1, :] = zrow
    pad_ref[:, lo:lo + 1, :] = zcol
    pad_ref[:, hi:hi + 1, :] = zcol

    def conv3x3_relu(cin, w_ref, b_ref):
        kp = w_ref.shape[0]
        # im2col: 9 shifted windows -> (M, 9*cin) patch matrix -> one matmul.
        for kh in range(3):
            for kw in range(3):
                tap = kh * 3 + kw
                win = pad_ref[kh:kh + H, lo + kw:lo + kw + W, 0:cin]
                patch_ref[:, tap * cin:(tap + 1) * cin] = win.reshape(M, cin)
        if kp > 9 * cin:      # zero K padding (matching weight rows are zero)
            patch_ref[:, 9 * cin:kp] = jnp.zeros((M, kp - 9 * cin), jnp.float32)
        h = jnp.dot(patch_ref[:, 0:kp], w_ref[...],
                    preferred_element_type=jnp.float32)
        return jnp.maximum(h + b_ref[...], 0.0)

    pad_ref[1:H + 1, _WOFF:_WOFF + W, 0:c_in0] = x_ref[0]
    h1 = conv3x3_relu(c_in0, w1_ref, b1_ref)                     # (M, 32)
    pad_ref[1:H + 1, _WOFF:_WOFF + W, 0:h1.shape[-1]] = h1.reshape(H, W, -1)
    h2 = conv3x3_relu(h1.shape[-1], w2_ref, b2_ref)              # (M, 64)
    pad_ref[1:H + 1, _WOFF:_WOFF + W, 0:h2.shape[-1]] = h2.reshape(H, W, -1)
    h3 = conv3x3_relu(h2.shape[-1], w3_ref, b3_ref)              # (M, 64)
    o_ref[...] = h3.reshape(1, H, W, h3.shape[-1]).astype(o_ref.dtype)


def conv_stack(x_nhwc, w1, b1, w2, b2, w3, b3):
    """x_nhwc: (B, H, W, 4) f32 -> conv1/2/3 ReLU output, (B, H, W, 64) bf16."""
    B, H, W, Cin = x_nhwc.shape
    C3 = w3.shape[-1]
    cmax = max(Cin, w1.shape[-1], w2.shape[-1], w3.shape[-1])
    WP = _WOFF + _round_up(W + 1, 8)          # padded scratch width (>= W + 2)
    kp_max = max(w1.shape[0], w2.shape[0], w3.shape[0])

    def const(shape):
        return pl.BlockSpec(shape, lambda b: (0,) * len(shape))

    return pl.pallas_call(
        _conv_stack_kernel,
        out_shape=jax.ShapeDtypeStruct((B, H, W, C3), jnp.bfloat16),
        grid=(B,),
        in_specs=[
            pl.BlockSpec((1, H, W, Cin), lambda b: (b, 0, 0, 0)),
            const(w1.shape), const(b1.shape),
            const(w2.shape), const(b2.shape),
            const(w3.shape), const(b3.shape),
        ],
        out_specs=pl.BlockSpec((1, H, W, C3), lambda b: (b, 0, 0, 0)),
        scratch_shapes=[
            pltpu.VMEM((H + 2, WP, cmax), jnp.float32),
            pltpu.VMEM((H * W, kp_max), jnp.float32),
        ],
        compiler_params=pltpu.CompilerParams(
            dimension_semantics=("parallel",)),
    )(x_nhwc, w1, b1, w2, b2, w3, b3)


# ----------------------------------------------------------------------------
# Kernel 2: fused fc1 -> fc2 -> fc3 -> fc4 (fc1 K-streamed, bf16 weights)
# ----------------------------------------------------------------------------
def _fused_fc_kernel(act_ref, w1_ref, b1_ref, w2_ref, b2_ref, w3_ref, b3_ref,
                     w4_ref, b4_ref, o_ref, acc_ref):
    k = pl.program_id(0)

    @pl.when(k == 0)
    def _():
        acc_ref[...] = jnp.zeros_like(acc_ref)

    # Streamed bf16 K tile of fc1 (MXU-native), f32 accumulation in VMEM.
    acc_ref[...] += jnp.dot(act_ref[...], w1_ref[...],
                            preferred_element_type=jnp.float32)

    @pl.when(k == pl.num_programs(0) - 1)
    def _():
        h = jnp.maximum(acc_ref[...] + b1_ref[...], 0.0)
        h = jnp.maximum(
            jnp.dot(h, w2_ref[...], preferred_element_type=jnp.float32)
            + b2_ref[...], 0.0)
        h = jnp.maximum(
            jnp.dot(h, w3_ref[...], preferred_element_type=jnp.float32)
            + b3_ref[...], 0.0)
        y = (jnp.dot(h, w4_ref[...], preferred_element_type=jnp.float32)
             + b4_ref[...])
        o_ref[...] = y.astype(o_ref.dtype)


def _pick_fc1_tile(K, target=4096):
    """Largest power-of-two tile <= target that divides K (falls back to K)."""
    if K <= target:
        return K
    tk = target
    while tk >= 128:
        if K % tk == 0:
            return tk
        tk //= 2
    return K


def fused_fc(act, w1, b1, w2, b2, w3, b3, w4, b4):
    """act: (B, K) bf16; w1: (K, 128) bf16; w2/w3: (128, 128); w4: (128, Np).
    Returns (B, Np) f32 (fc4 padded to lane-dense Np columns)."""
    B, K = act.shape
    N1, N4 = w1.shape[1], w4.shape[1]
    tk = _pick_fc1_tile(K)

    def const(shape):
        return pl.BlockSpec(shape, lambda k: (0,) * len(shape))

    return pl.pallas_call(
        _fused_fc_kernel,
        out_shape=jax.ShapeDtypeStruct((B, N4), jnp.float32),
        grid=(K // tk,),
        in_specs=[
            pl.BlockSpec((B, tk), lambda k: (0, k)),     # activation K tile
            pl.BlockSpec((tk, N1), lambda k: (k, 0)),    # fc1 weight K tile (bf16)
            const(b1.shape),
            const(w2.shape), const(b2.shape),
            const(w3.shape), const(b3.shape),
            const(w4.shape), const(b4.shape),
        ],
        out_specs=const((B, N4)),
        scratch_shapes=[pltpu.VMEM((B, N1), jnp.float32)],
        compiler_params=pltpu.CompilerParams(
            dimension_semantics=("arbitrary",)),
    )(act, w1, b1, w2, b2, w3, b3, w4, b4)


# ----------------------------------------------------------------------------
# Full forward (mirrors ConvoNN.forward, noisy=False path)
# ----------------------------------------------------------------------------
def convo_nn_forward(x_nchw, p, *, output_dim):
    x = jnp.transpose(x_nchw, (0, 2, 3, 1))               # NCHW -> NHWC (tiny)
    a = conv_stack(x, p["c1w"], p["c1b"], p["c2w"], p["c2b"],
                   p["c3w"], p["c3b"])                     # (B, H, W, 64) bf16
    act = a.reshape(a.shape[0], -1)                        # free (h,w,c) flatten
    y = fused_fc(act, p["f1w"], p["f1b"], p["f2w"], p["f2b"],
                 p["f3w"], p["f3b"], p["f4w"], p["f4b"])   # (B, 128) f32
    return y[:, :output_dim]


# ----------------------------------------------------------------------------
# Parameters: torch-layout init, one-time conversion to kernel layouts
# ----------------------------------------------------------------------------
def init_torch_layout_params(key, H, W, output_dim):
    """Random params in PyTorch's native layouts: conv (Cout,Cin,3,3),
    linear (out,in)."""
    ks = jax.random.split(key, 14)

    def w(k, shape, fan_in):
        return (jax.random.normal(k, shape, jnp.float32)
                / jnp.sqrt(jnp.float32(fan_in)))

    flat = 64 * H * W  # get_conv_out_dim with the same spatial size
    return {
        "conv1.weight": w(ks[0], (32, 4, 3, 3), 36),
        "conv1.bias": w(ks[1], (32,), 36),
        "conv2.weight": w(ks[2], (64, 32, 3, 3), 288),
        "conv2.bias": w(ks[3], (64,), 288),
        "conv3.weight": w(ks[4], (64, 64, 3, 3), 576),
        "conv3.bias": w(ks[5], (64,), 576),
        "fc1.weight": w(ks[6], (128, flat), flat),
        "fc1.bias": w(ks[7], (128,), flat),
        "fc2.weight": w(ks[8], (128, 128), 128),
        "fc2.bias": w(ks[9], (128,), 128),
        "fc3.weight": w(ks[10], (128, 128), 128),
        "fc3.bias": w(ks[11], (128,), 128),
        "fc4.weight": w(ks[12], (output_dim, 128), 128),
        "fc4.bias": w(ks[13], (output_dim,), 128),
    }


def prepare_params(tp, H, W):
    """One-time conversion from torch layouts to kernel layouts:
    * conv weights -> im2col (round_up(9*Cin, 8), Cout), rows (kh, kw, ci)
    * fc1 rows permuted from torch's (c,h,w) flatten to the kernel's (h,w,c)
      flatten, stored bf16 (the dominant HBM stream)
    * fc4 zero-padded to 128 lane-dense output columns."""
    def conv_w(w):
        cout, cin = w.shape[0], w.shape[1]
        wk = jnp.transpose(w, (2, 3, 1, 0)).reshape(9 * cin, cout)
        kp = _round_up(9 * cin, 8)
        return jnp.zeros((kp, cout), jnp.float32).at[:9 * cin, :].set(wk)

    C = tp["conv3.weight"].shape[0]                         # 64
    f1 = tp["fc1.weight"].T                                 # (C*H*W, 128), (c,h,w)
    f1 = (f1.reshape(C, H, W, -1).transpose(1, 2, 0, 3)
            .reshape(H * W * C, -1)).astype(jnp.bfloat16)   # rows now (h,w,c)

    n_out = tp["fc4.weight"].shape[0]
    n_pad = max(128, _round_up(n_out, 128))
    f4w = jnp.zeros((tp["fc4.weight"].shape[1], n_pad), jnp.float32)
    f4w = f4w.at[:, :n_out].set(tp["fc4.weight"].T)
    f4b = jnp.zeros((1, n_pad), jnp.float32).at[:, :n_out].set(
        tp["fc4.bias"][None, :])

    return {
        "c1w": conv_w(tp["conv1.weight"]), "c1b": tp["conv1.bias"].reshape(1, -1),
        "c2w": conv_w(tp["conv2.weight"]), "c2b": tp["conv2.bias"].reshape(1, -1),
        "c3w": conv_w(tp["conv3.weight"]), "c3b": tp["conv3.bias"].reshape(1, -1),
        "f1w": f1,                         "f1b": tp["fc1.bias"].reshape(1, -1),
        "f2w": tp["fc2.weight"].T,         "f2b": tp["fc2.bias"].reshape(1, -1),
        "f3w": tp["fc3.weight"].T,         "f3b": tp["fc3.bias"].reshape(1, -1),
        "f4w": f4w,                        "f4b": f4b,
    }


if __name__ == "__main__":
    B, C, H, W = 2, 4, 16, 16          # NCHW input, like the PyTorch module
    OUTPUT_DIM = 6

    key = jax.random.PRNGKey(0)
    k_x, k_p = jax.random.split(key)
    x = jax.random.normal(k_x, (B, C, H, W), jnp.float32)
    params = prepare_params(init_torch_layout_params(k_p, H, W, OUTPUT_DIM), H, W)

    fwd = jax.jit(functools.partial(convo_nn_forward, output_dim=OUTPUT_DIM))
    out = jax.block_until_ready(fwd(x, params))

    assert out.shape == (B, OUTPUT_DIM)
    assert bool(jnp.all(jnp.isfinite(out)))
    print("KERNEL_OK")
</pallas_src>

<mosaic_0001>
module attributes {stable_mosaic.version = 11 : i64} {
  func.func @_fused_fc_kernel(%arg0: i32, %arg1: memref<2x4096xbf16, #tpu.memory_space<vmem>>, %arg2: memref<4096x128xbf16, #tpu.memory_space<vmem>>, %arg3: memref<1x128xf32, #tpu.memory_space<vmem>>, %arg4: memref<128x128xf32, #tpu.memory_space<vmem>>, %arg5: memref<1x128xf32, #tpu.memory_space<vmem>>, %arg6: memref<128x128xf32, #tpu.memory_space<vmem>>, %arg7: memref<1x128xf32, #tpu.memory_space<vmem>>, %arg8: memref<128x128xf32, #tpu.memory_space<vmem>>, %arg9: memref<1x128xf32, #tpu.memory_space<vmem>>, %arg10: memref<2x128xf32, #tpu.memory_space<vmem>>, %arg11: memref<2x128xf32, #tpu.memory_space<vmem>>) attributes {dimension_semantics = [#tpu.dimension_semantics<arbitrary>], iteration_bounds = array<i64: 4>, scalar_prefetch = 0 : i64, scratch_operands = 1 : i64, tpu.core_type = #tpu.core_type<tc>, window_params = [{transform_indices = @transform_0, window_bounds = array<i64: 2, 4096>}, {transform_indices = @transform_1, window_bounds = array<i64: 4096, 128>}, {pipeline_mode = #tpu.pipeline_mode<synchronous>, transform_indices = @transform_2, window_bounds = array<i64: 1, 128>}, {pipeline_mode = #tpu.pipeline_mode<synchronous>, transform_indices = @transform_3, window_bounds = array<i64: 128, 128>}, {pipeline_mode = #tpu.pipeline_mode<synchronous>, transform_indices = @transform_4, window_bounds = array<i64: 1, 128>}, {pipeline_mode = #tpu.pipeline_mode<synchronous>, transform_indices = @transform_5, window_bounds = array<i64: 128, 128>}, {pipeline_mode = #tpu.pipeline_mode<synchronous>, transform_indices = @transform_6, window_bounds = array<i64: 1, 128>}, {pipeline_mode = #tpu.pipeline_mode<synchronous>, transform_indices = @transform_7, window_bounds = array<i64: 128, 128>}, {pipeline_mode = #tpu.pipeline_mode<synchronous>, transform_indices = @transform_8, window_bounds = array<i64: 1, 128>}, {pipeline_mode = #tpu.pipeline_mode<synchronous>, transform_indices = @transform_9, window_bounds = array<i64: 2, 128>}]} {
    %c0_i32 = arith.constant 0 : i32
    %0 = arith.cmpi eq, %arg0, %c0_i32 : i32
    %1 = arith.extui %0 : i1 to i32
    %c0_i32_0 = arith.constant 0 : i32
    %2 = arith.cmpi ne, %1, %c0_i32_0 : i32
    scf.if %2 {
      %cst_9 = arith.constant 0.000000e+00 : f32
      %12 = vector.broadcast %cst_9 : f32 to vector<2x128xf32>
      %c0_10 = arith.constant 0 : index
      %c0_11 = arith.constant 0 : index
      %13 = vector.load %arg11[%c0_10, %c0_11] : memref<2x128xf32, #tpu.memory_space<vmem>>, vector<2x128xf32>
      tpu.vector_store %arg11[%c0_10, %c0_11], %12 {strides = array<i32>} : memref<2x128xf32, #tpu.memory_space<vmem>>, vector<2x128xf32>,
    } else {
    }
    %c0 = arith.constant 0 : index
    %c0_1 = arith.constant 0 : index
    %3 = vector.load %arg11[%c0, %c0_1] : memref<2x128xf32, #tpu.memory_space<vmem>>, vector<2x128xf32>
    %c0_2 = arith.constant 0 : index
    %c0_3 = arith.constant 0 : index
    %4 = vector.load %arg1[%c0_2, %c0_3] : memref<2x4096xbf16, #tpu.memory_space<vmem>>, vector<2x4096xbf16>
    %c0_4 = arith.constant 0 : index
    %c0_5 = arith.constant 0 : index
    %5 = vector.load %arg2[%c0_4, %c0_5] : memref<4096x128xbf16, #tpu.memory_space<vmem>>, vector<4096x128xbf16>
    %cst = arith.constant dense<0.000000e+00> : vector<2x128xf32>
    %6 = tpu.matmul %4, %5, %cst {dimension_numbers = #tpu.dot_dimension_numbers<[1], [0], [0], [1], [0, 0, 1, 1], [], []>} : vector<2x4096xbf16>, vector<4096x128xbf16>, vector<2x128xf32> -> vector<2x128xf32>
    %7 = arith.addf %3, %6 : vector<2x128xf32>
    %c0_6 = arith.constant 0 : index
    %c0_7 = arith.constant 0 : index
    %8 = vector.load %arg11[%c0_6, %c0_7] : memref<2x128xf32, #tpu.memory_space<vmem>>, vector<2x128xf32>
    tpu.vector_store %arg11[%c0_6, %c0_7], %7 {strides = array<i32>} : memref<2x128xf32, #tpu.memory_space<vmem>>, vector<2x128xf32>,
    %c3_i32 = arith.constant 3 : i32
    %9 = arith.cmpi eq, %arg0, %c3_i32 : i32
    %10 = arith.extui %9 : i1 to i32
    %c0_i32_8 = arith.constant 0 : i32
    %11 = arith.cmpi ne, %10, %c0_i32_8 : i32
    scf.if %11 {
      %c0_9 = arith.constant 0 : index
      %c0_10 = arith.constant 0 : index
      %12 = vector.load %arg11[%c0_9, %c0_10] : memref<2x128xf32, #tpu.memory_space<vmem>>, vector<2x128xf32>
      %c0_11 = arith.constant 0 : index
      %c0_12 = arith.constant 0 : index
      %13 = vector.load %arg3[%c0_11, %c0_12] : memref<1x128xf32, #tpu.memory_space<vmem>>, vector<1x128xf32>
      %14 = vector.broadcast %13 : vector<1x128xf32> to vector<2x128xf32>
      %15 = arith.addf %12, %14 : vector<2x128xf32>
      %cst_13 = arith.constant 0.000000e+00 : f32
      %16 = vector.broadcast %cst_13 : f32 to vector<2x128xf32>
      %17 = arith.maximumf %15, %16 : vector<2x128xf32>
      %c0_14 = arith.constant 0 : index
      %c0_15 = arith.constant 0 : index
      %18 = vector.load %arg4[%c0_14, %c0_15] : memref<128x128xf32, #tpu.memory_space<vmem>>, vector<128x128xf32>
      %cst_16 = arith.constant dense<0.000000e+00> : vector<2x128xf32>
      %19 = tpu.matmul %17, %18, %cst_16 {dimension_numbers = #tpu.dot_dimension_numbers<[1], [0], [0], [1], [0, 0, 1, 1], [], []>} : vector<2x128xf32>, vector<128x128xf32>, vector<2x128xf32> -> vector<2x128xf32>
      %c0_17 = arith.constant 0 : index
      %c0_18 = arith.constant 0 : index
      %20 = vector.load %arg5[%c0_17, %c0_18] : memref<1x128xf32, #tpu.memory_space<vmem>>, vector<1x128xf32>
      %21 = vector.broadcast %20 : vector<1x128xf32> to vector<2x128xf32>
      %22 = arith.addf %19, %21 : vector<2x128xf32>
      %cst_19 = arith.constant 0.000000e+00 : f32
      %23 = vector.broadcast %cst_19 : f32 to vector<2x128xf32>
      %24 = arith.maximumf %22, %23 : vector<2x128xf32>
      %c0_20 = arith.constant 0 : index
      %c0_21 = arith.constant 0 : index
      %25 = vector.load %arg6[%c0_20, %c0_21] : memref<128x128xf32, #tpu.memory_space<vmem>>, vector<128x128xf32>
      %cst_22 = arith.constant dense<0.000000e+00> : vector<2x128xf32>
      %26 = tpu.matmul %24, %25, %cst_22 {dimension_numbers = #tpu.dot_dimension_numbers<[1], [0], [0], [1], [0, 0, 1, 1], [], []>} : vector<2x128xf32>, vector<128x128xf32>, vector<2x128xf32> -> vector<2x128xf32>
      %c0_23 = arith.constant 0 : index
      %c0_24 = arith.constant 0 : index
      %27 = vector.load %arg7[%c0_23, %c0_24] : memref<1x128xf32, #tpu.memory_space<vmem>>, vector<1x128xf32>
      %28 = vector.broadcast %27 : vector<1x128xf32> to vector<2x128xf32>
      %29 = arith.addf %26, %28 : vector<2x128xf32>
      %cst_25 = arith.constant 0.000000e+00 : f32
      %30 = vector.broadcast %cst_25 : f32 to vector<2x128xf32>
      %31 = arith.maximumf %29, %30 : vector<2x128xf32>
      %c0_26 = arith.constant 0 : index
      %c0_27 = arith.constant 0 : index
      %32 = vector.load %arg8[%c0_26, %c0_27] : memref<128x128xf32, #tpu.memory_space<vmem>>, vector<128x128xf32>
      %cst_28 = arith.constant dense<0.000000e+00> : vector<2x128xf32>
      %33 = tpu.matmul %31, %32, %cst_28 {dimension_numbers = #tpu.dot_dimension_numbers<[1], [0], [0], [1], [0, 0, 1, 1], [], []>} : vector<2x128xf32>, vector<128x128xf32>, vector<2x128xf32> -> vector<2x128xf32>
      %c0_29 = arith.constant 0 : index
      %c0_30 = arith.constant 0 : index
      %34 = vector.load %arg9[%c0_29, %c0_30] : memref<1x128xf32, #tpu.memory_space<vmem>>, vector<1x128xf32>
      %35 = vector.broadcast %34 : vector<1x128xf32> to vector<2x128xf32>
      %36 = arith.addf %33, %35 : vector<2x128xf32>
      %c0_31 = arith.constant 0 : index
      %c0_32 = arith.constant 0 : index
      %37 = vector.load %arg10[%c0_31, %c0_32] : memref<2x128xf32, #tpu.memory_space<vmem>>, vector<2x128xf32>
      tpu.vector_store %arg10[%c0_31, %c0_32], %36 {strides = array<i32>} : memref<2x128xf32, #tpu.memory_space<vmem>>, vector<2x128xf32>,
    } else {
    }
    return
  }
  func.func @transform_0(%arg0: i32) -> (i32, i32) {
    %c0_i32 = arith.constant 0 : i32
    %c0_i32_0 = arith.constant 0 : i32
    return %c0_i32, %arg0 : i32, i32
  }
  func.func @transform_1(%arg0: i32) -> (i32, i32) {
    %c0_i32 = arith.constant 0 : i32
    %c0_i32_0 = arith.constant 0 : i32
    return %arg0, %c0_i32 : i32, i32
  }
  func.func @transform_2(%arg0: i32) -> (i32, i32) {
    %c0_i32 = arith.constant 0 : i32
    %c0_i32_0 = arith.constant 0 : i32
    %c0_i32_1 = arith.constant 0 : i32
    return %c0_i32, %c0_i32_0 : i32, i32
  }
  func.func @transform_3(%arg0: i32) -> (i32, i32) {
    %c0_i32 = arith.constant 0 : i32
    %c0_i32_0 = arith.constant 0 : i32
    %c0_i32_1 = arith.constant 0 : i32
    return %c0_i32, %c0_i32_0 : i32, i32
  }
  func.func @transform_4(%arg0: i32) -> (i32, i32) {
    %c0_i32 = arith.constant 0 : i32
    %c0_i32_0 = arith.constant 0 : i32
    %c0_i32_1 = arith.constant 0 : i32
    return %c0_i32, %c0_i32_0 : i32, i32
  }
  func.func @transform_5(%arg0: i32) -> (i32, i32) {
    %c0_i32 = arith.constant 0 : i32
    %c0_i32_0 = arith.constant 0 : i32
    %c0_i32_1 = arith.constant 0 : i32
    return %c0_i32, %c0_i32_0 : i32, i32
  }
  func.func @transform_6(%arg0: i32) -> (i32, i32) {
    %c0_i32 = arith.constant 0 : i32
    %c0_i32_0 = arith.constant 0 : i32
    %c0_i32_1 = arith.constant 0 : i32
    return %c0_i32, %c0_i32_0 : i32, i32
  }
  func.func @transform_7(%arg0: i32) -> (i32, i32) {
    %c0_i32 = arith.constant 0 : i32
    %c0_i32_0 = arith.constant 0 : i32
    %c0_i32_1 = arith.constant 0 : i32
    return %c0_i32, %c0_i32_0 : i32, i32
  }
  func.func @transform_8(%arg0: i32) -> (i32, i32) {
    %c0_i32 = arith.constant 0 : i32
    %c0_i32_0 = arith.constant 0 : i32
    %c0_i32_1 = arith.constant 0 : i32
    return %c0_i32, %c0_i32_0 : i32, i32
  }
  func.func @transform_9(%arg0: i32) -> (i32, i32) {
    %c0_i32 = arith.constant 0 : i32
    %c0_i32_0 = arith.constant 0 : i32
    %c0_i32_1 = arith.constant 0 : i32
    return %c0_i32, %c0_i32_0 : i32, i32
  }
}

module attributes {stable_mosaic.version = 11 : i64} {
  func.func @_conv_stack_kernel(%arg0: i32, %arg1: memref<1x16x16x4xf32, #tpu.memory_space<vmem>>, %arg2: memref<40x32xf32, #tpu.memory_space<vmem>>, %arg3: memref<1x32xf32, #tpu.memory_space<vmem>>, %arg4: memref<288x64xf32, #tpu.memory_space<vmem>>, %arg5: memref<1x64xf32, #tpu.memory_space<vmem>>, %arg6: memref<576x64xf32, #tpu.memory_space<vmem>>, %arg7: memref<1x64xf32, #tpu.memory_space<vmem>>, %arg8: memref<1x16x16x64xbf16, #tpu.memory_space<vmem>>, %arg9: memref<18x32x64xf32, #tpu.memory_space<vmem>>, %arg10: memref<256x576xf32, #tpu.memory_space<vmem>>) attributes {dimension_semantics = [#tpu.dimension_semantics<parallel>], iteration_bounds = array<i64: 2>, scalar_prefetch = 0 : i64, scratch_operands = 2 : i64, tpu.core_type = #tpu.core_type<tc>, window_params = [{transform_indices = @transform_0, window_bounds = array<i64: 1, 16, 16, 4>}, {pipeline_mode = #tpu.pipeline_mode<synchronous>, transform_indices = @transform_1, window_bounds = array<i64: 40, 32>}, {pipeline_mode = #tpu.pipeline_mode<synchronous>, transform_indices = @transform_2, window_bounds = array<i64: 1, 32>}, {pipeline_mode = #tpu.pipeline_mode<synchronous>, transform_indices = @transform_3, window_bounds = array<i64: 288, 64>}, {pipeline_mode = #tpu.pipeline_mode<synchronous>, transform_indices = @transform_4, window_bounds = array<i64: 1, 64>}, {pipeline_mode = #tpu.pipeline_mode<synchronous>, transform_indices = @transform_5, window_bounds = array<i64: 576, 64>}, {pipeline_mode = #tpu.pipeline_mode<synchronous>, transform_indices = @transform_6, window_bounds = array<i64: 1, 64>}, {transform_indices = @transform_7, window_bounds = array<i64: 1, 16, 16, 64>}]} {
    %cst = arith.constant 0.000000e+00 : f32
    %0 = vector.broadcast %cst : f32 to vector<1x18x64xf32>
    %cst_0 = arith.constant 0.000000e+00 : f32
    %1 = vector.broadcast %cst_0 : f32 to vector<18x1x64xf32>
    %c0 = arith.constant 0 : index
    %c7 = arith.constant 7 : index
    %c0_1 = arith.constant 0 : index
    %2 = vector.load %arg9[%c0, %c7, %c0_1] : memref<18x32x64xf32, #tpu.memory_space<vmem>>, vector<1x18x64xf32>
    tpu.vector_store %arg9[%c0, %c7, %c0_1], %0 {strides = array<i32>} : memref<18x32x64xf32, #tpu.memory_space<vmem>>, vector<1x18x64xf32>,
    %c17 = arith.constant 17 : index
    %c7_2 = arith.constant 7 : index
    %c0_3 = arith.constant 0 : index
    %3 = vector.load %arg9[%c17, %c7_2, %c0_3] : memref<18x32x64xf32, #tpu.memory_space<vmem>>, vector<1x18x64xf32>
    tpu.vector_store %arg9[%c17, %c7_2, %c0_3], %0 {strides = array<i32>} : memref<18x32x64xf32, #tpu.memory_space<vmem>>, vector<1x18x64xf32>,
    %c0_4 = arith.constant 0 : index
    %c7_5 = arith.constant 7 : index
    %c0_6 = arith.constant 0 : index
    %4 = vector.load %arg9[%c0_4, %c7_5, %c0_6] : memref<18x32x64xf32, #tpu.memory_space<vmem>>, vector<18x1x64xf32>
    tpu.vector_store %arg9[%c0_4, %c7_5, %c0_6], %1 {strides = array<i32>} : memref<18x32x64xf32, #tpu.memory_space<vmem>>, vector<18x1x64xf32>,
    %c0_7 = arith.constant 0 : index
    %c24 = arith.constant 24 : index
    %c0_8 = arith.constant 0 : index
    %5 = vector.load %arg9[%c0_7, %c24, %c0_8] : memref<18x32x64xf32, #tpu.memory_space<vmem>>, vector<18x1x64xf32>
    tpu.vector_store %arg9[%c0_7, %c24, %c0_8], %1 {strides = array<i32>} : memref<18x32x64xf32, #tpu.memory_space<vmem>>, vector<18x1x64xf32>,
    %c0_9 = arith.constant 0 : index
    %c0_10 = arith.constant 0 : index
    %c0_11 = arith.constant 0 : index
    %c0_12 = arith.constant 0 : index
    %6 = vector.load %arg1[%c0_9, %c0_10, %c0_11, %c0_12] : memref<1x16x16x4xf32, #tpu.memory_space<vmem>>, vector<1x16x16x4xf32>
    %7 = vector.shape_cast %6 : vector<1x16x16x4xf32> to vector<16x16x4xf32>
    %c1 = arith.constant 1 : index
    %c8 = arith.constant 8 : index
    %c0_13 = arith.constant 0 : index
    %8 = vector.load %arg9[%c1, %c8, %c0_13] : memref<18x32x64xf32, #tpu.memory_space<vmem>>, vector<16x16x4xf32>
    tpu.vector_store %arg9[%c1, %c8, %c0_13], %7 {strides = array<i32>} : memref<18x32x64xf32, #tpu.memory_space<vmem>>, vector<16x16x4xf32>,
    %c0_14 = arith.constant 0 : index
    %c7_15 = arith.constant 7 : index
    %c0_16 = arith.constant 0 : index
    %9 = vector.load %arg9[%c0_14, %c7_15, %c0_16] : memref<18x32x64xf32, #tpu.memory_space<vmem>>, vector<16x16x4xf32>
    %10 = vector.shape_cast %9 : vector<16x16x4xf32> to vector<256x4xf32>
    %c0_17 = arith.constant 0 : index
    %c0_18 = arith.constant 0 : index
    %11 = vector.load %arg10[%c0_17, %c0_18] : memref<256x576xf32, #tpu.memory_space<vmem>>, vector<256x4xf32>
    tpu.vector_store %arg10[%c0_17, %c0_18], %10 {strides = array<i32>} : memref<256x576xf32, #tpu.memory_space<vmem>>, vector<256x4xf32>,
    %c0_19 = arith.constant 0 : index
    %c8_20 = arith.constant 8 : index
    %c0_21 = arith.constant 0 : index
    %12 = vector.load %arg9[%c0_19, %c8_20, %c0_21] : memref<18x32x64xf32, #tpu.memory_space<vmem>>, vector<16x16x4xf32>
    %13 = vector.shape_cast %12 : vector<16x16x4xf32> to vector<256x4xf32>
    %c0_22 = arith.constant 0 : index
    %c4 = arith.constant 4 : index
    %14 = vector.load %arg10[%c0_22, %c4] : memref<256x576xf32, #tpu.memory_space<vmem>>, vector<256x4xf32>
    tpu.vector_store %arg10[%c0_22, %c4], %13 {strides = array<i32>} : memref<256x576xf32, #tpu.memory_space<vmem>>, vector<256x4xf32>,
    %c0_23 = arith.constant 0 : index
    %c9 = arith.constant 9 : index
    %c0_24 = arith.constant 0 : index
    %15 = vector.load %arg9[%c0_23, %c9, %c0_24] : memref<18x32x64xf32, #tpu.memory_space<vmem>>, vector<16x16x4xf32>
    %16 = vector.shape_cast %15 : vector<16x16x4xf32> to vector<256x4xf32>
    %c0_25 = arith.constant 0 : index
    %c8_26 = arith.constant 8 : index
    %17 = vector.load %arg10[%c0_25, %c8_26] : memref<256x576xf32, #tpu.memory_space<vmem>>, vector<256x4xf32>
    tpu.vector_store %arg10[%c0_25, %c8_26], %16 {strides = array<i32>} : memref<256x576xf32, #tpu.memory_space<vmem>>, vector<256x4xf32>,
    %c1_27 = arith.constant 1 : index
    %c7_28 = arith.constant 7 : index
    %c0_29 = arith.constant 0 : index
    %18 = vector.load %arg9[%c1_27, %c7_28, %c0_29] : memref<18x32x64xf32, #tpu.memory_space<vmem>>, vector<16x16x4xf32>
    %19 = vector.shape_cast %18 : vector<16x16x4xf32> to vector<256x4xf32>
    %c0_30 = arith.constant 0 : index
    %c12 = arith.constant 12 : index
    %20 = vector.load %arg10[%c0_30, %c12] : memref<256x576xf32, #tpu.memory_space<vmem>>, vector<256x4xf32>
    tpu.vector_store %arg10[%c0_30, %c12], %19 {strides = array<i32>} : memref<256x576xf32, #tpu.memory_space<vmem>>, vector<256x4xf32>,
    %c1_31 = arith.constant 1 : index
    %c8_32 = arith.constant 8 : index
    %c0_33 = arith.constant 0 : index
    %21 = vector.load %arg9[%c1_31, %c8_32, %c0_33] : memref<18x32x64xf32, #tpu.memory_space<vmem>>, vector<16x16x4xf32>
    %22 = vector.shape_cast %21 : vector<16x16x4xf32> to vector<256x4xf32>
    %c0_34 = arith.constant 0 : index
    %c16 = arith.constant 16 : index
    %23 = vector.load %arg10[%c0_34, %c16] : memref<256x576xf32, #tpu.memory_space<vmem>>, vector<256x4xf32>
    tpu.vector_store %arg10[%c0_34, %c16], %22 {strides = array<i32>} : memref<256x576xf32, #tpu.memory_space<vmem>>, vector<256x4xf32>,
    %c1_35 = arith.constant 1 : index
    %c9_36 = arith.constant 9 : index
    %c0_37 = arith.constant 0 : index
    %24 = vector.load %arg9[%c1_35, %c9_36, %c0_37] : memref<18x32x64xf32, #tpu.memory_space<vmem>>, vector<16x16x4xf32>
    %25 = vector.shape_cast %24 : vector<16x16x4xf32> to vector<256x4xf32>
    %c0_38 = arith.constant 0 : index
    %c20 = arith.constant 20 : index
    %26 = vector.load %arg10[%c0_38, %c20] : memref<256x576xf32, #tpu.memory_space<vmem>>, vector<256x4xf32>
    tpu.vector_store %arg10[%c0_38, %c20], %25 {strides = array<i32>} : memref<256x576xf32, #tpu.memory_space<vmem>>, vector<256x4xf32>,
    %c2 = arith.constant 2 : index
    %c7_39 = arith.constant 7 : index
    %c0_40 = arith.constant 0 : index
    %27 = vector.load %arg9[%c2, %c7_39, %c0_40] : memref<18x32x64xf32, #tpu.memory_space<vmem>>, vector<16x16x4xf32>
    %28 = vector.shape_cast %27 : vector<16x16x4xf32> to vector<256x4xf32>
    %c0_41 = arith.constant 0 : index
    %c24_42 = arith.constant 24 : index
    %29 = vector.load %arg10[%c0_41, %c24_42] : memref<256x576xf32, #tpu.memory_space<vmem>>, vector<256x4xf32>
    tpu.vector_store %arg10[%c0_41, %c24_42], %28 {strides = array<i32>} : memref<256x576xf32, #tpu.memory_space<vmem>>, vector<256x4xf32>,
    %c2_43 = arith.constant 2 : index
    %c8_44 = arith.constant 8 : index
    %c0_45 = arith.constant 0 : index
    %30 = vector.load %arg9[%c2_43, %c8_44, %c0_45] : memref<18x32x64xf32, #tpu.memory_space<vmem>>, vector<16x16x4xf32>
    %31 = vector.shape_cast %30 : vector<16x16x4xf32> to vector<256x4xf32>
    %c0_46 = arith.constant 0 : index
    %c28 = arith.constant 28 : index
    %32 = vector.load %arg10[%c0_46, %c28] : memref<256x576xf32, #tpu.memory_space<vmem>>, vector<256x4xf32>
    tpu.vector_store %arg10[%c0_46, %c28], %31 {strides = array<i32>} : memref<256x576xf32, #tpu.memory_space<vmem>>, vector<256x4xf32>,
    %c2_47 = arith.constant 2 : index
    %c9_48 = arith.constant 9 : index
    %c0_49 = arith.constant 0 : index
    %33 = vector.load %arg9[%c2_47, %c9_48, %c0_49] : memref<18x32x64xf32, #tpu.memory_space<vmem>>, vector<16x16x4xf32>
    %34 = vector.shape_cast %33 : vector<16x16x4xf32> to vector<256x4xf32>
    %c0_50 = arith.constant 0 : index
    %c32 = arith.constant 32 : index
    %35 = vector.load %arg10[%c0_50, %c32] : memref<256x576xf32, #tpu.memory_space<vmem>>, vector<256x4xf32>
    tpu.vector_store %arg10[%c0_50, %c32], %34 {strides = array<i32>} : memref<256x576xf32, #tpu.memory_space<vmem>>, vector<256x4xf32>,
    %cst_51 = arith.constant 0.000000e+00 : f32
    %36 = vector.broadcast %cst_51 : f32 to vector<256x4xf32>
    %c0_52 = arith.constant 0 : index
    %c36 = arith.constant 36 : index
    %37 = vector.load %arg10[%c0_52, %c36] : memref<256x576xf32, #tpu.memory_space<vmem>>, vector<256x4xf32>
    tpu.vector_store %arg10[%c0_52, %c36], %36 {strides = array<i32>} : memref<256x576xf32, #tpu.memory_space<vmem>>, vector<256x4xf32>,
    %c0_53 = arith.constant 0 : index
    %c0_54 = arith.constant 0 : index
    %38 = vector.load %arg10[%c0_53, %c0_54] : memref<256x576xf32, #tpu.memory_space<vmem>>, vector<256x40xf32>
    %c0_55 = arith.constant 0 : index
    %c0_56 = arith.constant 0 : index
    %39 = vector.load %arg2[%c0_55, %c0_56] : memref<40x32xf32, #tpu.memory_space<vmem>>, vector<40x32xf32>
    %cst_57 = arith.constant dense<0.000000e+00> : vector<256x32xf32>
    %40 = tpu.matmul %38, %39, %cst_57 {dimension_numbers = #tpu.dot_dimension_numbers<[1], [0], [0], [1], [0, 0, 1, 1], [], []>} : vector<256x40xf32>, vector<40x32xf32>, vector<256x32xf32> -> vector<256x32xf32>
    %c0_58 = arith.constant 0 : index
    %c0_59 = arith.constant 0 : index
    %41 = vector.load %arg3[%c0_58, %c0_59] : memref<1x32xf32, #tpu.memory_space<vmem>>, vector<1x32xf32>
    %42 = vector.broadcast %41 : vector<1x32xf32> to vector<256x32xf32>
    %43 = arith.addf %40, %42 : vector<256x32xf32>
    %cst_60 = arith.constant 0.000000e+00 : f32
    %44 = vector.broadcast %cst_60 : f32 to vector<256x32xf32>
    %45 = arith.maximumf %43, %44 : vector<256x32xf32>
    %46 = vector.shape_cast %45 : vector<256x32xf32> to vector<16x16x32xf32>
    %c1_61 = arith.constant 1 : index
    %c8_62 = arith.constant 8 : index
    %c0_63 = arith.constant 0 : index
    %47 = vector.load %arg9[%c1_61, %c8_62, %c0_63] : memref<18x32x64xf32, #tpu.memory_space<vmem>>, vector<16x16x32xf32>
    tpu.vector_store %arg9[%c1_61, %c8_62, %c0_63], %46 {strides = array<i32>} : memref<18x32x64xf32, #tpu.memory_space<vmem>>, vector<16x16x32xf32>,
    %c0_64 = arith.constant 0 : index
    %c7_65 = arith.constant 7 : index
    %c0_66 = arith.constant 0 : index
    %48 = vector.load %arg9[%c0_64, %c7_65, %c0_66] : memref<18x32x64xf32, #tpu.memory_space<vmem>>, vector<16x16x32xf32>
    %49 = vector.shape_cast %48 : vector<16x16x32xf32> to vector<256x32xf32>
    %c0_67 = arith.constant 0 : index
    %c0_68 = arith.constant 0 : index
    %50 = vector.load %arg10[%c0_67, %c0_68] : memref<256x576xf32, #tpu.memory_space<vmem>>, vector<256x32xf32>
    tpu.vector_store %arg10[%c0_67, %c0_68], %49 {strides = array<i32>} : memref<256x576xf32, #tpu.memory_space<vmem>>, vector<256x32xf32>,
    %c0_69 = arith.constant 0 : index
    %c8_70 = arith.constant 8 : index
    %c0_71 = arith.constant 0 : index
    %51 = vector.load %arg9[%c0_69, %c8_70, %c0_71] : memref<18x32x64xf32, #tpu.memory_space<vmem>>, vector<16x16x32xf32>
    %52 = vector.shape_cast %51 : vector<16x16x32xf32> to vector<256x32xf32>
    %c0_72 = arith.constant 0 : index
    %c32_73 = arith.constant 32 : index
    %53 = vector.load %arg10[%c0_72, %c32_73] : memref<256x576xf32, #tpu.memory_space<vmem>>, vector<256x32xf32>
    tpu.vector_store %arg10[%c0_72, %c32_73], %52 {strides = array<i32>} : memref<256x576xf32, #tpu.memory_space<vmem>>, vector<256x32xf32>,
    %c0_74 = arith.constant 0 : index
    %c9_75 = arith.constant 9 : index
    %c0_76 = arith.constant 0 : index
    %54 = vector.load %arg9[%c0_74, %c9_75, %c0_76] : memref<18x32x64xf32, #tpu.memory_space<vmem>>, vector<16x16x32xf32>
    %55 = vector.shape_cast %54 : vector<16x16x32xf32> to vector<256x32xf32>
    %c0_77 = arith.constant 0 : index
    %c64 = arith.constant 64 : index
    %56 = vector.load %arg10[%c0_77, %c64] : memref<256x576xf32, #tpu.memory_space<vmem>>, vector<256x32xf32>
    tpu.vector_store %arg10[%c0_77, %c64], %55 {strides = array<i32>} : memref<256x576xf32, #tpu.memory_space<vmem>>, vector<256x32xf32>,
    %c1_78 = arith.constant 1 : index
    %c7_79 = arith.constant 7 : index
    %c0_80 = arith.constant 0 : index
    %57 = vector.load %arg9[%c1_78, %c7_79, %c0_80] : memref<18x32x64xf32, #tpu.memory_space<vmem>>, vector<16x16x32xf32>
    %58 = vector.shape_cast %57 : vector<16x16x32xf32> to vector<256x32xf32>
    %c0_81 = arith.constant 0 : index
    %c96 = arith.constant 96 : index
    %59 = vector.load %arg10[%c0_81, %c96] : memref<256x576xf32, #tpu.memory_space<vmem>>, vector<256x32xf32>
    tpu.vector_store %arg10[%c0_81, %c96], %58 {strides = array<i32>} : memref<256x576xf32, #tpu.memory_space<vmem>>, vector<256x32xf32>,
    %c1_82 = arith.constant 1 : index
    %c8_83 = arith.constant 8 : index
    %c0_84 = arith.constant 0 : index
    %60 = vector.load %arg9[%c1_82, %c8_83, %c0_84] : memref<18x32x64xf32, #tpu.memory_space<vmem>>, vector<16x16x32xf32>
    %61 = vector.shape_cast %60 : vector<16x16x32xf32> to vector<256x32xf32>
    %c0_85 = arith.constant 0 : index
    %c128 = arith.constant 128 : index
    %62 = vector.load %arg10[%c0_85, %c128] : memref<256x576xf32, #tpu.memory_space<vmem>>, vector<256x32xf32>
    tpu.vector_store %arg10[%c0_85, %c128], %61 {strides = array<i32>} : memref<256x576xf32, #tpu.memory_space<vmem>>, vector<256x32xf32>,
    %c1_86 = arith.constant 1 : index
    %c9_87 = arith.constant 9 : index
    %c0_88 = arith.constant 0 : index
    %63 = vector.load %arg9[%c1_86, %c9_87, %c0_88] : memref<18x32x64xf32, #tpu.memory_space<vmem>>, vector<16x16x32xf32>
    %64 = vector.shape_cast %63 : vector<16x16x32xf32> to vector<256x32xf32>
    %c0_89 = arith.constant 0 : index
    %c160 = arith.constant 160 : index
    %65 = vector.load %arg10[%c0_89, %c160] : memref<256x576xf32, #tpu.memory_space<vmem>>, vector<256x32xf32>
    tpu.vector_store %arg10[%c0_89, %c160], %64 {strides = array<i32>} : memref<256x576xf32, #tpu.memory_space<vmem>>, vector<256x32xf32>,
    %c2_90 = arith.constant 2 : index
    %c7_91 = arith.constant 7 : index
    %c0_92 = arith.constant 0 : index
    %66 = vector.load %arg9[%c2_90, %c7_91, %c0_92] : memref<18x32x64xf32, #tpu.memory_space<vmem>>, vector<16x16x32xf32>
    %67 = vector.shape_cast %66 : vector<16x16x32xf32> to vector<256x32xf32>
    %c0_93 = arith.constant 0 : index
    %c192 = arith.constant 192 : index
    %68 = vector.load %arg10[%c0_93, %c192] : memref<256x576xf32, #tpu.memory_space<vmem>>, vector<256x32xf32>
    tpu.vector_store %arg10[%c0_93, %c192], %67 {strides = array<i32>} : memref<256x576xf32, #tpu.memory_space<vmem>>, vector<256x32xf32>,
    %c2_94 = arith.constant 2 : index
    %c8_95 = arith.constant 8 : index
    %c0_96 = arith.constant 0 : index
    %69 = vector.load %arg9[%c2_94, %c8_95, %c0_96] : memref<18x32x64xf32, #tpu.memory_space<vmem>>, vector<16x16x32xf32>
    %70 = vector.shape_cast %69 : vector<16x16x32xf32> to vector<256x32xf32>
    %c0_97 = arith.constant 0 : index
    %c224 = arith.constant 224 : index
    %71 = vector.load %arg10[%c0_97, %c224] : memref<256x576xf32, #tpu.memory_space<vmem>>, vector<256x32xf32>
    tpu.vector_store %arg10[%c0_97, %c224], %70 {strides = array<i32>} : memref<256x576xf32, #tpu.memory_space<vmem>>, vector<256x32xf32>,
    %c2_98 = arith.constant 2 : index
    %c9_99 = arith.constant 9 : index
    %c0_100 = arith.constant 0 : index
    %72 = vector.load %arg9[%c2_98, %c9_99, %c0_100] : memref<18x32x64xf32, #tpu.memory_space<vmem>>, vector<16x16x32xf32>
    %73 = vector.shape_cast %72 : vector<16x16x32xf32> to vector<256x32xf32>
    %c0_101 = arith.constant 0 : index
    %c256 = arith.constant 256 : index
    %74 = vector.load %arg10[%c0_101, %c256] : memref<256x576xf32, #tpu.memory_space<vmem>>, vector<256x32xf32>
    tpu.vector_store %arg10[%c0_101, %c256], %73 {strides = array<i32>} : memref<256x576xf32, #tpu.memory_space<vmem>>, vector<256x32xf32>,
    %c0_102 = arith.constant 0 : index
    %c0_103 = arith.constant 0 : index
    %75 = vector.load %arg10[%c0_102, %c0_103] : memref<256x576xf32, #tpu.memory_space<vmem>>, vector<256x288xf32>
    %c0_104 = arith.constant 0 : index
    %c0_105 = arith.constant 0 : index
    %76 = vector.load %arg4[%c0_104, %c0_105] : memref<288x64xf32, #tpu.memory_space<vmem>>, vector<288x64xf32>
    %cst_106 = arith.constant dense<0.000000e+00> : vector<256x64xf32>
    %77 = tpu.matmul %75, %76, %cst_106 {dimension_numbers = #tpu.dot_dimension_numbers<[1], [0], [0], [1], [0, 0, 1, 1], [], []>} : vector<256x288xf32>, vector<288x64xf32>, vector<256x64xf32> -> vector<256x64xf32>
    %c0_107 = arith.constant 0 : index
    %c0_108 = arith.constant 0 : index
    %78 = vector.load %arg5[%c0_107, %c0_108] : memref<1x64xf32, #tpu.memory_space<vmem>>, vector<1x64xf32>
    %79 = vector.broadcast %78 : vector<1x64xf32> to vector<256x64xf32>
    %80 = arith.addf %77, %79 : vector<256x64xf32>
    %cst_109 = arith.constant 0.000000e+00 : f32
    %81 = vector.broadcast %cst_109 : f32 to vector<256x64xf32>
    %82 = arith.maximumf %80, %81 : vector<256x64xf32>
    %83 = vector.shape_cast %82 : vector<256x64xf32> to vector<16x16x64xf32>
    %c1_110 = arith.constant 1 : index
    %c8_111 = arith.constant 8 : index
    %c0_112 = arith.constant 0 : index
    %84 = vector.load %arg9[%c1_110, %c8_111, %c0_112] : memref<18x32x64xf32, #tpu.memory_space<vmem>>, vector<16x16x64xf32>
    tpu.vector_store %arg9[%c1_110, %c8_111, %c0_112], %83 {strides = array<i32>} : memref<18x32x64xf32, #tpu.memory_space<vmem>>, vector<16x16x64xf32>,
    %c0_113 = arith.constant 0 : index
    %c7_114 = arith.constant 7 : index
    %c0_115 = arith.constant 0 : index
    %85 = vector.load %arg9[%c0_113, %c7_114, %c0_115] : memref<18x32x64xf32, #tpu.memory_space<vmem>>, vector<16x16x64xf32>
    %86 = vector.shape_cast %85 : vector<16x16x64xf32> to vector<256x64xf32>
    %c0_116 = arith.constant 0 : index
    %c0_117 = arith.constant 0 : index
    %87 = vector.load %arg10[%c0_116, %c0_117] : memref<256x576xf32, #tpu.memory_space<vmem>>, vector<256x64xf32>
    tpu.vector_store %arg10[%c0_116, %c0_117], %86 {strides = array<i32>} : memref<256x576xf32, #tpu.memory_space<vmem>>, vector<256x64xf32>,
    %c0_118 = arith.constant 0 : index
    %c8_119 = arith.constant 8 : index
    %c0_120 = arith.constant 0 : index
    %88 = vector.load %arg9[%c0_118, %c8_119, %c0_120] : memref<18x32x64xf32, #tpu.memory_space<vmem>>, vector<16x16x64xf32>
    %89 = vector.shape_cast %88 : vector<16x16x64xf32> to vector<256x64xf32>
    %c0_121 = arith.constant 0 : index
    %c64_122 = arith.constant 64 : index
    %90 = vector.load %arg10[%c0_121, %c64_122] : memref<256x576xf32, #tpu.memory_space<vmem>>, vector<256x64xf32>
    tpu.vector_store %arg10[%c0_121, %c64_122], %89 {strides = array<i32>} : memref<256x576xf32, #tpu.memory_space<vmem>>, vector<256x64xf32>,
    %c0_123 = arith.constant 0 : index
    %c9_124 = arith.constant 9 : index
    %c0_125 = arith.constant 0 : index
    %91 = vector.load %arg9[%c0_123, %c9_124, %c0_125] : memref<18x32x64xf32, #tpu.memory_space<vmem>>, vector<16x16x64xf32>
    %92 = vector.shape_cast %91 : vector<16x16x64xf32> to vector<256x64xf32>
    %c0_126 = arith.constant 0 : index
    %c128_127 = arith.constant 128 : index
    %93 = vector.load %arg10[%c0_126, %c128_127] : memref<256x576xf32, #tpu.memory_space<vmem>>, vector<256x64xf32>
    tpu.vector_store %arg10[%c0_126, %c128_127], %92 {strides = array<i32>} : memref<256x576xf32, #tpu.memory_space<vmem>>, vector<256x64xf32>,
    %c1_128 = arith.constant 1 : index
    %c7_129 = arith.constant 7 : index
    %c0_130 = arith.constant 0 : index
    %94 = vector.load %arg9[%c1_128, %c7_129, %c0_130] : memref<18x32x64xf32, #tpu.memory_space<vmem>>, vector<16x16x64xf32>
    %95 = vector.shape_cast %94 : vector<16x16x64xf32> to vector<256x64xf32>
    %c0_131 = arith.constant 0 : index
    %c192_132 = arith.constant 192 : index
    %96 = vector.load %arg10[%c0_131, %c192_132] : memref<256x576xf32, #tpu.memory_space<vmem>>, vector<256x64xf32>
    tpu.vector_store %arg10[%c0_131, %c192_132], %95 {strides = array<i32>} : memref<256x576xf32, #tpu.memory_space<vmem>>, vector<256x64xf32>,
    %c1_133 = arith.constant 1 : index
    %c8_134 = arith.constant 8 : index
    %c0_135 = arith.constant 0 : index
    %97 = vector.load %arg9[%c1_133, %c8_134, %c0_135] : memref<18x32x64xf32, #tpu.memory_space<vmem>>, vector<16x16x64xf32>
    %98 = vector.shape_cast %97 : vector<16x16x64xf32> to vector<256x64xf32>
    %c0_136 = arith.constant 0 : index
    %c256_137 = arith.constant 256 : index
    %99 = vector.load %arg10[%c0_136, %c256_137] : memref<256x576xf32, #tpu.memory_space<vmem>>, vector<256x64xf32>
    tpu.vector_store %arg10[%c0_136, %c256_137], %98 {strides = array<i32>} : memref<256x576xf32, #tpu.memory_space<vmem>>, vector<256x64xf32>,
    %c1_138 = arith.constant 1 : index
    %c9_139 = arith.constant 9 : index
    %c0_140 = arith.constant 0 : index
    %100 = vector.load %arg9[%c1_138, %c9_139, %c0_140] : memref<18x32x64xf32, #tpu.memory_space<vmem>>, vector<16x16x64xf32>
    %101 = vector.shape_cast %100 : vector<16x16x64xf32> to vector<256x64xf32>
    %c0_141 = arith.constant 0 : index
    %c320 = arith.constant 320 : index
    %102 = vector.load %arg10[%c0_141, %c320] : memref<256x576xf32, #tpu.memory_space<vmem>>, vector<256x64xf32>
    tpu.vector_store %arg10[%c0_141, %c320], %101 {strides = array<i32>} : memref<256x576xf32, #tpu.memory_space<vmem>>, vector<256x64xf32>,
    %c2_142 = arith.constant 2 : index
    %c7_143 = arith.constant 7 : index
    %c0_144 = arith.constant 0 : index
    %103 = vector.load %arg9[%c2_142, %c7_143, %c0_144] : memref<18x32x64xf32, #tpu.memory_space<vmem>>, vector<16x16x64xf32>
    %104 = vector.shape_cast %103 : vector<16x16x64xf32> to vector<256x64xf32>
    %c0_145 = arith.constant 0 : index
    %c384 = arith.constant 384 : index
    %105 = vector.load %arg10[%c0_145, %c384] : memref<256x576xf32, #tpu.memory_space<vmem>>, vector<256x64xf32>
    tpu.vector_store %arg10[%c0_145, %c384], %104 {strides = array<i32>} : memref<256x576xf32, #tpu.memory_space<vmem>>, vector<256x64xf32>,
    %c2_146 = arith.constant 2 : index
    %c8_147 = arith.constant 8 : index
    %c0_148 = arith.constant 0 : index
    %106 = vector.load %arg9[%c2_146, %c8_147, %c0_148] : memref<18x32x64xf32, #tpu.memory_space<vmem>>, vector<16x16x64xf32>
    %107 = vector.shape_cast %106 : vector<16x16x64xf32> to vector<256x64xf32>
    %c0_149 = arith.constant 0 : index
    %c448 = arith.constant 448 : index
    %108 = vector.load %arg10[%c0_149, %c448] : memref<256x576xf32, #tpu.memory_space<vmem>>, vector<256x64xf32>
    tpu.vector_store %arg10[%c0_149, %c448], %107 {strides = array<i32>} : memref<256x576xf32, #tpu.memory_space<vmem>>, vector<256x64xf32>,
    %c2_150 = arith.constant 2 : index
    %c9_151 = arith.constant 9 : index
    %c0_152 = arith.constant 0 : index
    %109 = vector.load %arg9[%c2_150, %c9_151, %c0_152] : memref<18x32x64xf32, #tpu.memory_space<vmem>>, vector<16x16x64xf32>
    %110 = vector.shape_cast %109 : vector<16x16x64xf32> to vector<256x64xf32>
    %c0_153 = arith.constant 0 : index
    %c512 = arith.constant 512 : index
    %111 = vector.load %arg10[%c0_153, %c512] : memref<256x576xf32, #tpu.memory_space<vmem>>, vector<256x64xf32>
    tpu.vector_store %arg10[%c0_153, %c512], %110 {strides = array<i32>} : memref<256x576xf32, #tpu.memory_space<vmem>>, vector<256x64xf32>,
    %c0_154 = arith.constant 0 : index
    %c0_155 = arith.constant 0 : index
    %112 = vector.load %arg10[%c0_154, %c0_155] : memref<256x576xf32, #tpu.memory_space<vmem>>, vector<256x576xf32>
    %c0_156 = arith.constant 0 : index
    %c0_157 = arith.constant 0 : index
    %113 = vector.load %arg6[%c0_156, %c0_157] : memref<576x64xf32, #tpu.memory_space<vmem>>, vector<576x64xf32>
    %cst_158 = arith.constant dense<0.000000e+00> : vector<256x64xf32>
    %114 = tpu.matmul %112, %113, %cst_158 {dimension_numbers = #tpu.dot_dimension_numbers<[1], [0], [0], [1], [0, 0, 1, 1], [], []>} : vector<256x576xf32>, vector<576x64xf32>, vector<256x64xf32> -> vector<256x64xf32>
    %c0_159 = arith.constant 0 : index
    %c0_160 = arith.constant 0 : index
    %115 = vector.load %arg7[%c0_159, %c0_160] : memref<1x64xf32, #tpu.memory_space<vmem>>, vector<1x64xf32>
    %116 = vector.broadcast %115 : vector<1x64xf32> to vector<256x64xf32>
    %117 = arith.addf %114, %116 : vector<256x64xf32>
    %cst_161 = arith.constant 0.000000e+00 : f32
    %118 = vector.broadcast %cst_161 : f32 to vector<256x64xf32>
    %119 = arith.maximumf %117, %118 : vector<256x64xf32>
    %120 = vector.shape_cast %119 : vector<256x64xf32> to vector<1x16x16x64xf32>
    %121 = arith.truncf %120 : vector<1x16x16x64xf32> to vector<1x16x16x64xbf16>
    %c0_162 = arith.constant 0 : index
    %c0_163 = arith.constant 0 : index
    %c0_164 = arith.constant 0 : index
    %c0_165 = arith.constant 0 : index
    %122 = vector.load %arg8[%c0_162, %c0_163, %c0_164, %c0_165] : memref<1x16x16x64xbf16, #tpu.memory_space<vmem>>, vector<1x16x16x64xbf16>
    tpu.vector_store %arg8[%c0_162, %c0_163, %c0_164, %c0_165], %121 {strides = array<i32>} : memref<1x16x16x64xbf16, #tpu.memory_space<vmem>>, vector<1x16x16x64xbf16>,
    return
  }
  func.func @transform_0(%arg0: i32) -> (i32, i32, i32, i32) {
    %c0_i32 = arith.constant 0 : i32
    %c0_i32_0 = arith.constant 0 : i32
    %c0_i32_1 = arith.constant 0 : i32
    %c0_i32_2 = arith.constant 0 : i32
    return %arg0, %c0_i32, %c0_i32_0, %c0_i32_1 : i32, i32, i32, i32
  }
  func.func @transform_1(%arg0: i32) -> (i32, i32) {
    %c0_i32 = arith.constant 0 : i32
    %c0_i32_0 = arith.constant 0 : i32
    %c0_i32_1 = arith.constant 0 : i32
    return %c0_i32, %c0_i32_0 : i32, i32
  }
  func.func @transform_2(%arg0: i32) -> (i32, i32) {
    %c0_i32 = arith.constant 0 : i32
    %c0_i32_0 = arith.constant 0 : i32
    %c0_i32_1 = arith.constant 0 : i32
    return %c0_i32, %c0_i32_0 : i32, i32
  }
  func.func @transform_3(%arg0: i32) -> (i32, i32) {
    %c0_i32 = arith.constant 0 : i32
    %c0_i32_0 = arith.constant 0 : i32
    %c0_i32_1 = arith.constant 0 : i32
    return %c0_i32, %c0_i32_0 : i32, i32
  }
  func.func @transform_4(%arg0: i32) -> (i32, i32) {
    %c0_i32 = arith.constant 0 : i32
    %c0_i32_0 = arith.constant 0 : i32
    %c0_i32_1 = arith.constant 0 : i32
    return %c0_i32, %c0_i32_0 : i32, i32
  }
  func.func @transform_5(%arg0: i32) -> (i32, i32) {
    %c0_i32 = arith.constant 0 : i32
    %c0_i32_0 = arith.constant 0 : i32
    %c0_i32_1 = arith.constant 0 : i32
    return %c0_i32, %c0_i32_0 : i32, i32
  }
  func.func @transform_6(%arg0: i32) -> (i32, i32) {
    %c0_i32 = arith.constant 0 : i32
    %c0_i32_0 = arith.constant 0 : i32
    %c0_i32_1 = arith.constant 0 : i32
    return %c0_i32, %c0_i32_0 : i32, i32
  }
  func.func @transform_7(%arg0: i32) -> (i32, i32, i32, i32) {
    %c0_i32 = arith.constant 0 : i32
    %c0_i32_0 = arith.constant 0 : i32
    %c0_i32_1 = arith.constant 0 : i32
    %c0_i32_2 = arith.constant 0 : i32
    return %arg0, %c0_i32, %c0_i32_0, %c0_i32_1 : i32, i32, i32, i32
  }
}

</mosaic_0001>

<bundles_post_ra>
// kernel: convo_nn_forward.3
= control target key start
LH: loop header
LB: loop body
LE: loop exit
PB: predicated region body
PF: predicated region fallthrough
CT: control target
= control target key end

     0   :  { %14 = vsyncpa [#allocation4], 0  ;;  %s5951_s0 = inlined_call_operand.vmem [shape: bf16[2,16384], index: 0, kind: input, shape index: {}]   ;;  %s5952_s1 = inlined_call_operand.hbm [shape: bf16[16384,128], index: 1, kind: input, shape index: {}]   ;;  %s5953_s2 = inlined_call_operand.hbm [shape: f32[1,128], index: 2, kind: input, shape index: {}]   ;;  %s5954_s3 = inlined_call_operand.hbm [shape: f32[128,128], index: 3, kind: input, shape index: {}]   ;;  %s5955_s4 = inlined_call_operand.hbm [shape: f32[1,128], index: 4, kind: input, shape index: {}]   ;;  %s5956_s5 = inlined_call_operand.hbm [shape: f32[128,128], index: 5, kind: input, shape index: {}]   ;;  %s5957_s6 = inlined_call_operand.hbm [shape: f32[1,128], index: 6, kind: input, shape index: {}]   ;;  %s5958_s7 = inlined_call_operand.hbm [shape: f32[128,128], index: 7, kind: input, shape index: {}]   ;;  %s5959_s8 = inlined_call_operand.hbm [shape: f32[1,128], index: 8, kind: input, shape index: {}]   ;;  %s5960_s9 = inlined_call_operand.hbm [shape: f32[2,128], index: 9, kind: output, shape index: {}]  }
   0x1   :  { %16 = vsyncpa [#allocation4 + $0x1], 0 }
   0x2   :  { %17 = vsyncpa [#allocation7], 0 }
   0x3   :  { %18 = vsyncpa [#allocation10], 0 }
   0x4   :  { %19 = vsyncpa [#allocation13], 0 }
   0x5   :  { %20 = vsyncpa [#allocation16], 0 }
   0x6   :  { %21 = vsyncpa [#allocation5], 0  ;;  %s5355_s30 = smov 0   ;;  %s5357_s10 = smov 0  }
   0x7   :  { %s5359_s11 = smov 0   ;;  %s5361_s12 = smov 0  }
   0x8 LB: > { %s5288_s13 = smov [#allocation6]   ;;  %s5376_s15 = sadd.s32 4294967295, %s5286_s12   ;;  %s5286_s12 = sphi %s5361_s12, %s5983_s12   ;;  %s5282_s11 = sphi %s5359_s11, %s5982_s11   ;;  %s5278_s10 = sphi %s5357_s10, %s5981_s10   ;;  %s5274_s30 = sphi %s5355_s30, %s5980_s30  }
   0x9   : > { %s265_s14 = sshll.u32 %s5288_s13, 4  ;;  %p3816_p0 = scmp.ge.s32.totalorder %s5286_s12, 1  ;;  %s266_s14 = int_to_ptr.vmem [resolvable:$true] %s265_s14 }
   0xa   : > { %p5961_p1 = scmp.eq.s32.totalorder %s5376_s15, 0  ;;  %p252_p2 = scmp.lt.s32.totalorder %s5286_s12, 5 }
   0xb   : > { %s5289_s17 = smov [#allocation9]   ;;  %s5290_s19 = smov [#allocation12]  }
   0xc   : > { %p5382_p4 = pnand %p3816_p0, %p252_p2  ;;  %s289_s18 = sshll.u32 %s5289_s17, 4  ;;  %s5388_s18 = int_to_ptr.vmem [resolvable:$true] %s289_s18 }
   0xd   : > { %s313_s20 = sshll.u32 %s5290_s19, 4  ;;  %s5291_s22 = smov [#allocation8]   ;;  %s5396_s20 = int_to_ptr.vmem [resolvable:$true] %s313_s20 }
   0xe   : > { %s5964_s16 = scalar_select %p5382_p4, 1, 0 }
   0xf   : > { %p4647_p5 = pneg %p5382_p4  ;;  %s5398_s23 = sshll.u32 %s5291_s22, 4  ;;  %s276_s23 = int_to_ptr.vmem [resolvable:$true] %s5398_s23 }
  0x10   : > { %s5009_s25 = scalar_lea.vmem %s266_s14, 16  ;;  %s5016_s26 = scalar_lea.vmem %s266_s14, 32 }
  0x11   : > { %p5392_p6 = pnand %p4647_p5, %p5961_p1  ;;  %p5010_p8 = scmp.ne.s32.totalorder %s266_s14, %s5009_s25 }
  0x12   : > { %p5017_p11 = scmp.lt.s32.totalorder %s266_s14, %s266_s14  ;;  %p5018_p12 = scmp.lt.s32.totalorder %s5016_s26, %s5009_s25 }
  0x13   : > { %p5402_p7 = pneg %p5392_p6 }
  0x14   : > { %p5019_p13 = por %p5018_p12, %p5017_p11 }
  0x15   : > { %p5012_p9 = pnand %p5010_p8, %p5402_p7 }
  0x17   : > { %p5013_p10 = pneg %p5012_p9 }
  0x19   : > { %p5020_p0 = pnand %p5019_p13, %p5013_p10 }
  0x1b   : > { %5023 = shalt.err (!%p5020_p0)
}
  0x1c   : > { %4650 = dma.hbm_to_vmem [thread:$0]  (!%p5392_p6), %s5953_s2, 16, %s266_s14, [#allocation7]  }
  0x1d   : > { %s5035_s29 = scalar_lea.vmem %s5388_s18, 16  ;;  %s5042_s13 = scalar_lea.vmem %s5388_s18, 32 }
  0x1e   : > { %p5036_p2 = scmp.ne.s32.totalorder %s5388_s18, %s5035_s29  ;;  %p5043_p9 = scmp.lt.s32.totalorder %s5388_s18, %s5388_s18 }
  0x1f   : > { %p5044_p10 = scmp.lt.s32.totalorder %s5042_s13, %s5035_s29 }
  0x20   : > { %p5038_p5 = pnand %p5036_p2, %p5402_p7 }
  0x21   : > { %p5045_p11 = por %p5044_p10, %p5043_p9 }
  0x22   : > { %p5039_p8 = pneg %p5038_p5 }
  0x24   : > { %p5046_p12 = pnand %p5045_p11, %p5039_p8 }
  0x26   : > { %5049 = shalt.err (!%p5046_p12)
}
  0x27   : > { %4656 = dma.hbm_to_vmem [thread:$0]  (!%p5392_p6), %s5955_s4, 16, %s5388_s18, [#allocation10]  }
  0x28   : > { %s5061_s14 = scalar_lea.vmem %s5396_s20, 16  ;;  %s5068_s22 = scalar_lea.vmem %s5396_s20, 32 }
  0x29   : > { %p5062_p13 = scmp.ne.s32.totalorder %s5396_s20, %s5061_s14  ;;  %p5069_p5 = scmp.lt.s32.totalorder %s5396_s20, %s5396_s20 }
  0x2a   : > { %p5070_p8 = scmp.lt.s32.totalorder %s5068_s22, %s5061_s14 }
  0x2b   : > { %p5064_p0 = pnand %p5062_p13, %p5402_p7 }
  0x2c   : > { %p5071_p9 = por %p5070_p8, %p5069_p5 }
  0x2d   : > { %p5065_p2 = pneg %p5064_p0 }
  0x2f   : > { %p5072_p10 = pnand %p5071_p9, %p5065_p2 }
  0x31   : > { %5075 = shalt.err (!%p5072_p10)
}
  0x32   : > { %4662 = dma.hbm_to_vmem [thread:$0]  (!%p5392_p6), %s5957_s6, 16, %s5396_s20, [#allocation13]  }
  0x33   : > { %s5087_s18 = scalar_lea.vmem %s276_s23, 2048  ;;  %p5095_p0 = scmp.lt.s32.totalorder %s276_s23, %s276_s23 }
  0x34   : > { %p5088_p11 = scmp.ne.s32.totalorder %s276_s23, %s5087_s18  ;;  %p5096_p3 = scmp.lt.s32.totalorder %s5087_s18, %s5087_s18 }
  0x36   : > { %p5090_p12 = pnand %p5088_p11, %p5402_p7  ;;  %p5097_p5 = por %p5096_p3, %p5095_p0 }
  0x38   : > { %p5091_p13 = pneg %p5090_p12 }
  0x3a   : > { %p5098_p2 = pnand %p5097_p5, %p5091_p13 }
  0x3c   : > { %5101 = shalt.err (!%p5098_p2)
}
  0x3d   : > { %s5292_s27 = smov 128   ;;  %s5293_s28 = smov 8  }
  0x3e   : > { %4653 = dma.hbm_to_vmem [thread:$0]  (!%p5392_p6), %s5954_s3, 2048, %s276_s23, [#allocation7], %s5292_s27, %s5292_s27, %s5293_s28  }
  0x3f   : > { %s5294_s13 = smov [#allocation11]   ;;  %s5295_s19 = smov [#allocation14]  }
  0x40   : > { %s299_s17 = sshll.u32 %s5294_s13, 4  ;;  %s323_s14 = sshll.u32 %s5295_s19, 4  ;;  %s300_s17 = int_to_ptr.vmem [resolvable:$true] %s299_s17  ;;  %s324_s14 = int_to_ptr.vmem [resolvable:$true] %s323_s14 }
  0x41   : > { %s5113_s22 = scalar_lea.vmem %s300_s17, 2048  ;;  %p5121_p10 = scmp.lt.s32.totalorder %s300_s17, %s300_s17 }
  0x42   : > { %p5114_p3 = scmp.ne.s32.totalorder %s300_s17, %s5113_s22  ;;  %p5122_p11 = scmp.lt.s32.totalorder %s5113_s22, %s5113_s22 }
  0x44   : > { %p5116_p8 = pnand %p5114_p3, %p5402_p7  ;;  %p5123_p12 = por %p5122_p11, %p5121_p10 }
  0x46   : > { %p5117_p9 = pneg %p5116_p8 }
  0x48   : > { %p5124_p13 = pnand %p5123_p12, %p5117_p9 }
  0x4a   : > { %5127 = shalt.err (!%p5124_p13)
}
  0x4b   : > { %4659 = dma.hbm_to_vmem [thread:$0]  (!%p5392_p6), %s5956_s5, 2048, %s300_s17, [#allocation10], %s5292_s27, %s5292_s27, %s5293_s28  }
  0x4c   : > { %s5139_s26 = scalar_lea.vmem %s324_s14, 2048  ;;  %p5147_p3 = scmp.lt.s32.totalorder %s324_s14, %s324_s14 }
  0x4d   : > { %p5140_p0 = scmp.ne.s32.totalorder %s324_s14, %s5139_s26  ;;  %p5148_p8 = scmp.lt.s32.totalorder %s5139_s26, %s5139_s26 }
  0x4f   : > { %p5142_p5 = pnand %p5140_p0, %p5402_p7  ;;  %p5149_p10 = por %p5148_p8, %p5147_p3 }
  0x51   : > { %p5143_p2 = pneg %p5142_p5 }
  0x53   : > { %p5150_p9 = pnand %p5149_p10, %p5143_p2 }
  0x55   : > { %5153 = shalt.err (!%p5150_p9)
}
  0x56   : > { %4665 = dma.hbm_to_vmem [thread:$0]  (!%p5392_p6), %s5958_s7, 2048, %s324_s14, [#allocation13], %s5292_s27, %s5292_s27, %s5293_s28  }
  0x57   : > { %s5296_s29 = smov [#allocation15]  }
  0x58   : > { %s337_s13 = sshll.u32 %s5296_s29, 4  ;;  %s338_s13 = int_to_ptr.vmem [resolvable:$true] %s337_s13 }
  0x59   : > { %s5165_s17 = scalar_lea.vmem %s338_s13, 16  ;;  %s5172_s19 = scalar_lea.vmem %s338_s13, 32 }
  0x5a   : > { %p5166_p11 = scmp.ne.s32.totalorder %s338_s13, %s5165_s17  ;;  %p5173_p0 = scmp.lt.s32.totalorder %s338_s13, %s338_s13 }
  0x5b   : > { %p5174_p5 = scmp.lt.s32.totalorder %s5172_s19, %s5165_s17 }
  0x5c   : > { %p5168_p12 = pnand %p5166_p11, %p5402_p7 }
  0x5d   : > { %p5175_p2 = por %p5174_p5, %p5173_p0 }
  0x5e   : > { %p5169_p13 = pneg %p5168_p12 }
  0x60   : > { %p5176_p3 = pnand %p5175_p2, %p5169_p13 }
  0x62   : > { %5179 = shalt.err (!%p5176_p3)
}
  0x63   : > { %4668 = dma.hbm_to_vmem [thread:$0]  (!%p5392_p6), %s5959_s8, 16, %s338_s13, [#allocation16]  }
  0x64   : > { %s5478_s24 = sadd.s32 1, %s5286_s12   ;;  %s60_s27 = sadd.s32 1, %s5282_s11 }
  0x65   : > { %s57_s21 = ssub.s32 %s5286_s12, %s5478_s24  ;;  %p67_p8 = scmp.ne.s32.totalorder %s5282_s11, %s5278_s10 }
  0x66   : > { %p58_p7 = scmp.eq.s32.totalorder %s57_s21, 0  ;;  %p68_p10 = scmp.eq.s32.totalorder %s5286_s12, 0 }
  0x67   : > { %p73_p9 = scmp.ne.s32.totalorder %s5278_s10, %s5274_s30  ;;  %p4680_p13 = scmp.lt.s32.totalorder %s5286_s12, 4 }
  0x68   : > { %s5489_s28 = scalar_select %p58_p7, %s5282_s11, %s60_s27  }
  0x69   : > { %p69_p11 = por %p68_p10, %p67_p8  ;;  %p5493_p12 = por %p5961_p1, %p73_p9 }
  0x6a   : > { %s356_s25 = sand.u32 1, %s5282_s11   ;;  %s4104_s18 = sshll.u32 %s5286_s12, 15 }
  0x6b   : > { %s5967_s14 = scalar_select %p5493_p12, 1, 0 }
  0x6c   : > { %s3825_s26 = sshll.u32 %s356_s25, 11  ;;  %s5503_s13 = scalar_lea.hbm %s5952_s1, %s4104_s18 }
  0x6d   : > { %s360_s30 = scalar_lea.vmem [#allocation3], %s3825_s26  ;;  %p5507_p6 = pnand %p4680_p13, %p69_p11 }
  0x6e   : > { %s367_s17 = sshll.u32 %s360_s30, 4  ;;  %s5511_s22 = scalar_lea.sflag [#allocation4], %s356_s25  ;;  %s5505_s17 = int_to_ptr.vmem [resolvable:$true] %s367_s17 }
  0x6f   : > { %s5180_s12 = scalar_lea.hbm %s5503_s13, 32768  ;;  %p5182_p5 = pneg %p5507_p6 }
  0x70   : > { %p5181_p0 = scmp.ne.s32.totalorder %s5503_s13, %s5180_s12  ;;  %s5185_s27 = scalar_lea.hbm %s5952_s1, 131072 }
  0x71   : > { %p5186_p7 = scmp.lt.s32.totalorder %s5503_s13, %s5952_s1  ;;  %p5187_p8 = scmp.lt.s32.totalorder %s5185_s27, %s5180_s12 }
  0x72   : > { %p5183_p2 = pnand %p5182_p5, %p5181_p0 }
  0x73   : > { %p5188_p10 = por %p5187_p8, %p5186_p7 }
  0x74   : > { %p5184_p3 = pneg %p5183_p2 }
  0x76   : > { %p5189_p9 = pnand %p5188_p10, %p5184_p3 }
  0x78   : > { %5192 = shalt.err (!%p5189_p9)
}
  0x79   : > { %s5193_s25 = scalar_lea.vmem %s5505_s17, 32768  ;;  %s5297_s20 = smov [#allocation3]  }
  0x7a   : > { %p5194_p11 = scmp.ne.s32.totalorder %s5505_s17, %s5193_s25  ;;  %s5198_s29 = sshll.u32 %s5297_s20, 4  ;;  %s5199_s29 = int_to_ptr.vmem [resolvable:$false] %s5198_s29 }
  0x7b   : > { %s5200_s30 = scalar_lea.vmem %s5199_s29, 65536  ;;  %p5201_p2 = scmp.lt.s32.totalorder %s5505_s17, %s5199_s29 }
  0x7c   : > { %p5196_p13 = pnand %p5194_p11, %p5182_p5  ;;  %p5202_p1 = scmp.lt.s32.totalorder %s5200_s30, %s5193_s25 }
  0x7e   : > { %p5197_p0 = pneg %p5196_p13  ;;  %p5203_p12 = por %p5202_p1, %p5201_p2 }
  0x80   : > { %p5204_p4 = pnand %p5203_p12, %p5197_p0 }
  0x82   : > { %5207 = shalt.err (!%p5204_p4)
}
  0x83   : > { %s5298_s12 = smov 64   ;;  %s5299_s23 = smov 4  }
  0x84   : > { %4672 = dma.hbm_to_vmem [thread:$0]  (!%p5507_p6), %s5503_s13, 32768, %s5505_s17, %s5511_s22, %s5298_s12, %s5298_s12, %s5299_s23  }
  0x85   : > { %p5969_p5 = scmp.ne.s32.totalorder %s5964_s16, 0 }
  0x86   : > { %s381_s21 = sand.u32 (!%p5969_p5), 1, %s5278_s10   ;;  %p5970_p1 = scmp.ne.s32.totalorder (!%p5969_p5), %s5967_s14, 0 }
  0x87   : > { %379 = sbr.rel (%p5969_p5) target bundleno = 1263 (0x4ef), region = 56  ;;  %s3829_s27 = sshll.u32 (!%p5969_p5), %s381_s21, 11 }
  0x88   : > { %s382_s26 = scalar_lea.sflag (!%p5969_p5), [#allocation4], %s381_s21  ;;  %s5535_s18 = scalar_lea.vmem (!%p5969_p5), [#allocation3], %s3829_s27 }
  0x8c   : > { %5249 = dma.done.wait (%p5970_p1), %s382_s26, 32768  }
  0x8d   : > { %5251 = vsyncadd (%p5970_p1), %s382_s26, 4294934528  ;;  %p5971_p4 = scmp.eq.s32.totalorder %s5376_s15, 0 }
  0x8f   : > { %5253 = dma.done.wait (%p5971_p4), [#allocation7], 2064   ;;  %p5972_p12 = pmov %p5971_p4 }
  0x90   : > { %p5973_p6 = pmov %p5971_p4 }
  0x91   : > { %5255 = vsyncadd (%p5972_p12), [#allocation7], 4294965232 }
  0x92   : > { %5257 = dma.done.wait (%p5973_p6), [#allocation10], 2064   ;;  %p5974_p3 = pmov %p5971_p4 }
  0x94   : > { %5259 = vsyncadd (%p5974_p3), [#allocation10], 4294965232  ;;  %p5975_p7 = pmov %p5974_p3 }
  0x95   : > { %p5976_p8 = pmov %p5974_p3 }
  0x96   : > { %5261 = dma.done.wait (%p5975_p7), [#allocation13], 2064  }
  0x97   : > { %5263 = vsyncadd (%p5976_p8), [#allocation13], 4294965232  ;;  %p5977_p10 = pmov %p5974_p3 }
  0x98   : > { %p5978_p9 = pmov %p5974_p3 }
  0x99   : > { %5265 = dma.done.wait (%p5977_p10), [#allocation16], 16  }
  0x9a   : > { %5267 = vsyncadd (%p5978_p9), [#allocation16], 4294967280  ;;  %s3837_s16 = sshll.u32 %s5376_s15, 5  ;;  %p5979_p13 = scmp.ne.s32.totalorder %s5376_s15, 0 }
  0x9b   : > { %p448_p11 = scmp.lt.s32.totalorder %s3837_s16, 127 }
  0x9c   : > { %457 = sbr.rel (%p5979_p13) target bundleno = 163 (0xa3), region = 92 }
  0x9d   : > { %s5985_s16 = smov (!%p448_p11, %s3837_s16), 127 }
  0x9e   : > { %s5561_s17 = scalar_lea.vmem %s5951_s0, %s5985_s16 }
  0xa1   : > { %v5300_v0 = vmov 0.0  }
  0xa2   : > { %458 = vst [vmem:[#allocation2] sm:$0x3] %v5300_v0 }
  0xa3 PF: > { %v4738_v1 = vld [vmem:[%s5535_s18 + $0x78] sm:$0xff]   ;;  %v4742_v5 = vld [vmem:[%s5535_s18 + $0x70] sm:$0xff]   ;;  %v4746_v9 = vld [vmem:[%s5535_s18 + $0x68] sm:$0xff]   ;;  %v984_v29 = vlaneseq  ;;  %v5301_v37 = vmov 1966171168   ;;  %p4095_p0 = scmp.ne.s32.totalorder %s5376_s15, 3 }
  0xa4   : > { %v4739_v2 = vld [vmem:[%s5535_s18 + $0xf8] sm:$0xff]   ;;  %4105 = vmatprep.subr.bf16.mxu0 %v4738_v1  ;;  %v4743_v6 = vld [vmem:[%s5535_s18 + $0xf0] sm:$0xff]   ;;  %v4747_v10 = vld [vmem:[%s5535_s18 + $0xe8] sm:$0xff]   ;;  %v982_v38 = vunpack.c.l.s4 %v5301_v37 }
  0xa5   : > { %v4740_v3 = vld [vmem:[%s5535_s18 + $0x38] sm:$0xff]   ;;  %4127 = vmatprep.subr.bf16.mxu1 %v4739_v2  ;;  %v4744_v7 = vld [vmem:[%s5535_s18 + $0x30] sm:$0xff]   ;;  %v4748_v11 = vld [vmem:[%s5535_s18 + $0x28] sm:$0xff]   ;;  %v985_v34 = vshrl.u32 %v984_v29, 7 }
  0xa6   : > { %v4741_v4 = vld [vmem:[%s5535_s18 + $0xb8] sm:$0xff]   ;;  %4106 = vmatpush3.bf16.msra.mxu0 %v4740_v3  ;;  %v4745_v8 = vld [vmem:[%s5535_s18 + $0xb0] sm:$0xff]   ;;  %v4749_v12 = vld [vmem:[%s5535_s18 + $0xa8] sm:$0xff]   ;;  %v983_v41 = vunpack.c.0.s8 %v982_v38 }
  0xa7   : > { %4128 = vmatpush3.bf16.msra.mxu1 %v4741_v4  ;;  %4107 = vmatprep.subr.bf16.mxu0 %v4742_v5  ;;  %v4750_v13 = vld [vmem:[%s5535_s18 + $0x60] sm:$0xff]   ;;  %v4754_v17 = vld [vmem:[%s5535_s18 + $0x58] sm:$0xff]   ;;  %v4758_v21 = vld [vmem:[%s5535_s18 + $0x50] sm:$0xff]  }
  0xa8   : > { %4129 = vmatprep.subr.bf16.mxu1 %v4743_v6  ;;  %v4751_v14 = vld [vmem:[%s5535_s18 + $0xe0] sm:$0xff]   ;;  %v4755_v18 = vld [vmem:[%s5535_s18 + $0xd8] sm:$0xff]   ;;  %v4759_v22 = vld [vmem:[%s5535_s18 + $0xd0] sm:$0xff]   ;;  %v5600_v42 = vsub.s32 %v983_v41, %v985_v34 }
  0xa9   : > { %v4752_v15 = vld [vmem:[%s5535_s18 + $0x20] sm:$0xff]   ;;  %v4756_v19 = vld [vmem:[%s5535_s18 + $0x18] sm:$0xff]   ;;  %v4760_v23 = vld [vmem:[%s5535_s18 + $0x10] sm:$0xff]  }
  0xaa   : > { %4108 = vmatpush3.bf16.msra.mxu0 %v4744_v7  ;;  %v4753_v16 = vld [vmem:[%s5535_s18 + $0xa0] sm:$0xff]   ;;  %v4757_v20 = vld [vmem:[%s5535_s18 + $0x98] sm:$0xff]   ;;  %v4761_v24 = vld [vmem:[%s5535_s18 + $0x90] sm:$0xff]  }
  0xab   : > { %4130 = vmatpush3.bf16.msra.mxu1 %v4745_v8  ;;  %4109 = vmatprep.subr.bf16.mxu0 %v4746_v9  ;;  %v4762_v25 = vld [vmem:[%s5535_s18 + $0x48] sm:$0xff]   ;;  %v4766_v30 = vld [vmem:[%s5535_s18 + $0x40] sm:$0xff]   ;;  %v4771_v36 = vld [vmem:[%s5535_s18 + $0x178] sm:$0xff]  }
  0xac   : > { %4131 = vmatprep.subr.bf16.mxu1 %v4747_v10  ;;  %v4763_v26 = vld [vmem:[%s5535_s18 + $0xc8] sm:$0xff]   ;;  %v4767_v31 = vld [vmem:[%s5535_s18 + $0xc0] sm:$0xff]   ;;  %v4772_v39 = vld [vmem:[%s5535_s18 + $0x1f8] sm:$0xff]  }
  0xad   : > { %v4764_v27 = vld [vmem:[%s5535_s18 + $0x8] sm:$0xff]   ;;  %v4768_v32 = vld [vmem:[%s5535_s18] sm:$0xff]   ;;  %v4773_v48 = vld [vmem:[%s5535_s18 + $0x138] sm:$0xff]  }
  0xae   : > { %4110 = vmatpush3.bf16.msra.mxu0 %v4748_v11  ;;  %v4765_v28 = vld [vmem:[%s5535_s18 + $0x88] sm:$0xff]   ;;  %v4769_v33 = vld [vmem:[%s5535_s18 + $0x80] sm:$0xff]   ;;  %v4774_v50 = vld [vmem:[%s5535_s18 + $0x1b8] sm:$0xff]  }
  0xaf   : > { %4132 = vmatpush3.bf16.msra.mxu1 %v4749_v12  ;;  %4111 = vmatprep.subr.bf16.mxu0 %v4750_v13  ;;  %v460_v35 = vld [vmem:[%s5561_s17] sm:$0xff]  ;;  %v4775_v53 = vld [vmem:[%s5535_s18 + $0x170] sm:$0xff]   ;;  %v4779_v59 = vld [vmem:[%s5535_s18 + $0x168] sm:$0xff]  }
  0xb0   : > { %4133 = vmatprep.subr.bf16.mxu1 %v4751_v14  ;;  %v980_v40 = vcombine.high %v460_v35, %v460_v35  ;;  %v987_v43 = vrot.slane %v460_v35, %v5600_v42  ;;  %v4776_v55 = vld [vmem:[%s5535_s18 + $0x1f0] sm:$0xff]   ;;  %v4780_v60 = vld [vmem:[%s5535_s18 + $0x1e8] sm:$0xff]   ;;  %v4783_v63 = vld [vmem:[%s5535_s18 + $0x160] sm:$0xff]  }
  0xb1   : > { %v4777_v56 = vld [vmem:[%s5535_s18 + $0x130] sm:$0xff]   ;;  %v4781_v61 = vld [vmem:[%s5535_s18 + $0x128] sm:$0xff]   ;;  %v4784_v0 = vld [vmem:[%s5535_s18 + $0x1e0] sm:$0xff]  }
  0xb2   : > { %4112 = vmatpush3.bf16.msra.mxu0 %v4752_v15  ;;  %v5604_v44 = vrot.slane %v980_v40, %v5600_v42  ;;  %v995_v45 = vcombine.high %v987_v43, %v987_v43  ;;  %v1003_v46 = vrot.slane %v987_v43, %v5600_v42  ;;  %v4778_v58 = vld [vmem:[%s5535_s18 + $0x1b0] sm:$0xff]   ;;  %v4782_v62 = vld [vmem:[%s5535_s18 + $0x1a8] sm:$0xff]   ;;  %v4785_v1 = vld [vmem:[%s5535_s18 + $0x120] sm:$0xff]  }
  0xb3   : > { %4134 = vmatpush3.bf16.msra.mxu1 %v4753_v16  ;;  %4113 = vmatprep.subr.bf16.mxu0 %v4754_v17  ;;  %v4786_v2 = vld [vmem:[%s5535_s18 + $0x1a0] sm:$0xff]   ;;  %v4787_v3 = vld [vmem:[%s5535_s18 + $0x158] sm:$0xff]   ;;  %v4791_v7 = vld [vmem:[%s5535_s18 + $0x150] sm:$0xff]  }
  0xb4   : > { %4135 = vmatprep.subr.bf16.mxu1 %v4755_v18  ;;  %v996_v47 = vcombine.high %v5604_v44, %v5604_v44  ;;  %v1017_v49 = vrot.slane %v995_v45, %v5600_v42  ;;  %v1025_v52 = vcombine.high %v1003_v46, %v1003_v46  ;;  %v4788_v4 = vld [vmem:[%s5535_s18 + $0x1d8] sm:$0xff]   ;;  %v4792_v8 = vld [vmem:[%s5535_s18 + $0x1d0] sm:$0xff]   ;;  %v4795_v11 = vld [vmem:[%s5535_s18 + $0x148] sm:$0xff]  }
  0xb5   : > { %v4789_v5 = vld [vmem:[%s5535_s18 + $0x118] sm:$0xff]   ;;  %v4793_v9 = vld [vmem:[%s5535_s18 + $0x110] sm:$0xff]   ;;  %v4796_v12 = vld [vmem:[%s5535_s18 + $0x1c8] sm:$0xff]  }
  0xb6   : > { %4114 = vmatpush3.bf16.msra.mxu0 %v4756_v19  ;;  %v1024_v51 = vrot.slane %v996_v47, %v5600_v42  ;;  %2776 = vmatprep.mubr.bf16.mxu0 %v1017_v49  ;;  %v1027_v54 = vcombine.high %v1017_v49, %v1017_v49  ;;  %v4790_v6 = vld [vmem:[%s5535_s18 + $0x198] sm:$0xff]   ;;  %v4794_v10 = vld [vmem:[%s5535_s18 + $0x190] sm:$0xff]   ;;  %v4797_v13 = vld [vmem:[%s5535_s18 + $0x108] sm:$0xff]   ;;  %v1010_v19 = vrot.slane %v5604_v44, %v5600_v42 }
  0xb7   : > { %4136 = vmatpush3.bf16.msra.mxu1 %v4757_v20  ;;  %4115 = vmatprep.subr.bf16.mxu0 %v4758_v21  ;;  %v4798_v14 = vld [vmem:[%s5535_s18 + $0x188] sm:$0xff]   ;;  %v4799_v15 = vld [vmem:[%s5535_s18 + $0x140] sm:$0xff]   ;;  %v4803_v20 = vld [vmem:[%s5535_s18 + $0x278] sm:$0xff]  }
  0xb8   : > { %4137 = vmatprep.subr.bf16.mxu1 %v4759_v22  ;;  %v1028_v57 = vcombine.high %v1024_v51, %v1024_v51  ;;  %2816 = vmatprep.mubr.bf16.mxu1 %v1027_v54  ;;  %v4800_v16 = vld [vmem:[%s5535_s18 + $0x1c0] sm:$0xff]   ;;  %v4804_v21 = vld [vmem:[%s5535_s18 + $0x2f8] sm:$0xff]   ;;  %v4811_v29 = vld [vmem:[%s5535_s18 + $0x268] sm:$0xff]  }
  0xb9   : > { %v4801_v17 = vld [vmem:[%s5535_s18 + $0x100] sm:$0xff]   ;;  %v4805_v22 = vld [vmem:[%s5535_s18 + $0x238] sm:$0xff]   ;;  %v4823_v41 = vld [vmem:[%s5535_s18 + $0x250] sm:$0xff]  }
  0xba   : > { %4116 = vmatpush3.bf16.msra.mxu0 %v4760_v23  ;;  %v4802_v18 = vld [vmem:[%s5535_s18 + $0x180] sm:$0xff]   ;;  %v4806_v23 = vld [vmem:[%s5535_s18 + $0x2b8] sm:$0xff]   ;;  %v4824_v43 = vld [vmem:[%s5535_s18 + $0x2d0] sm:$0xff]  }
  0xbb   : > { %4138 = vmatpush3.bf16.msra.mxu1 %v4761_v24  ;;  %4117 = vmatprep.subr.bf16.mxu0 %v4762_v25  ;;  %v1026_v24 = vcombine.high %v1010_v19, %v1010_v19  ;;  %v4807_v25 = vld [vmem:[%s5535_s18 + $0x270] sm:$0xff]   ;;  %v4816_v34 = vld [vmem:[%s5535_s18 + $0x2e0] sm:$0xff]   ;;  %v4819_v37 = vld [vmem:[%s5535_s18 + $0x258] sm:$0xff]  }
  0xbc   : > { %4139 = vmatprep.subr.bf16.mxu1 %v4763_v26  ;;  %v4808_v26 = vld [vmem:[%s5535_s18 + $0x2f0] sm:$0xff]   ;;  %v4817_v35 = vld [vmem:[%s5535_s18 + $0x220] sm:$0xff]   ;;  %v4820_v38 = vld [vmem:[%s5535_s18 + $0x2d8] sm:$0xff]  }
  0xbd   : > { %v4822_v40 = vld [vmem:[%s5535_s18 + $0x298] sm:$0xff]   ;;  %v4825_v44 = vld [vmem:[%s5535_s18 + $0x210] sm:$0xff]   ;;  %v461_v47 = vld [vmem:[%s5561_s17 + $0x8] sm:$0xff] }
  0xbe   : > { %4118 = vmatpush3.bf16.msra.mxu0 %v4764_v27  ;;  %v4809_v27 = vld [vmem:[%s5535_s18 + $0x230] sm:$0xff]   ;;  %v1036_v49 = vrot.slane %v461_v47, %v5600_v42 }
  0xbf   : > { %4140 = vmatpush3.bf16.msra.mxu1 %v4765_v28  ;;  %4119 = vmatprep.subr.bf16.mxu0 %v4766_v30  ;;  %v4810_v28 = vld [vmem:[%s5535_s18 + $0x2b0] sm:$0xff]   ;;  %v4812_v30 = vld [vmem:[%s5535_s18 + $0x2e8] sm:$0xff]  }
  0xc0   : > { %4141 = vmatprep.subr.bf16.mxu1 %v4767_v31  ;;  %v4813_v31 = vld [vmem:[%s5535_s18 + $0x228] sm:$0xff]   ;;  %v4826_v45 = vld [vmem:[%s5535_s18 + $0x290] sm:$0xff]  }
  0xc2   : > { %4120 = vmatpush3.bf16.msra.mxu0 %v4768_v32  ;;  %v4814_v32 = vld [vmem:[%s5535_s18 + $0x2a8] sm:$0xff]  }
  0xc3   : > { %4142 = vmatpush3.bf16.msra.mxu1 %v4769_v33  ;;  %4149 = vmatprep.subr.bf16.mxu0 %v4771_v36  ;;  %v4815_v33 = vld [vmem:[%s5535_s18 + $0x260] sm:$0xff]  }
  0xc4   : > { %4171 = vmatprep.subr.bf16.mxu1 %v4772_v39  ;;  %v4818_v36 = vld [vmem:[%s5535_s18 + $0x2a0] sm:$0xff]   ;;  %v4821_v39 = vld [vmem:[%s5535_s18 + $0x218] sm:$0xff]  }
  0xc5   : > { %2777 = vmatmul.mubr.bf16.vlgmr.msra.gmra.mxu0 %v1003_v46  ;;  %v4827_v46 = vld [vmem:[%s5535_s18 + $0x248] sm:$0xff]  }
  0xc6   : > { %4150 = vmatpush3.bf16.msra.mxu0 %v4773_v48  ;;  %2817 = vmatmul.mubr.bf16.vlgmr.msra.gmra.mxu1 %v1025_v52  ;;  %v4828_v48 = vld [vmem:[%s5535_s18 + $0x2c8] sm:$0xff]  }
  0xc7   : > { %4151 = vmatprep.subr.bf16.mxu0 %v4775_v53  ;;  %4172 = vmatpush3.bf16.msra.mxu1 %v4774_v50  ;;  %v1029_v50 = vcombine.high %v461_v47, %v461_v47  ;;  %v4830_v52 = vld [vmem:[%s5535_s18 + $0x288] sm:$0xff]   ;;  %v1044_v53 = vcombine.high %v1036_v49, %v1036_v49 }
  0xc8   : > { %2856 = vmatprep.mubr.bf16.mxu0 %v1024_v51  ;;  %4173 = vmatprep.subr.bf16.mxu1 %v4776_v55  ;;  %v4829_v51 = vld [vmem:[%s5535_s18 + $0x208] sm:$0xff]   ;;  %v4831_v55 = vld [vmem:[%s5535_s18 + $0x240] sm:$0xff]  }
  0xc9   : > { %2896 = vmatprep.mubr.bf16.mxu1 %v1028_v57  ;;  %v5674_v54 = vrot.slane %v1029_v50, %v5600_v42  ;;  %v1066_v57 = vrot.slane %v1044_v53, %v5600_v42  ;;  %v4878_v47 = vld [vmem:[%s5535_s18 + $0x428] sm:$0xff]   ;;  %v4881_v50 = vld [vmem:[%s5535_s18 + $0x4e0] sm:$0xff]   ;;  %v4884_v53 = vld [vmem:[%s5535_s18 + $0x458] sm:$0xff]  }
  0xca   : > { %4152 = vmatpush3.bf16.msra.mxu0 %v4777_v56  ;;  %v4832_v56 = vld [vmem:[%s5535_s18 + $0x2c0] sm:$0xff]  }
  0xcb   : > { %4153 = vmatprep.subr.bf16.mxu0 %v4779_v59  ;;  %4174 = vmatpush3.bf16.msra.mxu1 %v4778_v58  ;;  %v1045_v58 = vcombine.high %v5674_v54, %v5674_v54  ;;  %v4833_v59 = vld [vmem:[%s5535_s18 + $0x200] sm:$0xff]  }
  0xcc   : > { %4175 = vmatprep.subr.bf16.mxu1 %v4780_v60  ;;  %v4834_v60 = vld [vmem:[%s5535_s18 + $0x280] sm:$0xff]  }
  0xce   : > { %4154 = vmatpush3.bf16.msra.mxu0 %v4781_v61  ;;  %v1076_v61 = vcombine.high %v1066_v57, %v1066_v57 }
  0xcf   : > { %4155 = vmatprep.subr.bf16.mxu0 %v4783_v63  ;;  %4176 = vmatpush3.bf16.msra.mxu1 %v4782_v62  ;;  %v1052_v62 = vrot.slane %v1036_v49, %v5600_v42  ;;  %v4835_v63 = vld [vmem:[%s5535_s18 + $0x378] sm:$0xff]   ;;  %v4880_v49 = vld [vmem:[%s5535_s18 + $0x460] sm:$0xff]  }
  0xd0   : > { %4177 = vmatprep.subr.bf16.mxu1 %v4784_v0  ;;  %v4836_v0 = vld [vmem:[%s5535_s18 + $0x3f8] sm:$0xff]  }
  0xd2   : > { %4156 = vmatpush3.bf16.msra.mxu0 %v4785_v1  ;;  %v1073_v1 = vrot.slane %v1045_v58, %v5600_v42  ;;  %v4889_v58 = vld [vmem:[%s5535_s18 + $0x4d0] sm:$0xff]  }
  0xd3   : > { %4157 = vmatprep.subr.bf16.mxu0 %v4787_v3  ;;  %4178 = vmatpush3.bf16.msra.mxu1 %v4786_v2  ;;  %v4837_v2 = vld [vmem:[%s5535_s18 + $0x338] sm:$0xff]  }
  0xd4   : > { %4179 = vmatprep.subr.bf16.mxu1 %v4788_v4  ;;  %v4838_v3 = vld [vmem:[%s5535_s18 + $0x3b8] sm:$0xff]   ;;  %v1074_v4 = vcombine.high %v1052_v62, %v1052_v62 }
  0xd6   : > { %4158 = vmatpush3.bf16.msra.mxu0 %v4789_v5  ;;  %v4839_v5 = vld [vmem:[%s5535_s18 + $0x370] sm:$0xff]  }
  0xd7   : > { %4159 = vmatprep.subr.bf16.mxu0 %v4791_v7  ;;  %4180 = vmatpush3.bf16.msra.mxu1 %v4790_v6  ;;  %v4840_v6 = vld [vmem:[%s5535_s18 + $0x3f0] sm:$0xff]   ;;  %v1077_v7 = vcombine.high %v1073_v1, %v1073_v1 }
  0xd8   : > { %4181 = vmatprep.subr.bf16.mxu1 %v4792_v8  ;;  %v4841_v8 = vld [vmem:[%s5535_s18 + $0x330] sm:$0xff]  }
  0xda   : > { %4160 = vmatpush3.bf16.msra.mxu0 %v4793_v9  ;;  %v4842_v9 = vld [vmem:[%s5535_s18 + $0x3b0] sm:$0xff]  }
  0xdb   : > { %4161 = vmatprep.subr.bf16.mxu0 %v4795_v11  ;;  %4182 = vmatpush3.bf16.msra.mxu1 %v4794_v10  ;;  %v4843_v10 = vld [vmem:[%s5535_s18 + $0x368] sm:$0xff]  }
  0xdc   : > { %4183 = vmatprep.subr.bf16.mxu1 %v4796_v12  ;;  %v4844_v11 = vld [vmem:[%s5535_s18 + $0x3e8] sm:$0xff]  }
  0xdd   : > { %v4845_v12 = vld [vmem:[%s5535_s18 + $0x328] sm:$0xff]  }
  0xde   : > { %4162 = vmatpush3.bf16.msra.mxu0 %v4797_v13  ;;  %v4846_v13 = vld [vmem:[%s5535_s18 + $0x3a8] sm:$0xff]  }
  0xdf   : > { %4163 = vmatprep.subr.bf16.mxu0 %v4799_v15  ;;  %4184 = vmatpush3.bf16.msra.mxu1 %v4798_v14  ;;  %v4847_v14 = vld [vmem:[%s5535_s18 + $0x360] sm:$0xff]  }
  0xe0   : > { %4185 = vmatprep.subr.bf16.mxu1 %v4800_v16  ;;  %v4848_v15 = vld [vmem:[%s5535_s18 + $0x3e0] sm:$0xff]  }
  0xe1   : > { %v4849_v16 = vld [vmem:[%s5535_s18 + $0x320] sm:$0xff]  }
  0xe2   : > { %4164 = vmatpush3.bf16.msra.mxu0 %v4801_v17  ;;  %v4850_v17 = vld [vmem:[%s5535_s18 + $0x3a0] sm:$0xff]  }
  0xe3   : > { %4193 = vmatprep.subr.bf16.mxu0 %v4803_v20  ;;  %4186 = vmatpush3.bf16.msra.mxu1 %v4802_v18  ;;  %v4851_v18 = vld [vmem:[%s5535_s18 + $0x358] sm:$0xff]  }
  0xe4   : > { %4215 = vmatprep.subr.bf16.mxu1 %v4804_v21  ;;  %v4853_v20 = vld [vmem:[%s5535_s18 + $0x318] sm:$0xff]  }
  0xe5   : > { %2857 = vmatmul.mubr.bf16.vlgmr.msra.gmra.mxu0 %v1010_v19  ;;  %v4852_v19 = vld [vmem:[%s5535_s18 + $0x3d8] sm:$0xff]  }
  0xe6   : > { %4194 = vmatpush3.bf16.msra.mxu0 %v4805_v22  ;;  %2897 = vmatmul.mubr.bf16.vlgmr.msra.gmra.mxu1 %v1026_v24  ;;  %v4854_v21 = vld [vmem:[%s5535_s18 + $0x398] sm:$0xff]   ;;  %v4855_v22 = vld [vmem:[%s5535_s18 + $0x350] sm:$0xff]  }
  0xe7   : > { %4195 = vmatprep.subr.bf16.mxu0 %v4807_v25  ;;  %4216 = vmatpush3.bf16.msra.mxu1 %v4806_v23  ;;  %v4856_v23 = vld [vmem:[%s5535_s18 + $0x3d0] sm:$0xff]  }
  0xe8   : > { %4217 = vmatprep.subr.bf16.mxu1 %v4808_v26  ;;  %2936 = vmatprep.mubr.bf16.mxu0 %v1066_v57  ;;  %v4857_v24 = vld [vmem:[%s5535_s18 + $0x310] sm:$0xff]   ;;  %v4859_v26 = vld [vmem:[%s5535_s18 + $0x348] sm:$0xff]  }
  0xe9   : > { %2976 = vmatprep.mubr.bf16.mxu1 %v1076_v61  ;;  %v4858_v25 = vld [vmem:[%s5535_s18 + $0x390] sm:$0xff]   ;;  %v4892_v61 = vld [vmem:[%s5535_s18 + $0x448] sm:$0xff]  }
  0xea   : > { %4196 = vmatpush3.bf16.msra.mxu0 %v4809_v27  ;;  %v4860_v27 = vld [vmem:[%s5535_s18 + $0x3c8] sm:$0xff]   ;;  %v4888_v57 = vld [vmem:[%s5535_s18 + $0x450] sm:$0xff]  }
  0xeb   : > { %4197 = vmatprep.subr.bf16.mxu0 %v4811_v29  ;;  %4218 = vmatpush3.bf16.msra.mxu1 %v4810_v28  ;;  %v4861_v28 = vld [vmem:[%s5535_s18 + $0x308] sm:$0xff]  }
  0xec   : > { %4219 = vmatprep.subr.bf16.mxu1 %v4812_v30  ;;  %v4862_v29 = vld [vmem:[%s5535_s18 + $0x388] sm:$0xff]   ;;  %v4863_v30 = vld [vmem:[%s5535_s18 + $0x340] sm:$0xff]  }
  0xee   : > { %4198 = vmatpush3.bf16.msra.mxu0 %v4813_v31  ;;  %v4864_v31 = vld [vmem:[%s5535_s18 + $0x3c0] sm:$0xff]  }
  0xef   : > { %4199 = vmatprep.subr.bf16.mxu0 %v4815_v33  ;;  %4220 = vmatpush3.bf16.msra.mxu1 %v4814_v32  ;;  %v4865_v32 = vld [vmem:[%s5535_s18 + $0x300] sm:$0xff]  }
  0xf0   : > { %4221 = vmatprep.subr.bf16.mxu1 %v4816_v34  ;;  %v4866_v33 = vld [vmem:[%s5535_s18 + $0x380] sm:$0xff]   ;;  %v1059_v34 = vrot.slane %v5674_v54, %v5600_v42  ;;  %v4885_v54 = vld [vmem:[%s5535_s18 + $0x4d8] sm:$0xff]  }
  0xf2   : > { %4200 = vmatpush3.bf16.msra.mxu0 %v4817_v35  ;;  %v4868_v35 = vld [vmem:[%s5535_s18 + $0x478] sm:$0xff]  }
  0xf3   : > { %4201 = vmatprep.subr.bf16.mxu0 %v4819_v37  ;;  %4222 = vmatpush3.bf16.msra.mxu1 %v4818_v36  ;;  %v4869_v36 = vld [vmem:[%s5535_s18 + $0x4f8] sm:$0xff]  }
  0xf4   : > { %4223 = vmatprep.subr.bf16.mxu1 %v4820_v38  ;;  %v4870_v37 = vld [vmem:[%s5535_s18 + $0x438] sm:$0xff]  }
  0xf5   : > { %v4871_v38 = vld [vmem:[%s5535_s18 + $0x4b8] sm:$0xff]  }
  0xf6   : > { %4202 = vmatpush3.bf16.msra.mxu0 %v4821_v39  ;;  %v1075_v39 = vcombine.high %v1059_v34, %v1059_v34 }
  0xf7   : > { %4203 = vmatprep.subr.bf16.mxu0 %v4823_v41  ;;  %4224 = vmatpush3.bf16.msra.mxu1 %v4822_v40  ;;  %v4872_v40 = vld [vmem:[%s5535_s18 + $0x470] sm:$0xff]  }
  0xf8   : > { %4225 = vmatprep.subr.bf16.mxu1 %v4824_v43  ;;  %v4873_v41 = vld [vmem:[%s5535_s18 + $0x4f0] sm:$0xff]  }
  0xf9   : > { %v4874_v43 = vld [vmem:[%s5535_s18 + $0x430] sm:$0xff]  }
  0xfa   : > { %4204 = vmatpush3.bf16.msra.mxu0 %v4825_v44  ;;  %v4875_v44 = vld [vmem:[%s5535_s18 + $0x4b0] sm:$0xff]  }
  0xfb   : > { %4205 = vmatprep.subr.bf16.mxu0 %v4827_v46  ;;  %4226 = vmatpush3.bf16.msra.mxu1 %v4826_v45  ;;  %v4876_v45 = vld [vmem:[%s5535_s18 + $0x468] sm:$0xff]  }
  0xfc   : > { %4227 = vmatprep.subr.bf16.mxu1 %v4828_v48  ;;  %v4877_v46 = vld [vmem:[%s5535_s18 + $0x4e8] sm:$0xff]  }
  0xfd   : > { %v4879_v48 = vld [vmem:[%s5535_s18 + $0x4a8] sm:$0xff]  }
  0xfe   : > { %4206 = vmatpush3.bf16.msra.mxu0 %v4829_v51  ;;  %v4882_v51 = vld [vmem:[%s5535_s18 + $0x420] sm:$0xff]  }
  0xff   : > { %4207 = vmatprep.subr.bf16.mxu0 %v4831_v55  ;;  %4228 = vmatpush3.bf16.msra.mxu1 %v4830_v52  ;;  %v4883_v52 = vld [vmem:[%s5535_s18 + $0x4a0] sm:$0xff]   ;;  %v4886_v55 = vld [vmem:[%s5535_s18 + $0x418] sm:$0xff]  }
 0x100   : > { %4229 = vmatprep.subr.bf16.mxu1 %v4832_v56  ;;  %v4887_v56 = vld [vmem:[%s5535_s18 + $0x498] sm:$0xff]  }
 0x102   : > { %4208 = vmatpush3.bf16.msra.mxu0 %v4833_v59  ;;  %v4890_v59 = vld [vmem:[%s5535_s18 + $0x410] sm:$0xff]  }
 0x103   : > { %4237 = vmatprep.subr.bf16.mxu0 %v4835_v63  ;;  %4230 = vmatpush3.bf16.msra.mxu1 %v4834_v60  ;;  %v4891_v60 = vld [vmem:[%s5535_s18 + $0x490] sm:$0xff]   ;;  %v4893_v63 = vld [vmem:[%s5535_s18 + $0x4c8] sm:$0xff]  }
 0x104   : > { %4259 = vmatprep.subr.bf16.mxu1 %v4836_v0 }
 0x105   : > { %2937 = vmatmul.mubr.bf16.vlgmr.msra.gmra.mxu0 %v1052_v62  ;;  %v462_v62 = vld [vmem:[%s5561_s17 + $0x10] sm:$0xff] }
 0x106   : > { %4238 = vmatpush3.bf16.msra.mxu0 %v4837_v2  ;;  %3016 = vmatprep.mubr.bf16.mxu0 %v1073_v1  ;;  %v1085_v0 = vrot.slane %v462_v62, %v5600_v42  ;;  %v1078_v1 = vcombine.high %v462_v62, %v462_v62  ;;  %v4894_v2 = vld [vmem:[%s5535_s18 + $0x408] sm:$0xff]  }
 0x107   : > { %2977 = vmatmul.mubr.bf16.vlgmr.msra.gmra.mxu1 %v1074_v4  ;;  %4239 = vmatprep.subr.bf16.mxu0 %v4839_v5  ;;  %v4943_v62 = vld [vmem:[%s5535_s18 + $0x628] sm:$0xff]  }
 0x108   : > { %4260 = vmatpush3.bf16.msra.mxu1 %v4838_v3  ;;  %3056 = vmatprep.mubr.bf16.mxu1 %v1077_v7  ;;  %v4895_v3 = vld [vmem:[%s5535_s18 + $0x488] sm:$0xff]   ;;  %v1093_v4 = vcombine.high %v1085_v0, %v1085_v0  ;;  %v5750_v5 = vrot.slane %v1078_v1, %v5600_v42  ;;  %v4897_v7 = vld [vmem:[%s5535_s18 + $0x4c0] sm:$0xff]  }
 0x109   : > { %4261 = vmatprep.subr.bf16.mxu1 %v4840_v6  ;;  %v4896_v6 = vld [vmem:[%s5535_s18 + $0x440] sm:$0xff]  }
 0x10a   : > { %4240 = vmatpush3.bf16.msra.mxu0 %v4841_v8  ;;  %v1115_v8 = vrot.slane %v1093_v4, %v5600_v42  ;;  %v4946_v1 = vld [vmem:[%s5535_s18 + $0x6e0] sm:$0xff]   ;;  %v4949_v4 = vld [vmem:[%s5535_s18 + $0x658] sm:$0xff]  }
 0x10b   : > { %4241 = vmatprep.subr.bf16.mxu0 %v4843_v10  ;;  %v4898_v10 = vld [vmem:[%s5535_s18 + $0x400] sm:$0xff]  }
 0x10c   : > { %4262 = vmatpush3.bf16.msra.mxu1 %v4842_v9  ;;  %v1094_v9 = vcombine.high %v5750_v5, %v5750_v5 }
 0x10d   : > { %4263 = vmatprep.subr.bf16.mxu1 %v4844_v11  ;;  %v4899_v11 = vld [vmem:[%s5535_s18 + $0x480] sm:$0xff]  }
 0x10e   : > { %4242 = vmatpush3.bf16.msra.mxu0 %v4845_v12  ;;  %v1125_v12 = vcombine.high %v1115_v8, %v1115_v8 }
 0x10f   : > { %4243 = vmatprep.subr.bf16.mxu0 %v4847_v14  ;;  %v4900_v14 = vld [vmem:[%s5535_s18 + $0x578] sm:$0xff]  }
 0x110   : > { %4264 = vmatpush3.bf16.msra.mxu1 %v4846_v13  ;;  %v1101_v13 = vrot.slane %v1085_v0, %v5600_v42  ;;  %v4945_v0 = vld [vmem:[%s5535_s18 + $0x660] sm:$0xff]  }
 0x111   : > { %4265 = vmatprep.subr.bf16.mxu1 %v4848_v15  ;;  %v4901_v15 = vld [vmem:[%s5535_s18 + $0x5f8] sm:$0xff]  }
 0x112   : > { %4244 = vmatpush3.bf16.msra.mxu0 %v4849_v16  ;;  %v1122_v16 = vrot.slane %v1094_v9, %v5600_v42  ;;  %v4954_v9 = vld [vmem:[%s5535_s18 + $0x6d0] sm:$0xff]  }
 0x113   : > { %4245 = vmatprep.subr.bf16.mxu0 %v4851_v18  ;;  %v4903_v18 = vld [vmem:[%s5535_s18 + $0x5b8] sm:$0xff]  }
 0x114   : > { %4266 = vmatpush3.bf16.msra.mxu1 %v4850_v17  ;;  %v4902_v17 = vld [vmem:[%s5535_s18 + $0x538] sm:$0xff]  }
 0x115   : > { %4267 = vmatprep.subr.bf16.mxu1 %v4852_v19  ;;  %v1123_v19 = vcombine.high %v1101_v13, %v1101_v13 }
 0x116   : > { %4246 = vmatpush3.bf16.msra.mxu0 %v4853_v20  ;;  %v4904_v20 = vld [vmem:[%s5535_s18 + $0x570] sm:$0xff]  }
 0x117   : > { %4247 = vmatprep.subr.bf16.mxu0 %v4855_v22  ;;  %v1126_v22 = vcombine.high %v1122_v16, %v1122_v16 }
 0x118   : > { %4268 = vmatpush3.bf16.msra.mxu1 %v4854_v21  ;;  %v4905_v21 = vld [vmem:[%s5535_s18 + $0x5f0] sm:$0xff]  }
 0x119   : > { %4269 = vmatprep.subr.bf16.mxu1 %v4856_v23  ;;  %v4906_v23 = vld [vmem:[%s5535_s18 + $0x530] sm:$0xff]  }
 0x11a   : > { %4248 = vmatpush3.bf16.msra.mxu0 %v4857_v24  ;;  %v4907_v24 = vld [vmem:[%s5535_s18 + $0x5b0] sm:$0xff]  }
 0x11b   : > { %4249 = vmatprep.subr.bf16.mxu0 %v4859_v26  ;;  %v4909_v26 = vld [vmem:[%s5535_s18 + $0x5e8] sm:$0xff]  }
 0x11c   : > { %4270 = vmatpush3.bf16.msra.mxu1 %v4858_v25  ;;  %v4908_v25 = vld [vmem:[%s5535_s18 + $0x568] sm:$0xff]  }
 0x11d   : > { %4271 = vmatprep.subr.bf16.mxu1 %v4860_v27  ;;  %v4910_v27 = vld [vmem:[%s5535_s18 + $0x528] sm:$0xff]  }
 0x11e   : > { %4250 = vmatpush3.bf16.msra.mxu0 %v4861_v28  ;;  %v4911_v28 = vld [vmem:[%s5535_s18 + $0x5a8] sm:$0xff]  }
 0x11f   : > { %4251 = vmatprep.subr.bf16.mxu0 %v4863_v30  ;;  %v4913_v30 = vld [vmem:[%s5535_s18 + $0x5e0] sm:$0xff]  }
 0x120   : > { %4272 = vmatpush3.bf16.msra.mxu1 %v4862_v29  ;;  %v4912_v29 = vld [vmem:[%s5535_s18 + $0x560] sm:$0xff]  }
 0x121   : > { %4273 = vmatprep.subr.bf16.mxu1 %v4864_v31  ;;  %v4914_v31 = vld [vmem:[%s5535_s18 + $0x520] sm:$0xff]  }
 0x122   : > { %4252 = vmatpush3.bf16.msra.mxu0 %v4865_v32  ;;  %v4915_v32 = vld [vmem:[%s5535_s18 + $0x5a0] sm:$0xff]  }
 0x123   : > { %4281 = vmatprep.subr.bf16.mxu0 %v4868_v35  ;;  %v4918_v35 = vld [vmem:[%s5535_s18 + $0x518] sm:$0xff]  }
 0x124   : > { %4274 = vmatpush3.bf16.msra.mxu1 %v4866_v33  ;;  %v4916_v33 = vld [vmem:[%s5535_s18 + $0x558] sm:$0xff]  }
 0x125   : > { %3017 = vmatmul.mubr.bf16.vlgmr.msra.gmra.mxu0 %v1059_v34  ;;  %4303 = vmatprep.subr.bf16.mxu1 %v4869_v36  ;;  %v4917_v34 = vld [vmem:[%s5535_s18 + $0x5d8] sm:$0xff]  }
 0x126   : > { %4282 = vmatpush3.bf16.msra.mxu0 %v4870_v37  ;;  %3096 = vmatprep.mubr.bf16.mxu0 %v1115_v8  ;;  %v4919_v36 = vld [vmem:[%s5535_s18 + $0x598] sm:$0xff]   ;;  %v4920_v37 = vld [vmem:[%s5535_s18 + $0x550] sm:$0xff]  }
 0x127   : > { %3057 = vmatmul.mubr.bf16.vlgmr.msra.gmra.mxu1 %v1075_v39  ;;  %4283 = vmatprep.subr.bf16.mxu0 %v4872_v40  ;;  %v4922_v39 = vld [vmem:[%s5535_s18 + $0x510] sm:$0xff]  }
 0x128   : > { %4304 = vmatpush3.bf16.msra.mxu1 %v4871_v38  ;;  %3136 = vmatprep.mubr.bf16.mxu1 %v1125_v12  ;;  %v4921_v38 = vld [vmem:[%s5535_s18 + $0x5d0] sm:$0xff]   ;;  %v4957_v12 = vld [vmem:[%s5535_s18 + $0x648] sm:$0xff]  }
 0x129   : > { %4305 = vmatprep.subr.bf16.mxu1 %v4873_v41  ;;  %v4923_v40 = vld [vmem:[%s5535_s18 + $0x590] sm:$0xff]   ;;  %v4924_v41 = vld [vmem:[%s5535_s18 + $0x548] sm:$0xff]  }
 0x12a   : > { %4284 = vmatpush3.bf16.msra.mxu0 %v4874_v43  ;;  %v4925_v43 = vld [vmem:[%s5535_s18 + $0x5c8] sm:$0xff]   ;;  %v4953_v8 = vld [vmem:[%s5535_s18 + $0x650] sm:$0xff]  }
 0x12b   : > { %4285 = vmatprep.subr.bf16.mxu0 %v4876_v45  ;;  %v4927_v45 = vld [vmem:[%s5535_s18 + $0x588] sm:$0xff]  }
 0x12c   : > { %4306 = vmatpush3.bf16.msra.mxu1 %v4875_v44  ;;  %v4926_v44 = vld [vmem:[%s5535_s18 + $0x508] sm:$0xff]  }
 0x12d   : > { %4307 = vmatprep.subr.bf16.mxu1 %v4877_v46  ;;  %v4928_v46 = vld [vmem:[%s5535_s18 + $0x540] sm:$0xff]  }
 0x12e   : > { %4286 = vmatpush3.bf16.msra.mxu0 %v4878_v47  ;;  %v4929_v47 = vld [vmem:[%s5535_s18 + $0x5c0] sm:$0xff]  }
 0x12f   : > { %4287 = vmatprep.subr.bf16.mxu0 %v4880_v49  ;;  %v4931_v49 = vld [vmem:[%s5535_s18 + $0x580] sm:$0xff]  }
 0x130   : > { %4308 = vmatpush3.bf16.msra.mxu1 %v4879_v48  ;;  %v4930_v48 = vld [vmem:[%s5535_s18 + $0x500] sm:$0xff]  }
 0x131   : > { %4309 = vmatprep.subr.bf16.mxu1 %v4881_v50  ;;  %v1108_v50 = vrot.slane %v5750_v5, %v5600_v42  ;;  %v4950_v5 = vld [vmem:[%s5535_s18 + $0x6d8] sm:$0xff]  }
 0x132   : > { %4288 = vmatpush3.bf16.msra.mxu0 %v4882_v51  ;;  %v4933_v51 = vld [vmem:[%s5535_s18 + $0x678] sm:$0xff]  }
 0x133   : > { %4289 = vmatprep.subr.bf16.mxu0 %v4884_v53  ;;  %v4935_v53 = vld [vmem:[%s5535_s18 + $0x638] sm:$0xff]  }
 0x134   : > { %4310 = vmatpush3.bf16.msra.mxu1 %v4883_v52  ;;  %v4934_v52 = vld [vmem:[%s5535_s18 + $0x6f8] sm:$0xff]  }
 0x135   : > { %4311 = vmatprep.subr.bf16.mxu1 %v4885_v54  ;;  %v4936_v54 = vld [vmem:[%s5535_s18 + $0x6b8] sm:$0xff]  }
 0x136   : > { %4290 = vmatpush3.bf16.msra.mxu0 %v4886_v55  ;;  %v1124_v55 = vcombine.high %v1108_v50, %v1108_v50 }
 0x137   : > { %4291 = vmatprep.subr.bf16.mxu0 %v4888_v57  ;;  %v4938_v57 = vld [vmem:[%s5535_s18 + $0x6f0] sm:$0xff]  }
 0x138   : > { %4312 = vmatpush3.bf16.msra.mxu1 %v4887_v56  ;;  %v4937_v56 = vld [vmem:[%s5535_s18 + $0x670] sm:$0xff]  }
 0x139   : > { %4313 = vmatprep.subr.bf16.mxu1 %v4889_v58  ;;  %v4939_v58 = vld [vmem:[%s5535_s18 + $0x630] sm:$0xff]  }
 0x13a   : > { %4292 = vmatpush3.bf16.msra.mxu0 %v4890_v59  ;;  %v4940_v59 = vld [vmem:[%s5535_s18 + $0x6b0] sm:$0xff]  }
 0x13b   : > { %4293 = vmatprep.subr.bf16.mxu0 %v4892_v61  ;;  %v4942_v61 = vld [vmem:[%s5535_s18 + $0x6e8] sm:$0xff]  }
 0x13c   : > { %4314 = vmatpush3.bf16.msra.mxu1 %v4891_v60  ;;  %v4941_v60 = vld [vmem:[%s5535_s18 + $0x668] sm:$0xff]  }
 0x13d   : > { %4315 = vmatprep.subr.bf16.mxu1 %v4893_v63  ;;  %v4944_v63 = vld [vmem:[%s5535_s18 + $0x6a8] sm:$0xff]  }
 0x13e   : > { %4294 = vmatpush3.bf16.msra.mxu0 %v4894_v2  ;;  %v4947_v2 = vld [vmem:[%s5535_s18 + $0x620] sm:$0xff]  }
 0x13f   : > { %4295 = vmatprep.subr.bf16.mxu0 %v4896_v6  ;;  %v4951_v6 = vld [vmem:[%s5535_s18 + $0x618] sm:$0xff]  }
 0x140   : > { %4316 = vmatpush3.bf16.msra.mxu1 %v4895_v3  ;;  %v4948_v3 = vld [vmem:[%s5535_s18 + $0x6a0] sm:$0xff]  }
 0x141   : > { %4317 = vmatprep.subr.bf16.mxu1 %v4897_v7  ;;  %v4952_v7 = vld [vmem:[%s5535_s18 + $0x698] sm:$0xff]  }
 0x142   : > { %4296 = vmatpush3.bf16.msra.mxu0 %v4898_v10  ;;  %v4955_v10 = vld [vmem:[%s5535_s18 + $0x610] sm:$0xff]  }
 0x143   : > { %4325 = vmatprep.subr.bf16.mxu0 %v4900_v14  ;;  %v4958_v14 = vld [vmem:[%s5535_s18 + $0x6c8] sm:$0xff]  }
 0x144   : > { %4318 = vmatpush3.bf16.msra.mxu1 %v4899_v11  ;;  %v4956_v11 = vld [vmem:[%s5535_s18 + $0x690] sm:$0xff]  }
 0x145   : > { %3097 = vmatmul.mubr.bf16.vlgmr.msra.gmra.mxu0 %v1101_v13  ;;  %4347 = vmatprep.subr.bf16.mxu1 %v4901_v15  ;;  %v463_v13 = vld [vmem:[%s5561_s17 + $0x18] sm:$0xff] }
 0x146   : > { %4326 = vmatpush3.bf16.msra.mxu0 %v4902_v17  ;;  %3176 = vmatprep.mubr.bf16.mxu0 %v1122_v16  ;;  %v1134_v15 = vrot.slane %v463_v13, %v5600_v42  ;;  %v1127_v16 = vcombine.high %v463_v13, %v463_v13  ;;  %v4959_v17 = vld [vmem:[%s5535_s18 + $0x608] sm:$0xff]  }
 0x147   : > { %3137 = vmatmul.mubr.bf16.vlgmr.msra.gmra.mxu1 %v1123_v19  ;;  %4327 = vmatprep.subr.bf16.mxu0 %v4904_v20 }
 0x148   : > { %4348 = vmatpush3.bf16.msra.mxu1 %v4903_v18  ;;  %3216 = vmatprep.mubr.bf16.mxu1 %v1126_v22  ;;  %v4961_v18 = vld [vmem:[%s5535_s18 + $0x640] sm:$0xff]   ;;  %v1142_v19 = vcombine.high %v1134_v15, %v1134_v15  ;;  %v5826_v20 = vrot.slane %v1127_v16, %v5600_v42 }
 0x149   : > { %4349 = vmatprep.subr.bf16.mxu1 %v4905_v21  ;;  %v4960_v21 = vld [vmem:[%s5535_s18 + $0x688] sm:$0xff]   ;;  %v4962_v22 = vld [vmem:[%s5535_s18 + $0x6c0] sm:$0xff]  }
 0x14a   : > { %4328 = vmatpush3.bf16.msra.mxu0 %v4906_v23  ;;  %v1164_v23 = vrot.slane %v1142_v19, %v5600_v42 }
 0x14b   : > { %4329 = vmatprep.subr.bf16.mxu0 %v4908_v25  ;;  %v4963_v25 = vld [vmem:[%s5535_s18 + $0x600] sm:$0xff]  }
 0x14c   : > { %4350 = vmatpush3.bf16.msra.mxu1 %v4907_v24  ;;  %v1143_v24 = vcombine.high %v5826_v20, %v5826_v20 }
 0x14d   : > { %4351 = vmatprep.subr.bf16.mxu1 %v4909_v26  ;;  %v1174_v26 = vcombine.high %v1164_v23, %v1164_v23 }
 0x14e   : > { %4330 = vmatpush3.bf16.msra.mxu0 %v4910_v27  ;;  %v1150_v27 = vrot.slane %v1134_v15, %v5600_v42 }
 0x14f   : > { %4331 = vmatprep.subr.bf16.mxu0 %v4912_v29  ;;  %v4964_v29 = vld [vmem:[%s5535_s18 + $0x680] sm:$0xff]  }
 0x150   : > { %4352 = vmatpush3.bf16.msra.mxu1 %v4911_v28  ;;  %v4965_v28 = vld [vmem:[%s5535_s18 + $0x778] sm:$0xff]  }
 0x151   : > { %4353 = vmatprep.subr.bf16.mxu1 %v4913_v30  ;;  %v1171_v30 = vrot.slane %v1143_v24, %v5600_v42 }
 0x152   : > { %4332 = vmatpush3.bf16.msra.mxu0 %v4914_v31  ;;  %v4966_v31 = vld [vmem:[%s5535_s18 + $0x7f8] sm:$0xff]  }
 0x153   : > { %4333 = vmatprep.subr.bf16.mxu0 %v4916_v33  ;;  %v1172_v33 = vcombine.high %v1150_v27, %v1150_v27 }
 0x154   : > { %4354 = vmatpush3.bf16.msra.mxu1 %v4915_v32  ;;  %v4967_v32 = vld [vmem:[%s5535_s18 + $0x738] sm:$0xff]  }
 0x155   : > { %4355 = vmatprep.subr.bf16.mxu1 %v4917_v34  ;;  %v4969_v34 = vld [vmem:[%s5535_s18 + $0x770] sm:$0xff]  }
 0x156   : > { %4334 = vmatpush3.bf16.msra.mxu0 %v4918_v35  ;;  %v4968_v35 = vld [vmem:[%s5535_s18 + $0x7b8] sm:$0xff]  }
 0x157   : > { %4335 = vmatprep.subr.bf16.mxu0 %v4920_v37 }
 0x158   : > { %4356 = vmatpush3.bf16.msra.mxu1 %v4919_v36  ;;  %v1175_v36 = vcombine.high %v1171_v30, %v1171_v30 }
 0x159   : > { %4357 = vmatprep.subr.bf16.mxu1 %v4921_v38  ;;  %v4970_v38 = vld [vmem:[%s5535_s18 + $0x7f0] sm:$0xff]  }
 0x15a   : > { %4336 = vmatpush3.bf16.msra.mxu0 %v4922_v39  ;;  %v4971_v39 = vld [vmem:[%s5535_s18 + $0x730] sm:$0xff]  }
 0x15b   : > { %4337 = vmatprep.subr.bf16.mxu0 %v4924_v41 }
 0x15c   : > { %4358 = vmatpush3.bf16.msra.mxu1 %v4923_v40 }
 0x15d   : > { %4359 = vmatprep.subr.bf16.mxu1 %v4925_v43  ;;  %v4973_v43 = vld [vmem:[%s5535_s18 + $0x768] sm:$0xff]  }
 0x15e   : > { %4338 = vmatpush3.bf16.msra.mxu0 %v4926_v44 }
 0x15f   : > { %4339 = vmatprep.subr.bf16.mxu0 %v4928_v46 }
 0x160   : > { %4360 = vmatpush3.bf16.msra.mxu1 %v4927_v45  ;;  %v4972_v45 = vld [vmem:[%s5535_s18 + $0x7b0] sm:$0xff]  }
 0x161   : > { %4361 = vmatprep.subr.bf16.mxu1 %v4929_v47 }
 0x162   : > { %4340 = vmatpush3.bf16.msra.mxu0 %v4930_v48  ;;  %v4974_v48 = vld [vmem:[%s5535_s18 + $0x7e8] sm:$0xff]  }
 0x163   : > { %4369 = vmatprep.subr.bf16.mxu0 %v4933_v51 }
 0x164   : > { %4362 = vmatpush3.bf16.msra.mxu1 %v4931_v49 }
 0x165   : > { %3177 = vmatmul.mubr.bf16.vlgmr.msra.gmra.mxu0 %v1108_v50  ;;  %4391 = vmatprep.subr.bf16.mxu1 %v4934_v52  ;;  %v4975_v50 = vld [vmem:[%s5535_s18 + $0x728] sm:$0xff]  }
 0x166   : > { %4370 = vmatpush3.bf16.msra.mxu0 %v4935_v53  ;;  %3256 = vmatprep.mubr.bf16.mxu0 %v1164_v23  ;;  %v4977_v53 = vld [vmem:[%s5535_s18 + $0x760] sm:$0xff]  }
 0x167   : > { %3217 = vmatmul.mubr.bf16.vlgmr.msra.gmra.mxu1 %v1124_v55  ;;  %4371 = vmatprep.subr.bf16.mxu0 %v4937_v56  ;;  %v4976_v55 = vld [vmem:[%s5535_s18 + $0x7a8] sm:$0xff]  }
 0x168   : > { %4392 = vmatpush3.bf16.msra.mxu1 %v4936_v54  ;;  %3296 = vmatprep.mubr.bf16.mxu1 %v1174_v26 }
 0x169   : > { %4393 = vmatprep.subr.bf16.mxu1 %v4938_v57  ;;  %v4978_v57 = vld [vmem:[%s5535_s18 + $0x7e0] sm:$0xff]  }
 0x16a   : > { %4372 = vmatpush3.bf16.msra.mxu0 %v4939_v58  ;;  %v4979_v58 = vld [vmem:[%s5535_s18 + $0x720] sm:$0xff]  }
 0x16b   : > { %4373 = vmatprep.subr.bf16.mxu0 %v4941_v60  ;;  %v4980_v60 = vld [vmem:[%s5535_s18 + $0x7a0] sm:$0xff]  }
 0x16c   : > { %4394 = vmatpush3.bf16.msra.mxu1 %v4940_v59  ;;  %v4981_v59 = vld [vmem:[%s5535_s18 + $0x758] sm:$0xff]  }
 0x16d   : > { %4395 = vmatprep.subr.bf16.mxu1 %v4942_v61  ;;  %v4982_v61 = vld [vmem:[%s5535_s18 + $0x7d8] sm:$0xff]  }
 0x16e   : > { %4374 = vmatpush3.bf16.msra.mxu0 %v4943_v62  ;;  %v4983_v62 = vld [vmem:[%s5535_s18 + $0x718] sm:$0xff]  }
 0x16f   : > { %4375 = vmatprep.subr.bf16.mxu0 %v4945_v0  ;;  %v4984_v0 = vld [vmem:[%s5535_s18 + $0x798] sm:$0xff]  }
 0x170   : > { %4396 = vmatpush3.bf16.msra.mxu1 %v4944_v63  ;;  %v4985_v63 = vld [vmem:[%s5535_s18 + $0x750] sm:$0xff]  }
 0x171   : > { %4397 = vmatprep.subr.bf16.mxu1 %v4946_v1  ;;  %v4986_v1 = vld [vmem:[%s5535_s18 + $0x7d0] sm:$0xff]  }
 0x172   : > { %4376 = vmatpush3.bf16.msra.mxu0 %v4947_v2  ;;  %v4987_v2 = vld [vmem:[%s5535_s18 + $0x710] sm:$0xff]  }
 0x173   : > { %4377 = vmatprep.subr.bf16.mxu0 %v4949_v4  ;;  %v4988_v4 = vld [vmem:[%s5535_s18 + $0x790] sm:$0xff]  }
 0x174   : > { %4398 = vmatpush3.bf16.msra.mxu1 %v4948_v3  ;;  %v4989_v3 = vld [vmem:[%s5535_s18 + $0x748] sm:$0xff]  }
 0x175   : > { %4399 = vmatprep.subr.bf16.mxu1 %v4950_v5  ;;  %v4990_v5 = vld [vmem:[%s5535_s18 + $0x7c8] sm:$0xff]  }
 0x176   : > { %4378 = vmatpush3.bf16.msra.mxu0 %v4951_v6  ;;  %v4991_v6 = vld [vmem:[%s5535_s18 + $0x708] sm:$0xff]  }
 0x177   : > { %4379 = vmatprep.subr.bf16.mxu0 %v4953_v8  ;;  %v4992_v8 = vld [vmem:[%s5535_s18 + $0x788] sm:$0xff]  }
 0x178   : > { %4400 = vmatpush3.bf16.msra.mxu1 %v4952_v7  ;;  %v4993_v7 = vld [vmem:[%s5535_s18 + $0x740] sm:$0xff]  }
 0x179   : > { %4401 = vmatprep.subr.bf16.mxu1 %v4954_v9  ;;  %v4994_v9 = vld [vmem:[%s5535_s18 + $0x7c0] sm:$0xff]  }
 0x17a   : > { %4380 = vmatpush3.bf16.msra.mxu0 %v4955_v10  ;;  %v4995_v10 = vld [vmem:[%s5535_s18 + $0x700] sm:$0xff]  }
 0x17b   : > { %4381 = vmatprep.subr.bf16.mxu0 %v4957_v12  ;;  %v4996_v12 = vld [vmem:[%s5535_s18 + $0x780] sm:$0xff]  }
 0x17c   : > { %4402 = vmatpush3.bf16.msra.mxu1 %v4956_v11  ;;  %v1157_v11 = vrot.slane %v5826_v20, %v5600_v42 }
 0x17d   : > { %4403 = vmatprep.subr.bf16.mxu1 %v4958_v14 }
 0x17e   : > { %4382 = vmatpush3.bf16.msra.mxu0 %v4959_v17  ;;  %v1173_v13 = vcombine.high %v1157_v11, %v1157_v11 }
 0x17f   : > { %4383 = vmatprep.subr.bf16.mxu0 %v4961_v18 }
 0x180   : > { %4404 = vmatpush3.bf16.msra.mxu1 %v4960_v21 }
 0x181   : > { %4405 = vmatprep.subr.bf16.mxu1 %v4962_v22 }
 0x182   : > { %4384 = vmatpush3.bf16.msra.mxu0 %v4963_v25 }
 0x183   : > { %4413 = vmatprep.subr.bf16.mxu0 %v4965_v28 }
 0x184   : > { %4406 = vmatpush3.bf16.msra.mxu1 %v4964_v29 }
 0x185   : > { %v4121_v37 = vpop.f32.mrf.mxu0  ;;  %3257 = vmatmul.mubr.bf16.vlgmr.msra.gmra.mxu0 %v1150_v27  ;;  %4435 = vmatprep.subr.bf16.mxu1 %v4966_v31 }
 0x186   : > { %4414 = vmatpush3.bf16.msra.mxu0 %v4967_v32  ;;  %3336 = vmatprep.mubr.bf16.mxu0 %v1171_v30  ;;  %v4143_v40 = vpop.f32.mrf.mxu1 }
 0x187   : > { %3297 = vmatmul.mubr.bf16.vlgmr.msra.gmra.mxu1 %v1172_v33  ;;  %v4122_v41 = vpop.f32.mrf.mxu0  ;;  %4415 = vmatprep.subr.bf16.mxu0 %v4969_v34 }
 0x188   : > { %4436 = vmatpush3.bf16.msra.mxu1 %v4968_v35  ;;  %v4123_v44 = vadd.f32 %v4122_v41, %v4121_v37  ;;  %3376 = vmatprep.mubr.bf16.mxu1 %v1175_v36  ;;  %v4144_v46 = vpop.f32.mrf.mxu1 }
 0x189   : > { %v4124_v47 = vpop.f32.mrf.mxu0  ;;  %4437 = vmatprep.subr.bf16.mxu1 %v4970_v38  ;;  %v4145_v49 = vadd.f32 %v4144_v46, %v4143_v40 }
 0x18a   : > { %4416 = vmatpush3.bf16.msra.mxu0 %v4971_v39  ;;  %v4146_v51 = vpop.f32.mrf.mxu1 }
 0x18b   : > { %v4125_v52 = vpop.f32.mrf.mxu0  ;;  %4417 = vmatprep.subr.bf16.mxu0 %v4973_v43  ;;  %v2819_v54 = vadd.f32 %v4145_v49, %v4123_v44 }
 0x18c   : > { %4438 = vmatpush3.bf16.msra.mxu1 %v4972_v45  ;;  %v4147_v56 = vpop.f32.mrf.mxu1 }
 0x18d   : > { %4439 = vmatprep.subr.bf16.mxu1 %v4974_v48 }
 0x18e   : > { %4418 = vmatpush3.bf16.msra.mxu0 %v4975_v50 }
 0x18f   : > { %4419 = vmatprep.subr.bf16.mxu0 %v4977_v53 }
 0x190   : > { %4440 = vmatpush3.bf16.msra.mxu1 %v4976_v55 }
 0x191   : > { %4441 = vmatprep.subr.bf16.mxu1 %v4978_v57 }
 0x192   : > { %4420 = vmatpush3.bf16.msra.mxu0 %v4979_v58 }
 0x193   : > { %4421 = vmatprep.subr.bf16.mxu0 %v4981_v59 }
 0x194   : > { %4442 = vmatpush3.bf16.msra.mxu1 %v4980_v60 }
 0x195   : > { %4443 = vmatprep.subr.bf16.mxu1 %v4982_v61 }
 0x196   : > { %4422 = vmatpush3.bf16.msra.mxu0 %v4983_v62 }
 0x197   : > { %4423 = vmatprep.subr.bf16.mxu0 %v4985_v63 }
 0x198   : > { %4444 = vmatpush3.bf16.msra.mxu1 %v4984_v0 }
 0x199   : > { %4445 = vmatprep.subr.bf16.mxu1 %v4986_v1 }
 0x19a   : > { %4424 = vmatpush3.bf16.msra.mxu0 %v4987_v2 }
 0x19b   : > { %4425 = vmatprep.subr.bf16.mxu0 %v4989_v3 }
 0x19c   : > { %4446 = vmatpush3.bf16.msra.mxu1 %v4988_v4 }
 0x19d   : > { %4447 = vmatprep.subr.bf16.mxu1 %v4990_v5 }
 0x19e   : > { %4426 = vmatpush3.bf16.msra.mxu0 %v4991_v6 }
 0x19f   : > { %4427 = vmatprep.subr.bf16.mxu0 %v4993_v7 }
 0x1a0   : > { %4448 = vmatpush3.bf16.msra.mxu1 %v4992_v8 }
 0x1a1   : > { %4449 = vmatprep.subr.bf16.mxu1 %v4994_v9 }
 0x1a2   : > { %4428 = vmatpush3.bf16.msra.mxu0 %v4995_v10 }
 0x1a4   : > { %4450 = vmatpush3.bf16.msra.mxu1 %v4996_v12 }
 0x1a5   : > { %v4165_v14 = vpop.f32.mrf.mxu0  ;;  %3337 = vmatmul.mubr.bf16.vlgmr.msra.gmra.mxu0 %v1157_v11 }
 0x1a6   : > { %v4187_v15 = vpop.f32.mrf.mxu1 }
 0x1a7   : > { %3377 = vmatmul.mubr.bf16.vlgmr.msra.gmra.mxu1 %v1173_v13  ;;  %v4166_v16 = vpop.f32.mrf.mxu0 }
 0x1a8   : > { %v4167_v17 = vadd.f32 %v4166_v16, %v4165_v14  ;;  %v4188_v18 = vpop.f32.mrf.mxu1 }
 0x1a9   : > { %v4168_v19 = vpop.f32.mrf.mxu0  ;;  %v4189_v22 = vadd.f32 %v4188_v18, %v4187_v15 }
 0x1aa   : > { %v2859_v21 = vadd.f32 %v4167_v17, %v2819_v54  ;;  %v4190_v23 = vpop.f32.mrf.mxu1 }
 0x1ab   : > { %v4169_v24 = vpop.f32.mrf.mxu0 }
 0x1ac   : > { %v2899_v25 = vadd.f32 %v4189_v22, %v2859_v21  ;;  %v4191_v42 = vpop.f32.mrf.mxu1 }
 0x1c5   : > { %v4209_v20 = vpop.f32.mrf.mxu0 }
 0x1c7   : > { %v4231_v26 = vpop.f32.mrf.mxu1  ;;  %v4210_v27 = vpop.f32.mrf.mxu0 }
 0x1c8   : > { %v4211_v28 = vadd.f32 %v4210_v27, %v4209_v20 }
 0x1c9   : > { %v4232_v29 = vpop.f32.mrf.mxu1  ;;  %v4212_v30 = vpop.f32.mrf.mxu0 }
 0x1ca   : > { %v2939_v31 = vadd.f32 %v4211_v28, %v2899_v25  ;;  %v4233_v32 = vadd.f32 %v4232_v29, %v4231_v26  ;;  %v459_v29 = vld [vmem:[#allocation2] sm:$0x3] }
 0x1cb   : > { %v4234_v33 = vpop.f32.mrf.mxu1  ;;  %v4213_v34 = vpop.f32.mrf.mxu0 }
 0x1cc   : > { %v2979_v35 = vadd.f32 %v4233_v32, %v2939_v31 }
 0x1cd   : > { %v4235_v36 = vpop.f32.mrf.mxu1 }
 0x1e5   : > { %v4253_v37 = vpop.f32.mrf.mxu0 }
 0x1e7   : > { %v4275_v38 = vpop.f32.mrf.mxu1  ;;  %v4254_v39 = vpop.f32.mrf.mxu0 }
 0x1e8   : > { %v4255_v40 = vadd.f32 %v4254_v39, %v4253_v37 }
 0x1e9   : > { %v4276_v41 = vpop.f32.mrf.mxu1  ;;  %v4256_v43 = vpop.f32.mrf.mxu0 }
 0x1ea   : > { %v3019_v44 = vadd.f32 %v4255_v40, %v2979_v35  ;;  %v4277_v45 = vadd.f32 %v4276_v41, %v4275_v38 }
 0x1eb   : > { %v4278_v46 = vpop.f32.mrf.mxu1  ;;  %v4257_v47 = vpop.f32.mrf.mxu0 }
 0x1ec   : > { %v3059_v48 = vadd.f32 %v4277_v45, %v3019_v44 }
 0x1ed   : > { %v4279_v49 = vpop.f32.mrf.mxu1 }
 0x205   : > { %v4297_v50 = vpop.f32.mrf.mxu0 }
 0x207   : > { %v4319_v51 = vpop.f32.mrf.mxu1  ;;  %v4298_v52 = vpop.f32.mrf.mxu0 }
 0x208   : > { %v4299_v53 = vadd.f32 %v4298_v52, %v4297_v50 }
 0x209   : > { %v4320_v54 = vpop.f32.mrf.mxu1  ;;  %v4300_v55 = vpop.f32.mrf.mxu0 }
 0x20a   : > { %v3099_v56 = vadd.f32 %v4299_v53, %v3059_v48  ;;  %v4321_v57 = vadd.f32 %v4320_v54, %v4319_v51 }
 0x20b   : > { %v4322_v58 = vpop.f32.mrf.mxu1  ;;  %v4301_v59 = vpop.f32.mrf.mxu0 }
 0x20c   : > { %v3139_v60 = vadd.f32 %v4321_v57, %v3099_v56 }
 0x20d   : > { %v4323_v61 = vpop.f32.mrf.mxu1 }
 0x225   : > { %v4341_v62 = vpop.f32.mrf.mxu0 }
 0x227   : > { %v4363_v63 = vpop.f32.mrf.mxu1  ;;  %v4342_v0 = vpop.f32.mrf.mxu0 }
 0x228   : > { %v4343_v14 = vadd.f32 %v4342_v0, %v4341_v62 }
 0x229   : > { %v4364_v1 = vpop.f32.mrf.mxu1  ;;  %v4344_v2 = vpop.f32.mrf.mxu0 }
 0x22a   : > { %v3179_v15 = vadd.f32 %v4343_v14, %v3139_v60  ;;  %v4365_v16 = vadd.f32 %v4364_v1, %v4363_v63 }
 0x22b   : > { %v4366_v3 = vpop.f32.mrf.mxu1  ;;  %v4345_v4 = vpop.f32.mrf.mxu0 }
 0x22c   : > { %v3219_v18 = vadd.f32 %v4365_v16, %v3179_v15 }
 0x22d   : > { %v4367_v5 = vpop.f32.mrf.mxu1 }
 0x245   : > { %v4385_v6 = vpop.f32.mrf.mxu0 }
 0x247   : > { %v4407_v7 = vpop.f32.mrf.mxu1  ;;  %v4386_v8 = vpop.f32.mrf.mxu0 }
 0x248   : > { %v4387_v17 = vadd.f32 %v4386_v8, %v4385_v6 }
 0x249   : > { %v4408_v9 = vpop.f32.mrf.mxu1  ;;  %v4388_v10 = vpop.f32.mrf.mxu0 }
 0x24a   : > { %v3259_v19 = vadd.f32 %v4387_v17, %v3219_v18  ;;  %v4409_v21 = vadd.f32 %v4408_v9, %v4407_v7 }
 0x24b   : > { %v4410_v11 = vpop.f32.mrf.mxu1  ;;  %v4389_v12 = vpop.f32.mrf.mxu0 }
 0x24c   : > { %v3299_v25 = vadd.f32 %v4409_v21, %v3259_v19 }
 0x24d   : > { %v4411_v13 = vpop.f32.mrf.mxu1 }
 0x265   : > { %v4429_v22 = vpop.f32.mrf.mxu0 }
 0x267   : > { %v4451_v23 = vpop.f32.mrf.mxu1  ;;  %v4430_v24 = vpop.f32.mrf.mxu0 }
 0x268   : > { %v4431_v42 = vadd.f32 %v4430_v24, %v4429_v22 }
 0x269   : > { %v4452_v20 = vpop.f32.mrf.mxu1  ;;  %v4432_v26 = vpop.f32.mrf.mxu0 }
 0x26a   : > { %v3339_v27 = vadd.f32 %v4431_v42, %v3299_v25  ;;  %v4453_v28 = vadd.f32 %v4452_v20, %v4451_v23 }
 0x26b   : > { %v4454_v30 = vpop.f32.mrf.mxu1  ;;  %v4433_v31 = vpop.f32.mrf.mxu0 }
 0x26c   : > { %v3379_v32 = vadd.f32 %v4453_v28, %v3339_v27  ;;  %3389 = sbr.rel (%p4095_p0) target bundleno = 1248 (0x4e0), region = 96 }
 0x26d   : > { %v4455_v33 = vpop.f32.mrf.mxu1 }
 0x26e   : > { %v3384_v34 = vadd.f32 %v3379_v32, %v459_v29 }
 0x270   : > { %3385 = vst [vmem:[#allocation2] sm:$0x3] %v3384_v34 }
 0x271   : > { %v3415_v35 = vld [vmem:[#allocation8 + $0x78] sm:$0xff]  ;;  %v5302_v36 = vmov 0.0   ;;  %v3414_v37 = vld [vmem:[#allocation8 + $0x70] sm:$0xff]  ;;  %vm5303_vm0 = vmmov 0   ;;  %v3413_v38 = vld [vmem:[#allocation8 + $0x68] sm:$0xff] }
 0x272   : > { %4508 = vmatprep.subr.mxu0 %v5302_v36  ;;  %4540 = vmatprep.mubr.msk.f32.mxu0 %vm5303_vm0, %v5302_v36  ;;  %v3412_v39 = vld [vmem:[#allocation8 + $0x60] sm:$0xff]  ;;  %v3508_v41 = vld [vmem:[#allocation11 + $0x70] sm:$0xff]  ;;  %v3507_v44 = vld [vmem:[#allocation11 + $0x68] sm:$0xff] }
 0x273   : > { %4509 = vmatpush3.msra.mxu0 %v3415_v35  ;;  %4543 = vmatprep.subr.mxu1 %v5302_v36  ;;  %v3509_v40 = vld [vmem:[#allocation11 + $0x78] sm:$0xff]  ;;  %v3410_v45 = vld [vmem:[#allocation8 + $0x50] sm:$0xff]  ;;  %v3506_v46 = vld [vmem:[#allocation11 + $0x60] sm:$0xff] }
 0x274   : > { %4510 = vmatprep.subr.mxu0 %v5302_v36  ;;  %4575 = vmatprep.mubr.msk.f32.mxu1 %vm5303_vm0, %v5302_v36  ;;  %v3411_v43 = vld [vmem:[#allocation8 + $0x58] sm:$0xff]  ;;  %v3409_v47 = vld [vmem:[#allocation8 + $0x48] sm:$0xff]  ;;  %v3408_v49 = vld [vmem:[#allocation8 + $0x40] sm:$0xff] }
 0x275   : > { %4511 = vmatpush3.msra.mxu0 %v3414_v37  ;;  %4544 = vmatpush3.msra.mxu1 %v3509_v40  ;;  %v3505_v48 = vld [vmem:[#allocation11 + $0x58] sm:$0xff]  ;;  %v3504_v50 = vld [vmem:[#allocation11 + $0x50] sm:$0xff]  ;;  %v3503_v52 = vld [vmem:[#allocation11 + $0x48] sm:$0xff] }
 0x276   : > { %4512 = vmatprep.subr.mxu0 %v5302_v36  ;;  %4545 = vmatprep.subr.mxu1 %v5302_v36  ;;  %v3407_v51 = vld [vmem:[#allocation8 + $0x38] sm:$0xff]  ;;  %v3406_v53 = vld [vmem:[#allocation8 + $0x30] sm:$0xff]  ;;  %v3502_v54 = vld [vmem:[#allocation11 + $0x40] sm:$0xff] }
 0x277   : > { %4513 = vmatpush3.msra.mxu0 %v3413_v38  ;;  %4546 = vmatpush3.msra.mxu1 %v3508_v41  ;;  %v3405_v55 = vld [vmem:[#allocation8 + $0x28] sm:$0xff]  ;;  %v3501_v56 = vld [vmem:[#allocation11 + $0x38] sm:$0xff]  ;;  %v3500_v60 = vld [vmem:[#allocation11 + $0x30] sm:$0xff] }
 0x278   : > { %4514 = vmatprep.subr.mxu0 %v5302_v36  ;;  %4547 = vmatprep.subr.mxu1 %v5302_v36  ;;  %v3404_v57 = vld [vmem:[#allocation8 + $0x20] sm:$0xff]  ;;  %v3390_v58 = vld [vmem:[#allocation2] sm:$0x3]  ;;  %v4096_v59 = vld [vmem:[#allocation6] ss:$0 sm:$0xff] }
 0x279   : > { %4515 = vmatpush3.msra.mxu0 %v3412_v39  ;;  %4548 = vmatpush3.msra.mxu1 %v3507_v44  ;;  %v3403_v61 = vld [vmem:[#allocation8 + $0x18] sm:$0xff]  ;;  %v3499_v62 = vld [vmem:[#allocation11 + $0x28] sm:$0xff]  ;;  %v3398_v0 = vadd.f32 %v4096_v59, %v3390_v58  ;;  %v3498_v1 = vld [vmem:[#allocation11 + $0x20] sm:$0xff] }
 0x27a   : > { %4516 = vmatprep.subr.mxu0 %v5302_v36  ;;  %4549 = vmatprep.subr.mxu1 %v5302_v36  ;;  %v3402_v63 = vld [vmem:[#allocation8 + $0x10] sm:$0xff]  ;;  %v3401_v2 = vld [vmem:[#allocation8 + $0x8] sm:$0xff]  ;;  %v3497_v3 = vld [vmem:[#allocation11 + $0x18] sm:$0xff] }
 0x27b   : > { %4517 = vmatpush3.msra.mxu0 %v3411_v43  ;;  %4550 = vmatpush3.msra.mxu1 %v3506_v46  ;;  %v3400_v4 = vld [vmem:[#allocation8] sm:$0xff]  ;;  %v3399_v5 = vmax.f32 %v3398_v0, 0.0  ;;  %v3496_v6 = vld [vmem:[#allocation11 + $0x10] sm:$0xff]  ;;  %v3495_v7 = vld [vmem:[#allocation11 + $0x8] sm:$0xff] }
 0x27c   : > { %4518 = vmatprep.subr.mxu0 %v5302_v36  ;;  %4551 = vmatprep.subr.mxu1 %v5302_v36  ;;  %v3494_v8 = vld [vmem:[#allocation11] sm:$0xff]  ;;  %v3602_v10 = vld [vmem:[#allocation14 + $0x70] sm:$0xff]  ;;  %v3601_v11 = vld [vmem:[#allocation14 + $0x68] sm:$0xff] }
 0x27d   : > { %4519 = vmatpush3.msra.mxu0 %v3410_v45  ;;  %4552 = vmatpush3.msra.mxu1 %v3505_v48  ;;  %v3603_v9 = vld [vmem:[#allocation14 + $0x78] sm:$0xff]  ;;  %v3600_v12 = vld [vmem:[#allocation14 + $0x60] sm:$0xff]  ;;  %v3598_v14 = vld [vmem:[#allocation14 + $0x50] sm:$0xff] }
 0x27e   : > { %4520 = vmatprep.subr.mxu0 %v5302_v36  ;;  %4553 = vmatprep.subr.mxu1 %v5302_v36  ;;  %v3599_v13 = vld [vmem:[#allocation14 + $0x58] sm:$0xff]  ;;  %v3597_v15 = vld [vmem:[#allocation14 + $0x48] sm:$0xff]  ;;  %v3596_v16 = vld [vmem:[#allocation14 + $0x40] sm:$0xff] }
 0x27f   : > { %4521 = vmatpush3.msra.mxu0 %v3409_v47  ;;  %4554 = vmatpush3.msra.mxu1 %v3504_v50  ;;  %v3595_v17 = vld [vmem:[#allocation14 + $0x38] sm:$0xff]  ;;  %v3594_v18 = vld [vmem:[#allocation14 + $0x30] sm:$0xff]  ;;  %v3593_v19 = vld [vmem:[#allocation14 + $0x28] sm:$0xff] }
 0x280   : > { %4522 = vmatprep.subr.mxu0 %v5302_v36  ;;  %4555 = vmatprep.subr.mxu1 %v5302_v36  ;;  %v3592_v21 = vld [vmem:[#allocation14 + $0x20] sm:$0xff]  ;;  %v3591_v22 = vld [vmem:[#allocation14 + $0x18] sm:$0xff]  ;;  %v3590_v26 = vld [vmem:[#allocation14 + $0x10] sm:$0xff] }
 0x281   : > { %4523 = vmatpush3.msra.mxu0 %v3408_v49  ;;  %4556 = vmatpush3.msra.mxu1 %v3503_v52  ;;  %v4097_v23 = vld [vmem:[#allocation9] ss:$0 sm:$0xff]  ;;  %v3589_v27 = vld [vmem:[#allocation14 + $0x8] sm:$0xff]  ;;  %v3588_v28 = vld [vmem:[#allocation14] sm:$0xff] }
 0x282   : > { %4524 = vmatprep.subr.mxu0 %v5302_v36  ;;  %4557 = vmatprep.subr.mxu1 %v5302_v36  ;;  %v4098_v29 = vld [vmem:[#allocation12] ss:$0 sm:$0xff]  ;;  %v4099_v34 = vld [vmem:[#allocation15] ss:$0 sm:$0xff] }
 0x283   : > { %4525 = vmatpush3.msra.mxu0 %v3407_v51  ;;  %4558 = vmatpush3.msra.mxu1 %v3502_v54 }
 0x284   : > { %4526 = vmatprep.subr.mxu0 %v5302_v36  ;;  %4559 = vmatprep.subr.mxu1 %v5302_v36 }
 0x285   : > { %4527 = vmatpush3.msra.mxu0 %v3406_v53  ;;  %4560 = vmatpush3.msra.mxu1 %v3501_v56 }
 0x286   : > { %4528 = vmatprep.subr.mxu0 %v5302_v36  ;;  %4561 = vmatprep.subr.mxu1 %v5302_v36 }
 0x287   : > { %4529 = vmatpush3.msra.mxu0 %v3405_v55  ;;  %4562 = vmatpush3.msra.mxu1 %v3500_v60 }
 0x288   : > { %4530 = vmatprep.subr.mxu0 %v5302_v36  ;;  %4563 = vmatprep.subr.mxu1 %v5302_v36 }
 0x289   : > { %4531 = vmatpush3.msra.mxu0 %v3404_v57  ;;  %4564 = vmatpush3.msra.mxu1 %v3499_v62 }
 0x28a   : > { %4532 = vmatprep.subr.mxu0 %v5302_v36  ;;  %4565 = vmatprep.subr.mxu1 %v5302_v36 }
 0x28b   : > { %4533 = vmatpush3.msra.mxu0 %v3403_v61  ;;  %4566 = vmatpush3.msra.mxu1 %v3498_v1 }
 0x28c   : > { %4534 = vmatprep.subr.mxu0 %v5302_v36  ;;  %4567 = vmatprep.subr.mxu1 %v5302_v36 }
 0x28d   : > { %4535 = vmatpush3.msra.mxu0 %v3402_v63  ;;  %4568 = vmatpush3.msra.mxu1 %v3497_v3 }
 0x28e   : > { %4536 = vmatprep.subr.mxu0 %v5302_v36  ;;  %4569 = vmatprep.subr.mxu1 %v5302_v36 }
 0x28f   : > { %4537 = vmatpush3.msra.mxu0 %v3401_v2  ;;  %4570 = vmatpush3.msra.mxu1 %v3496_v6 }
 0x290   : > { %4538 = vmatprep.subr.mxu0 %v5302_v36  ;;  %4571 = vmatprep.subr.mxu1 %v5302_v36 }
 0x291   : > { %4539 = vmatpush3.msra.mxu0 %v3400_v4  ;;  %4572 = vmatpush3.msra.mxu1 %v3495_v7 }
 0x292   : > { %4541 = vmatmul.mubr.f32.vlgmr.msra.gmra.mxu0 %v3399_v5  ;;  %4578 = vmatprep.subr.mxu0 %v5302_v36 }
 0x293   : > { %4610 = vmatprep.mubr.msk.f32.mxu0 %vm5303_vm0, %v5302_v36  ;;  %4573 = vmatprep.subr.mxu1 %v5302_v36 }
 0x294   : > { %4574 = vmatpush3.msra.mxu1 %v3494_v8  ;;  %4579 = vmatpush3.msra.mxu0 %v3603_v9 }
 0x295   : > { %4580 = vmatprep.subr.mxu0 %v5302_v36 }
 0x296   : > { %4581 = vmatpush3.msra.mxu0 %v3602_v10 }
 0x297   : > { %4582 = vmatprep.subr.mxu0 %v5302_v36 }
 0x298   : > { %4583 = vmatpush3.msra.mxu0 %v3601_v11 }
 0x299   : > { %4584 = vmatprep.subr.mxu0 %v5302_v36 }
 0x29a   : > { %4585 = vmatpush3.msra.mxu0 %v3600_v12 }
 0x29b   : > { %4586 = vmatprep.subr.mxu0 %v5302_v36 }
 0x29c   : > { %4587 = vmatpush3.msra.mxu0 %v3599_v13 }
 0x29d   : > { %4588 = vmatprep.subr.mxu0 %v5302_v36 }
 0x29e   : > { %4589 = vmatpush3.msra.mxu0 %v3598_v14 }
 0x29f   : > { %4590 = vmatprep.subr.mxu0 %v5302_v36 }
 0x2a0   : > { %4591 = vmatpush3.msra.mxu0 %v3597_v15 }
 0x2a1   : > { %4592 = vmatprep.subr.mxu0 %v5302_v36 }
 0x2a2   : > { %4593 = vmatpush3.msra.mxu0 %v3596_v16 }
 0x2a3   : > { %4594 = vmatprep.subr.mxu0 %v5302_v36 }
 0x2a4   : > { %4595 = vmatpush3.msra.mxu0 %v3595_v17 }
 0x2a5   : > { %4596 = vmatprep.subr.mxu0 %v5302_v36 }
 0x2a6   : > { %4597 = vmatpush3.msra.mxu0 %v3594_v18 }
 0x2a7   : > { %4598 = vmatprep.subr.mxu0 %v5302_v36 }
 0x2a8   : > { %4599 = vmatpush3.msra.mxu0 %v3593_v19 }
 0x2a9   : > { %4600 = vmatprep.subr.mxu0 %v5302_v36 }
 0x2aa   : > { %4601 = vmatpush3.msra.mxu0 %v3592_v21 }
 0x2ab   : > { %4602 = vmatprep.subr.mxu0 %v5302_v36 }
 0x2ac   : > { %4603 = vmatpush3.msra.mxu0 %v3591_v22 }
 0x2ad   : > { %4604 = vmatprep.subr.mxu0 %v5302_v36 }
 0x2ae   : > { %4605 = vmatpush3.msra.mxu0 %v3590_v26 }
 0x2af   : > { %4606 = vmatprep.subr.mxu0 %v5302_v36 }
 0x2b0   : > { %4607 = vmatpush3.msra.mxu0 %v3589_v27 }
 0x2b1   : > { %4608 = vmatprep.subr.mxu0 %v5302_v36 }
 0x2b2   : > { %4609 = vmatpush3.msra.mxu0 %v3588_v28 }
 0x352   : > { %v3489_v24 = vpop.f32.mrf.mxu0 }
 0x353   : > { %v3490_v25 = vadd.f32 %v4097_v23, %v3489_v24 }
 0x354   : > { %v4542_v42 = vpop.f32.mrf.mxu0 }
 0x355   : > { %v3493_v20 = vmax.f32 %v3490_v25, 0.0 }
 0x357   : > { %4576 = vmatmul.mubr.f32.vlgmr.msra.gmra.mxu1 %v3493_v20 }
 0x417   : > { %v3583_v30 = vpop.f32.mrf.mxu1 }
 0x418   : > { %v3584_v31 = vadd.f32 %v4098_v29, %v3583_v30 }
 0x419   : > { %v4577_v32 = vpop.f32.mrf.mxu1 }
 0x41a   : > { %v3587_v33 = vmax.f32 %v3584_v31, 0.0 }
 0x41c   : > { %4611 = vmatmul.mubr.f32.vlgmr.msra.gmra.mxu0 %v3587_v33 }
 0x4dc   : > { %v3677_v35 = vpop.f32.mrf.mxu0 }
 0x4dd   : > { %v3678_v37 = vadd.f32 %v4099_v34, %v3677_v35 }
 0x4de   : > { %v4612_v38 = vpop.f32.mrf.mxu0 }
 0x4df   : > { %3681 = vst [vmem:[#allocation17] sm:$0x3] %v3678_v37 }
 0x4e0 PF: > { %p4688_p2 = scmp.eq.s32.totalorder %s5376_s15, 3  ;;  %s5304_s19 = smov [#allocation17]  }
 0x4e1   : > { %s3689_s22 = sshll.u32 %s5304_s19, 4  ;;  %s3690_s22 = int_to_ptr.vmem [resolvable:$true] %s3689_s22 }
 0x4e2   : > { %s5208_s25 = scalar_lea.vmem %s3690_s22, 32  ;;  %p5215_p12 = scmp.lt.s32.totalorder %s3690_s22, %s3690_s22 }
 0x4e3   : > { %p5209_p5 = scmp.ne.s32.totalorder %s3690_s22, %s5208_s25  ;;  %p5216_p6 = scmp.lt.s32.totalorder %s5208_s25, %s5208_s25 }
 0x4e5   : > { %p5210_p1 = pnand %p5209_p5, %p4688_p2  ;;  %p5217_p3 = por %p5216_p6, %p5215_p12 }
 0x4e7   : > { %p5211_p4 = pneg %p5210_p1 }
 0x4e9   : > { %p5218_p7 = pnand %p5217_p3, %p5211_p4 }
 0x4eb   : > { %5221 = shalt.err (!%p5218_p7)
}
 0x4ec   : > { %4644 = dma.vmem_to_hbm [thread:$0]  (%p4688_p2), %s3690_s22, 32, %s5960_s9, [#allocation5]  }
 0x4ed   : > { %5269 = dma.done.wait (%p4688_p2), [#allocation5], 32  }
 0x4ee   : > { %5271 = vsyncadd (%p4688_p2), [#allocation5], 4294967264 }
 0x4ef PF: > { %p24_p8 = scmp.ge.s32.totalorder %s5478_s24, 6   ;;  %s5980_s30 = smov %s5278_s10 }
 0x4f0   : > { %s5981_s10 = smov %s5282_s11  ;;  %s5982_s11 = smov %s5489_s28 }
 0x4f1   : > { %s5983_s12 = smov %s5478_s24  ;;  %26 = sbr.rel (!%p24_p8) target bundleno = 8 (0x8), region = 132 }
 0x4f6   :  { %3702 = vsyncpa [#allocation4], 1 }
 0x4f7   :  { %3704 = vsyncpa [#allocation4 + $0x1], 1 }
 0x4f8   :  { %3705 = vsyncpa [#allocation7], 1 }
 0x4f9   :  { %3706 = vsyncpa [#allocation10], 1 }
 0x4fa   :  { %3707 = vsyncpa [#allocation13], 1 }
 0x4fb   :  { %3708 = vsyncpa [#allocation16], 1 }
 0x4fc   :  { %3709 = vsyncpa [#allocation5], 1 }
 0x4fd   :  { %3711 = vsyncpa [#allocation5 + $0x1], 1 }

// kernel: convo_nn_forward.2
= control target key start
LH: loop header
LB: loop body
LE: loop exit
PB: predicated region body
PF: predicated region fallthrough
CT: control target
= control target key end

     0   :  { %12 = vsyncpa [#allocation5], 0  ;;  %s11311_s0 = inlined_call_operand.vmem [shape: f32[2,16,16,4], index: 0, kind: input, shape index: {}]   ;;  %s11312_s1 = inlined_call_operand.vmem [shape: f32[40,32], index: 1, kind: input, shape index: {}]   ;;  %s11313_s2 = inlined_call_operand.hbm [shape: f32[1,32], index: 2, kind: input, shape index: {}]   ;;  %s11314_s3 = inlined_call_operand.vmem [shape: f32[288,64], index: 3, kind: input, shape index: {}]   ;;  %s11315_s4 = inlined_call_operand.hbm [shape: f32[1,64], index: 4, kind: input, shape index: {}]   ;;  %s11316_s5 = inlined_call_operand.vmem [shape: f32[576,64], index: 5, kind: input, shape index: {}]   ;;  %s11317_s6 = inlined_call_operand.hbm [shape: f32[1,64], index: 6, kind: input, shape index: {}]   ;;  %s11318_s7 = inlined_call_operand.vmem [shape: bf16[2,16,16,64], index: 7, kind: output, shape index: {}]  }
   0x1   :  { %13 = vsyncpa [#allocation7], 0  ;;  %s7667_s24 = smov 0  }
   0x2 LB: > { %s7673_s25 = sadd.s32 4294967295, %s7611_s24   ;;  %p6978_p0 = scmp.ge.s32.totalorder %s7611_s24, 1  ;;  %s7611_s24 = sphi %s7667_s24, %s19_s24  }
   0x3   : > { %p202_p1 = scmp.lt.s32.totalorder %s7611_s24, 3  ;;  %p11319_p2 = scmp.eq.s32.totalorder %s7673_s25, 0 }
   0x4   : > { %s7613_s27 = smov [#allocation6]   ;;  %s7614_s29 = smov [#allocation4]  }
   0x5   : > { %p7678_p3 = pnand %p6978_p0, %p202_p1  ;;  %s232_s28 = sshll.u32 %s7613_s27, 4  ;;  %s233_s28 = int_to_ptr.vmem [resolvable:$true] %s232_s28 }
   0x6   : > { %s218_s30 = sshll.u32 %s7614_s29, 4  ;;  %s7615_s8 = smov [#allocation8]   ;;  %s219_s30 = int_to_ptr.vmem [resolvable:$true] %s218_s30 }
   0x7   : > { %p7477_p4 = pneg %p7678_p3  ;;  %s246_s9 = sshll.u32 %s7615_s8, 4  ;;  %s7690_s9 = int_to_ptr.vmem [resolvable:$true] %s246_s9 }
   0x8   : > { %s7530_s11 = scalar_lea.vmem %s233_s28, 16  ;;  %s7537_s12 = scalar_lea.vmem %s233_s28, 32 }
   0x9   : > { %p7686_p5 = pnand %p11319_p2, %p7477_p4  ;;  %p7531_p7 = scmp.ne.s32.totalorder %s233_s28, %s7530_s11 }
   0xa   : > { %p7538_p10 = scmp.lt.s32.totalorder %s233_s28, %s233_s28  ;;  %p7539_p11 = scmp.lt.s32.totalorder %s7537_s12, %s7530_s11 }
   0xb   : > { %p7521_p6 = pneg %p7686_p5 }
   0xc   : > { %p7540_p12 = por %p7539_p11, %p7538_p10 }
   0xd   : > { %p7533_p8 = pnand %p7531_p7, %p7521_p6 }
   0xf   : > { %p7534_p9 = pneg %p7533_p8 }
  0x11   : > { %p7541_p13 = pnand %p7540_p12, %p7534_p9 }
  0x13   : > { %7544 = shalt.err (!%p7541_p13)
}
  0x14   : > { %7483 = dma.hbm_to_vmem [thread:$0]  (!%p7686_p5), %s11315_s4, 16, %s233_s28, [#allocation7]  }
  0x15   : > { %s7556_s15 = scalar_lea.vmem %s219_s30, 16  ;;  %s7563_s16 = scalar_lea.vmem %s219_s30, 32 }
  0x16   : > { %p7557_p0 = scmp.ne.s32.totalorder %s219_s30, %s7556_s15  ;;  %p7564_p7 = scmp.lt.s32.totalorder %s219_s30, %s219_s30 }
  0x17   : > { %p7565_p8 = scmp.lt.s32.totalorder %s7563_s16, %s7556_s15 }
  0x18   : > { %p7559_p1 = pnand %p7557_p0, %p7521_p6 }
  0x19   : > { %p7566_p2 = por %p7565_p8, %p7564_p7 }
  0x1a   : > { %p7560_p4 = pneg %p7559_p1 }
  0x1c   : > { %p7567_p10 = pnand %p7566_p2, %p7560_p4 }
  0x1e   : > { %7570 = shalt.err (!%p7567_p10)
}
  0x1f   : > { %7480 = dma.hbm_to_vmem [thread:$0]  (!%p7686_p5), %s11313_s2, 16, %s219_s30, [#allocation5]  }
  0x20   : > { %s7582_s19 = scalar_lea.vmem %s7690_s9, 16  ;;  %s7589_s20 = scalar_lea.vmem %s7690_s9, 32 }
  0x21   : > { %p7583_p9 = scmp.ne.s32.totalorder %s7690_s9, %s7582_s19  ;;  %p7590_p2 = scmp.lt.s32.totalorder %s7690_s9, %s7690_s9 }
  0x22   : > { %p7591_p13 = scmp.lt.s32.totalorder %s7589_s20, %s7582_s19 }
  0x23   : > { %p7585_p11 = pnand %p7583_p9, %p7521_p6 }
  0x24   : > { %p7592_p0 = por %p7591_p13, %p7590_p2 }
  0x25   : > { %p7586_p12 = pneg %p7585_p11 }
  0x27   : > { %p7593_p1 = pnand %p7592_p0, %p7586_p12 }
  0x29   : > { %7596 = shalt.err (!%p7593_p1)
}
  0x2a   : > { %7486 = dma.hbm_to_vmem [thread:$0]  (!%p7686_p5), %s11317_s6, 16, %s7690_s9, [#allocation7]  }
  0x2b   : > { %267 = sbr.rel (%p7678_p3) target bundleno = 1696 (0x6a0), region = 48  ;;  %p11322_p6 = scmp.eq.s32.totalorder (!%p7678_p3), %s7673_s25, 0 }
  0x30   : > { %7602 = dma.done.wait (%p11322_p6), [#allocation5], 16   ;;  %p11323_p4 = pmov %p11322_p6 }
  0x32   : > { %7604 = vsyncadd (%p11323_p4), [#allocation5], 4294967280  ;;  %p11324_p7 = pmov %p11323_p4 }
  0x33   : > { %p11325_p8 = pmov %p11323_p4 }
  0x34   : > { %7606 = dma.done.wait (%p11324_p7), [#allocation7], 32  }
  0x35   : > { %7608 = vsyncadd (%p11325_p8), [#allocation7], 4294967264  ;;  %vm317_vm0 = vcmask 523264   ;;  %vm320_vm1 = vcmask 517120   ;;  %v7616_v0 = vmov 0.0   ;;  %p307_p3 = scmp.lt.s32.totalorder %s7673_s25, 1 }
  0x36   : > { %318 = vst.msk [vmem:[#allocation2 + $0x7] sm:$0xff] %vm317_vm0, %v7616_v0  ;;  %319 = vst.msk [vmem:[#allocation2 + $0xf] sm:$0xff] %vm317_vm0, %v7616_v0  ;;  %vm326_vm2 = vcmask 516096   ;;  %4084 = vmatprep.subr.mxu1 %v7616_v0  ;;  %vm396_vm3 = vcmask 31744   ;;  %s7617_s29 = smov 4   ;;  %s7618_s30 = smov 8  }
  0x37   : > { %323 = vst.msk [vmem:[#allocation2 + $0x227] sm:$0xff] %vm317_vm0, %v7616_v0  ;;  %324 = vst.msk [vmem:[#allocation2 + $0x22f] sm:$0xff] %vm317_vm0, %v7616_v0  ;;  %s11327_s25 = smov (!%p307_p3, %s7673_s25), 1  ;;  %vm653_vm4 = vcmask 64544   ;;  %s7619_s8 = smov 12   ;;  %vm846_vm5 = vcmask 97344  }
  0x38   : > { %321 = vst.msk [vmem:[#allocation2 + $0x17] sm:$0x3] %vm320_vm1, %v7616_v0  ;;  %325 = vst.msk [vmem:[#allocation2 + $0x237] sm:$0x3] %vm320_vm1, %v7616_v0  ;;  %s7124_s23 = sshll.u32 %s11327_s25, 8  ;;  %s7620_s9 = smov 16  }
  0x39   : > { %345 = vst.msk [vmem:[#allocation2 + $0x18] sm:$0x1] %vm326_vm2, %v7616_v0  ;;  %327 = vst.msk [vmem:[#allocation2 + $0x7] sm:$0x1] %vm326_vm2, %v7616_v0  ;;  %s7827_s28 = scalar_lea.vmem %s11311_s0, %s7124_s23  ;;  %s7621_s10 = smov 20   ;;  %vm1039_vm6 = vcmask 130144  }
  0x3a   : > { %328 = vst.msk [vmem:[#allocation2 + $0x27] sm:$0x1] %vm326_vm2, %v7616_v0  ;;  %329 = vst.msk [vmem:[#allocation2 + $0x47] sm:$0x1] %vm326_vm2, %v7616_v0  ;;  %v363_v1 = vld [vmem:[%s7827_s28] sm:$0xff]  ;;  %v365_v2 = vld [vmem:[%s7827_s28 + $0x10] sm:$0xff] }
  0x3b   : > { %330 = vst.msk [vmem:[#allocation2 + $0x67] sm:$0x1] %vm326_vm2, %v7616_v0  ;;  %331 = vst.msk [vmem:[#allocation2 + $0x87] sm:$0x1] %vm326_vm2, %v7616_v0  ;;  %v364_v3 = vld [vmem:[%s7827_s28 + $0x8] sm:$0xff]  ;;  %v367_v6 = vld [vmem:[%s7827_s28 + $0x20] sm:$0xff] }
  0x3c   : > { %332 = vst.msk [vmem:[#allocation2 + $0xa7] sm:$0x1] %vm326_vm2, %v7616_v0  ;;  %333 = vst.msk [vmem:[#allocation2 + $0xc7] sm:$0x1] %vm326_vm2, %v7616_v0  ;;  %v366_v7 = vld [vmem:[%s7827_s28 + $0x18] sm:$0xff]  ;;  %v369_v8 = vld [vmem:[%s7827_s28 + $0x30] sm:$0xff] }
  0x3d   : > { %334 = vst.msk [vmem:[#allocation2 + $0xe7] sm:$0x1] %vm326_vm2, %v7616_v0  ;;  %335 = vst.msk [vmem:[#allocation2 + $0x107] sm:$0x1] %vm326_vm2, %v7616_v0  ;;  %v493_v4 = vld [vmem:[#allocation2 + $0x8] sm:$0xff]  ;;  %v371_v10 = vld [vmem:[%s7827_s28 + $0x40] sm:$0xff] }
  0x3e   : > { %336 = vst.msk [vmem:[#allocation2 + $0x127] sm:$0x1] %vm326_vm2, %v7616_v0  ;;  %337 = vst.msk [vmem:[#allocation2 + $0x147] sm:$0x1] %vm326_vm2, %v7616_v0  ;;  %557 = vrot.lane.b32.xlu0 %v493_v4, %s7617_s29  ;;  %v368_v9 = vld [vmem:[%s7827_s28 + $0x28] sm:$0xff]  ;;  %v370_v11 = vld [vmem:[%s7827_s28 + $0x38] sm:$0xff] }
  0x3f   : > { %338 = vst.msk [vmem:[#allocation2 + $0x167] sm:$0x1] %vm326_vm2, %v7616_v0  ;;  %339 = vst.msk [vmem:[#allocation2 + $0x187] sm:$0x1] %vm326_vm2, %v7616_v0  ;;  %v494_v5 = vld [vmem:[#allocation2 + $0x10] sm:$0xff]  ;;  %v372_v13 = vld [vmem:[%s7827_s28 + $0x48] sm:$0xff] }
  0x40   : > { %340 = vst.msk [vmem:[#allocation2 + $0x1a7] sm:$0x1] %vm326_vm2, %v7616_v0  ;;  %341 = vst.msk [vmem:[#allocation2 + $0x1c7] sm:$0x1] %vm326_vm2, %v7616_v0  ;;  %v373_v12 = vld [vmem:[%s7827_s28 + $0x50] sm:$0xff]  ;;  %v375_v14 = vld [vmem:[%s7827_s28 + $0x60] sm:$0xff] }
  0x41   : > { %342 = vst.msk [vmem:[#allocation2 + $0x1e7] sm:$0x1] %vm326_vm2, %v7616_v0  ;;  %343 = vst.msk [vmem:[#allocation2 + $0x207] sm:$0x1] %vm326_vm2, %v7616_v0  ;;  %v374_v15 = vld [vmem:[%s7827_s28 + $0x58] sm:$0xff]  ;;  %v377_v16 = vld [vmem:[%s7827_s28 + $0x70] sm:$0xff] }
  0x42   : > { %344 = vst.msk [vmem:[#allocation2 + $0x227] sm:$0x1] %vm326_vm2, %v7616_v0  ;;  %346 = vst.msk [vmem:[#allocation2 + $0x38] sm:$0x1] %vm326_vm2, %v7616_v0  ;;  %v376_v17 = vld [vmem:[%s7827_s28 + $0x68] sm:$0xff]  ;;  %v379_v18 = vld [vmem:[%s7827_s28 + $0x80] sm:$0xff]  ;;  %559 = vrot.lane.b32.xlu0 %v494_v5, %s7617_s29 }
  0x43   : > { %347 = vst.msk [vmem:[#allocation2 + $0x58] sm:$0x1] %vm326_vm2, %v7616_v0  ;;  %348 = vst.msk [vmem:[#allocation2 + $0x78] sm:$0x1] %vm326_vm2, %v7616_v0  ;;  %v378_v19 = vld [vmem:[%s7827_s28 + $0x78] sm:$0xff]  ;;  %v381_v20 = vld [vmem:[%s7827_s28 + $0x90] sm:$0xff] }
  0x44   : > { %349 = vst.msk [vmem:[#allocation2 + $0x98] sm:$0x1] %vm326_vm2, %v7616_v0  ;;  %350 = vst.msk [vmem:[#allocation2 + $0xb8] sm:$0x1] %vm326_vm2, %v7616_v0  ;;  %v380_v21 = vld [vmem:[%s7827_s28 + $0x88] sm:$0xff]  ;;  %v383_v22 = vld [vmem:[%s7827_s28 + $0xa0] sm:$0xff] }
  0x45   : > { %351 = vst.msk [vmem:[#allocation2 + $0xd8] sm:$0x1] %vm326_vm2, %v7616_v0  ;;  %352 = vst.msk [vmem:[#allocation2 + $0xf8] sm:$0x1] %vm326_vm2, %v7616_v0  ;;  %v382_v23 = vld [vmem:[%s7827_s28 + $0x98] sm:$0xff]  ;;  %v385_v24 = vld [vmem:[%s7827_s28 + $0xb0] sm:$0xff] }
  0x46   : > { %353 = vst.msk [vmem:[#allocation2 + $0x118] sm:$0x1] %vm326_vm2, %v7616_v0  ;;  %354 = vst.msk [vmem:[#allocation2 + $0x138] sm:$0x1] %vm326_vm2, %v7616_v0  ;;  %v384_v27 = vld [vmem:[%s7827_s28 + $0xa8] sm:$0xff]  ;;  %v387_v28 = vld [vmem:[%s7827_s28 + $0xc0] sm:$0xff] }
  0x47   : > { %355 = vst.msk [vmem:[#allocation2 + $0x158] sm:$0x1] %vm326_vm2, %v7616_v0  ;;  %356 = vst.msk [vmem:[#allocation2 + $0x178] sm:$0x1] %vm326_vm2, %v7616_v0  ;;  %v386_v33 = vld [vmem:[%s7827_s28 + $0xb8] sm:$0xff]  ;;  %v389_v34 = vld [vmem:[%s7827_s28 + $0xd0] sm:$0xff] }
  0x48   : > { %357 = vst.msk [vmem:[#allocation2 + $0x198] sm:$0x1] %vm326_vm2, %v7616_v0  ;;  %358 = vst.msk [vmem:[#allocation2 + $0x1b8] sm:$0x1] %vm326_vm2, %v7616_v0  ;;  %v388_v35 = vld [vmem:[%s7827_s28 + $0xc8] sm:$0xff]  ;;  %v391_v36 = vld [vmem:[%s7827_s28 + $0xe0] sm:$0xff] }
  0x49   : > { %359 = vst.msk [vmem:[#allocation2 + $0x1d8] sm:$0x1] %vm326_vm2, %v7616_v0  ;;  %360 = vst.msk [vmem:[#allocation2 + $0x1f8] sm:$0x1] %vm326_vm2, %v7616_v0  ;;  %v390_v38 = vld [vmem:[%s7827_s28 + $0xd8] sm:$0xff]  ;;  %v392_v39 = vld [vmem:[%s7827_s28 + $0xe8] sm:$0xff] }
  0x4a   : > { %361 = vst.msk [vmem:[#allocation2 + $0x218] sm:$0x1] %vm326_vm2, %v7616_v0  ;;  %362 = vst.msk [vmem:[#allocation2 + $0x238] sm:$0x1] %vm326_vm2, %v7616_v0  ;;  %v7933_v45 = vld [vmem:[#allocation2 + $0x7] sm:$0xff]  ;;  %v430_v46 = vld [vmem:[#allocation2 + $0xf] sm:$0xff] }
  0x4b   : > { %397 = vst.msk [vmem:[#allocation2 + $0x28] sm:$0xff] %vm396_vm3, %v363_v1  ;;  %399 = vst.msk [vmem:[#allocation2 + $0x48] sm:$0xff] %vm396_vm3, %v365_v2  ;;  %s7622_s11 = smov 24   ;;  %s7623_s12 = smov 28   ;;  %vm1232_vm7 = vcmask 162944   ;;  %vm1425_vm8 = vcmask 195744  }
  0x4c   : > { %398 = vst.msk [vmem:[#allocation2 + $0x30] sm:$0xff] %vm396_vm3, %v364_v3  ;;  %401 = vst.msk [vmem:[#allocation2 + $0x68] sm:$0xff] %vm396_vm3, %v367_v6  ;;  %s7624_s13 = smov 32   ;;  %vm1619_vm9 = vcmask 228544   ;;  %vm1812_vm10 = vcmask 261344   ;;  %vm2005_vm11 = vcmask 294144  }
  0x4d   : > { %400 = vst.msk [vmem:[#allocation2 + $0x50] sm:$0xff] %vm396_vm3, %v366_v7  ;;  %403 = vst.msk [vmem:[#allocation2 + $0x88] sm:$0xff] %vm396_vm3, %v369_v8  ;;  %vm2038_vm12 = vcmask 326944   ;;  %vm2115_vm13 = vcmask 326656   ;;  %vm2469_vm14 = vcmask 261120   ;;  %s7626_s23 = smov 96  }
  0x4e   : > { %402 = vst.msk [vmem:[#allocation2 + $0x70] sm:$0xff] %vm396_vm3, %v368_v9  ;;  %405 = vst.msk [vmem:[#allocation2 + $0xa8] sm:$0xff] %vm396_vm3, %v371_v10  ;;  %vm2726_vm15 = vcmask 523520   ;;  %vm2919_vm1 = vcmask 785920   ;;  %vm3112_vm2 = vcmask 1048320  }
  0x4f   : > { %404 = vst.msk [vmem:[#allocation2 + $0x90] sm:$0xff] %vm396_vm3, %v370_v11  ;;  %407 = vst.msk [vmem:[#allocation2 + $0xc8] sm:$0xff] %vm396_vm3, %v373_v12 }
  0x50   : > { %406 = vst.msk [vmem:[#allocation2 + $0xb0] sm:$0xff] %vm396_vm3, %v372_v13  ;;  %409 = vst.msk [vmem:[#allocation2 + $0xe8] sm:$0xff] %vm396_vm3, %v375_v14 }
  0x51   : > { %408 = vst.msk [vmem:[#allocation2 + $0xd0] sm:$0xff] %vm396_vm3, %v374_v15  ;;  %411 = vst.msk [vmem:[#allocation2 + $0x108] sm:$0xff] %vm396_vm3, %v377_v16 }
  0x52   : > { %410 = vst.msk [vmem:[#allocation2 + $0xf0] sm:$0xff] %vm396_vm3, %v376_v17  ;;  %413 = vst.msk [vmem:[#allocation2 + $0x128] sm:$0xff] %vm396_vm3, %v379_v18  ;;  %v7872_v25 = vld [vmem:[#allocation2 + $0x28] sm:$0xff] }
  0x53   : > { %412 = vst.msk [vmem:[#allocation2 + $0x110] sm:$0xff] %vm396_vm3, %v378_v19  ;;  %415 = vst.msk [vmem:[#allocation2 + $0x148] sm:$0xff] %vm396_vm3, %v381_v20  ;;  %v7874_v26 = vld [vmem:[#allocation2 + $0x48] sm:$0xff]  ;;  %561 = vrot.lane.b32.xlu1 %v7872_v25, %s7617_s29  ;;  %v7885_v29 = vld [vmem:[#allocation2 + $0x30] sm:$0xff] }
  0x54   : > { %414 = vst.msk [vmem:[#allocation2 + $0x130] sm:$0xff] %vm396_vm3, %v380_v21  ;;  %417 = vst.msk [vmem:[#allocation2 + $0x168] sm:$0xff] %vm396_vm3, %v383_v22  ;;  %565 = vrot.lane.b32.xlu0 %v7874_v26, %s7617_s29  ;;  %v7889_v30 = vld [vmem:[#allocation2 + $0x68] sm:$0xff]  ;;  %v7895_v31 = vld [vmem:[#allocation2 + $0x50] sm:$0xff] }
  0x55   : > { %416 = vst.msk [vmem:[#allocation2 + $0x150] sm:$0xff] %vm396_vm3, %v382_v23  ;;  %419 = vst.msk [vmem:[#allocation2 + $0x188] sm:$0xff] %vm396_vm3, %v385_v24  ;;  %v7897_v32 = vld [vmem:[#allocation2 + $0x88] sm:$0xff]  ;;  %v7910_v37 = vld [vmem:[#allocation2 + $0x70] sm:$0xff] }
  0x56   : > { %418 = vst.msk [vmem:[#allocation2 + $0x170] sm:$0xff] %vm396_vm3, %v384_v27  ;;  %421 = vst.msk [vmem:[#allocation2 + $0x1a8] sm:$0xff] %vm396_vm3, %v387_v28  ;;  %v7915_v40 = vld [vmem:[#allocation2 + $0xa8] sm:$0xff]  ;;  %v7923_v41 = vld [vmem:[#allocation2 + $0x90] sm:$0xff] }
  0x57   : > { %563 = vrot.lane.b32.xlu1 %v7885_v29, %s7617_s29  ;;  %420 = vst.msk [vmem:[#allocation2 + $0x190] sm:$0xff] %vm396_vm3, %v386_v33  ;;  %423 = vst.msk [vmem:[#allocation2 + $0x1c8] sm:$0xff] %vm396_vm3, %v389_v34  ;;  %v7925_v42 = vld [vmem:[#allocation2 + $0xc8] sm:$0xff]  ;;  %v7931_v43 = vld [vmem:[#allocation2 + $0xb0] sm:$0xff] }
  0x58   : > { %569 = vrot.lane.b32.xlu0 %v7889_v30, %s7617_s29  ;;  %422 = vst.msk [vmem:[#allocation2 + $0x1b0] sm:$0xff] %vm396_vm3, %v388_v35  ;;  %425 = vst.msk [vmem:[#allocation2 + $0x1e8] sm:$0xff] %vm396_vm3, %v391_v36  ;;  %v507_v44 = vld [vmem:[#allocation2 + $0xe8] sm:$0xff]  ;;  %v7940_v47 = vld [vmem:[#allocation2 + $0xd0] sm:$0xff] }
  0x59   : > { %424 = vst.msk [vmem:[#allocation2 + $0x1d0] sm:$0xff] %vm396_vm3, %v390_v38  ;;  %426 = vst.msk [vmem:[#allocation2 + $0x1f0] sm:$0xff] %vm396_vm3, %v392_v39  ;;  %v7943_v48 = vld [vmem:[#allocation2 + $0x27] sm:$0xff]  ;;  %v508_v51 = vld [vmem:[#allocation2 + $0xf0] sm:$0xff] }
  0x5a   : > { %461 = vst.msk [vmem:[#allocation3] sm:$0xff] %vm396_vm3, %v7933_v45  ;;  %462 = vst.msk [vmem:[#allocation3 + $0x28] sm:$0xff] %vm396_vm3, %v430_v46  ;;  %v509_v49 = vld [vmem:[#allocation2 + $0x108] sm:$0xff]  ;;  %v510_v63 = vld [vmem:[#allocation2 + $0x110] sm:$0xff] }
  0x5b   : > { %567 = vrot.lane.b32.xlu1 %v7895_v31, %s7617_s29  ;;  %463 = vst.msk [vmem:[#allocation3 + $0x50] sm:$0xff] %vm396_vm3, %v7943_v48  ;;  %v7947_v50 = vld [vmem:[#allocation2 + $0x47] sm:$0xff]  ;;  %v7951_v52 = vld [vmem:[#allocation2 + $0x2f] sm:$0xff] }
  0x5c   : > { %573 = vrot.lane.b32.xlu0 %v7897_v32, %s7617_s29  ;;  %465 = vst.msk [vmem:[#allocation3 + $0xa0] sm:$0xff] %vm396_vm3, %v7947_v50  ;;  %v7953_v53 = vld [vmem:[#allocation2 + $0x67] sm:$0xff]  ;;  %464 = vst.msk [vmem:[#allocation3 + $0x78] sm:$0xff] %vm396_vm3, %v7951_v52  ;;  %v7961_v55 = vld [vmem:[#allocation2 + $0x4f] sm:$0xff] }
  0x5d   : > { %v511_v54 = vld [vmem:[#allocation2 + $0x128] sm:$0xff]  ;;  %467 = vst.msk [vmem:[#allocation3 + $0xf0] sm:$0xff] %vm396_vm3, %v7953_v53  ;;  %466 = vst.msk [vmem:[#allocation3 + $0xc8] sm:$0xff] %vm396_vm3, %v7961_v55  ;;  %v512_v14 = vld [vmem:[#allocation2 + $0x130] sm:$0xff] }
  0x5e   : > { %v7963_v56 = vld [vmem:[#allocation2 + $0x87] sm:$0xff]  ;;  %v7970_v57 = vld [vmem:[#allocation2 + $0x6f] sm:$0xff] }
  0x5f   : > { %571 = vrot.lane.b32.xlu1 %v7910_v37, %s7617_s29  ;;  %469 = vst.msk [vmem:[#allocation3 + $0x140] sm:$0xff] %vm396_vm3, %v7963_v56  ;;  %v7972_v58 = vld [vmem:[#allocation2 + $0xa7] sm:$0xff]  ;;  %v7974_v59 = vld [vmem:[#allocation2 + $0x8f] sm:$0xff]  ;;  %468 = vst.msk [vmem:[#allocation3 + $0x118] sm:$0xff] %vm396_vm3, %v7970_v57 }
  0x60   : > { %577 = vrot.lane.b32.xlu0 %v7915_v40, %s7617_s29  ;;  %471 = vst.msk [vmem:[#allocation3 + $0x190] sm:$0xff] %vm396_vm3, %v7972_v58  ;;  %470 = vst.msk [vmem:[#allocation3 + $0x168] sm:$0xff] %vm396_vm3, %v7974_v59  ;;  %v7982_v60 = vld [vmem:[#allocation2 + $0xc7] sm:$0xff]  ;;  %v7984_v61 = vld [vmem:[#allocation2 + $0xaf] sm:$0xff] }
  0x61   : > { %v7986_v62 = vld [vmem:[#allocation2 + $0xe7] sm:$0xff]  ;;  %473 = vst.msk [vmem:[#allocation3 + $0x1e0] sm:$0xff] %vm396_vm3, %v7982_v60  ;;  %472 = vst.msk [vmem:[#allocation3 + $0x1b8] sm:$0xff] %vm396_vm3, %v7984_v61  ;;  %v7994_v1 = vld [vmem:[#allocation2 + $0xcf] sm:$0xff] }
  0x62   : > { %475 = vst.msk [vmem:[#allocation3 + $0x230] sm:$0xff] %vm396_vm3, %v7986_v62  ;;  %v7996_v2 = vld [vmem:[#allocation2 + $0x107] sm:$0xff]  ;;  %v7998_v3 = vld [vmem:[#allocation2 + $0xef] sm:$0xff]  ;;  %474 = vst.msk [vmem:[#allocation3 + $0x208] sm:$0xff] %vm396_vm3, %v7994_v1 }
  0x63   : > { %575 = vrot.lane.b32.xlu1 %v7923_v41, %s7617_s29  ;;  %477 = vst.msk [vmem:[#allocation3 + $0x280] sm:$0xff] %vm396_vm3, %v7996_v2  ;;  %476 = vst.msk [vmem:[#allocation3 + $0x258] sm:$0xff] %vm396_vm3, %v7998_v3  ;;  %v8007_v4 = vld [vmem:[#allocation2 + $0x127] sm:$0xff]  ;;  %v8009_v5 = vld [vmem:[#allocation2 + $0x10f] sm:$0xff] }
  0x64   : > { %581 = vrot.lane.b32.xlu0 %v7925_v42, %s7617_s29  ;;  %v8011_v6 = vld [vmem:[#allocation2 + $0x147] sm:$0xff]  ;;  %479 = vst.msk [vmem:[#allocation3 + $0x2d0] sm:$0xff] %vm396_vm3, %v8007_v4  ;;  %478 = vst.msk [vmem:[#allocation3 + $0x2a8] sm:$0xff] %vm396_vm3, %v8009_v5  ;;  %v8020_v7 = vld [vmem:[#allocation2 + $0x12f] sm:$0xff] }
  0x65   : > { %481 = vst.msk [vmem:[#allocation3 + $0x320] sm:$0xff] %vm396_vm3, %v8011_v6  ;;  %v8022_v8 = vld [vmem:[#allocation2 + $0x167] sm:$0xff]  ;;  %v8024_v9 = vld [vmem:[#allocation2 + $0x14f] sm:$0xff]  ;;  %480 = vst.msk [vmem:[#allocation3 + $0x2f8] sm:$0xff] %vm396_vm3, %v8020_v7 }
  0x66   : > { %v513_v10 = vld [vmem:[#allocation2 + $0x148] sm:$0xff]  ;;  %483 = vst.msk [vmem:[#allocation3 + $0x370] sm:$0xff] %vm396_vm3, %v8022_v8  ;;  %482 = vst.msk [vmem:[#allocation3 + $0x348] sm:$0xff] %vm396_vm3, %v8024_v9  ;;  %v514_v18 = vld [vmem:[#allocation2 + $0x150] sm:$0xff] }
  0x67   : > { %579 = vrot.lane.b32.xlu1 %v7931_v43, %s7617_s29  ;;  %v8032_v11 = vld [vmem:[#allocation2 + $0x187] sm:$0xff]  ;;  %v8034_v12 = vld [vmem:[#allocation2 + $0x16f] sm:$0xff] }
  0x68   : > { %585 = vrot.lane.b32.xlu0 %v507_v44, %s7617_s29  ;;  %485 = vst.msk [vmem:[#allocation3 + $0x3c0] sm:$0xff] %vm396_vm3, %v8032_v11  ;;  %484 = vst.msk [vmem:[#allocation3 + $0x398] sm:$0xff] %vm396_vm3, %v8034_v12  ;;  %v455_v13 = vld [vmem:[#allocation2 + $0x1a7] sm:$0xff]  ;;  %v8043_v15 = vld [vmem:[#allocation2 + $0x18f] sm:$0xff] }
  0x69   : > { %487 = vst.msk [vmem:[#allocation3 + $0x410] sm:$0xff] %vm396_vm3, %v455_v13  ;;  %v515_v16 = vld [vmem:[#allocation2 + $0x168] sm:$0xff]  ;;  %486 = vst.msk [vmem:[#allocation3 + $0x3e8] sm:$0xff] %vm396_vm3, %v8043_v15  ;;  %v516_v22 = vld [vmem:[#allocation2 + $0x170] sm:$0xff] }
  0x6a   : > { %v457_v17 = vld [vmem:[#allocation2 + $0x1c7] sm:$0xff]  ;;  %v456_v19 = vld [vmem:[#allocation2 + $0x1af] sm:$0xff] }
  0x6b   : > { %583 = vrot.lane.b32.xlu1 %v7940_v47, %s7617_s29  ;;  %489 = vst.msk [vmem:[#allocation3 + $0x460] sm:$0xff] %vm396_vm3, %v457_v17  ;;  %v517_v20 = vld [vmem:[#allocation2 + $0x188] sm:$0xff]  ;;  %488 = vst.msk [vmem:[#allocation3 + $0x438] sm:$0xff] %vm396_vm3, %v456_v19  ;;  %v518_v27 = vld [vmem:[#allocation2 + $0x190] sm:$0xff] }
  0x6c   : > { %589 = vrot.lane.b32.xlu0 %v509_v49, %s7617_s29  ;;  %v459_v21 = vld [vmem:[#allocation2 + $0x1e7] sm:$0xff]  ;;  %v458_v23 = vld [vmem:[#allocation2 + $0x1cf] sm:$0xff] }
  0x6d   : > { %491 = vst.msk [vmem:[#allocation3 + $0x4b0] sm:$0xff] %vm396_vm3, %v459_v21  ;;  %v519_v24 = vld [vmem:[#allocation2 + $0x1a8] sm:$0xff]  ;;  %490 = vst.msk [vmem:[#allocation3 + $0x488] sm:$0xff] %vm396_vm3, %v458_v23  ;;  %v520_v34 = vld [vmem:[#allocation2 + $0x1b0] sm:$0xff] }
  0x6e   : > { %v460_v28 = vld [vmem:[#allocation2 + $0x1ef] sm:$0xff] }
  0x6f   : > { %587 = vrot.lane.b32.xlu1 %v508_v51, %s7617_s29  ;;  %v521_v33 = vld [vmem:[#allocation2 + $0x1c8] sm:$0xff]  ;;  %492 = vst.msk [vmem:[#allocation3 + $0x4d8] sm:$0xff] %vm396_vm3, %v460_v28  ;;  %v522_v36 = vld [vmem:[#allocation2 + $0x1d0] sm:$0xff] }
  0x70   : > { %593 = vrot.lane.b32.xlu0 %v511_v54, %s7617_s29  ;;  %v523_v35 = vld [vmem:[#allocation2 + $0x1e8] sm:$0xff]  ;;  %v524_v39 = vld [vmem:[#allocation2 + $0x1f0] sm:$0xff] }
  0x71   : > { %v686_v38 = vld [vmem:[#allocation2 + $0x9] sm:$0xff]  ;;  %v687_v46 = vld [vmem:[#allocation2 + $0x11] sm:$0xff] }
  0x72   : > { %v8064_v44 = vld [vmem:[#allocation2 + $0x29] sm:$0xff]  ;;  %v8074_v51 = vld [vmem:[#allocation2 + $0x31] sm:$0xff] }
  0x73   : > { %591 = vrot.lane.b32.xlu1 %v510_v63, %s7617_s29  ;;  %v8069_v49 = vld [vmem:[#allocation2 + $0x49] sm:$0xff]  ;;  %v8082_v63 = vld [vmem:[#allocation2 + $0x51] sm:$0xff] }
  0x74   : > { %597 = vrot.lane.b32.xlu0 %v513_v10, %s7617_s29  ;;  %v8076_v54 = vld [vmem:[#allocation2 + $0x69] sm:$0xff]  ;;  %v8090_v13 = vld [vmem:[#allocation2 + $0x71] sm:$0xff] }
  0x75   : > { %v8084_v10 = vld [vmem:[#allocation2 + $0x89] sm:$0xff]  ;;  %v705_v28 = vld [vmem:[#allocation2 + $0x131] sm:$0xff] }
  0x76   : > { %v8100_v17 = vld [vmem:[#allocation2 + $0xc9] sm:$0xff] }
  0x77   : > { %595 = vrot.lane.b32.xlu1 %v512_v14, %s7617_s29  ;;  %v8092_v14 = vld [vmem:[#allocation2 + $0xa9] sm:$0xff] }
  0x78   : > { %601 = vrot.lane.b32.xlu0 %v515_v16, %s7617_s29  ;;  %v8098_v16 = vld [vmem:[#allocation2 + $0x91] sm:$0xff]  ;;  %v8108_v19 = vld [vmem:[#allocation2 + $0xe9] sm:$0xff] }
  0x79   : > { %v8116_v21 = vld [vmem:[#allocation2 + $0x109] sm:$0xff] }
  0x7a   : > { %v704_v23 = vld [vmem:[#allocation2 + $0x129] sm:$0xff] }
  0x7b   : > { %599 = vrot.lane.b32.xlu1 %v514_v18, %s7617_s29  ;;  %v8106_v18 = vld [vmem:[#allocation2 + $0xb1] sm:$0xff] }
  0x7c   : > { %605 = vrot.lane.b32.xlu0 %v517_v20, %s7617_s29  ;;  %v8114_v20 = vld [vmem:[#allocation2 + $0xd1] sm:$0xff] }
  0x7f   : > { %603 = vrot.lane.b32.xlu1 %v516_v22, %s7617_s29  ;;  %v8122_v22 = vld [vmem:[#allocation2 + $0xf1] sm:$0xff] }
  0x80   : > { %609 = vrot.lane.b32.xlu0 %v519_v24, %s7617_s29  ;;  %v8127_v24 = vld [vmem:[#allocation2 + $0x111] sm:$0xff] }
  0x83   : > { %607 = vrot.lane.b32.xlu1 %v518_v27, %s7617_s29  ;;  %v706_v27 = vld [vmem:[#allocation2 + $0x149] sm:$0xff] }
  0x84   : > { %613 = vrot.lane.b32.xlu0 %v521_v33, %s7617_s29  ;;  %v708_v33 = vld [vmem:[#allocation2 + $0x169] sm:$0xff] }
  0x87   : > { %611 = vrot.lane.b32.xlu1 %v520_v34, %s7617_s29  ;;  %v707_v34 = vld [vmem:[#allocation2 + $0x151] sm:$0xff] }
  0x88   : > { %617 = vrot.lane.b32.xlu0 %v523_v35, %s7617_s29  ;;  %v710_v35 = vld [vmem:[#allocation2 + $0x189] sm:$0xff] }
  0x8b   : > { %615 = vrot.lane.b32.xlu1 %v522_v36, %s7617_s29  ;;  %v709_v36 = vld [vmem:[#allocation2 + $0x171] sm:$0xff] }
  0x8c   : > { %750 = vrot.lane.b32.xlu0 %v686_v38, %s7618_s30  ;;  %v712_v38 = vld [vmem:[#allocation2 + $0x1a9] sm:$0xff] }
  0x8f   : > { %619 = vrot.lane.b32.xlu1 %v524_v39, %s7617_s29 }
  0x90   : > { %754 = vrot.lane.b32.xlu0 %v8064_v44, %s7618_s30 }
  0x93   : > { %752 = vrot.lane.b32.xlu1 %v687_v46, %s7618_s30  ;;  %v711_v46 = vld [vmem:[#allocation2 + $0x191] sm:$0xff] }
  0x94   : > { %758 = vrot.lane.b32.xlu0 %v8069_v49, %s7618_s30 }
  0x97   : > { %756 = vrot.lane.b32.xlu1 %v8074_v51, %s7618_s30 }
  0x98   : > { %762 = vrot.lane.b32.xlu0 %v8076_v54, %s7618_s30 }
  0x9b   : > { %760 = vrot.lane.b32.xlu1 %v8082_v63, %s7618_s30 }
  0x9c   : > { %766 = vrot.lane.b32.xlu0 %v8084_v10, %s7618_s30 }
  0x9f   : > { %764 = vrot.lane.b32.xlu1 %v8090_v13, %s7618_s30 }
  0xa0   : > { %770 = vrot.lane.b32.xlu0 %v8092_v14, %s7618_s30 }
  0xa3   : > { %768 = vrot.lane.b32.xlu1 %v8098_v16, %s7618_s30 }
  0xa4   : > { %774 = vrot.lane.b32.xlu0 %v8100_v17, %s7618_s30 }
  0xa7   : > { %772 = vrot.lane.b32.xlu1 %v8106_v18, %s7618_s30 }
  0xa8   : > { %778 = vrot.lane.b32.xlu0 %v8108_v19, %s7618_s30 }
  0xab   : > { %776 = vrot.lane.b32.xlu1 %v8114_v20, %s7618_s30 }
  0xac   : > { %782 = vrot.lane.b32.xlu0 %v8116_v21, %s7618_s30 }
  0xaf   : > { %780 = vrot.lane.b32.xlu1 %v8122_v22, %s7618_s30 }
  0xb0   : > { %786 = vrot.lane.b32.xlu0 %v704_v23, %s7618_s30  ;;  %v558_v39 = vpop.permute.xlu0 %557  ;;  %v714_v23 = vld [vmem:[#allocation2 + $0x1c9] sm:$0xff] }
  0xb1   : > { %654 = vst.msk [vmem:[#allocation3] sm:$0xff] %vm653_vm4, %v558_v39 }
  0xb3   : > { %784 = vrot.lane.b32.xlu1 %v8127_v24, %s7618_s30 }
  0xb4   : > { %790 = vrot.lane.b32.xlu0 %v706_v27, %s7618_s30  ;;  %v560_v27 = vpop.permute.xlu0 %559 }
  0xb5   : > { %655 = vst.msk [vmem:[#allocation3 + $0x28] sm:$0xff] %vm653_vm4, %v560_v27 }
  0xb7   : > { %788 = vrot.lane.b32.xlu1 %v705_v28, %s7618_s30  ;;  %v713_v28 = vld [vmem:[#allocation2 + $0x1b1] sm:$0xff] }
  0xb8   : > { %794 = vrot.lane.b32.xlu0 %v708_v33, %s7618_s30 }
  0xbb   : > { %792 = vrot.lane.b32.xlu1 %v707_v34, %s7618_s30  ;;  %v716_v34 = vld [vmem:[#allocation2 + $0x1e9] sm:$0xff] }
  0xbc   : > { %798 = vrot.lane.b32.xlu0 %v710_v35, %s7618_s30 }
  0xbf   : > { %796 = vrot.lane.b32.xlu1 %v709_v36, %s7618_s30  ;;  %v715_v36 = vld [vmem:[#allocation2 + $0x1d1] sm:$0xff] }
  0xc0   : > { %802 = vrot.lane.b32.xlu0 %v712_v38, %s7618_s30 }
  0xc3   : > { %800 = vrot.lane.b32.xlu1 %v711_v46, %s7618_s30  ;;  %v717_v46 = vld [vmem:[#allocation2 + $0x1f1] sm:$0xff] }
  0xc4   : > { %806 = vrot.lane.b32.xlu0 %v714_v23, %s7618_s30 }
  0xc5   : > { %v562_v33 = vpop.permute.xlu1 %561 }
  0xc6   : > { %656 = vst.msk [vmem:[#allocation3 + $0x50] sm:$0xff] %vm653_vm4, %v562_v33  ;;  %v566_v35 = vpop.permute.xlu0 %565 }
  0xc7   : > { %658 = vst.msk [vmem:[#allocation3 + $0xa0] sm:$0xff] %vm653_vm4, %v566_v35  ;;  %804 = vrot.lane.b32.xlu1 %v713_v28, %s7618_s30 }
  0xc8   : > { %810 = vrot.lane.b32.xlu0 %v716_v34, %s7618_s30 }
  0xc9   : > { %v564_v38 = vpop.permute.xlu1 %563 }
  0xca   : > { %657 = vst.msk [vmem:[#allocation3 + $0x78] sm:$0xff] %vm653_vm4, %v564_v38  ;;  %v570_v39 = vpop.permute.xlu0 %569 }
  0xcb   : > { %660 = vst.msk [vmem:[#allocation3 + $0xf0] sm:$0xff] %vm653_vm4, %v570_v39  ;;  %808 = vrot.lane.b32.xlu1 %v715_v36, %s7618_s30 }
  0xcc   : > { %943 = vrot.lane.b32.xlu0 %v7943_v48, %s7619_s8 }
  0xcd   : > { %v568_v23 = vpop.permute.xlu1 %567 }
  0xce   : > { %659 = vst.msk [vmem:[#allocation3 + $0xc8] sm:$0xff] %vm653_vm4, %v568_v23  ;;  %v574_v27 = vpop.permute.xlu0 %573 }
  0xcf   : > { %662 = vst.msk [vmem:[#allocation3 + $0x140] sm:$0xff] %vm653_vm4, %v574_v27  ;;  %812 = vrot.lane.b32.xlu1 %v717_v46, %s7618_s30  ;;  %v2107_v27 = vld [vmem:[%s11312_s1 + $0x20] sm:$0xff] }
  0xd0   : > { %947 = vrot.lane.b32.xlu0 %v7947_v50, %s7619_s8  ;;  %7271 = vmatprep.subr.mxu0 %v2107_v27 }
  0xd1   : > { %v572_v28 = vpop.permute.xlu1 %571  ;;  %7272 = vmatpush3.msra.mxu0 %v2107_v27 }
  0xd2   : > { %661 = vst.msk [vmem:[#allocation3 + $0x118] sm:$0xff] %vm653_vm4, %v572_v28  ;;  %v578_v33 = vpop.permute.xlu0 %577 }
  0xd3   : > { %664 = vst.msk [vmem:[#allocation3 + $0x190] sm:$0xff] %vm653_vm4, %v578_v33  ;;  %945 = vrot.lane.b32.xlu1 %v7951_v52, %s7619_s8 }
  0xd4   : > { %951 = vrot.lane.b32.xlu0 %v7953_v53, %s7619_s8 }
  0xd5   : > { %v576_v48 = vpop.permute.xlu1 %575 }
  0xd6   : > { %663 = vst.msk [vmem:[#allocation3 + $0x168] sm:$0xff] %vm653_vm4, %v576_v48  ;;  %v582_v34 = vpop.permute.xlu0 %581  ;;  %v2105_v48 = vld [vmem:[%s11312_s1 + $0x10] sm:$0xff] }
  0xd7   : > { %666 = vst.msk [vmem:[#allocation3 + $0x1e0] sm:$0xff] %vm653_vm4, %v582_v34  ;;  %949 = vrot.lane.b32.xlu1 %v7961_v55, %s7619_s8 }
  0xd8   : > { %955 = vrot.lane.b32.xlu0 %v7963_v56, %s7619_s8 }
  0xd9   : > { %v580_v35 = vpop.permute.xlu1 %579 }
  0xda   : > { %665 = vst.msk [vmem:[#allocation3 + $0x1b8] sm:$0xff] %vm653_vm4, %v580_v35  ;;  %v586_v36 = vpop.permute.xlu0 %585 }
  0xdb   : > { %668 = vst.msk [vmem:[#allocation3 + $0x230] sm:$0xff] %vm653_vm4, %v586_v36  ;;  %953 = vrot.lane.b32.xlu1 %v7970_v57, %s7619_s8  ;;  %v2103_v36 = vld [vmem:[%s11312_s1] sm:$0xff] }
  0xdc   : > { %1138 = vrot.lane.b32.xlu0 %v7885_v29, %s7620_s9 }
  0xdd   : > { %v584_v52 = vpop.permute.xlu1 %583 }
  0xde   : > { %667 = vst.msk [vmem:[#allocation3 + $0x208] sm:$0xff] %vm653_vm4, %v584_v52  ;;  %v590_v38 = vpop.permute.xlu0 %589 }
  0xdf   : > { %670 = vst.msk [vmem:[#allocation3 + $0x280] sm:$0xff] %vm653_vm4, %v590_v38  ;;  %1136 = vrot.lane.b32.xlu1 %v7872_v25, %s7620_s9 }
  0xe0   : > { %1331 = vrot.lane.b32.xlu0 %v8074_v51, %s7621_s10 }
  0xe1   : > { %v588_v39 = vpop.permute.xlu1 %587 }
  0xe2   : > { %669 = vst.msk [vmem:[#allocation3 + $0x258] sm:$0xff] %vm653_vm4, %v588_v39  ;;  %v594_v46 = vpop.permute.xlu0 %593 }
  0xe3   : > { %672 = vst.msk [vmem:[#allocation3 + $0x2d0] sm:$0xff] %vm653_vm4, %v594_v46  ;;  %1329 = vrot.lane.b32.xlu1 %v8064_v44, %s7621_s10 }
  0xe4   : > { %1525 = vrot.lane.b32.xlu0 %v7961_v55, %s7622_s11 }
  0xe5   : > { %v592_v29 = vpop.permute.xlu1 %591 }
  0xe6   : > { %671 = vst.msk [vmem:[#allocation3 + $0x2a8] sm:$0xff] %vm653_vm4, %v592_v29  ;;  %v598_v25 = vpop.permute.xlu0 %597 }
  0xe7   : > { %674 = vst.msk [vmem:[#allocation3 + $0x320] sm:$0xff] %vm653_vm4, %v598_v25  ;;  %1523 = vrot.lane.b32.xlu1 %v7947_v50, %s7622_s11 }
  0xe8   : > { %1140 = vrot.lane.b32.xlu0 %v7874_v26, %s7620_s9 }
  0xe9   : > { %v596_v51 = vpop.permute.xlu1 %595 }
  0xea   : > { %673 = vst.msk [vmem:[#allocation3 + $0x2f8] sm:$0xff] %vm653_vm4, %v596_v51  ;;  %v602_v44 = vpop.permute.xlu0 %601 }
  0xeb   : > { %676 = vst.msk [vmem:[#allocation3 + $0x370] sm:$0xff] %vm653_vm4, %v602_v44  ;;  %1716 = vrot.lane.b32.xlu1 %v7874_v26, %s7623_s12 }
  0xec   : > { %1909 = vrot.lane.b32.xlu0 %v8069_v49, %s7624_s13 }
  0xed   : > { %v600_v55 = vpop.permute.xlu1 %599 }
  0xee   : > { %675 = vst.msk [vmem:[#allocation3 + $0x348] sm:$0xff] %vm653_vm4, %v600_v55  ;;  %v606_v50 = vpop.permute.xlu0 %605 }
  0xef   : > { %678 = vst.msk [vmem:[#allocation3 + $0x3c0] sm:$0xff] %vm653_vm4, %v606_v50  ;;  %1718 = vrot.lane.b32.xlu1 %v7895_v31, %s7623_s12 }
  0xf0   : > { %1333 = vrot.lane.b32.xlu0 %v8069_v49, %s7621_s10  ;;  %v2106_v49 = vld [vmem:[%s11312_s1 + $0x18] sm:$0xff] }
  0xf1   : > { %v604_v23 = vpop.permute.xlu1 %603  ;;  %7273 = vmatprep.subr.mxu0 %v2106_v49 }
  0xf2   : > { %677 = vst.msk [vmem:[#allocation3 + $0x398] sm:$0xff] %vm653_vm4, %v604_v23  ;;  %v610_v26 = vpop.permute.xlu0 %609  ;;  %7274 = vmatpush3.msra.mxu0 %v2106_v49 }
  0xf3   : > { %680 = vst.msk [vmem:[#allocation3 + $0x410] sm:$0xff] %vm653_vm4, %v610_v26  ;;  %1142 = vrot.lane.b32.xlu1 %v7895_v31, %s7620_s9  ;;  %7275 = vmatprep.subr.mxu0 %v2105_v48  ;;  %v2104_v31 = vld [vmem:[%s11312_s1 + $0x8] sm:$0xff] }
  0xf4   : > { %1335 = vrot.lane.b32.xlu0 %v8082_v63, %s7621_s10  ;;  %7276 = vmatpush3.msra.mxu0 %v2105_v48 }
  0xf5   : > { %v608_v28 = vpop.permute.xlu1 %607  ;;  %7277 = vmatprep.subr.mxu0 %v2104_v31 }
  0xf6   : > { %679 = vst.msk [vmem:[#allocation3 + $0x3e8] sm:$0xff] %vm653_vm4, %v608_v28  ;;  %v614_v33 = vpop.permute.xlu0 %613  ;;  %7278 = vmatpush3.msra.mxu0 %v2104_v31  ;;  %v1082_v31 = vld [vmem:[#allocation2 + $0xc8] sm:$0xff] }
  0xf7   : > { %682 = vst.msk [vmem:[#allocation3 + $0x460] sm:$0xff] %vm653_vm4, %v614_v33  ;;  %1911 = vrot.lane.b32.xlu1 %v8082_v63, %s7624_s13  ;;  %7279 = vmatprep.subr.mxu0 %v2103_v36 }
  0xf8   : > { %1529 = vrot.lane.b32.xlu0 %v7970_v57, %s7622_s11  ;;  %7280 = vmatpush3.msra.mxu0 %v2103_v36 }
  0xf9   : > { %v612_v34 = vpop.permute.xlu1 %611 }
  0xfa   : > { %681 = vst.msk [vmem:[#allocation3 + $0x438] sm:$0xff] %vm653_vm4, %v612_v34  ;;  %v618_v35 = vpop.permute.xlu0 %617 }
  0xfb   : > { %684 = vst.msk [vmem:[#allocation3 + $0x4b0] sm:$0xff] %vm653_vm4, %v618_v35  ;;  %1527 = vrot.lane.b32.xlu1 %v7953_v53, %s7622_s11 }
  0xfc   : > { %1722 = vrot.lane.b32.xlu0 %v7910_v37, %s7623_s12 }
  0xfd   : > { %v616_v57 = vpop.permute.xlu1 %615 }
  0xfe   : > { %683 = vst.msk [vmem:[#allocation3 + $0x488] sm:$0xff] %vm653_vm4, %v616_v57  ;;  %v751_v63 = vpop.permute.xlu0 %750 }
  0xff   : > { %847 = vst.msk [vmem:[#allocation3] sm:$0xff] %vm846_vm5, %v751_v63  ;;  %1720 = vrot.lane.b32.xlu1 %v7889_v30, %s7623_s12 }
 0x100   : > { %1915 = vrot.lane.b32.xlu0 %v8090_v13, %s7624_s13 }
 0x101   : > { %v620_v52 = vpop.permute.xlu1 %619 }
 0x102   : > { %685 = vst.msk [vmem:[#allocation3 + $0x4d8] sm:$0xff] %vm653_vm4, %v620_v52  ;;  %v755_v53 = vpop.permute.xlu0 %754  ;;  %v1662_v52 = vld [vmem:[#allocation2 + $0xe8] sm:$0xff] }
 0x103   : > { %849 = vst.msk [vmem:[#allocation3 + $0x50] sm:$0xff] %vm846_vm5, %v755_v53  ;;  %1913 = vrot.lane.b32.xlu1 %v8076_v54, %s7624_s13 }
 0x104   : > { %1146 = vrot.lane.b32.xlu0 %v7910_v37, %s7620_s9 }
 0x105   : > { %v753_v38 = vpop.permute.xlu1 %752 }
 0x106   : > { %848 = vst.msk [vmem:[#allocation3 + $0x28] sm:$0xff] %vm846_vm5, %v753_v38  ;;  %v759_v39 = vpop.permute.xlu0 %758  ;;  %v1663_v38 = vld [vmem:[#allocation2 + $0xf0] sm:$0xff] }
 0x107   : > { %851 = vst.msk [vmem:[#allocation3 + $0xa0] sm:$0xff] %vm846_vm5, %v759_v39  ;;  %1144 = vrot.lane.b32.xlu1 %v7889_v30, %s7620_s9 }
 0x108   : > { %1339 = vrot.lane.b32.xlu0 %v8090_v13, %s7621_s10 }
 0x109   : > { %v757_v46 = vpop.permute.xlu1 %756 }
 0x10a   : > { %850 = vst.msk [vmem:[#allocation3 + $0x78] sm:$0xff] %vm846_vm5, %v757_v46  ;;  %v763_v29 = vpop.permute.xlu0 %762 }
 0x10b   : > { %853 = vst.msk [vmem:[#allocation3 + $0xf0] sm:$0xff] %vm846_vm5, %v763_v29  ;;  %1337 = vrot.lane.b32.xlu1 %v8076_v54, %s7621_s10 }
 0x10c   : > { %1533 = vrot.lane.b32.xlu0 %v7974_v59, %s7622_s11 }
 0x10d   : > { %v761_v37 = vpop.permute.xlu1 %760 }
 0x10e   : > { %852 = vst.msk [vmem:[#allocation3 + $0xc8] sm:$0xff] %vm846_vm5, %v761_v37  ;;  %v767_v25 = vpop.permute.xlu0 %766 }
 0x10f   : > { %855 = vst.msk [vmem:[#allocation3 + $0x140] sm:$0xff] %vm846_vm5, %v767_v25  ;;  %1531 = vrot.lane.b32.xlu1 %v7963_v56, %s7622_s11 }
 0x110   : > { %1726 = vrot.lane.b32.xlu0 %v7923_v41, %s7623_s12 }
 0x111   : > { %v765_v30 = vpop.permute.xlu1 %764 }
 0x112   : > { %854 = vst.msk [vmem:[#allocation3 + $0x118] sm:$0xff] %vm846_vm5, %v765_v30  ;;  %v771_v13 = vpop.permute.xlu0 %770 }
 0x113   : > { %857 = vst.msk [vmem:[#allocation3 + $0x190] sm:$0xff] %vm846_vm5, %v771_v13  ;;  %1724 = vrot.lane.b32.xlu1 %v7897_v32, %s7623_s12 }
 0x114   : > { %1919 = vrot.lane.b32.xlu0 %v8098_v16, %s7624_s13 }
 0x115   : > { %v769_v54 = vpop.permute.xlu1 %768 }
 0x116   : > { %856 = vst.msk [vmem:[#allocation3 + $0x168] sm:$0xff] %vm846_vm5, %v769_v54  ;;  %v775_v51 = vpop.permute.xlu0 %774 }
 0x117   : > { %859 = vst.msk [vmem:[#allocation3 + $0x1e0] sm:$0xff] %vm846_vm5, %v775_v51  ;;  %1917 = vrot.lane.b32.xlu1 %v8084_v10, %s7624_s13 }
 0x118   : > { %1148 = vrot.lane.b32.xlu0 %v7897_v32, %s7620_s9 }
 0x119   : > { %v773_v56 = vpop.permute.xlu1 %772 }
 0x11a   : > { %858 = vst.msk [vmem:[#allocation3 + $0x1b8] sm:$0xff] %vm846_vm5, %v773_v56  ;;  %v779_v44 = vpop.permute.xlu0 %778 }
 0x11b   : > { %861 = vst.msk [vmem:[#allocation3 + $0x230] sm:$0xff] %vm846_vm5, %v779_v44  ;;  %957 = vrot.lane.b32.xlu1 %v7974_v59, %s7619_s8 }
 0x11c   : > { %1341 = vrot.lane.b32.xlu0 %v8084_v10, %s7621_s10 }
 0x11d   : > { %v777_v55 = vpop.permute.xlu1 %776 }
 0x11e   : > { %860 = vst.msk [vmem:[#allocation3 + $0x208] sm:$0xff] %vm846_vm5, %v777_v55  ;;  %v783_v50 = vpop.permute.xlu0 %782 }
 0x11f   : > { %863 = vst.msk [vmem:[#allocation3 + $0x280] sm:$0xff] %vm846_vm5, %v783_v50  ;;  %1150 = vrot.lane.b32.xlu1 %v7923_v41, %s7620_s9 }
 0x120   : > { %1535 = vrot.lane.b32.xlu0 %v7972_v58, %s7622_s11 }
 0x121   : > { %v781_v32 = vpop.permute.xlu1 %780 }
 0x122   : > { %862 = vst.msk [vmem:[#allocation3 + $0x258] sm:$0xff] %vm846_vm5, %v781_v32  ;;  %v787_v23 = vpop.permute.xlu0 %786 }
 0x123   : > { %865 = vst.msk [vmem:[#allocation3 + $0x2d0] sm:$0xff] %vm846_vm5, %v787_v23  ;;  %1343 = vrot.lane.b32.xlu1 %v8098_v16, %s7621_s10 }
 0x124   : > { %1728 = vrot.lane.b32.xlu0 %v7915_v40, %s7623_s12 }
 0x125   : > { %v785_v59 = vpop.permute.xlu1 %784 }
 0x126   : > { %864 = vst.msk [vmem:[#allocation3 + $0x2a8] sm:$0xff] %vm846_vm5, %v785_v59  ;;  %v791_v10 = vpop.permute.xlu0 %790 }
 0x127   : > { %867 = vst.msk [vmem:[#allocation3 + $0x320] sm:$0xff] %vm846_vm5, %v791_v10  ;;  %1537 = vrot.lane.b32.xlu1 %v7984_v61, %s7622_s11 }
 0x128   : > { %1921 = vrot.lane.b32.xlu0 %v8092_v14, %s7624_s13 }
 0x129   : > { %v789_v41 = vpop.permute.xlu1 %788 }
 0x12a   : > { %866 = vst.msk [vmem:[#allocation3 + $0x2f8] sm:$0xff] %vm846_vm5, %v789_v41  ;;  %v795_v26 = vpop.permute.xlu0 %794 }
 0x12b   : > { %869 = vst.msk [vmem:[#allocation3 + $0x370] sm:$0xff] %vm846_vm5, %v795_v26  ;;  %1730 = vrot.lane.b32.xlu1 %v7931_v43, %s7623_s12 }
 0x12c   : > { %959 = vrot.lane.b32.xlu0 %v7972_v58, %s7619_s8 }
 0x12d   : > { %v793_v16 = vpop.permute.xlu1 %792 }
 0x12e   : > { %868 = vst.msk [vmem:[#allocation3 + $0x348] sm:$0xff] %vm846_vm5, %v793_v16  ;;  %v799_v27 = vpop.permute.xlu0 %798 }
 0x12f   : > { %871 = vst.msk [vmem:[#allocation3 + $0x3c0] sm:$0xff] %vm846_vm5, %v799_v27  ;;  %1923 = vrot.lane.b32.xlu1 %v8106_v18, %s7624_s13 }
 0x130   : > { %1152 = vrot.lane.b32.xlu0 %v7915_v40, %s7620_s9 }
 0x131   : > { %v797_v49 = vpop.permute.xlu1 %796 }
 0x132   : > { %870 = vst.msk [vmem:[#allocation3 + $0x398] sm:$0xff] %vm846_vm5, %v797_v49  ;;  %v803_v28 = vpop.permute.xlu0 %802  ;;  %v1859_v49 = vld [vmem:[#allocation2 + $0x129] sm:$0xff] }
 0x133   : > { %873 = vst.msk [vmem:[#allocation3 + $0x410] sm:$0xff] %vm846_vm5, %v803_v28  ;;  %961 = vrot.lane.b32.xlu1 %v7984_v61, %s7619_s8 }
 0x134   : > { %1345 = vrot.lane.b32.xlu0 %v8092_v14, %s7621_s10 }
 0x135   : > { %v801_v58 = vpop.permute.xlu1 %800 }
 0x136   : > { %872 = vst.msk [vmem:[#allocation3 + $0x3e8] sm:$0xff] %vm846_vm5, %v801_v58  ;;  %v807_v33 = vpop.permute.xlu0 %806  ;;  %v1667_v58 = vld [vmem:[#allocation2 + $0x130] sm:$0xff] }
 0x137   : > { %875 = vst.msk [vmem:[#allocation3 + $0x460] sm:$0xff] %vm846_vm5, %v807_v33  ;;  %1154 = vrot.lane.b32.xlu1 %v7931_v43, %s7620_s9 }
 0x138   : > { %1539 = vrot.lane.b32.xlu0 %v7982_v60, %s7622_s11 }
 0x139   : > { %v805_v40 = vpop.permute.xlu1 %804 }
 0x13a   : > { %874 = vst.msk [vmem:[#allocation3 + $0x438] sm:$0xff] %vm846_vm5, %v805_v40  ;;  %v811_v48 = vpop.permute.xlu0 %810 }
 0x13b   : > { %877 = vst.msk [vmem:[#allocation3 + $0x4b0] sm:$0xff] %vm846_vm5, %v811_v48  ;;  %1347 = vrot.lane.b32.xlu1 %v8106_v18, %s7621_s10  ;;  %v1860_v48 = vld [vmem:[#allocation2 + $0x131] sm:$0xff] }
 0x13c   : > { %1732 = vrot.lane.b32.xlu0 %v7925_v42, %s7623_s12 }
 0x13d   : > { %v809_v61 = vpop.permute.xlu1 %808 }
 0x13e   : > { %876 = vst.msk [vmem:[#allocation3 + $0x488] sm:$0xff] %vm846_vm5, %v809_v61  ;;  %v944_v43 = vpop.permute.xlu0 %943 }
 0x13f   : > { %1040 = vst.msk [vmem:[#allocation3] sm:$0xff] %vm1039_vm6, %v944_v43  ;;  %1541 = vrot.lane.b32.xlu1 %v7994_v1, %s7622_s11 }
 0x140   : > { %1925 = vrot.lane.b32.xlu0 %v8100_v17, %s7624_s13 }
 0x141   : > { %v813_v14 = vpop.permute.xlu1 %812 }
 0x142   : > { %878 = vst.msk [vmem:[#allocation3 + $0x4d8] sm:$0xff] %vm846_vm5, %v813_v14  ;;  %v948_v18 = vpop.permute.xlu0 %947 }
 0x143   : > { %1042 = vst.msk [vmem:[#allocation3 + $0x50] sm:$0xff] %vm1039_vm6, %v948_v18  ;;  %1734 = vrot.lane.b32.xlu1 %v7940_v47, %s7623_s12  ;;  %v1083_v47 = vld [vmem:[#allocation2 + $0xd0] sm:$0xff] }
 0x144   : > { %963 = vrot.lane.b32.xlu0 %v7982_v60, %s7619_s8 }
 0x145   : > { %v946_v42 = vpop.permute.xlu1 %945 }
 0x146   : > { %1041 = vst.msk [vmem:[#allocation3 + $0x28] sm:$0xff] %vm1039_vm6, %v946_v42  ;;  %v952_v34 = vpop.permute.xlu0 %951 }
 0x147   : > { %1044 = vst.msk [vmem:[#allocation3 + $0xa0] sm:$0xff] %vm1039_vm6, %v952_v34  ;;  %1927 = vrot.lane.b32.xlu1 %v8114_v20, %s7624_s13 }
 0x148   : > { %1156 = vrot.lane.b32.xlu0 %v1082_v31, %s7620_s9 }
 0x149   : > { %v950_v35 = vpop.permute.xlu1 %949 }
 0x14a   : > { %1043 = vst.msk [vmem:[#allocation3 + $0x78] sm:$0xff] %vm1039_vm6, %v950_v35  ;;  %v956_v36 = vpop.permute.xlu0 %955 }
 0x14b   : > { %1046 = vst.msk [vmem:[#allocation3 + $0xf0] sm:$0xff] %vm1039_vm6, %v956_v36  ;;  %965 = vrot.lane.b32.xlu1 %v7994_v1, %s7619_s8 }
 0x14c   : > { %1349 = vrot.lane.b32.xlu0 %v8100_v17, %s7621_s10 }
 0x14d   : > { %v954_v60 = vpop.permute.xlu1 %953 }
 0x14e   : > { %1045 = vst.msk [vmem:[#allocation3 + $0xc8] sm:$0xff] %vm1039_vm6, %v954_v60  ;;  %v1139_v57 = vpop.permute.xlu0 %1138  ;;  %v1861_v60 = vld [vmem:[#allocation2 + $0x149] sm:$0xff] }
 0x14f   : > { %1234 = vst.msk [vmem:[#allocation3 + $0x28] sm:$0xff] %vm1232_vm7, %v1139_v57  ;;  %1158 = vrot.lane.b32.xlu1 %v1083_v47, %s7620_s9 }
 0x150   : > { %1543 = vrot.lane.b32.xlu0 %v7986_v62, %s7622_s11 }
 0x151   : > { %v1137_v63 = vpop.permute.xlu1 %1136 }
 0x152   : > { %1233 = vst.msk [vmem:[#allocation3] sm:$0xff] %vm1232_vm7, %v1137_v63  ;;  %v1332_v1 = vpop.permute.xlu0 %1331  ;;  %v393_v63 = vld [vmem:[%s7827_s28 + $0xf0] sm:$0xff] }
 0x153   : > { %1427 = vst.msk [vmem:[#allocation3 + $0x28] sm:$0xff] %vm1425_vm8, %v1332_v1  ;;  %1351 = vrot.lane.b32.xlu1 %v8114_v20, %s7621_s10 }
 0x154   : > { %1736 = vrot.lane.b32.xlu0 %v1662_v52, %s7623_s12  ;;  %427 = vst.msk [vmem:[#allocation2 + $0x208] sm:$0xff] %vm396_vm3, %v393_v63 }
 0x155   : > { %v1330_v17 = vpop.permute.xlu1 %1329 }
 0x156   : > { %1426 = vst.msk [vmem:[#allocation3] sm:$0xff] %vm1425_vm8, %v1330_v17  ;;  %v1526_v53 = vpop.permute.xlu0 %1525 }
 0x157   : > { %1621 = vst.msk [vmem:[#allocation3 + $0x28] sm:$0xff] %vm1619_vm9, %v1526_v53  ;;  %1545 = vrot.lane.b32.xlu1 %v7998_v3, %s7622_s11 }
 0x158   : > { %1929 = vrot.lane.b32.xlu0 %v8108_v19, %s7624_s13 }
 0x159   : > { %v1524_v39 = vpop.permute.xlu1 %1523 }
 0x15a   : > { %1620 = vst.msk [vmem:[#allocation3] sm:$0xff] %vm1619_vm9, %v1524_v39  ;;  %v1141_v20 = vpop.permute.xlu0 %1140 }
 0x15b   : > { %1235 = vst.msk [vmem:[#allocation3 + $0x50] sm:$0xff] %vm1232_vm7, %v1141_v20  ;;  %1738 = vrot.lane.b32.xlu1 %v1663_v38, %s7623_s12 }
 0x15c   : > { %967 = vrot.lane.b32.xlu0 %v7986_v62, %s7619_s8 }
 0x15d   : > { %v1717_v46 = vpop.permute.xlu1 %1716 }
 0x15e   : > { %1813 = vst.msk [vmem:[#allocation3] sm:$0xff] %vm1812_vm10, %v1717_v46  ;;  %v1910_v29 = vpop.permute.xlu0 %1909  ;;  %v394_v46 = vld [vmem:[%s7827_s28 + $0xf8] sm:$0xff] }
 0x15f   : > { %2006 = vst.msk [vmem:[#allocation3] sm:$0xff] %vm2005_vm11, %v1910_v29  ;;  %1931 = vrot.lane.b32.xlu1 %v8122_v22, %s7624_s13 }
 0x160   : > { %2039 = vst.msk [vmem:[#allocation3] sm:$0xff] %vm2038_vm12, %v7616_v0  ;;  %1160 = vrot.lane.b32.xlu0 %v1662_v52, %s7620_s9  ;;  %v1669_v52 = vld [vmem:[#allocation2 + $0x150] sm:$0xff] }
 0x161   : > { %v1719_v37 = vpop.permute.xlu1 %1718  ;;  %428 = vst.msk [vmem:[#allocation2 + $0x210] sm:$0xff] %vm396_vm3, %v394_v46  ;;  %v1483_v46 = vld [vmem:[#allocation2 + $0x1c7] sm:$0xff]  ;;  %vm4822_vm3 = vcmask 1048064  }
 0x162   : > { %1814 = vst.msk [vmem:[#allocation3 + $0x28] sm:$0xff] %vm1812_vm10, %v1719_v37  ;;  %v1334_v62 = vpop.permute.xlu0 %1333 }
 0x163   : > { %1428 = vst.msk [vmem:[#allocation3 + $0x50] sm:$0xff] %vm1425_vm8, %v1334_v62  ;;  %969 = vrot.lane.b32.xlu1 %v7998_v3, %s7619_s8 }
 0x164   : > { %1353 = vrot.lane.b32.xlu0 %v8108_v19, %s7621_s10  ;;  %v1664_v19 = vld [vmem:[#allocation2 + $0x108] sm:$0xff] }
 0x165   : > { %v1143_v25 = vpop.permute.xlu1 %1142 }
 0x166   : > { %1236 = vst.msk [vmem:[#allocation3 + $0x78] sm:$0xff] %vm1232_vm7, %v1143_v25  ;;  %v1336_v30 = vpop.permute.xlu0 %1335 }
 0x167   : > { %1429 = vst.msk [vmem:[#allocation3 + $0x78] sm:$0xff] %vm1425_vm8, %v1336_v30  ;;  %1162 = vrot.lane.b32.xlu1 %v1663_v38, %s7620_s9  ;;  %v2071_v13 = vld [vmem:[#allocation3] sm:$0xff]  ;;  %v1862_v38 = vld [vmem:[#allocation2 + $0x151] sm:$0xff] }
 0x168   : > { %1547 = vrot.lane.b32.xlu0 %v7996_v2, %s7622_s11  ;;  %7281 = vmatprep.mubr.msk.f32.mxu0 %vm2115_vm13, %v2071_v13  ;;  %2534 = vst.msk [vmem:[#allocation3] sm:$0xff] %vm2469_vm14, %v7933_v45  ;;  %v1665_v45 = vld [vmem:[#allocation2 + $0x110] sm:$0xff]  ;;  %v1670_v13 = vld [vmem:[#allocation2 + $0x168] sm:$0xff] }
 0x169   : > { %v1912_v3 = vpop.permute.xlu1 %1911 }
 0x16a   : > { %2007 = vst.msk [vmem:[#allocation3 + $0x28] sm:$0xff] %vm2005_vm11, %v1912_v3  ;;  %v1530_v54 = vpop.permute.xlu0 %1529 }
 0x16b   : > { %2040 = vst.msk [vmem:[#allocation3 + $0x28] sm:$0xff] %vm2038_vm12, %v7616_v0  ;;  %1355 = vrot.lane.b32.xlu1 %v8122_v22, %s7621_s10 }
 0x16c   : > { %1623 = vst.msk [vmem:[#allocation3 + $0x78] sm:$0xff] %vm1619_vm9, %v1530_v54  ;;  %1740 = vrot.lane.b32.xlu0 %v1664_v19, %s7623_s12 }
 0x16d   : > { %v1528_v51 = vpop.permute.xlu1 %1527 }
 0x16e   : > { %1622 = vst.msk [vmem:[#allocation3 + $0x50] sm:$0xff] %vm1619_vm9, %v1528_v51  ;;  %v1723_v56 = vpop.permute.xlu0 %1722  ;;  %v1671_v51 = vld [vmem:[#allocation2 + $0x170] sm:$0xff] }
 0x16f   : > { %1816 = vst.msk [vmem:[#allocation3 + $0x78] sm:$0xff] %vm1812_vm10, %v1723_v56  ;;  %1549 = vrot.lane.b32.xlu1 %v8009_v5, %s7622_s11 }
 0x170   : > { %1933 = vrot.lane.b32.xlu0 %v8116_v21, %s7624_s13 }
 0x171   : > { %v1721_v44 = vpop.permute.xlu1 %1720 }
 0x172   : > { %1815 = vst.msk [vmem:[#allocation3 + $0x50] sm:$0xff] %vm1812_vm10, %v1721_v44  ;;  %v1916_v55 = vpop.permute.xlu0 %1915  ;;  %v2072_v22 = vld [vmem:[#allocation3 + $0x28] sm:$0xff] }
 0x173   : > { %2009 = vst.msk [vmem:[#allocation3 + $0x78] sm:$0xff] %vm2005_vm11, %v1916_v55  ;;  %1742 = vrot.lane.b32.xlu1 %v1665_v45, %s7623_s12  ;;  %7282 = vmatmul.mubr.msk.f32.vlgmr.msra.gmra.mxu0 %vm2115_vm13, %v2072_v22  ;;  %v1864_v55 = vld [vmem:[#allocation2 + $0x171] sm:$0xff] }
 0x174   : > { %2042 = vst.msk [vmem:[#allocation3 + $0x78] sm:$0xff] %vm2038_vm12, %v7616_v0  ;;  %971 = vrot.lane.b32.xlu0 %v7996_v2, %s7619_s8 }
 0x175   : > { %v1914_v50 = vpop.permute.xlu1 %1913 }
 0x176   : > { %2008 = vst.msk [vmem:[#allocation3 + $0x50] sm:$0xff] %vm2005_vm11, %v1914_v50  ;;  %v1147_v32 = vpop.permute.xlu0 %1146 }
 0x177   : > { %2041 = vst.msk [vmem:[#allocation3 + $0x50] sm:$0xff] %vm2038_vm12, %v7616_v0  ;;  %1935 = vrot.lane.b32.xlu1 %v8127_v24, %s7624_s13 }
 0x178   : > { %1238 = vst.msk [vmem:[#allocation3 + $0xc8] sm:$0xff] %vm1232_vm7, %v1147_v32  ;;  %1164 = vrot.lane.b32.xlu0 %v1664_v19, %s7620_s9  ;;  %v1863_v19 = vld [vmem:[#allocation2 + $0x169] sm:$0xff] }
 0x179   : > { %v1145_v23 = vpop.permute.xlu1 %1144 }
 0x17a   : > { %1237 = vst.msk [vmem:[#allocation3 + $0xa0] sm:$0xff] %vm1232_vm7, %v1145_v23  ;;  %v1340_v59 = vpop.permute.xlu0 %1339 }
 0x17b   : > { %1431 = vst.msk [vmem:[#allocation3 + $0xc8] sm:$0xff] %vm1425_vm8, %v1340_v59  ;;  %973 = vrot.lane.b32.xlu1 %v8009_v5, %s7619_s8  ;;  %v2074_v10 = vld [vmem:[#allocation3 + $0x78] sm:$0xff] }
 0x17c   : > { %1357 = vrot.lane.b32.xlu0 %v8116_v21, %s7621_s10  ;;  %v1280_v5 = vld [vmem:[#allocation2 + $0x111] sm:$0xff]  ;;  %v1666_v21 = vld [vmem:[#allocation2 + $0x128] sm:$0xff] }
 0x17d   : > { %v1338_v2 = vpop.permute.xlu1 %1337 }
 0x17e   : > { %1430 = vst.msk [vmem:[#allocation3 + $0xa0] sm:$0xff] %vm1425_vm8, %v1338_v2  ;;  %v1534_v41 = vpop.permute.xlu0 %1533  ;;  %v2073_v24 = vld [vmem:[#allocation3 + $0x50] sm:$0xff] }
 0x17f   : > { %1625 = vst.msk [vmem:[#allocation3 + $0xc8] sm:$0xff] %vm1619_vm9, %v1534_v41  ;;  %1166 = vrot.lane.b32.xlu1 %v1665_v45, %s7620_s9  ;;  %7284 = vmatprep.mubr.msk.f32.mxu0 %vm2115_vm13, %v2073_v24  ;;  %v1672_v41 = vld [vmem:[#allocation2 + $0x188] sm:$0xff] }
 0x180   : > { %1551 = vrot.lane.b32.xlu0 %v8007_v4, %s7622_s11  ;;  %7285 = vmatmul.mubr.msk.f32.gmra.mxu0 %vm2115_vm13, %v2074_v10 }
 0x181   : > { %v1532_v26 = vpop.permute.xlu1 %1531 }
 0x182   : > { %1624 = vst.msk [vmem:[#allocation3 + $0xa0] sm:$0xff] %vm1619_vm9, %v1532_v26  ;;  %v1727_v16 = vpop.permute.xlu0 %1726 }
 0x183   : > { %1818 = vst.msk [vmem:[#allocation3 + $0xc8] sm:$0xff] %vm1812_vm10, %v1727_v16  ;;  %1359 = vrot.lane.b32.xlu1 %v1280_v5, %s7621_s10  ;;  %v1865_v5 = vld [vmem:[#allocation2 + $0x189] sm:$0xff] }
 0x184   : > { %1744 = vrot.lane.b32.xlu0 %v1666_v21, %s7623_s12  ;;  %v901_v16 = vld [vmem:[#allocation2 + $0x187] sm:$0xff] }
 0x185   : > { %v1725_v27 = vpop.permute.xlu1 %1724 }
 0x186   : > { %1817 = vst.msk [vmem:[#allocation3 + $0xa0] sm:$0xff] %vm1812_vm10, %v1725_v27  ;;  %v1920_v28 = vpop.permute.xlu0 %1919 }
 0x187   : > { %2011 = vst.msk [vmem:[#allocation3 + $0xc8] sm:$0xff] %vm2005_vm11, %v1920_v28  ;;  %1553 = vrot.lane.b32.xlu1 %v8020_v7, %s7622_s11  ;;  %v1866_v28 = vld [vmem:[#allocation2 + $0x191] sm:$0xff] }
 0x188   : > { %2044 = vst.msk [vmem:[#allocation3 + $0xc8] sm:$0xff] %vm2038_vm12, %v7616_v0  ;;  %1937 = vrot.lane.b32.xlu0 %v1859_v49, %s7624_s13 }
 0x189   : > { %v1918_v33 = vpop.permute.xlu1 %1917 }
 0x18a   : > { %2010 = vst.msk [vmem:[#allocation3 + $0xa0] sm:$0xff] %vm2005_vm11, %v1918_v33  ;;  %v1149_v40 = vpop.permute.xlu0 %1148  ;;  %v902_v33 = vld [vmem:[#allocation2 + $0x18f] sm:$0xff] }
 0x18b   : > { %2043 = vst.msk [vmem:[#allocation3 + $0xa0] sm:$0xff] %vm2038_vm12, %v7616_v0  ;;  %1746 = vrot.lane.b32.xlu1 %v1667_v58, %s7623_s12 }
 0x18c   : > { %1239 = vst.msk [vmem:[#allocation3 + $0xf0] sm:$0xff] %vm1232_vm7, %v1149_v40  ;;  %975 = vrot.lane.b32.xlu0 %v8007_v4, %s7619_s8 }
 0x18d   : > { %v958_v61 = vpop.permute.xlu1 %957 }
 0x18e   : > { %1047 = vst.msk [vmem:[#allocation3 + $0x118] sm:$0xff] %vm1039_vm6, %v958_v61  ;;  %v1342_v43 = vpop.permute.xlu0 %1341 }
 0x18f   : > { %1432 = vst.msk [vmem:[#allocation3 + $0xf0] sm:$0xff] %vm1425_vm8, %v1342_v43  ;;  %1939 = vrot.lane.b32.xlu1 %v1860_v48, %s7624_s13  ;;  %v2076_v18 = vld [vmem:[#allocation3 + $0xc8] sm:$0xff] }
 0x190   : > { %1168 = vrot.lane.b32.xlu0 %v1666_v21, %s7620_s9 }
 0x191   : > { %v1151_v14 = vpop.permute.xlu1 %1150 }
 0x192   : > { %1240 = vst.msk [vmem:[#allocation3 + $0x118] sm:$0xff] %vm1232_vm7, %v1151_v14  ;;  %v1536_v42 = vpop.permute.xlu0 %1535  ;;  %v2075_v31 = vld [vmem:[#allocation3 + $0xa0] sm:$0xff] }
 0x193   : > { %1626 = vst.msk [vmem:[#allocation3 + $0xf0] sm:$0xff] %vm1619_vm9, %v1536_v42  ;;  %977 = vrot.lane.b32.xlu1 %v8020_v7, %s7619_s8  ;;  %7287 = vmatprep.mubr.msk.f32.mxu0 %vm2115_vm13, %v2075_v31  ;;  %v1668_v7 = vld [vmem:[#allocation2 + $0x148] sm:$0xff] }
 0x194   : > { %1361 = vrot.lane.b32.xlu0 %v1859_v49, %s7621_s10  ;;  %7288 = vmatmul.mubr.msk.f32.gmra.mxu0 %vm2115_vm13, %v2076_v18  ;;  %v1481_v14 = vld [vmem:[#allocation2 + $0x1a7] sm:$0xff] }
 0x195   : > { %v1344_v4 = vpop.permute.xlu1 %1343  ;;  %v1674_v31 = vld [vmem:[#allocation2 + $0x1a8] sm:$0xff] }
 0x196   : > { %1433 = vst.msk [vmem:[#allocation3 + $0x118] sm:$0xff] %vm1425_vm8, %v1344_v4  ;;  %v1729_v34 = vpop.permute.xlu0 %1728 }
 0x197   : > { %1819 = vst.msk [vmem:[#allocation3 + $0xf0] sm:$0xff] %vm1812_vm10, %v1729_v34  ;;  %1170 = vrot.lane.b32.xlu1 %v1667_v58, %s7620_s9  ;;  %v1482_v34 = vld [vmem:[#allocation2 + $0x1af] sm:$0xff] }
 0x198   : > { %1555 = vrot.lane.b32.xlu0 %v8011_v6, %s7622_s11 }
 0x199   : > { %v1538_v35 = vpop.permute.xlu1 %1537 }
 0x19a   : > { %1627 = vst.msk [vmem:[#allocation3 + $0x118] sm:$0xff] %vm1619_vm9, %v1538_v35  ;;  %v1922_v36 = vpop.permute.xlu0 %1921 }
 0x19b   : > { %2012 = vst.msk [vmem:[#allocation3 + $0xf0] sm:$0xff] %vm2005_vm11, %v1922_v36  ;;  %1363 = vrot.lane.b32.xlu1 %v1860_v48, %s7621_s10 }
 0x19c   : > { %2045 = vst.msk [vmem:[#allocation3 + $0xf0] sm:$0xff] %vm2038_vm12, %v7616_v0  ;;  %1748 = vrot.lane.b32.xlu0 %v1668_v7, %s7623_s12 }
 0x19d   : > { %v1731_v47 = vpop.permute.xlu1 %1730 }
 0x19e   : > { %1820 = vst.msk [vmem:[#allocation3 + $0x118] sm:$0xff] %vm1812_vm10, %v1731_v47  ;;  %v960_v57 = vpop.permute.xlu0 %959  ;;  %v1675_v47 = vld [vmem:[#allocation2 + $0x1b0] sm:$0xff] }
 0x19f   : > { %1048 = vst.msk [vmem:[#allocation3 + $0x140] sm:$0xff] %vm1039_vm6, %v960_v57  ;;  %1557 = vrot.lane.b32.xlu1 %v8024_v9, %s7622_s11 }
 0x1a0   : > { %1941 = vrot.lane.b32.xlu0 %v1861_v60, %s7624_s13 }
 0x1a1   : > { %v1924_v1 = vpop.permute.xlu1 %1923 }
 0x1a2   : > { %2013 = vst.msk [vmem:[#allocation3 + $0x118] sm:$0xff] %vm2005_vm11, %v1924_v1  ;;  %v1153_v17 = vpop.permute.xlu0 %1152 }
 0x1a3   : > { %2046 = vst.msk [vmem:[#allocation3 + $0x118] sm:$0xff] %vm2038_vm12, %v7616_v0  ;;  %1750 = vrot.lane.b32.xlu1 %v1669_v52, %s7623_s12  ;;  %v2077_v53 = vld [vmem:[#allocation3 + $0xf0] sm:$0xff] }
 0x1a4   : > { %1241 = vst.msk [vmem:[#allocation3 + $0x140] sm:$0xff] %vm1232_vm7, %v1153_v17  ;;  %979 = vrot.lane.b32.xlu0 %v8011_v6, %s7619_s8  ;;  %7290 = vmatprep.mubr.msk.f32.mxu0 %vm2115_vm13, %v2077_v53 }
 0x1a5   : > { %v962_v39 = vpop.permute.xlu1 %961 }
 0x1a6   : > { %1049 = vst.msk [vmem:[#allocation3 + $0x168] sm:$0xff] %vm1039_vm6, %v962_v39  ;;  %v1346_v20 = vpop.permute.xlu0 %1345 }
 0x1a7   : > { %1434 = vst.msk [vmem:[#allocation3 + $0x140] sm:$0xff] %vm1425_vm8, %v1346_v20  ;;  %1943 = vrot.lane.b32.xlu1 %v1862_v38, %s7624_s13 }
 0x1a8   : > { %1172 = vrot.lane.b32.xlu0 %v1668_v7, %s7620_s9  ;;  %v1867_v7 = vld [vmem:[#allocation2 + $0x1a9] sm:$0xff] }
 0x1a9   : > { %v1155_v29 = vpop.permute.xlu1 %1154 }
 0x1aa   : > { %1242 = vst.msk [vmem:[#allocation3 + $0x168] sm:$0xff] %vm1232_vm7, %v1155_v29  ;;  %v1540_v6 = vpop.permute.xlu0 %1539  ;;  %v2078_v37 = vld [vmem:[#allocation3 + $0x118] sm:$0xff] }
 0x1ab   : > { %1628 = vst.msk [vmem:[#allocation3 + $0x140] sm:$0xff] %vm1619_vm9, %v1540_v6  ;;  %981 = vrot.lane.b32.xlu1 %v8024_v9, %s7619_s8  ;;  %7291 = vmatmul.mubr.msk.f32.gmra.mxu0 %vm2115_vm13, %v2078_v37  ;;  %v1676_v37 = vld [vmem:[#allocation2 + $0x1c8] sm:$0xff] }
 0x1ac   : > { %1365 = vrot.lane.b32.xlu0 %v1861_v60, %s7621_s10 }
 0x1ad   : > { %v1348_v62 = vpop.permute.xlu1 %1347 }
 0x1ae   : > { %1435 = vst.msk [vmem:[#allocation3 + $0x168] sm:$0xff] %vm1425_vm8, %v1348_v62  ;;  %v1733_v25 = vpop.permute.xlu0 %1732 }
 0x1af   : > { %1821 = vst.msk [vmem:[#allocation3 + $0x140] sm:$0xff] %vm1812_vm10, %v1733_v25  ;;  %1174 = vrot.lane.b32.xlu1 %v1669_v52, %s7620_s9  ;;  %v1868_v52 = vld [vmem:[#allocation2 + $0x1b1] sm:$0xff] }
 0x1b0   : > { %1559 = vrot.lane.b32.xlu0 %v8022_v8, %s7622_s11  ;;  %v1484_v25 = vld [vmem:[#allocation2 + $0x1cf] sm:$0xff] }
 0x1b1   : > { %v1542_v30 = vpop.permute.xlu1 %1541 }
 0x1b2   : > { %1629 = vst.msk [vmem:[#allocation3 + $0x168] sm:$0xff] %vm1619_vm9, %v1542_v30  ;;  %v1926_v9 = vpop.permute.xlu0 %1925 }
 0x1b3   : > { %2014 = vst.msk [vmem:[#allocation3 + $0x140] sm:$0xff] %vm2005_vm11, %v1926_v9  ;;  %1367 = vrot.lane.b32.xlu1 %v1862_v38, %s7621_s10 }
 0x1b4   : > { %2047 = vst.msk [vmem:[#allocation3 + $0x140] sm:$0xff] %vm2038_vm12, %v7616_v0  ;;  %1752 = vrot.lane.b32.xlu0 %v1670_v13, %s7623_s12 }
 0x1b5   : > { %v1735_v3 = vpop.permute.xlu1 %1734 }
 0x1b6   : > { %1822 = vst.msk [vmem:[#allocation3 + $0x168] sm:$0xff] %vm1812_vm10, %v1735_v3  ;;  %v964_v54 = vpop.permute.xlu0 %963  ;;  %v1677_v3 = vld [vmem:[#allocation2 + $0x1d0] sm:$0xff] }
 0x1b7   : > { %1050 = vst.msk [vmem:[#allocation3 + $0x190] sm:$0xff] %vm1039_vm6, %v964_v54  ;;  %1561 = vrot.lane.b32.xlu1 %v8034_v12, %s7622_s11 }
 0x1b8   : > { %1945 = vrot.lane.b32.xlu0 %v1863_v19, %s7624_s13 }
 0x1b9   : > { %v1928_v56 = vpop.permute.xlu1 %1927 }
 0x1ba   : > { %2015 = vst.msk [vmem:[#allocation3 + $0x168] sm:$0xff] %vm2005_vm11, %v1928_v56  ;;  %v1157_v45 = vpop.permute.xlu0 %1156  ;;  %v1870_v56 = vld [vmem:[#allocation2 + $0x1d1] sm:$0xff] }
 0x1bb   : > { %2048 = vst.msk [vmem:[#allocation3 + $0x168] sm:$0xff] %vm2038_vm12, %v7616_v0  ;;  %1754 = vrot.lane.b32.xlu1 %v1671_v51, %s7623_s12  ;;  %v2079_v44 = vld [vmem:[#allocation3 + $0x140] sm:$0xff] }
 0x1bc   : > { %1243 = vst.msk [vmem:[#allocation3 + $0x190] sm:$0xff] %vm1232_vm7, %v1157_v45  ;;  %983 = vrot.lane.b32.xlu0 %v8022_v8, %s7619_s8  ;;  %7293 = vmatprep.mubr.msk.f32.mxu0 %vm2115_vm13, %v2079_v44 }
 0x1bd   : > { %v966_v22 = vpop.permute.xlu1 %965 }
 0x1be   : > { %1051 = vst.msk [vmem:[#allocation3 + $0x1b8] sm:$0xff] %vm1039_vm6, %v966_v22  ;;  %v1350_v50 = vpop.permute.xlu0 %1349 }
 0x1bf   : > { %1436 = vst.msk [vmem:[#allocation3 + $0x190] sm:$0xff] %vm1425_vm8, %v1350_v50  ;;  %1947 = vrot.lane.b32.xlu1 %v1864_v55, %s7624_s13 }
 0x1c0   : > { %1176 = vrot.lane.b32.xlu0 %v1670_v13, %s7620_s9  ;;  %v1869_v13 = vld [vmem:[#allocation2 + $0x1c9] sm:$0xff] }
 0x1c1   : > { %v1159_v32 = vpop.permute.xlu1 %1158 }
 0x1c2   : > { %1244 = vst.msk [vmem:[#allocation3 + $0x1b8] sm:$0xff] %vm1232_vm7, %v1159_v32  ;;  %v1544_v23 = vpop.permute.xlu0 %1543  ;;  %v2080_v59 = vld [vmem:[#allocation3 + $0x168] sm:$0xff] }
 0x1c3   : > { %1630 = vst.msk [vmem:[#allocation3 + $0x190] sm:$0xff] %vm1619_vm9, %v1544_v23  ;;  %985 = vrot.lane.b32.xlu1 %v8034_v12, %s7619_s8  ;;  %7294 = vmatmul.mubr.msk.f32.gmra.mxu0 %vm2115_vm13, %v2080_v59  ;;  %v1485_v23 = vld [vmem:[#allocation2 + $0x1e7] sm:$0xff] }
 0x1c4   : > { %1369 = vrot.lane.b32.xlu0 %v1863_v19, %s7621_s10 }
 0x1c5   : > { %v1352_v8 = vpop.permute.xlu1 %1351 }
 0x1c6   : > { %1437 = vst.msk [vmem:[#allocation3 + $0x1b8] sm:$0xff] %vm1425_vm8, %v1352_v8  ;;  %v1737_v2 = vpop.permute.xlu0 %1736 }
 0x1c7   : > { %1823 = vst.msk [vmem:[#allocation3 + $0x190] sm:$0xff] %vm1812_vm10, %v1737_v2  ;;  %1178 = vrot.lane.b32.xlu1 %v1671_v51, %s7620_s9  ;;  %v1678_v2 = vld [vmem:[#allocation2 + $0x1e8] sm:$0xff] }
 0x1c8   : > { %1563 = vrot.lane.b32.xlu0 %v8032_v11, %s7622_s11  ;;  %v1673_v11 = vld [vmem:[#allocation2 + $0x190] sm:$0xff] }
 0x1c9   : > { %v1546_v10 = vpop.permute.xlu1 %1545 }
 0x1ca   : > { %1631 = vst.msk [vmem:[#allocation3 + $0x1b8] sm:$0xff] %vm1619_vm9, %v1546_v10  ;;  %v1930_v12 = vpop.permute.xlu0 %1929 }
 0x1cb   : > { %2016 = vst.msk [vmem:[#allocation3 + $0x190] sm:$0xff] %vm2005_vm11, %v1930_v12  ;;  %1371 = vrot.lane.b32.xlu1 %v1864_v55, %s7621_s10 }
 0x1cc   : > { %2049 = vst.msk [vmem:[#allocation3 + $0x190] sm:$0xff] %vm2038_vm12, %v7616_v0  ;;  %1756 = vrot.lane.b32.xlu0 %v1672_v41, %s7623_s12 }
 0x1cd   : > { %v1739_v24 = vpop.permute.xlu1 %1738 }
 0x1ce   : > { %1824 = vst.msk [vmem:[#allocation3 + $0x1b8] sm:$0xff] %vm1812_vm10, %v1739_v24  ;;  %v968_v26 = vpop.permute.xlu0 %967  ;;  %v1871_v24 = vld [vmem:[#allocation2 + $0x1e9] sm:$0xff] }
 0x1cf   : > { %1052 = vst.msk [vmem:[#allocation3 + $0x1e0] sm:$0xff] %vm1039_vm6, %v968_v26  ;;  %1565 = vrot.lane.b32.xlu1 %v8043_v15, %s7622_s11  ;;  %v3960_v26 = vld [vmem:[%s11314_s3 + $0x78] sm:$0xff] }
 0x1d0   : > { %1949 = vrot.lane.b32.xlu0 %v1865_v5, %s7624_s13  ;;  %4085 = vmatpush1.msra.mxu1 %v3960_v26 }
 0x1d1   : > { %v1932_v21 = vpop.permute.xlu1 %1931  ;;  %4086 = vmatprep.subr.mxu1 %v7616_v0 }
 0x1d2   : > { %2017 = vst.msk [vmem:[#allocation3 + $0x1b8] sm:$0xff] %vm2005_vm11, %v1932_v21  ;;  %v1161_v27 = vpop.permute.xlu0 %1160  ;;  %v3959_v21 = vld [vmem:[%s11314_s3 + $0x70] sm:$0xff] }
 0x1d3   : > { %2050 = vst.msk [vmem:[#allocation3 + $0x1b8] sm:$0xff] %vm2038_vm12, %v7616_v0  ;;  %1758 = vrot.lane.b32.xlu1 %v1673_v11, %s7623_s12  ;;  %v2081_v49 = vld [vmem:[#allocation3 + $0x190] sm:$0xff]  ;;  %4087 = vmatpush1.msra.mxu1 %v3959_v21  ;;  %v1682_v21 = vld [vmem:[#allocation2 + $0x228] sm:$0xff] }
 0x1d4   : > { %1245 = vst.msk [vmem:[#allocation3 + $0x1e0] sm:$0xff] %vm1232_vm7, %v1161_v27  ;;  %987 = vrot.lane.b32.xlu0 %v901_v16, %s7619_s8  ;;  %7296 = vmatprep.mubr.msk.f32.mxu0 %vm2115_vm13, %v2081_v49  ;;  %v3958_v49 = vld [vmem:[%s11314_s3 + $0x68] sm:$0xff] }
 0x1d5   : > { %v970_v15 = vpop.permute.xlu1 %969  ;;  %4088 = vmatprep.subr.mxu1 %v7616_v0 }
 0x1d6   : > { %1053 = vst.msk [vmem:[#allocation3 + $0x208] sm:$0xff] %vm1039_vm6, %v970_v15  ;;  %v1354_v58 = vpop.permute.xlu0 %1353  ;;  %4089 = vmatpush1.msra.mxu1 %v3958_v49  ;;  %v1872_v15 = vld [vmem:[#allocation2 + $0x1f1] sm:$0xff] }
 0x1d7   : > { %1438 = vst.msk [vmem:[#allocation3 + $0x1e0] sm:$0xff] %vm1425_vm8, %v1354_v58  ;;  %1951 = vrot.lane.b32.xlu1 %v1866_v28, %s7624_s13  ;;  %v3957_v58 = vld [vmem:[%s11314_s3 + $0x60] sm:$0xff]  ;;  %4090 = vmatprep.subr.mxu1 %v7616_v0 }
 0x1d8   : > { %1180 = vrot.lane.b32.xlu0 %v1672_v41, %s7620_s9  ;;  %v1486_v41 = vld [vmem:[#allocation2 + $0x1ef] sm:$0xff]  ;;  %4091 = vmatpush1.msra.mxu1 %v3957_v58 }
 0x1d9   : > { %v1163_v40 = vpop.permute.xlu1 %1162  ;;  %4092 = vmatprep.subr.mxu1 %v7616_v0 }
 0x1da   : > { %1246 = vst.msk [vmem:[#allocation3 + $0x208] sm:$0xff] %vm1232_vm7, %v1163_v40  ;;  %v1548_v48 = vpop.permute.xlu0 %1547  ;;  %v2082_v61 = vld [vmem:[#allocation3 + $0x1b8] sm:$0xff] }
 0x1db   : > { %1632 = vst.msk [vmem:[#allocation3 + $0x1e0] sm:$0xff] %vm1619_vm9, %v1548_v48  ;;  %989 = vrot.lane.b32.xlu1 %v902_v33, %s7619_s8  ;;  %7297 = vmatmul.mubr.msk.f32.gmra.mxu0 %vm2115_vm13, %v2082_v61  ;;  %v3956_v48 = vld [vmem:[%s11314_s3 + $0x58] sm:$0xff]  ;;  %v3955_v61 = vld [vmem:[%s11314_s3 + $0x50] sm:$0xff] }
 0x1dc   : > { %1373 = vrot.lane.b32.xlu0 %v1865_v5, %s7621_s10  ;;  %4093 = vmatpush1.msra.mxu1 %v3956_v48  ;;  %v1490_v48 = vld [vmem:[#allocation2 + $0x22f] sm:$0xff] }
 0x1dd   : > { %v1356_v43 = vpop.permute.xlu1 %1355  ;;  %4094 = vmatprep.subr.mxu1 %v7616_v0 }
 0x1de   : > { %1439 = vst.msk [vmem:[#allocation3 + $0x208] sm:$0xff] %vm1425_vm8, %v1356_v43  ;;  %v1741_v18 = vpop.permute.xlu0 %1740  ;;  %4095 = vmatpush1.msra.mxu1 %v3955_v61  ;;  %v3970_v61 = vld [vmem:[%s11314_s3 + $0xc8] sm:$0xff] }
 0x1df   : > { %1825 = vst.msk [vmem:[#allocation3 + $0x1e0] sm:$0xff] %vm1812_vm10, %v1741_v18  ;;  %1182 = vrot.lane.b32.xlu1 %v1673_v11, %s7620_s9  ;;  %v1679_v11 = vld [vmem:[#allocation2 + $0x1f0] sm:$0xff]  ;;  %4096 = vmatprep.subr.mxu1 %v7616_v0 }
 0x1e0   : > { %1567 = vrot.lane.b32.xlu0 %v1481_v14, %s7622_s11 }
 0x1e1   : > { %v1550_v42 = vpop.permute.xlu1 %1549 }
 0x1e2   : > { %1633 = vst.msk [vmem:[#allocation3 + $0x208] sm:$0xff] %vm1619_vm9, %v1550_v42  ;;  %v1934_v4 = vpop.permute.xlu0 %1933  ;;  %v3954_v42 = vld [vmem:[%s11314_s3 + $0x48] sm:$0xff] }
 0x1e3   : > { %2018 = vst.msk [vmem:[#allocation3 + $0x1e0] sm:$0xff] %vm2005_vm11, %v1934_v4  ;;  %1375 = vrot.lane.b32.xlu1 %v1866_v28, %s7621_s10  ;;  %4097 = vmatpush1.msra.mxu1 %v3954_v42 }
 0x1e4   : > { %2051 = vst.msk [vmem:[#allocation3 + $0x1e0] sm:$0xff] %vm2038_vm12, %v7616_v0  ;;  %1760 = vrot.lane.b32.xlu0 %v1674_v31, %s7623_s12  ;;  %4098 = vmatprep.subr.mxu1 %v7616_v0 }
 0x1e5   : > { %v1743_v35 = vpop.permute.xlu1 %1742 }
 0x1e6   : > { %1826 = vst.msk [vmem:[#allocation3 + $0x208] sm:$0xff] %vm1812_vm10, %v1743_v35  ;;  %v972_v36 = vpop.permute.xlu0 %971 }
 0x1e7   : > { %1054 = vst.msk [vmem:[#allocation3 + $0x230] sm:$0xff] %vm1039_vm6, %v972_v36  ;;  %1569 = vrot.lane.b32.xlu1 %v1482_v34, %s7622_s11  ;;  %v3951_v36 = vld [vmem:[%s11314_s3 + $0x30] sm:$0xff] }
 0x1e8   : > { %1953 = vrot.lane.b32.xlu0 %v1867_v7, %s7624_s13 }
 0x1e9   : > { %v1936_v60 = vpop.permute.xlu1 %1935 }
 0x1ea   : > { %2019 = vst.msk [vmem:[#allocation3 + $0x208] sm:$0xff] %vm2005_vm11, %v1936_v60  ;;  %v1165_v57 = vpop.permute.xlu0 %1164  ;;  %v1680_v60 = vld [vmem:[#allocation2 + $0x208] sm:$0xff] }
 0x1eb   : > { %2052 = vst.msk [vmem:[#allocation3 + $0x208] sm:$0xff] %vm2038_vm12, %v7616_v0  ;;  %1762 = vrot.lane.b32.xlu1 %v1675_v47, %s7623_s12  ;;  %v2083_v63 = vld [vmem:[#allocation3 + $0x1e0] sm:$0xff] }
 0x1ec   : > { %1247 = vst.msk [vmem:[#allocation3 + $0x230] sm:$0xff] %vm1232_vm7, %v1165_v57  ;;  %991 = vrot.lane.b32.xlu0 %v1481_v14, %s7619_s8  ;;  %7299 = vmatprep.mubr.msk.f32.mxu0 %vm2115_vm13, %v2083_v63  ;;  %v3950_v63 = vld [vmem:[%s11314_s3 + $0x28] sm:$0xff] }
 0x1ed   : > { %v974_v1 = vpop.permute.xlu1 %973 }
 0x1ee   : > { %1055 = vst.msk [vmem:[#allocation3 + $0x258] sm:$0xff] %vm1039_vm6, %v974_v1  ;;  %v1358_v17 = vpop.permute.xlu0 %1357  ;;  %v3949_v1 = vld [vmem:[%s11314_s3 + $0x20] sm:$0xff] }
 0x1ef   : > { %1440 = vst.msk [vmem:[#allocation3 + $0x230] sm:$0xff] %vm1425_vm8, %v1358_v17  ;;  %1955 = vrot.lane.b32.xlu1 %v1868_v52, %s7624_s13 }
 0x1f0   : > { %1184 = vrot.lane.b32.xlu0 %v1674_v31, %s7620_s9  ;;  %v3953_v31 = vld [vmem:[%s11314_s3 + $0x40] sm:$0xff] }
 0x1f1   : > { %v1167_v53 = vpop.permute.xlu1 %1166  ;;  %4099 = vmatpush1.msra.mxu1 %v3953_v31  ;;  %v3969_v31 = vld [vmem:[%s11314_s3 + $0xc0] sm:$0xff] }
 0x1f2   : > { %1248 = vst.msk [vmem:[#allocation3 + $0x258] sm:$0xff] %vm1232_vm7, %v1167_v53  ;;  %v1552_v38 = vpop.permute.xlu0 %1551  ;;  %v2084_v39 = vld [vmem:[#allocation3 + $0x208] sm:$0xff]  ;;  %4100 = vmatprep.subr.mxu1 %v7616_v0 }
 0x1f3   : > { %1634 = vst.msk [vmem:[#allocation3 + $0x230] sm:$0xff] %vm1619_vm9, %v1552_v38  ;;  %993 = vrot.lane.b32.xlu1 %v1482_v34, %s7619_s8  ;;  %7300 = vmatmul.mubr.msk.f32.gmra.mxu0 %vm2115_vm13, %v2084_v39  ;;  %v1487_v34 = vld [vmem:[#allocation2 + $0x207] sm:$0xff]  ;;  %v3948_v39 = vld [vmem:[%s11314_s3 + $0x18] sm:$0xff] }
 0x1f4   : > { %1377 = vrot.lane.b32.xlu0 %v1867_v7, %s7621_s10  ;;  %v3952_v7 = vld [vmem:[%s11314_s3 + $0x38] sm:$0xff]  ;;  %v1873_v53 = vld [vmem:[#allocation2 + $0x209] sm:$0xff] }
 0x1f5   : > { %v1360_v20 = vpop.permute.xlu1 %1359  ;;  %4101 = vmatpush1.msra.mxu1 %v3952_v7 }
 0x1f6   : > { %1441 = vst.msk [vmem:[#allocation3 + $0x258] sm:$0xff] %vm1425_vm8, %v1360_v20  ;;  %v1745_v29 = vpop.permute.xlu0 %1744  ;;  %4102 = vmatprep.subr.mxu1 %v7616_v0  ;;  %v1681_v20 = vld [vmem:[#allocation2 + $0x210] sm:$0xff] }
 0x1f7   : > { %1827 = vst.msk [vmem:[#allocation3 + $0x230] sm:$0xff] %vm1812_vm10, %v1745_v29  ;;  %1186 = vrot.lane.b32.xlu1 %v1675_v47, %s7620_s9  ;;  %4103 = vmatpush1.msra.mxu1 %v3951_v36 }
 0x1f8   : > { %1571 = vrot.lane.b32.xlu0 %v1483_v46, %s7622_s11  ;;  %4104 = vmatprep.subr.mxu1 %v7616_v0 }
 0x1f9   : > { %v1554_v6 = vpop.permute.xlu1 %1553  ;;  %4105 = vmatpush1.msra.mxu1 %v3950_v63  ;;  %v3967_v63 = vld [vmem:[%s11314_s3 + $0xb0] sm:$0xff] }
 0x1fa   : > { %1635 = vst.msk [vmem:[#allocation3 + $0x258] sm:$0xff] %vm1619_vm9, %v1554_v6  ;;  %v1938_v62 = vpop.permute.xlu0 %1937  ;;  %4106 = vmatprep.subr.mxu1 %v7616_v0  ;;  %v8730_v6 = vld [vmem:[#allocation4] ss:$0 sm:$0xff] }
 0x1fb   : > { %2020 = vst.msk [vmem:[#allocation3 + $0x230] sm:$0xff] %vm2005_vm11, %v1938_v62  ;;  %1379 = vrot.lane.b32.xlu1 %v1868_v52, %s7621_s10  ;;  %v1488_v52 = vld [vmem:[#allocation2 + $0x20f] sm:$0xff]  ;;  %4107 = vmatpush1.msra.mxu1 %v3949_v1 }
 0x1fc   : > { %2053 = vst.msk [vmem:[#allocation3 + $0x230] sm:$0xff] %vm2038_vm12, %v7616_v0  ;;  %1764 = vrot.lane.b32.xlu0 %v1676_v37, %s7623_s12  ;;  %4108 = vmatprep.subr.mxu1 %v7616_v0 }
 0x1fd   : > { %v1747_v30 = vpop.permute.xlu1 %1746  ;;  %4109 = vmatpush1.msra.mxu1 %v3948_v39 }
 0x1fe   : > { %1828 = vst.msk [vmem:[#allocation3 + $0x258] sm:$0xff] %vm1812_vm10, %v1747_v30  ;;  %v976_v9 = vpop.permute.xlu0 %975  ;;  %4110 = vmatprep.subr.mxu1 %v7616_v0  ;;  %v3946_v30 = vld [vmem:[%s11314_s3 + $0x8] sm:$0xff] }
 0x1ff   : > { %1056 = vst.msk [vmem:[#allocation3 + $0x280] sm:$0xff] %vm1039_vm6, %v976_v9  ;;  %1573 = vrot.lane.b32.xlu1 %v1484_v25, %s7622_s11 }
 0x200   : > { %1957 = vrot.lane.b32.xlu0 %v1869_v13, %s7624_s13 }
 0x201   : > { %v1940_v19 = vpop.permute.xlu1 %1939 }
 0x202   : > { %2021 = vst.msk [vmem:[#allocation3 + $0x258] sm:$0xff] %vm2005_vm11, %v1940_v19  ;;  %v1169_v54 = vpop.permute.xlu0 %1168 }
 0x203   : > { %2054 = vst.msk [vmem:[#allocation3 + $0x258] sm:$0xff] %vm2038_vm12, %v7616_v0  ;;  %1766 = vrot.lane.b32.xlu1 %v1677_v3, %s7623_s12  ;;  %v2085_v51 = vld [vmem:[#allocation3 + $0x230] sm:$0xff] }
 0x204   : > { %1249 = vst.msk [vmem:[#allocation3 + $0x280] sm:$0xff] %vm1232_vm7, %v1169_v54  ;;  %995 = vrot.lane.b32.xlu0 %v1483_v46, %s7619_s8  ;;  %7302 = vmatprep.mubr.msk.f32.mxu0 %vm2115_vm13, %v2085_v51  ;;  %v3947_v46 = vld [vmem:[%s11314_s3 + $0x10] sm:$0xff]  ;;  %v3945_v54 = vld [vmem:[%s11314_s3] sm:$0xff] }
 0x205   : > { %v978_v45 = vpop.permute.xlu1 %977  ;;  %4111 = vmatpush1.msra.mxu1 %v3947_v46 }
 0x206   : > { %1057 = vst.msk [vmem:[#allocation3 + $0x2a8] sm:$0xff] %vm1039_vm6, %v978_v45  ;;  %v1362_v44 = vpop.permute.xlu0 %1361  ;;  %4112 = vmatprep.subr.mxu1 %v7616_v0 }
 0x207   : > { %1442 = vst.msk [vmem:[#allocation3 + $0x280] sm:$0xff] %vm1425_vm8, %v1362_v44  ;;  %1959 = vrot.lane.b32.xlu1 %v1870_v56, %s7624_s13  ;;  %4113 = vmatpush1.msra.mxu1 %v3946_v30  ;;  %v3976_v44 = vld [vmem:[%s11314_s3 + $0xf8] sm:$0xff]  ;;  %v2566_v30 = vld [vmem:[#allocation2 + $0x8] sm:$0xff] }
 0x208   : > { %1188 = vrot.lane.b32.xlu0 %v1676_v37, %s7620_s9  ;;  %4114 = vmatprep.subr.mxu1 %v7616_v0 }
 0x209   : > { %v1171_v55 = vpop.permute.xlu1 %1170  ;;  %4115 = vmatpush1.msra.mxu1 %v3945_v54 }
 0x20a   : > { %1250 = vst.msk [vmem:[#allocation3 + $0x2a8] sm:$0xff] %vm1232_vm7, %v1171_v55  ;;  %v1556_v22 = vpop.permute.xlu0 %1555  ;;  %v2086_v50 = vld [vmem:[#allocation3 + $0x258] sm:$0xff]  ;;  %4116 = vmatprep.subr.mxu1 %v7616_v0 }
 0x20b   : > { %1636 = vst.msk [vmem:[#allocation3 + $0x280] sm:$0xff] %vm1619_vm9, %v1556_v22  ;;  %997 = vrot.lane.b32.xlu1 %v1484_v25, %s7619_s8  ;;  %7303 = vmatmul.mubr.msk.f32.gmra.mxu0 %vm2115_vm13, %v2086_v50 }
 0x20c   : > { %1381 = vrot.lane.b32.xlu0 %v1869_v13, %s7621_s10  ;;  %v8742_v13 = vld [vmem:[#allocation2 + $0x211] sm:$0xff]  ;;  %4117 = vmatpush2.msra.mxu1 %v3976_v44 }
 0x20d   : > { %v1364_v32 = vpop.permute.xlu1 %1363  ;;  %4118 = vmatprep.subr.mxu1 %v7616_v0 }
 0x20e   : > { %1443 = vst.msk [vmem:[#allocation3 + $0x2a8] sm:$0xff] %vm1425_vm8, %v1364_v32  ;;  %v1749_v59 = vpop.permute.xlu0 %1748 }
 0x20f   : > { %1829 = vst.msk [vmem:[#allocation3 + $0x280] sm:$0xff] %vm1812_vm10, %v1749_v59  ;;  %1190 = vrot.lane.b32.xlu1 %v1677_v3, %s7620_s9  ;;  %v3974_v59 = vld [vmem:[%s11314_s3 + $0xe8] sm:$0xff] }
 0x210   : > { %1575 = vrot.lane.b32.xlu0 %v1485_v23, %s7622_s11 }
 0x211   : > { %v1558_v8 = vpop.permute.xlu1 %1557 }
 0x212   : > { %1637 = vst.msk [vmem:[#allocation3 + $0x2a8] sm:$0xff] %vm1619_vm9, %v1558_v8  ;;  %v1942_v10 = vpop.permute.xlu0 %1941 }
 0x213   : > { %2022 = vst.msk [vmem:[#allocation3 + $0x280] sm:$0xff] %vm2005_vm11, %v1942_v10  ;;  %1383 = vrot.lane.b32.xlu1 %v1870_v56, %s7621_s10 }
 0x214   : > { %2055 = vst.msk [vmem:[#allocation3 + $0x280] sm:$0xff] %vm2038_vm12, %v7616_v0  ;;  %1768 = vrot.lane.b32.xlu0 %v1678_v2, %s7623_s12 }
 0x215   : > { %v1751_v12 = vpop.permute.xlu1 %1750 }
 0x216   : > { %1830 = vst.msk [vmem:[#allocation3 + $0x2a8] sm:$0xff] %vm1812_vm10, %v1751_v12  ;;  %v980_v5 = vpop.permute.xlu0 %979 }
 0x217   : > { %1058 = vst.msk [vmem:[#allocation3 + $0x2d0] sm:$0xff] %vm1039_vm6, %v980_v5  ;;  %1577 = vrot.lane.b32.xlu1 %v1486_v41, %s7622_s11  ;;  %v3972_v5 = vld [vmem:[%s11314_s3 + $0xd8] sm:$0xff] }
 0x218   : > { %1961 = vrot.lane.b32.xlu0 %v1871_v24, %s7624_s13 }
 0x219   : > { %v1944_v16 = vpop.permute.xlu1 %1943 }
 0x21a   : > { %2023 = vst.msk [vmem:[#allocation3 + $0x2a8] sm:$0xff] %vm2005_vm11, %v1944_v16  ;;  %v1173_v27 = vpop.permute.xlu0 %1172 }
 0x21b   : > { %2056 = vst.msk [vmem:[#allocation3 + $0x2a8] sm:$0xff] %vm2038_vm12, %v7616_v0  ;;  %1770 = vrot.lane.b32.xlu1 %v1679_v11, %s7623_s12  ;;  %v2087_v28 = vld [vmem:[#allocation3 + $0x280] sm:$0xff] }
 0x21c   : > { %1251 = vst.msk [vmem:[#allocation3 + $0x2d0] sm:$0xff] %vm1232_vm7, %v1173_v27  ;;  %999 = vrot.lane.b32.xlu0 %v1485_v23, %s7619_s8  ;;  %7305 = vmatprep.mubr.msk.f32.mxu0 %vm2115_vm13, %v2087_v28  ;;  %v3975_v23 = vld [vmem:[%s11314_s3 + $0xf0] sm:$0xff] }
 0x21d   : > { %v982_v33 = vpop.permute.xlu1 %981  ;;  %4119 = vmatpush2.msra.mxu1 %v3975_v23 }
 0x21e   : > { %1059 = vst.msk [vmem:[#allocation3 + $0x2f8] sm:$0xff] %vm1039_vm6, %v982_v33  ;;  %v1366_v40 = vpop.permute.xlu0 %1365  ;;  %4120 = vmatprep.subr.mxu1 %v7616_v0 }
 0x21f   : > { %1444 = vst.msk [vmem:[#allocation3 + $0x2d0] sm:$0xff] %vm1425_vm8, %v1366_v40  ;;  %1963 = vrot.lane.b32.xlu1 %v1872_v15, %s7624_s13  ;;  %4121 = vmatpush2.msra.mxu1 %v3974_v59 }
 0x220   : > { %1192 = vrot.lane.b32.xlu0 %v1678_v2, %s7620_s9  ;;  %v1489_v2 = vld [vmem:[#allocation2 + $0x227] sm:$0xff]  ;;  %4122 = vmatprep.subr.mxu1 %v7616_v0 }
 0x221   : > { %v1175_v43 = vpop.permute.xlu1 %1174 }
 0x222   : > { %1252 = vst.msk [vmem:[#allocation3 + $0x2f8] sm:$0xff] %vm1232_vm7, %v1175_v43  ;;  %v1560_v14 = vpop.permute.xlu0 %1559  ;;  %v2088_v18 = vld [vmem:[#allocation3 + $0x2a8] sm:$0xff] }
 0x223   : > { %1638 = vst.msk [vmem:[#allocation3 + $0x2d0] sm:$0xff] %vm1619_vm9, %v1560_v14  ;;  %1001 = vrot.lane.b32.xlu1 %v1486_v41, %s7619_s8  ;;  %7306 = vmatmul.mubr.msk.f32.gmra.mxu0 %vm2115_vm13, %v2088_v18  ;;  %v3973_v41 = vld [vmem:[%s11314_s3 + $0xe0] sm:$0xff]  ;;  %v1875_v18 = vld [vmem:[#allocation2 + $0x229] sm:$0xff] }
 0x224   : > { %1385 = vrot.lane.b32.xlu0 %v1871_v24, %s7621_s10  ;;  %4123 = vmatpush2.msra.mxu1 %v3973_v41 }
 0x225   : > { %v1368_v4 = vpop.permute.xlu1 %1367  ;;  %4124 = vmatprep.subr.mxu1 %v7616_v0 }
 0x226   : > { %1445 = vst.msk [vmem:[#allocation3 + $0x2f8] sm:$0xff] %vm1425_vm8, %v1368_v4  ;;  %v1753_v35 = vpop.permute.xlu0 %1752  ;;  %4125 = vmatpush2.msra.mxu1 %v3972_v5  ;;  %v3980_v4 = vld [vmem:[%s11314_s3 + $0x118] sm:$0xff]  ;;  %v3961_v5 = vld [vmem:[%s11314_s3 + $0x80] sm:$0xff] }
 0x227   : > { %1831 = vst.msk [vmem:[#allocation3 + $0x2d0] sm:$0xff] %vm1812_vm10, %v1753_v35  ;;  %1194 = vrot.lane.b32.xlu1 %v1679_v11, %s7620_s9  ;;  %4126 = vmatprep.subr.mxu1 %v7616_v0  ;;  %v3968_v35 = vld [vmem:[%s11314_s3 + $0xb8] sm:$0xff] }
 0x228   : > { %1579 = vrot.lane.b32.xlu0 %v1487_v34, %s7622_s11  ;;  %7329 = vmatprep.subr.mxu0 %v3980_v4 }
 0x229   : > { %v1562_v47 = vpop.permute.xlu1 %1561  ;;  %7330 = vmatpush3.msra.mxu0 %v3980_v4 }
 0x22a   : > { %1639 = vst.msk [vmem:[#allocation3 + $0x2f8] sm:$0xff] %vm1619_vm9, %v1562_v47  ;;  %v1946_v57 = vpop.permute.xlu0 %1945 }
 0x22b   : > { %2024 = vst.msk [vmem:[#allocation3 + $0x2d0] sm:$0xff] %vm2005_vm11, %v1946_v57  ;;  %1387 = vrot.lane.b32.xlu1 %v1872_v15, %s7621_s10  ;;  %v3971_v15 = vld [vmem:[%s11314_s3 + $0xd0] sm:$0xff] }
 0x22c   : > { %2057 = vst.msk [vmem:[#allocation3 + $0x2d0] sm:$0xff] %vm2038_vm12, %v7616_v0  ;;  %1772 = vrot.lane.b32.xlu0 %v1680_v60, %s7623_s12  ;;  %4127 = vmatpush2.msra.mxu1 %v3971_v15 }
 0x22d   : > { %v1755_v17 = vpop.permute.xlu1 %1754  ;;  %4128 = vmatprep.subr.mxu1 %v7616_v0 }
 0x22e   : > { %1832 = vst.msk [vmem:[#allocation3 + $0x2f8] sm:$0xff] %vm1812_vm10, %v1755_v17  ;;  %v984_v38 = vpop.permute.xlu0 %983  ;;  %4129 = vmatpush2.msra.mxu1 %v3970_v61 }
 0x22f   : > { %1060 = vst.msk [vmem:[#allocation3 + $0x320] sm:$0xff] %vm1039_vm6, %v984_v38  ;;  %1581 = vrot.lane.b32.xlu1 %v1488_v52, %s7622_s11  ;;  %4130 = vmatprep.subr.mxu1 %v7616_v0  ;;  %v3966_v38 = vld [vmem:[%s11314_s3 + $0xa8] sm:$0xff] }
 0x230   : > { %1965 = vrot.lane.b32.xlu0 %v1873_v53, %s7624_s13  ;;  %4131 = vmatpush2.msra.mxu1 %v3969_v31 }
 0x231   : > { %v1948_v29 = vpop.permute.xlu1 %1947  ;;  %4132 = vmatprep.subr.mxu1 %v7616_v0 }
 0x232   : > { %2025 = vst.msk [vmem:[#allocation3 + $0x2f8] sm:$0xff] %vm2005_vm11, %v1948_v29  ;;  %v1177_v37 = vpop.permute.xlu0 %1176  ;;  %4133 = vmatpush2.msra.mxu1 %v3968_v35  ;;  %v3978_v29 = vld [vmem:[%s11314_s3 + $0x108] sm:$0xff] }
 0x233   : > { %2058 = vst.msk [vmem:[#allocation3 + $0x2f8] sm:$0xff] %vm2038_vm12, %v7616_v0  ;;  %1774 = vrot.lane.b32.xlu1 %v1681_v20, %s7623_s12  ;;  %v7283_v62 = vpop.f32.mrf.mxu0  ;;  %v2089_v25 = vld [vmem:[#allocation3 + $0x2d0] sm:$0xff]  ;;  %4134 = vmatprep.subr.mxu1 %v7616_v0 }
 0x234   : > { %1253 = vst.msk [vmem:[#allocation3 + $0x320] sm:$0xff] %vm1232_vm7, %v1177_v37  ;;  %1003 = vrot.lane.b32.xlu0 %v1487_v34, %s7619_s8  ;;  %v2284_v9 = vadd.f32 %v7283_v62, %v8730_v6  ;;  %7308 = vmatprep.mubr.msk.f32.mxu0 %vm2115_vm13, %v2089_v25  ;;  %v1683_v34 = vld [vmem:[#allocation2 + $0x230] sm:$0xff]  ;;  %v3965_v62 = vld [vmem:[%s11314_s3 + $0xa0] sm:$0xff] }
 0x235   : > { %v986_v3 = vpop.permute.xlu1 %985  ;;  %v2278_v19 = vpop.f32.mrf.mxu0  ;;  %4135 = vmatpush2.msra.mxu1 %v3967_v63 }
 0x236   : > { %1061 = vst.msk [vmem:[#allocation3 + $0x348] sm:$0xff] %vm1039_vm6, %v986_v3  ;;  %v1370_v51 = vpop.permute.xlu0 %1369  ;;  %v2438_v56 = vmax.f32 %v2284_v9, 0.0  ;;  %v2279_v45 = vadd.f32 %v8730_v6, %v2278_v19  ;;  %4136 = vmatprep.subr.mxu1 %v7616_v0  ;;  %v3977_v3 = vld [vmem:[%s11314_s3 + $0x100] sm:$0xff]  ;;  %v2503_v19 = vld [vmem:[#allocation2 + $0xf] sm:$0xff] }
 0x237   : > { %1446 = vst.msk [vmem:[#allocation3 + $0x320] sm:$0xff] %vm1425_vm8, %v1370_v51  ;;  %1967 = vrot.lane.b32.xlu1 %v8742_v13, %s7624_s13  ;;  %4137 = vmatpush2.msra.mxu1 %v3966_v38 }
 0x238   : > { %1196 = vrot.lane.b32.xlu0 %v1680_v60, %s7620_s9  ;;  %2471 = vst.msk [vmem:[#allocation2 + $0x30] sm:$0xff] %vm2469_vm14, %v2438_v56  ;;  %v2437_v55 = vmax.f32 %v2279_v45, 0.0  ;;  %v3979_v60 = vld [vmem:[%s11314_s3 + $0x110] sm:$0xff]  ;;  %4138 = vmatprep.subr.mxu1 %v7616_v0  ;;  %2535 = vst.msk [vmem:[#allocation3 + $0x28] sm:$0xff] %vm2469_vm14, %v2503_v19  ;;  %v3964_v56 = vld [vmem:[%s11314_s3 + $0x98] sm:$0xff] }
 0x239   : > { %v1179_v22 = vpop.permute.xlu1 %1178  ;;  %7331 = vmatprep.subr.mxu0 %v3979_v60  ;;  %4139 = vmatpush2.msra.mxu1 %v3965_v62  ;;  %v8901_v45 = vld [vmem:[#allocation2 + $0x9] sm:$0xff] }
 0x23a   : > { %1254 = vst.msk [vmem:[#allocation3 + $0x348] sm:$0xff] %vm1232_vm7, %v1179_v22  ;;  %v1564_v50 = vpop.permute.xlu0 %1563  ;;  %v2090_v32 = vld [vmem:[#allocation3 + $0x2f8] sm:$0xff]  ;;  %7332 = vmatpush3.msra.mxu0 %v3979_v60  ;;  %4140 = vmatprep.subr.mxu1 %v7616_v0 }
 0x23b   : > { %2470 = vst.msk [vmem:[#allocation2 + $0x28] sm:$0xff] %vm2469_vm14, %v2437_v55  ;;  %1005 = vrot.lane.b32.xlu1 %v1488_v52, %s7619_s8  ;;  %7309 = vmatmul.mubr.msk.f32.gmra.mxu0 %vm2115_vm13, %v2090_v32  ;;  %v1876_v52 = vld [vmem:[#allocation2 + $0x231] sm:$0xff] }
 0x23c   : > { %1640 = vst.msk [vmem:[#allocation3 + $0x320] sm:$0xff] %vm1619_vm9, %v1564_v50  ;;  %1389 = vrot.lane.b32.xlu0 %v1873_v53, %s7621_s10  ;;  %7333 = vmatprep.subr.mxu0 %v3978_v29  ;;  %v3963_v50 = vld [vmem:[%s11314_s3 + $0x90] sm:$0xff] }
 0x23d   : > { %v1372_v8 = vpop.permute.xlu1 %1371  ;;  %7334 = vmatpush3.msra.mxu0 %v3978_v29  ;;  %4141 = vmatpush2.msra.mxu1 %v3964_v56 }
 0x23e   : > { %1447 = vst.msk [vmem:[#allocation3 + $0x348] sm:$0xff] %vm1425_vm8, %v1372_v8  ;;  %v1757_v10 = vpop.permute.xlu0 %1756  ;;  %7335 = vmatprep.subr.mxu0 %v3977_v3  ;;  %4142 = vmatprep.subr.mxu1 %v7616_v0 }
 0x23f   : > { %1833 = vst.msk [vmem:[#allocation3 + $0x320] sm:$0xff] %vm1812_vm10, %v1757_v10  ;;  %1198 = vrot.lane.b32.xlu1 %v1681_v20, %s7620_s9  ;;  %v8782_v12 = vld [vmem:[#allocation2 + $0x30] sm:$0xff]  ;;  %s7625_s9 = smov 64   ;;  %7336 = vmatpush3.msra.mxu0 %v3977_v3  ;;  %v3962_v10 = vld [vmem:[%s11314_s3 + $0x88] sm:$0xff] }
 0x240   : > { %1583 = vrot.lane.b32.xlu0 %v1489_v2, %s7622_s11  ;;  %v7286_v24 = vpop.f32.mrf.mxu0  ;;  %3178 = vst.msk [vmem:[#allocation3 + $0x30] sm:$0xff] %vm2469_vm14, %v8782_v12  ;;  %6022 = vmatprep.subr.mxu0 %v7616_v0  ;;  %v8913_v59 = vld [vmem:[#allocation2 + $0x31] sm:$0xff] }
 0x241   : > { %v1566_v26 = vpop.permute.xlu1 %1565  ;;  %v2294_v11 = vadd.f32 %v7286_v24, %v8730_v6  ;;  %4143 = vmatpush2.msra.mxu1 %v3963_v50 }
 0x242   : > { %v8792_v16 = vld [vmem:[#allocation2 + $0x27] sm:$0xff]  ;;  %1641 = vst.msk [vmem:[#allocation3 + $0x348] sm:$0xff] %vm1619_vm9, %v1566_v26  ;;  %v1950_v27 = vpop.permute.xlu0 %1949  ;;  %v2288_v49 = vpop.f32.mrf.mxu0  ;;  %v2505_v58 = vld [vmem:[#allocation2 + $0x2f] sm:$0xff]  ;;  %4144 = vmatprep.subr.mxu1 %v7616_v0 }
 0x243   : > { %v8795_v28 = vld [vmem:[#allocation2 + $0x28] sm:$0xff]  ;;  %2536 = vst.msk [vmem:[#allocation3 + $0x50] sm:$0xff] %vm2469_vm14, %v8792_v16  ;;  %v2440_v33 = vmax.f32 %v2294_v11, 0.0  ;;  %1391 = vrot.lane.b32.xlu1 %v8742_v13, %s7621_s10  ;;  %v2289_v40 = vadd.f32 %v8730_v6, %v2288_v49  ;;  %2537 = vst.msk [vmem:[#allocation3 + $0x78] sm:$0xff] %vm2469_vm14, %v2505_v58  ;;  %4145 = vmatpush2.msra.mxu1 %v3962_v10 }
 0x244   : > { %2026 = vst.msk [vmem:[#allocation3 + $0x320] sm:$0xff] %vm2005_vm11, %v1950_v27  ;;  %1776 = vrot.lane.b32.xlu0 %v1682_v21, %s7623_s12  ;;  %v8834_v36 = vld [vmem:[#allocation2 + $0x29] sm:$0xff]  ;;  %4146 = vmatprep.subr.mxu1 %v7616_v0 }
 0x245   : > { %3177 = vst.msk [vmem:[#allocation3 + $0x8] sm:$0xff] %vm2469_vm14, %v8795_v28  ;;  %2473 = vst.msk [vmem:[#allocation2 + $0x50] sm:$0xff] %vm2469_vm14, %v2440_v33  ;;  %v2439_v43 = vmax.f32 %v2289_v40, 0.0  ;;  %v1759_v14 = vpop.permute.xlu1 %1758  ;;  %v2567_v21 = vld [vmem:[#allocation2 + $0x10] sm:$0xff]  ;;  %4147 = vmatpush2.msra.mxu1 %v3961_v5 }
 0x246   : > { %2059 = vst.msk [vmem:[#allocation3 + $0x320] sm:$0xff] %vm2038_vm12, %v7616_v0  ;;  %v988_v42 = vpop.permute.xlu0 %987  ;;  %6247 = vmatprep.subr.mxu1 %v7616_v0 }
 0x247   : > { %1834 = vst.msk [vmem:[#allocation3 + $0x348] sm:$0xff] %vm1812_vm10, %v1759_v14  ;;  %1585 = vrot.lane.b32.xlu1 %v1490_v48, %s7622_s11 }
 0x248   : > { %2472 = vst.msk [vmem:[#allocation2 + $0x48] sm:$0xff] %vm2469_vm14, %v2439_v43  ;;  %1969 = vrot.lane.b32.xlu0 %v1875_v18, %s7624_s13 }
 0x249   : > { %1062 = vst.msk [vmem:[#allocation3 + $0x370] sm:$0xff] %vm1039_vm6, %v988_v42  ;;  %v1952_v7 = vpop.permute.xlu1 %1951 }
 0x24a   : > { %2027 = vst.msk [vmem:[#allocation3 + $0x348] sm:$0xff] %vm2005_vm11, %v1952_v7  ;;  %v1181_v47 = vpop.permute.xlu0 %1180 }
 0x24b   : > { %2060 = vst.msk [vmem:[#allocation3 + $0x348] sm:$0xff] %vm2038_vm12, %v7616_v0  ;;  %1778 = vrot.lane.b32.xlu1 %v1683_v34, %s7623_s12  ;;  %v2953_v34 = vld [vmem:[#allocation2 + $0x2f] sm:$0xff] }
 0x24c   : > { %1255 = vst.msk [vmem:[#allocation3 + $0x370] sm:$0xff] %vm1232_vm7, %v1181_v47  ;;  %3273 = vrot.lane.b32.xlu0 %v8834_v36, %s7624_s13  ;;  %v8851_v1 = vld [vmem:[#allocation2 + $0x50] sm:$0xff] }
 0x24d   : > { %v2091_v57 = vld [vmem:[#allocation3 + $0x320] sm:$0xff]  ;;  %v8853_v17 = vld [vmem:[#allocation2 + $0x51] sm:$0xff]  ;;  %v990_v53 = vpop.permute.xlu1 %989  ;;  %3180 = vst.msk [vmem:[#allocation3 + $0x80] sm:$0xff] %vm2469_vm14, %v8851_v1 }
 0x24e   : > { %7311 = vmatprep.mubr.msk.f32.mxu0 %vm2115_vm13, %v2091_v57  ;;  %3818 = vst.msk [vmem:[#allocation3 + $0x38] sm:$0xff] %vm2469_vm14, %v8853_v17  ;;  %v1374_v39 = vpop.permute.xlu0 %1373 }
 0x24f   : > { %1063 = vst.msk [vmem:[#allocation3 + $0x398] sm:$0xff] %vm1039_vm6, %v990_v53  ;;  %v8864_v20 = vld [vmem:[#allocation2 + $0x47] sm:$0xff]  ;;  %1971 = vrot.lane.b32.xlu1 %v1876_v52, %s7624_s13  ;;  %v2507_v13 = vld [vmem:[#allocation2 + $0x4f] sm:$0xff] }
 0x250   : > { %v8866_v46 = vld [vmem:[#allocation2 + $0x48] sm:$0xff]  ;;  %1448 = vst.msk [vmem:[#allocation3 + $0x370] sm:$0xff] %vm1425_vm8, %v1374_v39  ;;  %3465 = vrot.lane.b32.xlu0 %v8864_v20, %s7625_s9 }
 0x251   : > { %v8873_v37 = vld [vmem:[#allocation2 + $0x49] sm:$0xff]  ;;  %3179 = vst.msk [vmem:[#allocation3 + $0x58] sm:$0xff] %vm2469_vm14, %v8866_v46  ;;  %v1183_v9 = vpop.permute.xlu1 %1182  ;;  %2539 = vst.msk [vmem:[#allocation3 + $0xc8] sm:$0xff] %vm2469_vm14, %v2507_v13 }
 0x252   : > { %v2506_v25 = vld [vmem:[#allocation2 + $0x47] sm:$0xff]  ;;  %3817 = vst.msk [vmem:[#allocation3 + $0x10] sm:$0xff] %vm2469_vm14, %v8873_v37  ;;  %v1568_v54 = vpop.permute.xlu0 %1567  ;;  %v8932_v11 = vld [vmem:[#allocation2 + $0x4f] sm:$0xff] }
 0x253   : > { %2538 = vst.msk [vmem:[#allocation3 + $0xa0] sm:$0xff] %vm2469_vm14, %v2506_v25  ;;  %v2092_v51 = vld [vmem:[#allocation3 + $0x348] sm:$0xff]  ;;  %2630 = vrot.lane.b32.xlu1 %v2566_v30, %s7624_s13 }
 0x254   : > { %1256 = vst.msk [vmem:[#allocation3 + $0x398] sm:$0xff] %vm1232_vm7, %v1183_v9  ;;  %7312 = vmatmul.mubr.msk.f32.gmra.mxu0 %vm2115_vm13, %v2092_v51  ;;  %3657 = vrot.lane.b32.xlu0 %v8866_v46, %s7626_s23  ;;  %v7289_v44 = vpop.f32.mrf.mxu0 }
 0x255   : > { %1642 = vst.msk [vmem:[#allocation3 + $0x370] sm:$0xff] %vm1619_vm9, %v1568_v54  ;;  %v1376_v55 = vpop.permute.xlu1 %1375  ;;  %v2304_v22 = vadd.f32 %v7289_v44, %v8730_v6 }
 0x256   : > { %1449 = vst.msk [vmem:[#allocation3 + $0x398] sm:$0xff] %vm1425_vm8, %v1376_v55  ;;  %v1761_v32 = vpop.permute.xlu0 %1760  ;;  %v2298_v23 = vpop.f32.mrf.mxu0 }
 0x257   : > { %1835 = vst.msk [vmem:[#allocation3 + $0x370] sm:$0xff] %vm1812_vm10, %v1761_v32  ;;  %2823 = vrot.lane.b32.xlu1 %v8901_v45, %s7625_s9  ;;  %v2442_v8 = vmax.f32 %v2304_v22, 0.0  ;;  %v2299_v2 = vadd.f32 %v8730_v6, %v2298_v23 }
 0x258   : > { %3275 = vrot.lane.b32.xlu0 %v8913_v59, %s7624_s13 }
 0x259   : > { %v1570_v41 = vpop.permute.xlu1 %1569  ;;  %2475 = vst.msk [vmem:[#allocation2 + $0x70] sm:$0xff] %vm2469_vm14, %v2442_v8  ;;  %v2441_v24 = vmax.f32 %v2299_v2, 0.0 }
 0x25a   : > { %1643 = vst.msk [vmem:[#allocation3 + $0x398] sm:$0xff] %vm1619_vm9, %v1570_v41  ;;  %v1954_v26 = vpop.permute.xlu0 %1953 }
 0x25b   : > { %2028 = vst.msk [vmem:[#allocation3 + $0x370] sm:$0xff] %vm2005_vm11, %v1954_v26  ;;  %3016 = vrot.lane.b32.xlu1 %v8792_v16, %s7626_s23  ;;  %v2760_v16 = vld [vmem:[#allocation2 + $0x11] sm:$0xff] }
 0x25c   : > { %2474 = vst.msk [vmem:[#allocation2 + $0x68] sm:$0xff] %vm2469_vm14, %v2441_v24  ;;  %3467 = vrot.lane.b32.xlu0 %v8932_v11, %s7625_s9 }
 0x25d   : > { %2061 = vst.msk [vmem:[#allocation3 + $0x370] sm:$0xff] %vm2038_vm12, %v7616_v0  ;;  %v1763_v27 = vpop.permute.xlu1 %1762 }
 0x25e   : > { %1836 = vst.msk [vmem:[#allocation3 + $0x398] sm:$0xff] %vm1812_vm10, %v1763_v27  ;;  %v992_v49 = vpop.permute.xlu0 %991 }
 0x25f   : > { %1064 = vst.msk [vmem:[#allocation3 + $0x3c0] sm:$0xff] %vm1039_vm6, %v992_v49  ;;  %2632 = vrot.lane.b32.xlu1 %v2567_v21, %s7624_s13 }
 0x260   : > { %3659 = vrot.lane.b32.xlu0 %v8851_v1, %s7626_s23  ;;  %v8945_v15 = vld [vmem:[#allocation2 + $0x71] sm:$0xff] }
 0x261   : > { %v3150_v58 = vld [vmem:[#allocation2 + $0x70] sm:$0xff]  ;;  %v1956_v33 = vpop.permute.xlu1 %1955  ;;  %3820 = vst.msk [vmem:[#allocation3 + $0x88] sm:$0xff] %vm2469_vm14, %v8945_v15 }
 0x262   : > { %3182 = vst.msk [vmem:[#allocation3 + $0xd0] sm:$0xff] %vm2469_vm14, %v3150_v58  ;;  %v1185_v40 = vpop.permute.xlu0 %1184  ;;  %v9005_v9 = vld [vmem:[#allocation2 + $0x70] sm:$0xff] }
 0x263   : > { %2029 = vst.msk [vmem:[#allocation3 + $0x398] sm:$0xff] %vm2005_vm11, %v1956_v33  ;;  %2825 = vrot.lane.b32.xlu1 %v2760_v16, %s7625_s9  ;;  %v8955_v61 = vld [vmem:[#allocation2 + $0x69] sm:$0xff] }
 0x264   : > { %2062 = vst.msk [vmem:[#allocation3 + $0x398] sm:$0xff] %vm2038_vm12, %v7616_v0  ;;  %v2093_v48 = vld [vmem:[#allocation3 + $0x370] sm:$0xff]  ;;  %v3149_v43 = vld [vmem:[#allocation2 + $0x68] sm:$0xff]  ;;  %3277 = vrot.lane.b32.xlu0 %v8873_v37, %s7624_s13 }
 0x265   : > { %1257 = vst.msk [vmem:[#allocation3 + $0x3c0] sm:$0xff] %vm1232_vm7, %v1185_v40  ;;  %7314 = vmatprep.mubr.msk.f32.mxu0 %vm2115_vm13, %v2093_v48  ;;  %v2508_v14 = vld [vmem:[#allocation2 + $0x67] sm:$0xff]  ;;  %v2509_v18 = vld [vmem:[#allocation2 + $0x6f] sm:$0xff]  ;;  %v994_v42 = vpop.permute.xlu1 %993 }
 0x266   : > { %3819 = vst.msk [vmem:[#allocation3 + $0x60] sm:$0xff] %vm2469_vm14, %v8955_v61  ;;  %3181 = vst.msk [vmem:[#allocation3 + $0xa8] sm:$0xff] %vm2469_vm14, %v3149_v43  ;;  %v8963_v31 = vld [vmem:[#allocation2 + $0x67] sm:$0xff]  ;;  %v1378_v4 = vpop.permute.xlu0 %1377  ;;  %v8995_v30 = vld [vmem:[#allocation2 + $0x6f] sm:$0xff] }
 0x267   : > { %2540 = vst.msk [vmem:[#allocation3 + $0xf0] sm:$0xff] %vm2469_vm14, %v2508_v14  ;;  %2541 = vst.msk [vmem:[#allocation3 + $0x118] sm:$0xff] %vm2469_vm14, %v2509_v18  ;;  %3018 = vrot.lane.b32.xlu1 %v2953_v34, %s7626_s23  ;;  %v8972_v7 = vld [vmem:[#allocation2 + $0x68] sm:$0xff] }
 0x268   : > { %1065 = vst.msk [vmem:[#allocation3 + $0x3e8] sm:$0xff] %vm1039_vm6, %v994_v42  ;;  %3469 = vrot.lane.b32.xlu0 %v8963_v31, %s7625_s9 }
 0x269   : > { %1450 = vst.msk [vmem:[#allocation3 + $0x3c0] sm:$0xff] %vm1425_vm8, %v1378_v4  ;;  %v1187_v35 = vpop.permute.xlu1 %1186 }
 0x26a   : > { %1258 = vst.msk [vmem:[#allocation3 + $0x3e8] sm:$0xff] %vm1232_vm7, %v1187_v35  ;;  %v1572_v47 = vpop.permute.xlu0 %1571 }
 0x26b   : > { %v2094_v60 = vld [vmem:[#allocation3 + $0x398] sm:$0xff]  ;;  %1644 = vst.msk [vmem:[#allocation3 + $0x3c0] sm:$0xff] %vm1619_vm9, %v1572_v47  ;;  %2634 = vrot.lane.b32.xlu1 %v8795_v28, %s7624_s13  ;;  %v7292_v57 = vpop.f32.mrf.mxu0 }
 0x26c   : > { %7315 = vmatmul.mubr.msk.f32.gmra.mxu0 %vm2115_vm13, %v2094_v60  ;;  %3661 = vrot.lane.b32.xlu0 %v8972_v7, %s7626_s23  ;;  %v2314_v63 = vadd.f32 %v7292_v57, %v8730_v6 }
 0x26d   : > { %v1380_v52 = vpop.permute.xlu1 %1379  ;;  %v2308_v53 = vpop.f32.mrf.mxu0 }
 0x26e   : > { %1451 = vst.msk [vmem:[#allocation3 + $0x3e8] sm:$0xff] %vm1425_vm8, %v1380_v52  ;;  %v1765_v38 = vpop.permute.xlu0 %1764  ;;  %v2444_v39 = vmax.f32 %v2314_v63, 0.0  ;;  %v2309_v29 = vadd.f32 %v8730_v6, %v2308_v53 }
 0x26f   : > { %1837 = vst.msk [vmem:[#allocation3 + $0x3c0] sm:$0xff] %vm1812_vm10, %v1765_v38  ;;  %2827 = vrot.lane.b32.xlu1 %v8834_v36, %s7625_s9 }
 0x270   : > { %3279 = vrot.lane.b32.xlu0 %v8853_v17, %s7624_s13  ;;  %2477 = vst.msk [vmem:[#allocation2 + $0x90] sm:$0xff] %vm2469_vm14, %v2444_v39  ;;  %v2443_v28 = vmax.f32 %v2309_v29, 0.0 }
 0x271   : > { %v1574_v62 = vpop.permute.xlu1 %1573 }
 0x272   : > { %1645 = vst.msk [vmem:[#allocation3 + $0x3e8] sm:$0xff] %vm1619_vm9, %v1574_v62  ;;  %v1958_v25 = vpop.permute.xlu0 %1957 }
 0x273   : > { %2476 = vst.msk [vmem:[#allocation2 + $0x88] sm:$0xff] %vm2469_vm14, %v2443_v28  ;;  %3020 = vrot.lane.b32.xlu1 %v8864_v20, %s7626_s23 }
 0x274   : > { %2030 = vst.msk [vmem:[#allocation3 + $0x3c0] sm:$0xff] %vm2005_vm11, %v1958_v25  ;;  %3471 = vrot.lane.b32.xlu0 %v8995_v30, %s7625_s9 }
 0x275   : > { %2063 = vst.msk [vmem:[#allocation3 + $0x3c0] sm:$0xff] %vm2038_vm12, %v7616_v0  ;;  %v1767_v36 = vpop.permute.xlu1 %1766 }
 0x276   : > { %1838 = vst.msk [vmem:[#allocation3 + $0x3e8] sm:$0xff] %vm1812_vm10, %v1767_v36  ;;  %v996_v13 = vpop.permute.xlu0 %995 }
 0x277   : > { %1066 = vst.msk [vmem:[#allocation3 + $0x410] sm:$0xff] %vm1039_vm6, %v996_v13  ;;  %2636 = vrot.lane.b32.xlu1 %v8782_v12, %s7624_s13  ;;  %v9007_v20 = vld [vmem:[#allocation2 + $0x91] sm:$0xff] }
 0x278   : > { %v3152_v3 = vld [vmem:[#allocation2 + $0x90] sm:$0xff]  ;;  %3663 = vrot.lane.b32.xlu0 %v9005_v9, %s7626_s23  ;;  %3822 = vst.msk [vmem:[#allocation3 + $0xd8] sm:$0xff] %vm2469_vm14, %v9007_v20 }
 0x279   : > { %3184 = vst.msk [vmem:[#allocation3 + $0x120] sm:$0xff] %vm2469_vm14, %v3152_v3  ;;  %v1960_v19 = vpop.permute.xlu1 %1959  ;;  %v9071_v33 = vld [vmem:[#allocation2 + $0x90] sm:$0xff] }
 0x27a   : > { %2031 = vst.msk [vmem:[#allocation3 + $0x3e8] sm:$0xff] %vm2005_vm11, %v1960_v19  ;;  %v1189_v54 = vpop.permute.xlu0 %1188  ;;  %v9015_v51 = vld [vmem:[#allocation2 + $0x89] sm:$0xff] }
 0x27b   : > { %v3151_v12 = vld [vmem:[#allocation2 + $0x88] sm:$0xff]  ;;  %2064 = vst.msk [vmem:[#allocation3 + $0x3e8] sm:$0xff] %vm2038_vm12, %v7616_v0  ;;  %2829 = vrot.lane.b32.xlu1 %v8913_v59, %s7625_s9 }
 0x27c   : > { %v2510_v56 = vld [vmem:[#allocation2 + $0x87] sm:$0xff]  ;;  %1259 = vst.msk [vmem:[#allocation3 + $0x410] sm:$0xff] %vm1232_vm7, %v1189_v54  ;;  %v2511_v55 = vld [vmem:[#allocation2 + $0x8f] sm:$0xff]  ;;  %3281 = vrot.lane.b32.xlu0 %v8955_v61, %s7624_s13 }
 0x27d   : > { %v2095_v44 = vld [vmem:[#allocation3 + $0x3c0] sm:$0xff]  ;;  %3821 = vst.msk [vmem:[#allocation3 + $0xb0] sm:$0xff] %vm2469_vm14, %v9015_v51  ;;  %3183 = vst.msk [vmem:[#allocation3 + $0xf8] sm:$0xff] %vm2469_vm14, %v3151_v12  ;;  %v998_v22 = vpop.permute.xlu1 %997  ;;  %v9038_v59 = vld [vmem:[#allocation2 + $0x88] sm:$0xff] }
 0x27e   : > { %2542 = vst.msk [vmem:[#allocation3 + $0x140] sm:$0xff] %vm2469_vm14, %v2510_v56  ;;  %7317 = vmatprep.mubr.msk.f32.mxu0 %vm2115_vm13, %v2095_v44  ;;  %2543 = vst.msk [vmem:[#allocation3 + $0x168] sm:$0xff] %vm2469_vm14, %v2511_v55  ;;  %v9030_v50 = vld [vmem:[#allocation2 + $0x87] sm:$0xff]  ;;  %v1382_v32 = vpop.permute.xlu0 %1381  ;;  %v9061_v16 = vld [vmem:[#allocation2 + $0x8f] sm:$0xff] }
 0x27f   : > { %1067 = vst.msk [vmem:[#allocation3 + $0x438] sm:$0xff] %vm1039_vm6, %v998_v22  ;;  %3022 = vrot.lane.b32.xlu1 %v8932_v11, %s7626_s23 }
 0x280   : > { %1452 = vst.msk [vmem:[#allocation3 + $0x410] sm:$0xff] %vm1425_vm8, %v1382_v32  ;;  %3473 = vrot.lane.b32.xlu0 %v9030_v50, %s7625_s9 }
 0x281   : > { %v1191_v23 = vpop.permute.xlu1 %1190 }
 0x282   : > { %1260 = vst.msk [vmem:[#allocation3 + $0x438] sm:$0xff] %vm1232_vm7, %v1191_v23  ;;  %v1576_v8 = vpop.permute.xlu0 %1575  ;;  %v2096_v2 = vld [vmem:[#allocation3 + $0x3e8] sm:$0xff] }
 0x283   : > { %1646 = vst.msk [vmem:[#allocation3 + $0x410] sm:$0xff] %vm1619_vm9, %v1576_v8  ;;  %2638 = vrot.lane.b32.xlu1 %v8866_v46, %s7624_s13  ;;  %v7295_v10 = vpop.f32.mrf.mxu0  ;;  %7318 = vmatmul.mubr.msk.f32.gmra.mxu0 %vm2115_vm13, %v2096_v2 }
 0x284   : > { %3665 = vrot.lane.b32.xlu0 %v9038_v59, %s7626_s23  ;;  %v2324_v41 = vadd.f32 %v7295_v10, %v8730_v6 }
 0x285   : > { %v1384_v24 = vpop.permute.xlu1 %1383  ;;  %v2318_v5 = vpop.f32.mrf.mxu0 }
 0x286   : > { %1453 = vst.msk [vmem:[#allocation3 + $0x438] sm:$0xff] %vm1425_vm8, %v1384_v24  ;;  %v1769_v26 = vpop.permute.xlu0 %1768  ;;  %v2446_v11 = vmax.f32 %v2324_v41, 0.0  ;;  %v2319_v21 = vadd.f32 %v8730_v6, %v2318_v5 }
 0x287   : > { %1839 = vst.msk [vmem:[#allocation3 + $0x410] sm:$0xff] %vm1812_vm10, %v1769_v26  ;;  %2831 = vrot.lane.b32.xlu1 %v8873_v37, %s7625_s9 }
 0x288   : > { %3283 = vrot.lane.b32.xlu0 %v8945_v15, %s7624_s13  ;;  %2479 = vst.msk [vmem:[#allocation2 + $0xb0] sm:$0xff] %vm2469_vm14, %v2446_v11  ;;  %v2445_v46 = vmax.f32 %v2319_v21, 0.0 }
 0x289   : > { %v1578_v27 = vpop.permute.xlu1 %1577 }
 0x28a   : > { %1647 = vst.msk [vmem:[#allocation3 + $0x438] sm:$0xff] %vm1619_vm9, %v1578_v27  ;;  %v1962_v49 = vpop.permute.xlu0 %1961 }
 0x28b   : > { %2478 = vst.msk [vmem:[#allocation2 + $0xa8] sm:$0xff] %vm2469_vm14, %v2445_v46  ;;  %3024 = vrot.lane.b32.xlu1 %v8963_v31, %s7626_s23 }
 0x28c   : > { %2032 = vst.msk [vmem:[#allocation3 + $0x410] sm:$0xff] %vm2005_vm11, %v1962_v49  ;;  %3475 = vrot.lane.b32.xlu0 %v9061_v16, %s7625_s9 }
 0x28d   : > { %2065 = vst.msk [vmem:[#allocation3 + $0x410] sm:$0xff] %vm2038_vm12, %v7616_v0  ;;  %v1771_v37 = vpop.permute.xlu1 %1770 }
 0x28e   : > { %1840 = vst.msk [vmem:[#allocation3 + $0x438] sm:$0xff] %vm1812_vm10, %v1771_v37  ;;  %v1000_v58 = vpop.permute.xlu0 %999 }
 0x28f   : > { %1068 = vst.msk [vmem:[#allocation3 + $0x460] sm:$0xff] %vm1039_vm6, %v1000_v58  ;;  %2640 = vrot.lane.b32.xlu1 %v8851_v1, %s7624_s13  ;;  %v9073_v40 = vld [vmem:[#allocation2 + $0xb1] sm:$0xff] }
 0x290   : > { %v3154_v48 = vld [vmem:[#allocation2 + $0xb0] sm:$0xff]  ;;  %3667 = vrot.lane.b32.xlu0 %v9071_v33, %s7626_s23  ;;  %3824 = vst.msk [vmem:[#allocation3 + $0x128] sm:$0xff] %vm2469_vm14, %v9073_v40 }
 0x291   : > { %3186 = vst.msk [vmem:[#allocation3 + $0x170] sm:$0xff] %vm2469_vm14, %v3154_v48  ;;  %v1964_v43 = vpop.permute.xlu1 %1963  ;;  %v9137_v3 = vld [vmem:[#allocation2 + $0xb0] sm:$0xff] }
 0x292   : > { %2033 = vst.msk [vmem:[#allocation3 + $0x438] sm:$0xff] %vm2005_vm11, %v1964_v43  ;;  %v1193_v14 = vpop.permute.xlu0 %1192  ;;  %v9081_v18 = vld [vmem:[#allocation2 + $0xa9] sm:$0xff] }
 0x293   : > { %v3153_v1 = vld [vmem:[#allocation2 + $0xa8] sm:$0xff]  ;;  %2066 = vst.msk [vmem:[#allocation3 + $0x438] sm:$0xff] %vm2038_vm12, %v7616_v0  ;;  %2833 = vrot.lane.b32.xlu1 %v8853_v17, %s7625_s9 }
 0x294   : > { %v2512_v42 = vld [vmem:[#allocation2 + $0xa7] sm:$0xff]  ;;  %1261 = vst.msk [vmem:[#allocation3 + $0x460] sm:$0xff] %vm1232_vm7, %v1193_v14  ;;  %v2097_v31 = vld [vmem:[#allocation3 + $0x410] sm:$0xff]  ;;  %3285 = vrot.lane.b32.xlu0 %v9015_v51, %s7624_s13 }
 0x295   : > { %3823 = vst.msk [vmem:[#allocation3 + $0x100] sm:$0xff] %vm2469_vm14, %v9081_v18  ;;  %3185 = vst.msk [vmem:[#allocation3 + $0x148] sm:$0xff] %vm2469_vm14, %v3153_v1  ;;  %v2513_v4 = vld [vmem:[#allocation2 + $0xaf] sm:$0xff]  ;;  %7320 = vmatprep.mubr.msk.f32.mxu0 %vm2115_vm13, %v2097_v31  ;;  %v1002_v34 = vpop.permute.xlu1 %1001  ;;  %v9096_v35 = vld [vmem:[#allocation2 + $0xa7] sm:$0xff] }
 0x296   : > { %2544 = vst.msk [vmem:[#allocation3 + $0x190] sm:$0xff] %vm2469_vm14, %v2512_v42  ;;  %2545 = vst.msk [vmem:[#allocation3 + $0x1b8] sm:$0xff] %vm2469_vm14, %v2513_v4  ;;  %v1386_v17 = vpop.permute.xlu0 %1385  ;;  %v9104_v60 = vld [vmem:[#allocation2 + $0xa8] sm:$0xff] }
 0x297   : > { %1069 = vst.msk [vmem:[#allocation3 + $0x488] sm:$0xff] %vm1039_vm6, %v1002_v34  ;;  %3026 = vrot.lane.b32.xlu1 %v8995_v30, %s7626_s23  ;;  %v9127_v36 = vld [vmem:[#allocation2 + $0xaf] sm:$0xff] }
 0x298   : > { %1454 = vst.msk [vmem:[#allocation3 + $0x460] sm:$0xff] %vm1425_vm8, %v1386_v17  ;;  %3477 = vrot.lane.b32.xlu0 %v9096_v35, %s7625_s9 }
 0x299   : > { %v1195_v47 = vpop.permute.xlu1 %1194 }
 0x29a   : > { %1262 = vst.msk [vmem:[#allocation3 + $0x488] sm:$0xff] %vm1232_vm7, %v1195_v47  ;;  %v1580_v57 = vpop.permute.xlu0 %1579  ;;  %v2098_v63 = vld [vmem:[#allocation3 + $0x438] sm:$0xff] }
 0x29b   : > { %1648 = vst.msk [vmem:[#allocation3 + $0x460] sm:$0xff] %vm1619_vm9, %v1580_v57  ;;  %2642 = vrot.lane.b32.xlu1 %v8972_v7, %s7624_s13  ;;  %v7298_v52 = vpop.f32.mrf.mxu0  ;;  %7321 = vmatmul.mubr.msk.f32.gmra.mxu0 %vm2115_vm13, %v2098_v63  ;;  %v3851_v63 = vld [vmem:[#allocation3 + $0x10] sm:$0xff] }
 0x29c   : > { %3669 = vrot.lane.b32.xlu0 %v9104_v60, %s7626_s23  ;;  %v2334_v53 = vadd.f32 %v7298_v52, %v8730_v6 }
 0x29d   : > { %v1388_v38 = vpop.permute.xlu1 %1387  ;;  %v2328_v39 = vpop.f32.mrf.mxu0 }
 0x29e   : > { %1455 = vst.msk [vmem:[#allocation3 + $0x488] sm:$0xff] %vm1425_vm8, %v1388_v38  ;;  %v1773_v29 = vpop.permute.xlu0 %1772  ;;  %v2448_v28 = vmax.f32 %v2334_v53, 0.0  ;;  %v2329_v62 = vadd.f32 %v8730_v6, %v2328_v39  ;;  %v9251_v53 = vld [vmem:[#allocation4] ss:$0 sm:$0xff] }
 0x29f   : > { %1841 = vst.msk [vmem:[#allocation3 + $0x460] sm:$0xff] %vm1812_vm10, %v1773_v29  ;;  %2835 = vrot.lane.b32.xlu1 %v8955_v61, %s7625_s9 }
 0x2a0   : > { %3287 = vrot.lane.b32.xlu0 %v9007_v20, %s7624_s13  ;;  %2481 = vst.msk [vmem:[#allocation2 + $0xd0] sm:$0xff] %vm2469_vm14, %v2448_v28  ;;  %v2447_v7 = vmax.f32 %v2329_v62, 0.0 }
 0x2a1   : > { %v1582_v25 = vpop.permute.xlu1 %1581 }
 0x2a2   : > { %1649 = vst.msk [vmem:[#allocation3 + $0x488] sm:$0xff] %vm1619_vm9, %v1582_v25  ;;  %v1966_v30 = vpop.permute.xlu0 %1965 }
 0x2a3   : > { %2480 = vst.msk [vmem:[#allocation2 + $0xc8] sm:$0xff] %vm2469_vm14, %v2447_v7  ;;  %3028 = vrot.lane.b32.xlu1 %v9030_v50, %s7626_s23  ;;  %v3854_v7 = vld [vmem:[#allocation3 + $0x38] sm:$0xff] }
 0x2a4   : > { %2034 = vst.msk [vmem:[#allocation3 + $0x460] sm:$0xff] %vm2005_vm11, %v1966_v30  ;;  %3479 = vrot.lane.b32.xlu0 %v9127_v36, %s7625_s9  ;;  %v3857_v30 = vld [vmem:[#allocation3 + $0x60] sm:$0xff] }
 0x2a5   : > { %2067 = vst.msk [vmem:[#allocation3 + $0x460] sm:$0xff] %vm2038_vm12, %v7616_v0  ;;  %v1775_v61 = vpop.permute.xlu1 %1774 }
 0x2a6   : > { %1842 = vst.msk [vmem:[#allocation3 + $0x488] sm:$0xff] %vm1812_vm10, %v1775_v61  ;;  %v1004_v13 = vpop.permute.xlu0 %1003 }
 0x2a7   : > { %1070 = vst.msk [vmem:[#allocation3 + $0x4b0] sm:$0xff] %vm1039_vm6, %v1004_v13  ;;  %2644 = vrot.lane.b32.xlu1 %v9005_v9, %s7624_s13  ;;  %v9139_v19 = vld [vmem:[#allocation2 + $0xd0] sm:$0xff] }
 0x2a8   : > { %v9141_v54 = vld [vmem:[#allocation2 + $0xd1] sm:$0xff]  ;;  %3671 = vrot.lane.b32.xlu0 %v9137_v3, %s7626_s23  ;;  %3188 = vst.msk [vmem:[#allocation3 + $0x1c0] sm:$0xff] %vm2469_vm14, %v9139_v19 }
 0x2a9   : > { %3826 = vst.msk [vmem:[#allocation3 + $0x178] sm:$0xff] %vm2469_vm14, %v9141_v54  ;;  %v1968_v12 = vpop.permute.xlu1 %1967 }
 0x2aa   : > { %2035 = vst.msk [vmem:[#allocation3 + $0x488] sm:$0xff] %vm2005_vm11, %v1968_v12  ;;  %v1197_v56 = vpop.permute.xlu0 %1196  ;;  %v9150_v9 = vld [vmem:[#allocation2 + $0xc9] sm:$0xff] }
 0x2ab   : > { %v3155_v44 = vld [vmem:[#allocation2 + $0xc8] sm:$0xff]  ;;  %2068 = vst.msk [vmem:[#allocation3 + $0x488] sm:$0xff] %vm2038_vm12, %v7616_v0  ;;  %2837 = vrot.lane.b32.xlu1 %v8945_v15, %s7625_s9 }
 0x2ac   : > { %v2514_v55 = vld [vmem:[#allocation2 + $0xc7] sm:$0xff]  ;;  %1263 = vst.msk [vmem:[#allocation3 + $0x4b0] sm:$0xff] %vm1232_vm7, %v1197_v56  ;;  %v2515_v50 = vld [vmem:[#allocation2 + $0xcf] sm:$0xff]  ;;  %3289 = vrot.lane.b32.xlu0 %v9081_v18, %s7624_s13 }
 0x2ad   : > { %v2099_v22 = vld [vmem:[#allocation3 + $0x460] sm:$0xff]  ;;  %3825 = vst.msk [vmem:[#allocation3 + $0x150] sm:$0xff] %vm2469_vm14, %v9150_v9  ;;  %3187 = vst.msk [vmem:[#allocation3 + $0x198] sm:$0xff] %vm2469_vm14, %v3155_v44  ;;  %v1006_v32 = vpop.permute.xlu1 %1005  ;;  %v9173_v2 = vld [vmem:[#allocation2 + $0xc8] sm:$0xff] }
 0x2ae   : > { %2546 = vst.msk [vmem:[#allocation3 + $0x1e0] sm:$0xff] %vm2469_vm14, %v2514_v55  ;;  %7323 = vmatprep.mubr.msk.f32.mxu0 %vm2115_vm13, %v2099_v22  ;;  %2547 = vst.msk [vmem:[#allocation3 + $0x208] sm:$0xff] %vm2469_vm14, %v2515_v50  ;;  %v9165_v23 = vld [vmem:[#allocation2 + $0xc7] sm:$0xff]  ;;  %v1390_v15 = vpop.permute.xlu0 %1389  ;;  %v3866_v22 = vld [vmem:[#allocation3 + $0xd8] sm:$0xff] }
 0x2af   : > { %1071 = vst.msk [vmem:[#allocation3 + $0x4d8] sm:$0xff] %vm1039_vm6, %v1006_v32  ;;  %3030 = vrot.lane.b32.xlu1 %v9061_v16, %s7626_s23  ;;  %v3869_v50 = vld [vmem:[#allocation3 + $0x100] sm:$0xff] }
 0x2b0   : > { %1456 = vst.msk [vmem:[#allocation3 + $0x4b0] sm:$0xff] %vm1425_vm8, %v1390_v15  ;;  %3481 = vrot.lane.b32.xlu0 %v9165_v23, %s7625_s9 }
 0x2b1   : > { %v1199_v8 = vpop.permute.xlu1 %1198 }
 0x2b2   : > { %1264 = vst.msk [vmem:[#allocation3 + $0x4d8] sm:$0xff] %vm1232_vm7, %v1199_v8  ;;  %v1584_v10 = vpop.permute.xlu0 %1583  ;;  %v2100_v41 = vld [vmem:[#allocation3 + $0x488] sm:$0xff] }
 0x2b3   : > { %1650 = vst.msk [vmem:[#allocation3 + $0x4b0] sm:$0xff] %vm1619_vm9, %v1584_v10  ;;  %2646 = vrot.lane.b32.xlu1 %v9038_v59, %s7624_s13  ;;  %v7301_v24 = vpop.f32.mrf.mxu0  ;;  %7324 = vmatmul.mubr.msk.f32.gmra.mxu0 %vm2115_vm13, %v2100_v41 }
 0x2b4   : > { %3673 = vrot.lane.b32.xlu0 %v9173_v2, %s7626_s23  ;;  %v2344_v5 = vadd.f32 %v7301_v24, %v8730_v6  ;;  %v3872_v24 = vld [vmem:[#allocation3 + $0x128] sm:$0xff] }
 0x2b5   : > { %v1392_v26 = vpop.permute.xlu1 %1391  ;;  %v2338_v11 = vpop.f32.mrf.mxu0 }
 0x2b6   : > { %1457 = vst.msk [vmem:[#allocation3 + $0x4d8] sm:$0xff] %vm1425_vm8, %v1392_v26  ;;  %v1777_v21 = vpop.permute.xlu0 %1776  ;;  %v2450_v46 = vmax.f32 %v2344_v5, 0.0  ;;  %v2339_v27 = vadd.f32 %v8730_v6, %v2338_v11  ;;  %v9196_v6 = vld [vmem:[#allocation2 + $0xcf] sm:$0xff] }
 0x2b7   : > { %1843 = vst.msk [vmem:[#allocation3 + $0x4b0] sm:$0xff] %vm1812_vm10, %v1777_v21  ;;  %2839 = vrot.lane.b32.xlu1 %v9015_v51, %s7625_s9  ;;  %v3875_v26 = vld [vmem:[#allocation3 + $0x150] sm:$0xff] }
 0x2b8   : > { %3291 = vrot.lane.b32.xlu0 %v9073_v40, %s7624_s13  ;;  %2483 = vst.msk [vmem:[#allocation2 + $0xf0] sm:$0xff] %vm2469_vm14, %v2450_v46  ;;  %v2449_v59 = vmax.f32 %v2339_v27, 0.0  ;;  %v3878_v27 = vld [vmem:[#allocation3 + $0x178] sm:$0xff] }
 0x2b9   : > { %v1586_v49 = vpop.permute.xlu1 %1585 }
 0x2ba   : > { %1651 = vst.msk [vmem:[#allocation3 + $0x4d8] sm:$0xff] %vm1619_vm9, %v1586_v49  ;;  %v1970_v16 = vpop.permute.xlu0 %1969 }
 0x2bb   : > { %2482 = vst.msk [vmem:[#allocation2 + $0xe8] sm:$0xff] %vm2469_vm14, %v2449_v59  ;;  %3032 = vrot.lane.b32.xlu1 %v9096_v35, %s7626_s23 }
 0x2bc   : > { %2036 = vst.msk [vmem:[#allocation3 + $0x4b0] sm:$0xff] %vm2005_vm11, %v1970_v16  ;;  %3483 = vrot.lane.b32.xlu0 %v9196_v6, %s7625_s9 }
 0x2bd   : > { %2069 = vst.msk [vmem:[#allocation3 + $0x4b0] sm:$0xff] %vm2038_vm12, %v7616_v0  ;;  %v1779_v51 = vpop.permute.xlu1 %1778 }
 0x2be   : > { %1844 = vst.msk [vmem:[#allocation3 + $0x4d8] sm:$0xff] %vm1812_vm10, %v1779_v51  ;;  %v3274_v37 = vpop.permute.xlu0 %3273 }
 0x2bf   : > { %3369 = vst.msk [vmem:[#allocation3 + $0x8] sm:$0xff] %vm2726_vm15, %v3274_v37  ;;  %2648 = vrot.lane.b32.xlu1 %v9071_v33, %s7624_s13  ;;  %v9206_v58 = vld [vmem:[#allocation2 + $0xf0] sm:$0xff] }
 0x2c0   : > { %v9208_v48 = vld [vmem:[#allocation2 + $0xf1] sm:$0xff]  ;;  %3675 = vrot.lane.b32.xlu0 %v9139_v19, %s7626_s23  ;;  %3190 = vst.msk [vmem:[#allocation3 + $0x210] sm:$0xff] %vm2469_vm14, %v9206_v58 }
 0x2c1   : > { %3828 = vst.msk [vmem:[#allocation3 + $0x1c8] sm:$0xff] %vm2469_vm14, %v9208_v48  ;;  %v1972_v43 = vpop.permute.xlu1 %1971 }
 0x2c2   : > { %v9216_v14 = vld [vmem:[#allocation2 + $0xe8] sm:$0xff]  ;;  %2037 = vst.msk [vmem:[#allocation3 + $0x4d8] sm:$0xff] %vm2005_vm11, %v1972_v43  ;;  %v3466_v33 = vpop.permute.xlu0 %3465 }
 0x2c3   : > { %v9219_v1 = vld [vmem:[#allocation2 + $0xe9] sm:$0xff]  ;;  %3189 = vst.msk [vmem:[#allocation3 + $0x1e8] sm:$0xff] %vm2469_vm14, %v9216_v14  ;;  %2841 = vrot.lane.b32.xlu1 %v9007_v20, %s7625_s9 }
 0x2c4   : > { %v2516_v42 = vld [vmem:[#allocation2 + $0xe7] sm:$0xff]  ;;  %v2517_v31 = vld [vmem:[#allocation2 + $0xef] sm:$0xff]  ;;  %2070 = vst.msk [vmem:[#allocation3 + $0x4d8] sm:$0xff] %vm2038_vm12, %v7616_v0  ;;  %3293 = vrot.lane.b32.xlu0 %v9150_v9, %s7624_s13 }
 0x2c5   : > { %3561 = vst.msk [vmem:[#allocation3 + $0x8] sm:$0xff] %vm2919_vm1, %v3466_v33  ;;  %v2101_v4 = vld [vmem:[#allocation3 + $0x4b0] sm:$0xff]  ;;  %v2631_v34 = vpop.permute.xlu1 %2630  ;;  %v9235_v35 = vld [vmem:[#allocation2 + $0xe7] sm:$0xff] }
 0x2c6   : > { %3827 = vst.msk [vmem:[#allocation3 + $0x1a0] sm:$0xff] %vm2469_vm14, %v9219_v1  ;;  %2548 = vst.msk [vmem:[#allocation3 + $0x230] sm:$0xff] %vm2469_vm14, %v2516_v42  ;;  %7326 = vmatprep.mubr.msk.f32.mxu0 %vm2115_vm13, %v2101_v4  ;;  %v3658_v20 = vpop.permute.xlu0 %3657  ;;  %v9273_v12 = vld [vmem:[#allocation2 + $0xef] sm:$0xff] }
 0x2c7   : > { %2549 = vst.msk [vmem:[#allocation3 + $0x258] sm:$0xff] %vm2469_vm14, %v2517_v31  ;;  %3034 = vrot.lane.b32.xlu1 %v9127_v36, %s7626_s23 }
 0x2c8   : > { %2727 = vst.msk [vmem:[#allocation3] sm:$0xff] %vm2726_vm15, %v2631_v34  ;;  %3485 = vrot.lane.b32.xlu0 %v9235_v35, %s7625_s9  ;;  %v3884_v43 = vld [vmem:[#allocation3 + $0x1c8] sm:$0xff] }
 0x2c9   : > { %3753 = vst.msk [vmem:[#allocation3 + $0x8] sm:$0xff] %vm3112_vm2, %v3658_v20  ;;  %v2824_v17 = vpop.permute.xlu1 %2823 }
 0x2ca   : > { %2920 = vst.msk [vmem:[#allocation3] sm:$0xff] %vm2919_vm1, %v2824_v17  ;;  %v3276_v47 = vpop.permute.xlu0 %3275 }
 0x2cb   : > { %v2102_v57 = vld [vmem:[#allocation3 + $0x4d8] sm:$0xff]  ;;  %3370 = vst.msk [vmem:[#allocation3 + $0x30] sm:$0xff] %vm2726_vm15, %v3276_v47  ;;  %2650 = vrot.lane.b32.xlu1 %v9104_v60, %s7624_s13  ;;  %v7304_v52 = vpop.f32.mrf.mxu0 }
 0x2cc   : > { %7327 = vmatmul.mubr.msk.f32.gmra.mxu0 %vm2115_vm13, %v2102_v57  ;;  %3677 = vrot.lane.b32.xlu0 %v9216_v14, %s7626_s23  ;;  %v2354_v38 = vadd.f32 %v9251_v53, %v7304_v52 }
 0x2cd   : > { %7337 = vmatprep.mubr.msk.f32.mxu0 %vm2469_vm14, %v3851_v63  ;;  %v3017_v39 = vpop.permute.xlu1 %3016  ;;  %v2348_v29 = vpop.f32.mrf.mxu0  ;;  %v3881_v49 = vld [vmem:[#allocation3 + $0x1a0] sm:$0xff] }
 0x2ce   : > { %3113 = vst.msk [vmem:[#allocation3] sm:$0xff] %vm3112_vm2, %v3017_v39  ;;  %v3468_v28 = vpop.permute.xlu0 %3467  ;;  %v2452_v25 = vmax.f32 %v2354_v38, 0.0  ;;  %v2349_v60 = vadd.f32 %v9251_v53, %v2348_v29 }
 0x2cf   : > { %3562 = vst.msk [vmem:[#allocation3 + $0x30] sm:$0xff] %vm2919_vm1, %v3468_v28  ;;  %2843 = vrot.lane.b32.xlu1 %v9081_v18, %s7625_s9  ;;  %v3863_v18 = vld [vmem:[#allocation3 + $0xb0] sm:$0xff] }
 0x2d0   : > { %v3850_v62 = vld [vmem:[#allocation3 + $0x8] sm:$0xff]  ;;  %7338 = vmatmul.mubr.msk.f32.vlgmr.msra.gmra.mxu0 %vm2469_vm14, %v3854_v7  ;;  %2485 = vst.msk [vmem:[#allocation2 + $0x110] sm:$0xff] %vm2469_vm14, %v2452_v25  ;;  %v2451_v36 = vmax.f32 %v2349_v60, 0.0  ;;  %3295 = vrot.lane.b32.xlu0 %v9141_v54, %s7624_s13 }
 0x2d1   : > { %4148 = vmatprep.mubr.f32.mxu1 %v3850_v62  ;;  %4887 = vst.msk [vmem:[#allocation3 + $0x8] sm:$0xff] %vm317_vm0, %v8901_v45  ;;  %7340 = vmatprep.mubr.msk.f32.mxu0 %vm2469_vm14, %v3857_v30  ;;  %v2633_v61 = vpop.permute.xlu1 %2632  ;;  %v3860_v45 = vld [vmem:[#allocation3 + $0x88] sm:$0xff] }
 0x2d2   : > { %2728 = vst.msk [vmem:[#allocation3 + $0x28] sm:$0xff] %vm2726_vm15, %v2633_v61  ;;  %v3660_v13 = vpop.permute.xlu0 %3659 }
 0x2d3   : > { %2484 = vst.msk [vmem:[#allocation2 + $0x108] sm:$0xff] %vm2469_vm14, %v2451_v36  ;;  %3036 = vrot.lane.b32.xlu1 %v9165_v23, %s7626_s23 }
 0x2d4   : > { %3754 = vst.msk [vmem:[#allocation3 + $0x30] sm:$0xff] %vm3112_vm2, %v3660_v13  ;;  %7341 = vmatmul.mubr.msk.f32.gmra.mxu0 %vm2469_vm14, %v3860_v45  ;;  %3487 = vrot.lane.b32.xlu0 %v9273_v12, %s7625_s9 }
 0x2d5   : > { %7343 = vmatprep.mubr.msk.f32.mxu0 %vm2469_vm14, %v3863_v18  ;;  %v2826_v56 = vpop.permute.xlu1 %2825  ;;  %v3849_v44 = vld [vmem:[#allocation3] sm:$0xff] }
 0x2d6   : > { %2921 = vst.msk [vmem:[#allocation3 + $0x28] sm:$0xff] %vm2919_vm1, %v2826_v56  ;;  %v3278_v55 = vpop.permute.xlu0 %3277  ;;  %4149 = vmatmul.mubr.f32.vlgmr.msra.gmra.mxu1 %v3849_v44 }
 0x2d7   : > { %3371 = vst.msk [vmem:[#allocation3 + $0x58] sm:$0xff] %vm2726_vm15, %v3278_v55  ;;  %v9280_v32 = vld [vmem:[#allocation2 + $0x111] sm:$0xff]  ;;  %2652 = vrot.lane.b32.xlu1 %v9137_v3, %s7624_s13 }
 0x2d8   : > { %7344 = vmatmul.mubr.msk.f32.gmra.mxu0 %vm2469_vm14, %v3866_v22  ;;  %v9282_v23 = vld [vmem:[#allocation2 + $0x110] sm:$0xff]  ;;  %3830 = vst.msk [vmem:[#allocation3 + $0x218] sm:$0xff] %vm2469_vm14, %v9280_v32  ;;  %3679 = vrot.lane.b32.xlu0 %v9206_v58, %s7626_s23 }
 0x2d9   : > { %7346 = vmatprep.mubr.msk.f32.mxu0 %vm2469_vm14, %v3869_v50  ;;  %3192 = vst.msk [vmem:[#allocation3 + $0x260] sm:$0xff] %vm2469_vm14, %v9282_v23  ;;  %v3019_v15 = vpop.permute.xlu1 %3018 }
 0x2da   : > { %v9293_v8 = vld [vmem:[#allocation2 + $0x108] sm:$0xff]  ;;  %3114 = vst.msk [vmem:[#allocation3 + $0x28] sm:$0xff] %vm3112_vm2, %v3019_v15  ;;  %v3470_v41 = vpop.permute.xlu0 %3469 }
 0x2db   : > { %v9295_v10 = vld [vmem:[#allocation2 + $0x109] sm:$0xff]  ;;  %3191 = vst.msk [vmem:[#allocation3 + $0x238] sm:$0xff] %vm2469_vm14, %v9293_v8  ;;  %2845 = vrot.lane.b32.xlu1 %v9073_v40, %s7625_s9 }
 0x2dc   : > { %v3853_v3 = vld [vmem:[#allocation3 + $0x30] sm:$0xff]  ;;  %3829 = vst.msk [vmem:[#allocation3 + $0x1f0] sm:$0xff] %vm2469_vm14, %v9295_v10  ;;  %v2518_v5 = vld [vmem:[#allocation2 + $0x107] sm:$0xff]  ;;  %7347 = vmatmul.mubr.msk.f32.gmra.mxu0 %vm2469_vm14, %v3872_v24  ;;  %3297 = vrot.lane.b32.xlu0 %v9219_v1, %s7624_s13 }
 0x2dd   : > { %3563 = vst.msk [vmem:[#allocation3 + $0x58] sm:$0xff] %vm2919_vm1, %v3470_v41  ;;  %4153 = vmatprep.mubr.f32.mxu1 %v3853_v3  ;;  %v2519_v11 = vld [vmem:[#allocation2 + $0x10f] sm:$0xff]  ;;  %7349 = vmatprep.mubr.msk.f32.mxu0 %vm2469_vm14, %v3875_v26  ;;  %v2635_v21 = vpop.permute.xlu1 %2634  ;;  %v9312_v59 = vld [vmem:[#allocation2 + $0x107] sm:$0xff] }
 0x2de   : > { %2550 = vst.msk [vmem:[#allocation3 + $0x280] sm:$0xff] %vm2469_vm14, %v2518_v5  ;;  %2551 = vst.msk [vmem:[#allocation3 + $0x2a8] sm:$0xff] %vm2469_vm14, %v2519_v11  ;;  %v3662_v46 = vpop.permute.xlu0 %3661  ;;  %v9344_v52 = vld [vmem:[#allocation2 + $0x10f] sm:$0xff] }
 0x2df   : > { %2729 = vst.msk [vmem:[#allocation3 + $0x50] sm:$0xff] %vm2726_vm15, %v2635_v21  ;;  %3038 = vrot.lane.b32.xlu1 %v9196_v6, %s7626_s23  ;;  %v3890_v42 = vld [vmem:[#allocation3 + $0x218] sm:$0xff] }
 0x2e0   : > { %3755 = vst.msk [vmem:[#allocation3 + $0x58] sm:$0xff] %vm3112_vm2, %v3662_v46  ;;  %7350 = vmatmul.mubr.msk.f32.gmra.mxu0 %vm2469_vm14, %v3878_v27  ;;  %3489 = vrot.lane.b32.xlu0 %v9312_v59, %s7625_s9 }
 0x2e1   : > { %7352 = vmatprep.mubr.msk.f32.mxu0 %vm2469_vm14, %v3881_v49  ;;  %v2828_v40 = vpop.permute.xlu1 %2827  ;;  %v3852_v16 = vld [vmem:[#allocation3 + $0x28] sm:$0xff] }
 0x2e2   : > { %2922 = vst.msk [vmem:[#allocation3 + $0x50] sm:$0xff] %vm2919_vm1, %v2828_v40  ;;  %v3280_v37 = vpop.permute.xlu0 %3279  ;;  %4154 = vmatmul.mubr.f32.gmra.mxu1 %v3852_v16 }
 0x2e3   : > { %v3887_v51 = vld [vmem:[#allocation3 + $0x1f0] sm:$0xff]  ;;  %3372 = vst.msk [vmem:[#allocation3 + $0x80] sm:$0xff] %vm2726_vm15, %v3280_v37  ;;  %v7307_v33 = vpop.f32.mrf.mxu0  ;;  %2654 = vrot.lane.b32.xlu1 %v9173_v2, %s7624_s13 }
 0x2e4   : > { %7353 = vmatmul.mubr.msk.f32.gmra.mxu0 %vm2469_vm14, %v3884_v43  ;;  %v2364_v6 = vadd.f32 %v9251_v53, %v7307_v33  ;;  %3681 = vrot.lane.b32.xlu0 %v9293_v8, %s7626_s23 }
 0x2e5   : > { %7355 = vmatprep.mubr.msk.f32.mxu0 %vm2469_vm14, %v3887_v51  ;;  %v3021_v31 = vpop.permute.xlu1 %3020  ;;  %v2358_v4 = vpop.f32.mrf.mxu0 }
 0x2e6   : > { %3115 = vst.msk [vmem:[#allocation3 + $0x50] sm:$0xff] %vm3112_vm2, %v3021_v31  ;;  %v3472_v34 = vpop.permute.xlu0 %3471  ;;  %v2454_v17 = vmax.f32 %v2364_v6, 0.0  ;;  %v2359_v47 = vadd.f32 %v9251_v53, %v2358_v4 }
 0x2e7   : > { %v3856_v20 = vld [vmem:[#allocation3 + $0x58] sm:$0xff]  ;;  %3564 = vst.msk [vmem:[#allocation3 + $0x80] sm:$0xff] %vm2919_vm1, %v3472_v34  ;;  %2847 = vrot.lane.b32.xlu1 %v9150_v9, %s7625_s9 }
 0x2e8   : > { %4158 = vmatprep.mubr.f32.mxu1 %v3856_v20  ;;  %7356 = vmatmul.mubr.msk.f32.gmra.mxu0 %vm2469_vm14, %v3890_v42  ;;  %2487 = vst.msk [vmem:[#allocation2 + $0x130] sm:$0xff] %vm2469_vm14, %v2454_v17  ;;  %v2453_v2 = vmax.f32 %v2359_v47, 0.0 }
 0x2e9   : > { %3299 = vrot.lane.b32.xlu0 %v9208_v48, %s7624_s13  ;;  %v2637_v57 = vpop.permute.xlu1 %2636 }
 0x2ea   : > { %2730 = vst.msk [vmem:[#allocation3 + $0x78] sm:$0xff] %vm2726_vm15, %v2637_v57  ;;  %v3664_v63 = vpop.permute.xlu0 %3663 }
 0x2eb   : > { %2486 = vst.msk [vmem:[#allocation2 + $0x128] sm:$0xff] %vm2469_vm14, %v2453_v2  ;;  %3040 = vrot.lane.b32.xlu1 %v9235_v35, %s7626_s23 }
 0x2ec   : > { %3756 = vst.msk [vmem:[#allocation3 + $0x80] sm:$0xff] %vm3112_vm2, %v3664_v63 }
 0x2ed   : > { %3491 = vrot.lane.b32.xlu0 %v9344_v52, %s7625_s9  ;;  %v2830_v9 = vpop.permute.xlu1 %2829  ;;  %v3855_v38 = vld [vmem:[#allocation3 + $0x50] sm:$0xff] }
 0x2ee   : > { %2923 = vst.msk [vmem:[#allocation3 + $0x78] sm:$0xff] %vm2919_vm1, %v2830_v9  ;;  %v3282_v39 = vpop.permute.xlu0 %3281  ;;  %4159 = vmatmul.mubr.f32.gmra.mxu1 %v3855_v38 }
 0x2ef   : > { %3373 = vst.msk [vmem:[#allocation3 + $0xa8] sm:$0xff] %vm2726_vm15, %v3282_v39  ;;  %v9350_v29 = vld [vmem:[#allocation2 + $0x131] sm:$0xff]  ;;  %2656 = vrot.lane.b32.xlu1 %v9139_v19, %s7624_s13 }
 0x2f0   : > { %v9352_v28 = vld [vmem:[#allocation2 + $0x130] sm:$0xff]  ;;  %3832 = vst.msk [vmem:[#allocation3 + $0x268] sm:$0xff] %vm2469_vm14, %v9350_v29 }
 0x2f1   : > { %3194 = vst.msk [vmem:[#allocation3 + $0x2b0] sm:$0xff] %vm2469_vm14, %v9352_v28  ;;  %3683 = vrot.lane.b32.xlu0 %v9282_v23, %s7626_s23  ;;  %v3023_v35 = vpop.permute.xlu1 %3022 }
 0x2f2   : > { %v9362_v62 = vld [vmem:[#allocation2 + $0x128] sm:$0xff]  ;;  %3116 = vst.msk [vmem:[#allocation3 + $0x78] sm:$0xff] %vm3112_vm2, %v3023_v35  ;;  %v3474_v25 = vpop.permute.xlu0 %3473 }
 0x2f3   : > { %v9364_v7 = vld [vmem:[#allocation2 + $0x129] sm:$0xff]  ;;  %v3859_v60 = vld [vmem:[#allocation3 + $0x80] sm:$0xff]  ;;  %3193 = vst.msk [vmem:[#allocation3 + $0x288] sm:$0xff] %vm2469_vm14, %v9362_v62  ;;  %2849 = vrot.lane.b32.xlu1 %v9141_v54, %s7625_s9 }
 0x2f4   : > { %3831 = vst.msk [vmem:[#allocation3 + $0x240] sm:$0xff] %vm2469_vm14, %v9364_v7  ;;  %v2520_v19 = vld [vmem:[#allocation2 + $0x127] sm:$0xff]  ;;  %4163 = vmatprep.mubr.f32.mxu1 %v3859_v60  ;;  %v2521_v30 = vld [vmem:[#allocation2 + $0x12f] sm:$0xff] }
 0x2f5   : > { %3565 = vst.msk [vmem:[#allocation3 + $0xa8] sm:$0xff] %vm2919_vm1, %v3474_v25  ;;  %3301 = vrot.lane.b32.xlu0 %v9295_v10, %s7624_s13  ;;  %v2639_v36 = vpop.permute.xlu1 %2638  ;;  %v9379_v13 = vld [vmem:[#allocation2 + $0x127] sm:$0xff]  ;;  %v9408_v11 = vld [vmem:[#allocation2 + $0x12f] sm:$0xff] }
 0x2f6   : > { %2552 = vst.msk [vmem:[#allocation3 + $0x2d0] sm:$0xff] %vm2469_vm14, %v2520_v19  ;;  %2553 = vst.msk [vmem:[#allocation3 + $0x2f8] sm:$0xff] %vm2469_vm14, %v2521_v30  ;;  %v3666_v61 = vpop.permute.xlu0 %3665 }
 0x2f7   : > { %2731 = vst.msk [vmem:[#allocation3 + $0xa0] sm:$0xff] %vm2726_vm15, %v2639_v36  ;;  %3042 = vrot.lane.b32.xlu1 %v9273_v12, %s7626_s23  ;;  %v3896_v45 = vld [vmem:[#allocation3 + $0x268] sm:$0xff] }
 0x2f8   : > { %3757 = vst.msk [vmem:[#allocation3 + $0xa8] sm:$0xff] %vm3112_vm2, %v3666_v61 }
 0x2f9   : > { %3493 = vrot.lane.b32.xlu0 %v9379_v13, %s7625_s9  ;;  %v2832_v54 = vpop.permute.xlu1 %2831  ;;  %v3858_v18 = vld [vmem:[#allocation3 + $0x78] sm:$0xff] }
 0x2fa   : > { %2924 = vst.msk [vmem:[#allocation3 + $0xa0] sm:$0xff] %vm2919_vm1, %v2832_v54  ;;  %v3284_v44 = vpop.permute.xlu0 %3283  ;;  %4164 = vmatmul.mubr.f32.gmra.mxu1 %v3858_v18 }
 0x2fb   : > { %v3893_v56 = vld [vmem:[#allocation3 + $0x240] sm:$0xff]  ;;  %3374 = vst.msk [vmem:[#allocation3 + $0xd0] sm:$0xff] %vm2726_vm15, %v3284_v44  ;;  %v7310_v55 = vpop.f32.mrf.mxu0  ;;  %2658 = vrot.lane.b32.xlu1 %v9216_v14, %s7624_s13 }
 0x2fc   : > { %7358 = vmatprep.mubr.msk.f32.mxu0 %vm2469_vm14, %v3893_v56  ;;  %v2374_v12 = vadd.f32 %v9251_v53, %v7310_v55 }
 0x2fd   : > { %7359 = vmatmul.mubr.msk.f32.gmra.mxu0 %vm2469_vm14, %v3896_v45  ;;  %3685 = vrot.lane.b32.xlu0 %v9362_v62, %s7626_s23  ;;  %v3025_v22 = vpop.permute.xlu1 %3024  ;;  %v2368_v50 = vpop.f32.mrf.mxu0 }
 0x2fe   : > { %3117 = vst.msk [vmem:[#allocation3 + $0xa0] sm:$0xff] %vm3112_vm2, %v3025_v22  ;;  %v3476_v15 = vpop.permute.xlu0 %3475  ;;  %v2456_v3 = vmax.f32 %v2374_v12, 0.0  ;;  %v2369_v24 = vadd.f32 %v9251_v53, %v2368_v50 }
 0x2ff   : > { %v3862_v41 = vld [vmem:[#allocation3 + $0xa8] sm:$0xff]  ;;  %3566 = vst.msk [vmem:[#allocation3 + $0xd0] sm:$0xff] %vm2919_vm1, %v3476_v15  ;;  %2851 = vrot.lane.b32.xlu1 %v9219_v1, %s7625_s9 }
 0x300   : > { %4168 = vmatprep.mubr.f32.mxu1 %v3862_v41  ;;  %2489 = vst.msk [vmem:[#allocation2 + $0x150] sm:$0xff] %vm2469_vm14, %v2456_v3  ;;  %v2455_v14 = vmax.f32 %v2369_v24, 0.0 }
 0x301   : > { %3303 = vrot.lane.b32.xlu0 %v9280_v32, %s7624_s13  ;;  %v2641_v5 = vpop.permute.xlu1 %2640 }
 0x302   : > { %2732 = vst.msk [vmem:[#allocation3 + $0xc8] sm:$0xff] %vm2726_vm15, %v2641_v5  ;;  %v3668_v26 = vpop.permute.xlu0 %3667 }
 0x303   : > { %2488 = vst.msk [vmem:[#allocation2 + $0x148] sm:$0xff] %vm2469_vm14, %v2455_v14  ;;  %3044 = vrot.lane.b32.xlu1 %v9312_v59, %s7626_s23 }
 0x304   : > { %3758 = vst.msk [vmem:[#allocation3 + $0xd0] sm:$0xff] %vm3112_vm2, %v3668_v26 }
 0x305   : > { %3495 = vrot.lane.b32.xlu0 %v9408_v11, %s7625_s9  ;;  %v2834_v1 = vpop.permute.xlu1 %2833  ;;  %v3861_v21 = vld [vmem:[#allocation3 + $0xa0] sm:$0xff] }
 0x306   : > { %2925 = vst.msk [vmem:[#allocation3 + $0xc8] sm:$0xff] %vm2919_vm1, %v2834_v1  ;;  %v3286_v46 = vpop.permute.xlu0 %3285  ;;  %4169 = vmatmul.mubr.f32.gmra.mxu1 %v3861_v21 }
 0x307   : > { %3375 = vst.msk [vmem:[#allocation3 + $0xf8] sm:$0xff] %vm2726_vm15, %v3286_v46  ;;  %v9414_v27 = vld [vmem:[#allocation2 + $0x151] sm:$0xff]  ;;  %2660 = vrot.lane.b32.xlu1 %v9206_v58, %s7624_s13 }
 0x308   : > { %v9416_v49 = vld [vmem:[#allocation2 + $0x150] sm:$0xff]  ;;  %3834 = vst.msk [vmem:[#allocation3 + $0x2b8] sm:$0xff] %vm2469_vm14, %v9414_v27 }
 0x309   : > { %3196 = vst.msk [vmem:[#allocation3 + $0x300] sm:$0xff] %vm2469_vm14, %v9416_v49  ;;  %3687 = vrot.lane.b32.xlu0 %v9352_v28, %s7626_s23  ;;  %v3027_v59 = vpop.permute.xlu1 %3026 }
 0x30a   : > { %v9426_v40 = vld [vmem:[#allocation2 + $0x148] sm:$0xff]  ;;  %3118 = vst.msk [vmem:[#allocation3 + $0xc8] sm:$0xff] %vm3112_vm2, %v3027_v59  ;;  %v3478_v51 = vpop.permute.xlu0 %3477 }
 0x30b   : > { %v9428_v16 = vld [vmem:[#allocation2 + $0x149] sm:$0xff]  ;;  %3195 = vst.msk [vmem:[#allocation3 + $0x2d8] sm:$0xff] %vm2469_vm14, %v9426_v40  ;;  %2853 = vrot.lane.b32.xlu1 %v9208_v48, %s7625_s9 }
 0x30c   : > { %v3865_v37 = vld [vmem:[#allocation3 + $0xd0] sm:$0xff]  ;;  %3833 = vst.msk [vmem:[#allocation3 + $0x290] sm:$0xff] %vm2469_vm14, %v9428_v16  ;;  %v2522_v58 = vld [vmem:[#allocation2 + $0x147] sm:$0xff] }
 0x30d   : > { %3567 = vst.msk [vmem:[#allocation3 + $0xf8] sm:$0xff] %vm2919_vm1, %v3478_v51  ;;  %4173 = vmatprep.mubr.f32.mxu1 %v3865_v37  ;;  %v2523_v43 = vld [vmem:[#allocation2 + $0x14f] sm:$0xff]  ;;  %3305 = vrot.lane.b32.xlu0 %v9364_v7, %s7624_s13  ;;  %v2643_v33 = vpop.permute.xlu1 %2642  ;;  %v9443_v42 = vld [vmem:[#allocation2 + $0x147] sm:$0xff] }
 0x30e   : > { %2554 = vst.msk [vmem:[#allocation3 + $0x320] sm:$0xff] %vm2469_vm14, %v2522_v58  ;;  %2555 = vst.msk [vmem:[#allocation3 + $0x348] sm:$0xff] %vm2469_vm14, %v2523_v43  ;;  %v3670_v6 = vpop.permute.xlu0 %3669  ;;  %v9472_v25 = vld [vmem:[#allocation2 + $0x14f] sm:$0xff] }
 0x30f   : > { %2733 = vst.msk [vmem:[#allocation3 + $0xf0] sm:$0xff] %vm2726_vm15, %v2643_v33  ;;  %3046 = vrot.lane.b32.xlu1 %v9344_v52, %s7626_s23  ;;  %v3902_v31 = vld [vmem:[#allocation3 + $0x2b8] sm:$0xff] }
 0x310   : > { %3759 = vst.msk [vmem:[#allocation3 + $0xf8] sm:$0xff] %vm3112_vm2, %v3670_v6 }
 0x311   : > { %3497 = vrot.lane.b32.xlu0 %v9443_v42, %s7625_s9  ;;  %v2836_v48 = vpop.permute.xlu1 %2835  ;;  %v3864_v4 = vld [vmem:[#allocation3 + $0xc8] sm:$0xff] }
 0x312   : > { %2926 = vst.msk [vmem:[#allocation3 + $0xf0] sm:$0xff] %vm2919_vm1, %v2836_v48  ;;  %v3288_v20 = vpop.permute.xlu0 %3287  ;;  %4174 = vmatmul.mubr.f32.gmra.mxu1 %v3864_v4 }
 0x313   : > { %v3899_v34 = vld [vmem:[#allocation3 + $0x290] sm:$0xff]  ;;  %3376 = vst.msk [vmem:[#allocation3 + $0x120] sm:$0xff] %vm2726_vm15, %v3288_v20  ;;  %2662 = vrot.lane.b32.xlu1 %v9293_v8, %s7624_s13 }
 0x314   : > { %7361 = vmatprep.mubr.msk.f32.mxu0 %vm2469_vm14, %v3899_v34  ;;  %v7313_v17 = vpop.f32.mrf.mxu0 }
 0x315   : > { %7362 = vmatmul.mubr.msk.f32.gmra.mxu0 %vm2469_vm14, %v3902_v31  ;;  %v2384_v47 = vadd.f32 %v9251_v53, %v7313_v17  ;;  %3689 = vrot.lane.b32.xlu0 %v9426_v40, %s7626_s23  ;;  %v3029_v2 = vpop.permute.xlu1 %3028 }
 0x316   : > { %v2378_v57 = vpop.f32.mrf.mxu0  ;;  %3119 = vst.msk [vmem:[#allocation3 + $0xf0] sm:$0xff] %vm3112_vm2, %v3029_v2  ;;  %v3480_v63 = vpop.permute.xlu0 %3479 }
 0x317   : > { %v3868_v52 = vld [vmem:[#allocation3 + $0xf8] sm:$0xff]  ;;  %v2458_v9 = vmax.f32 %v2384_v47, 0.0  ;;  %v2379_v38 = vadd.f32 %v9251_v53, %v2378_v57  ;;  %3568 = vst.msk [vmem:[#allocation3 + $0x120] sm:$0xff] %vm2919_vm1, %v3480_v63  ;;  %2855 = vrot.lane.b32.xlu1 %v9295_v10, %s7625_s9 }
 0x318   : > { %4178 = vmatprep.mubr.f32.mxu1 %v3868_v52 }
 0x319   : > { %2491 = vst.msk [vmem:[#allocation2 + $0x170] sm:$0xff] %vm2469_vm14, %v2458_v9  ;;  %v2457_v8 = vmax.f32 %v2379_v38, 0.0  ;;  %3307 = vrot.lane.b32.xlu0 %v9350_v29, %s7624_s13  ;;  %v2645_v39 = vpop.permute.xlu1 %2644 }
 0x31a   : > { %2734 = vst.msk [vmem:[#allocation3 + $0x118] sm:$0xff] %vm2726_vm15, %v2645_v39  ;;  %v3672_v35 = vpop.permute.xlu0 %3671 }
 0x31b   : > { %2490 = vst.msk [vmem:[#allocation2 + $0x168] sm:$0xff] %vm2469_vm14, %v2457_v8  ;;  %3048 = vrot.lane.b32.xlu1 %v9379_v13, %s7626_s23 }
 0x31c   : > { %3760 = vst.msk [vmem:[#allocation3 + $0x120] sm:$0xff] %vm3112_vm2, %v3672_v35 }
 0x31d   : > { %3499 = vrot.lane.b32.xlu0 %v9472_v25, %s7625_s9  ;;  %v2838_v10 = vpop.permute.xlu1 %2837  ;;  %v3867_v60 = vld [vmem:[#allocation3 + $0xf0] sm:$0xff] }
 0x31e   : > { %2927 = vst.msk [vmem:[#allocation3 + $0x118] sm:$0xff] %vm2919_vm1, %v2838_v10  ;;  %v3290_v19 = vpop.permute.xlu0 %3289  ;;  %4179 = vmatmul.mubr.f32.gmra.mxu1 %v3867_v60 }
 0x31f   : > { %3377 = vst.msk [vmem:[#allocation3 + $0x148] sm:$0xff] %vm2726_vm15, %v3290_v19  ;;  %2664 = vrot.lane.b32.xlu1 %v9282_v23, %s7624_s13 }
 0x320   : > { %v9478_v30 = vld [vmem:[#allocation2 + $0x171] sm:$0xff] }
 0x321   : > { %v9480_v36 = vld [vmem:[#allocation2 + $0x170] sm:$0xff]  ;;  %3836 = vst.msk [vmem:[#allocation3 + $0x308] sm:$0xff] %vm2469_vm14, %v9478_v30  ;;  %3691 = vrot.lane.b32.xlu0 %v9416_v49, %s7626_s23  ;;  %v3031_v61 = vpop.permute.xlu1 %3030 }
 0x322   : > { %3198 = vst.msk [vmem:[#allocation3 + $0x350] sm:$0xff] %vm2469_vm14, %v9480_v36  ;;  %v9490_v13 = vld [vmem:[#allocation2 + $0x168] sm:$0xff]  ;;  %v3482_v54 = vpop.permute.xlu0 %3481 }
 0x323   : > { %v9492_v45 = vld [vmem:[#allocation2 + $0x169] sm:$0xff]  ;;  %3120 = vst.msk [vmem:[#allocation3 + $0x118] sm:$0xff] %vm3112_vm2, %v3031_v61  ;;  %v3871_v18 = vld [vmem:[#allocation3 + $0x120] sm:$0xff]  ;;  %2857 = vrot.lane.b32.xlu1 %v9280_v32, %s7625_s9 }
 0x324   : > { %3835 = vst.msk [vmem:[#allocation3 + $0x2e0] sm:$0xff] %vm2469_vm14, %v9492_v45  ;;  %3197 = vst.msk [vmem:[#allocation3 + $0x328] sm:$0xff] %vm2469_vm14, %v9490_v13  ;;  %v2524_v23 = vld [vmem:[#allocation2 + $0x167] sm:$0xff]  ;;  %4183 = vmatprep.mubr.f32.mxu1 %v3871_v18  ;;  %v2525_v56 = vld [vmem:[#allocation2 + $0x16f] sm:$0xff] }
 0x325   : > { %3569 = vst.msk [vmem:[#allocation3 + $0x148] sm:$0xff] %vm2919_vm1, %v3482_v54  ;;  %3309 = vrot.lane.b32.xlu0 %v9428_v16, %s7624_s13  ;;  %v2647_v44 = vpop.permute.xlu1 %2646  ;;  %v9507_v12 = vld [vmem:[#allocation2 + $0x167] sm:$0xff]  ;;  %v9536_v51 = vld [vmem:[#allocation2 + $0x16f] sm:$0xff] }
 0x326   : > { %2556 = vst.msk [vmem:[#allocation3 + $0x370] sm:$0xff] %vm2469_vm14, %v2524_v23  ;;  %2557 = vst.msk [vmem:[#allocation3 + $0x398] sm:$0xff] %vm2469_vm14, %v2525_v56  ;;  %v3674_v55 = vpop.permute.xlu0 %3673 }
 0x327   : > { %2735 = vst.msk [vmem:[#allocation3 + $0x140] sm:$0xff] %vm2726_vm15, %v2647_v44  ;;  %3050 = vrot.lane.b32.xlu1 %v9408_v11, %s7626_s23 }
 0x328   : > { %3761 = vst.msk [vmem:[#allocation3 + $0x148] sm:$0xff] %vm3112_vm2, %v3674_v55  ;;  %v3908_v22 = vld [vmem:[#allocation3 + $0x308] sm:$0xff] }
 0x329   : > { %3501 = vrot.lane.b32.xlu0 %v9507_v12, %s7625_s9  ;;  %v2840_v32 = vpop.permute.xlu1 %2839 }
 0x32a   : > { %v3870_v50 = vld [vmem:[#allocation3 + $0x118] sm:$0xff]  ;;  %2928 = vst.msk [vmem:[#allocation3 + $0x140] sm:$0xff] %vm2919_vm1, %v2840_v32  ;;  %v3292_v41 = vpop.permute.xlu0 %3291 }
 0x32b   : > { %v3905_v15 = vld [vmem:[#allocation3 + $0x2e0] sm:$0xff]  ;;  %4184 = vmatmul.mubr.f32.gmra.mxu1 %v3870_v50  ;;  %3378 = vst.msk [vmem:[#allocation3 + $0x170] sm:$0xff] %vm2726_vm15, %v3292_v41  ;;  %2666 = vrot.lane.b32.xlu1 %v9362_v62, %s7624_s13 }
 0x32c   : > { %7364 = vmatprep.mubr.msk.f32.mxu0 %vm2469_vm14, %v3905_v15  ;;  %v7316_v3 = vpop.f32.mrf.mxu0 }
 0x32d   : > { %7365 = vmatmul.mubr.msk.f32.gmra.mxu0 %vm2469_vm14, %v3908_v22  ;;  %v2394_v24 = vadd.f32 %v9251_v53, %v7316_v3  ;;  %3693 = vrot.lane.b32.xlu0 %v9490_v13, %s7626_s23  ;;  %v3033_v14 = vpop.permute.xlu1 %3032 }
 0x32e   : > { %v2388_v5 = vpop.f32.mrf.mxu0  ;;  %3121 = vst.msk [vmem:[#allocation3 + $0x140] sm:$0xff] %vm3112_vm2, %v3033_v14  ;;  %v3484_v26 = vpop.permute.xlu0 %3483 }
 0x32f   : > { %v3874_v11 = vld [vmem:[#allocation3 + $0x148] sm:$0xff]  ;;  %v2460_v1 = vmax.f32 %v2394_v24, 0.0  ;;  %v2389_v21 = vadd.f32 %v9251_v53, %v2388_v5  ;;  %3570 = vst.msk [vmem:[#allocation3 + $0x170] sm:$0xff] %vm2919_vm1, %v3484_v26  ;;  %2859 = vrot.lane.b32.xlu1 %v9364_v7, %s7625_s9 }
 0x330   : > { %4188 = vmatprep.mubr.f32.mxu1 %v3874_v11 }
 0x331   : > { %2493 = vst.msk [vmem:[#allocation2 + $0x190] sm:$0xff] %vm2469_vm14, %v2460_v1  ;;  %v2459_v62 = vmax.f32 %v2389_v21, 0.0  ;;  %3311 = vrot.lane.b32.xlu0 %v9414_v27, %s7624_s13  ;;  %v2649_v46 = vpop.permute.xlu1 %2648 }
 0x332   : > { %2736 = vst.msk [vmem:[#allocation3 + $0x168] sm:$0xff] %vm2726_vm15, %v2649_v46  ;;  %v3676_v59 = vpop.permute.xlu0 %3675 }
 0x333   : > { %2492 = vst.msk [vmem:[#allocation2 + $0x188] sm:$0xff] %vm2469_vm14, %v2459_v62  ;;  %3052 = vrot.lane.b32.xlu1 %v9443_v42, %s7626_s23 }
 0x334   : > { %3762 = vst.msk [vmem:[#allocation3 + $0x170] sm:$0xff] %vm3112_vm2, %v3676_v59 }
 0x335   : > { %3503 = vrot.lane.b32.xlu0 %v9536_v51, %s7625_s9  ;;  %v2842_v7 = vpop.permute.xlu1 %2841  ;;  %v3873_v37 = vld [vmem:[#allocation3 + $0x140] sm:$0xff] }
 0x336   : > { %2929 = vst.msk [vmem:[#allocation3 + $0x168] sm:$0xff] %vm2919_vm1, %v2842_v7  ;;  %v3294_v58 = vpop.permute.xlu0 %3293  ;;  %4189 = vmatmul.mubr.f32.gmra.mxu1 %v3873_v37 }
 0x337   : > { %3379 = vst.msk [vmem:[#allocation3 + $0x198] sm:$0xff] %vm2726_vm15, %v3294_v58  ;;  %2668 = vrot.lane.b32.xlu1 %v9352_v28, %s7624_s13 }
 0x338   : > { %v9542_v43 = vld [vmem:[#allocation2 + $0x191] sm:$0xff] }
 0x339   : > { %v9544_v33 = vld [vmem:[#allocation2 + $0x190] sm:$0xff]  ;;  %3838 = vst.msk [vmem:[#allocation3 + $0x358] sm:$0xff] %vm2469_vm14, %v9542_v43  ;;  %3695 = vrot.lane.b32.xlu0 %v9480_v36, %s7626_s23  ;;  %v3035_v6 = vpop.permute.xlu1 %3034 }
 0x33a   : > { %3200 = vst.msk [vmem:[#allocation3 + $0x3a0] sm:$0xff] %vm2469_vm14, %v9544_v33  ;;  %v9554_v42 = vld [vmem:[#allocation2 + $0x188] sm:$0xff]  ;;  %v3486_v48 = vpop.permute.xlu0 %3485 }
 0x33b   : > { %v9556_v31 = vld [vmem:[#allocation2 + $0x189] sm:$0xff]  ;;  %3122 = vst.msk [vmem:[#allocation3 + $0x168] sm:$0xff] %vm3112_vm2, %v3035_v6  ;;  %2861 = vrot.lane.b32.xlu1 %v9350_v29, %s7625_s9 }
 0x33c   : > { %v3877_v4 = vld [vmem:[#allocation3 + $0x170] sm:$0xff]  ;;  %3837 = vst.msk [vmem:[#allocation3 + $0x330] sm:$0xff] %vm2469_vm14, %v9556_v31  ;;  %3199 = vst.msk [vmem:[#allocation3 + $0x378] sm:$0xff] %vm2469_vm14, %v9554_v42  ;;  %v2526_v28 = vld [vmem:[#allocation2 + $0x187] sm:$0xff] }
 0x33d   : > { %3571 = vst.msk [vmem:[#allocation3 + $0x198] sm:$0xff] %vm2919_vm1, %v3486_v48  ;;  %4193 = vmatprep.mubr.f32.mxu1 %v3877_v4  ;;  %v2527_v34 = vld [vmem:[#allocation2 + $0x18f] sm:$0xff]  ;;  %3313 = vrot.lane.b32.xlu0 %v9492_v45, %s7624_s13  ;;  %v2651_v20 = vpop.permute.xlu1 %2650  ;;  %v9571_v47 = vld [vmem:[#allocation2 + $0x187] sm:$0xff] }
 0x33e   : > { %2558 = vst.msk [vmem:[#allocation3 + $0x3c0] sm:$0xff] %vm2469_vm14, %v2526_v28  ;;  %2559 = vst.msk [vmem:[#allocation3 + $0x3e8] sm:$0xff] %vm2469_vm14, %v2527_v34  ;;  %v3678_v17 = vpop.permute.xlu0 %3677  ;;  %v9600_v54 = vld [vmem:[#allocation2 + $0x18f] sm:$0xff] }
 0x33f   : > { %2737 = vst.msk [vmem:[#allocation3 + $0x190] sm:$0xff] %vm2726_vm15, %v2651_v20  ;;  %3054 = vrot.lane.b32.xlu1 %v9472_v25, %s7626_s23 }
 0x340   : > { %3763 = vst.msk [vmem:[#allocation3 + $0x198] sm:$0xff] %vm3112_vm2, %v3678_v17  ;;  %v3914_v2 = vld [vmem:[#allocation3 + $0x358] sm:$0xff] }
 0x341   : > { %3505 = vrot.lane.b32.xlu0 %v9571_v47, %s7625_s9  ;;  %v2844_v63 = vpop.permute.xlu1 %2843 }
 0x342   : > { %v3876_v29 = vld [vmem:[#allocation3 + $0x168] sm:$0xff]  ;;  %2930 = vst.msk [vmem:[#allocation3 + $0x190] sm:$0xff] %vm2919_vm1, %v2844_v63  ;;  %v3296_v52 = vpop.permute.xlu0 %3295 }
 0x343   : > { %v3911_v57 = vld [vmem:[#allocation3 + $0x330] sm:$0xff]  ;;  %4194 = vmatmul.mubr.f32.gmra.mxu1 %v3876_v29  ;;  %v7319_v9 = vpop.f32.mrf.mxu0  ;;  %3380 = vst.msk [vmem:[#allocation3 + $0x1c0] sm:$0xff] %vm2726_vm15, %v3296_v52  ;;  %2670 = vrot.lane.b32.xlu1 %v9426_v40, %s7624_s13 }
 0x344   : > { %7367 = vmatprep.mubr.msk.f32.mxu0 %vm2469_vm14, %v3911_v57  ;;  %v2404_v38 = vadd.f32 %v9251_v53, %v7319_v9 }
 0x345   : > { %7368 = vmatmul.mubr.msk.f32.gmra.mxu0 %vm2469_vm14, %v3914_v2  ;;  %3697 = vrot.lane.b32.xlu0 %v9554_v42, %s7626_s23  ;;  %v2398_v8 = vpop.f32.mrf.mxu0  ;;  %v3037_v39 = vpop.permute.xlu1 %3036 }
 0x346   : > { %v2462_v25 = vmax.f32 %v2404_v38, 0.0  ;;  %v2399_v10 = vadd.f32 %v9251_v53, %v2398_v8  ;;  %3123 = vst.msk [vmem:[#allocation3 + $0x190] sm:$0xff] %vm3112_vm2, %v3037_v39  ;;  %v3488_v60 = vpop.permute.xlu0 %3487 }
 0x347   : > { %v3880_v35 = vld [vmem:[#allocation3 + $0x198] sm:$0xff]  ;;  %3572 = vst.msk [vmem:[#allocation3 + $0x1c0] sm:$0xff] %vm2919_vm1, %v3488_v60  ;;  %2863 = vrot.lane.b32.xlu1 %v9428_v16, %s7625_s9 }
 0x348   : > { %4198 = vmatprep.mubr.f32.mxu1 %v3880_v35  ;;  %2495 = vst.msk [vmem:[#allocation2 + $0x1b0] sm:$0xff] %vm2469_vm14, %v2462_v25  ;;  %v2461_v40 = vmax.f32 %v2399_v10, 0.0  ;;  %v9712_v10 = vld [vmem:[#allocation4] ss:$0 sm:$0xff] }
 0x349   : > { %3315 = vrot.lane.b32.xlu0 %v9478_v30, %s7624_s13  ;;  %v2653_v19 = vpop.permute.xlu1 %2652 }
 0x34a   : > { %2494 = vst.msk [vmem:[#allocation2 + $0x1a8] sm:$0xff] %vm2469_vm14, %v2461_v40  ;;  %v3680_v61 = vpop.permute.xlu0 %3679 }
 0x34b   : > { %2738 = vst.msk [vmem:[#allocation3 + $0x1b8] sm:$0xff] %vm2726_vm15, %v2653_v19  ;;  %3056 = vrot.lane.b32.xlu1 %v9507_v12, %s7626_s23 }
 0x34c   : > { %3764 = vst.msk [vmem:[#allocation3 + $0x1c0] sm:$0xff] %vm3112_vm2, %v3680_v61 }
 0x34d   : > { %3507 = vrot.lane.b32.xlu0 %v9600_v54, %s7625_s9  ;;  %v2846_v16 = vpop.permute.xlu1 %2845  ;;  %v3879_v18 = vld [vmem:[#allocation3 + $0x190] sm:$0xff] }
 0x34e   : > { %2931 = vst.msk [vmem:[#allocation3 + $0x1b8] sm:$0xff] %vm2919_vm1, %v2846_v16  ;;  %v3298_v23 = vpop.permute.xlu0 %3297  ;;  %4199 = vmatmul.mubr.f32.gmra.mxu1 %v3879_v18 }
 0x34f   : > { %v9605_v56 = vld [vmem:[#allocation2 + $0x1b1] sm:$0xff]  ;;  %3381 = vst.msk [vmem:[#allocation3 + $0x1e8] sm:$0xff] %vm2726_vm15, %v3298_v23  ;;  %2672 = vrot.lane.b32.xlu1 %v9416_v49, %s7624_s13 }
 0x350   : > { %v9607_v44 = vld [vmem:[#allocation2 + $0x1b0] sm:$0xff]  ;;  %3840 = vst.msk [vmem:[#allocation3 + $0x3a8] sm:$0xff] %vm2469_vm14, %v9605_v56 }
 0x351   : > { %3202 = vst.msk [vmem:[#allocation3 + $0x3f0] sm:$0xff] %vm2469_vm14, %v9607_v44  ;;  %3699 = vrot.lane.b32.xlu0 %v9544_v33, %s7626_s23  ;;  %v9618_v55 = vld [vmem:[#allocation2 + $0x1a8] sm:$0xff]  ;;  %v3039_v22 = vpop.permute.xlu1 %3038 }
 0x352   : > { %v9620_v12 = vld [vmem:[#allocation2 + $0x1a9] sm:$0xff]  ;;  %3201 = vst.msk [vmem:[#allocation3 + $0x3c8] sm:$0xff] %vm2469_vm14, %v9618_v55  ;;  %v3490_v50 = vpop.permute.xlu0 %3489 }
 0x353   : > { %3839 = vst.msk [vmem:[#allocation3 + $0x380] sm:$0xff] %vm2469_vm14, %v9620_v12  ;;  %v2528_v49 = vld [vmem:[#allocation2 + $0x1a7] sm:$0xff]  ;;  %v2529_v32 = vld [vmem:[#allocation2 + $0x1af] sm:$0xff]  ;;  %2865 = vrot.lane.b32.xlu1 %v9414_v27, %s7625_s9 }
 0x354   : > { %3124 = vst.msk [vmem:[#allocation3 + $0x1b8] sm:$0xff] %vm3112_vm2, %v3039_v22  ;;  %v3883_v15 = vld [vmem:[#allocation3 + $0x1c0] sm:$0xff]  ;;  %v9664_v6 = vld [vmem:[#allocation2 + $0x1af] sm:$0xff] }
 0x355   : > { %2560 = vst.msk [vmem:[#allocation3 + $0x410] sm:$0xff] %vm2469_vm14, %v2528_v49  ;;  %2561 = vst.msk [vmem:[#allocation3 + $0x438] sm:$0xff] %vm2469_vm14, %v2529_v32  ;;  %4203 = vmatprep.mubr.f32.mxu1 %v3883_v15  ;;  %3317 = vrot.lane.b32.xlu0 %v9556_v31, %s7624_s13  ;;  %v2655_v41 = vpop.permute.xlu1 %2654  ;;  %v9634_v3 = vld [vmem:[#allocation2 + $0x1a7] sm:$0xff] }
 0x356   : > { %3573 = vst.msk [vmem:[#allocation3 + $0x1e8] sm:$0xff] %vm2919_vm1, %v3490_v50  ;;  %v3682_v24 = vpop.permute.xlu0 %3681 }
 0x357   : > { %2739 = vst.msk [vmem:[#allocation3 + $0x1e0] sm:$0xff] %vm2726_vm15, %v2655_v41  ;;  %3058 = vrot.lane.b32.xlu1 %v9536_v51, %s7626_s23  ;;  %v3920_v14 = vld [vmem:[#allocation3 + $0x3a8] sm:$0xff] }
 0x358   : > { %3765 = vst.msk [vmem:[#allocation3 + $0x1e8] sm:$0xff] %vm3112_vm2, %v3682_v24 }
 0x359   : > { %3509 = vrot.lane.b32.xlu0 %v9634_v3, %s7625_s9  ;;  %v2848_v5 = vpop.permute.xlu1 %2847 }
 0x35a   : > { %v3917_v27 = vld [vmem:[#allocation3 + $0x380] sm:$0xff]  ;;  %2932 = vst.msk [vmem:[#allocation3 + $0x1e0] sm:$0xff] %vm2919_vm1, %v2848_v5 }
 0x35b   : > { %v3882_v26 = vld [vmem:[#allocation3 + $0x1b8] sm:$0xff]  ;;  %7370 = vmatprep.mubr.msk.f32.mxu0 %vm2469_vm14, %v3917_v27  ;;  %v3300_v11 = vpop.permute.xlu0 %3299  ;;  %v7322_v1 = vpop.f32.mrf.mxu0  ;;  %2674 = vrot.lane.b32.xlu1 %v9490_v13, %s7624_s13 }
 0x35c   : > { %4204 = vmatmul.mubr.f32.gmra.mxu1 %v3882_v26  ;;  %7371 = vmatmul.mubr.msk.f32.gmra.mxu0 %vm2469_vm14, %v3920_v14  ;;  %3382 = vst.msk [vmem:[#allocation3 + $0x210] sm:$0xff] %vm2726_vm15, %v3300_v11  ;;  %v2414_v21 = vadd.f32 %v9251_v53, %v7322_v1 }
 0x35d   : > { %3701 = vrot.lane.b32.xlu0 %v9618_v55, %s7626_s23  ;;  %v2408_v62 = vpop.f32.mrf.mxu0  ;;  %v3041_v46 = vpop.permute.xlu1 %3040 }
 0x35e   : > { %v2464_v59 = vmax.f32 %v2414_v21, 0.0  ;;  %v2409_v51 = vadd.f32 %v9251_v53, %v2408_v62  ;;  %3125 = vst.msk [vmem:[#allocation3 + $0x1e0] sm:$0xff] %vm3112_vm2, %v3041_v46 }
 0x35f   : > { %v3492_v7 = vpop.permute.xlu0 %3491  ;;  %v3886_v37 = vld [vmem:[#allocation3 + $0x1e8] sm:$0xff]  ;;  %2867 = vrot.lane.b32.xlu1 %v9492_v45, %s7625_s9 }
 0x360   : > { %3574 = vst.msk [vmem:[#allocation3 + $0x210] sm:$0xff] %vm2919_vm1, %v3492_v7  ;;  %4208 = vmatprep.mubr.f32.mxu1 %v3886_v37  ;;  %v2463_v13 = vmax.f32 %v2409_v51, 0.0 }
 0x361   : > { %2497 = vst.msk [vmem:[#allocation2 + $0x1d0] sm:$0xff] %vm2469_vm14, %v2464_v59  ;;  %3319 = vrot.lane.b32.xlu0 %v9542_v43, %s7624_s13  ;;  %v2657_v58 = vpop.permute.xlu1 %2656 }
 0x362   : > { %2496 = vst.msk [vmem:[#allocation2 + $0x1c8] sm:$0xff] %vm2469_vm14, %v2463_v13 }
 0x363   : > { %2740 = vst.msk [vmem:[#allocation3 + $0x208] sm:$0xff] %vm2726_vm15, %v2657_v58  ;;  %v3684_v53 = vpop.permute.xlu0 %3683  ;;  %3060 = vrot.lane.b32.xlu1 %v9571_v47, %s7626_s23 }
 0x364   : > { %3766 = vst.msk [vmem:[#allocation3 + $0x210] sm:$0xff] %vm3112_vm2, %v3684_v53 }
 0x365   : > { %3511 = vrot.lane.b32.xlu0 %v9664_v6, %s7625_s9  ;;  %v2850_v45 = vpop.permute.xlu1 %2849  ;;  %v3885_v48 = vld [vmem:[#allocation3 + $0x1e0] sm:$0xff] }
 0x366   : > { %2933 = vst.msk [vmem:[#allocation3 + $0x208] sm:$0xff] %vm2919_vm1, %v2850_v45  ;;  %4209 = vmatmul.mubr.f32.gmra.mxu1 %v3885_v48 }
 0x367   : > { %v3302_v4 = vpop.permute.xlu0 %3301  ;;  %2676 = vrot.lane.b32.xlu1 %v9480_v36, %s7624_s13 }
 0x368   : > { %v9669_v28 = vld [vmem:[#allocation2 + $0x1d1] sm:$0xff]  ;;  %3383 = vst.msk [vmem:[#allocation3 + $0x238] sm:$0xff] %vm2726_vm15, %v3302_v4 }
 0x369   : > { %v9671_v34 = vld [vmem:[#allocation2 + $0x1d0] sm:$0xff]  ;;  %3842 = vst.msk [vmem:[#allocation3 + $0x3f8] sm:$0xff] %vm2469_vm14, %v9669_v28  ;;  %3703 = vrot.lane.b32.xlu0 %v9607_v44, %s7626_s23  ;;  %v9682_v20 = vld [vmem:[#allocation2 + $0x1c8] sm:$0xff]  ;;  %v3043_v47 = vpop.permute.xlu1 %3042  ;;  %v5862_v4 = vld [vmem:[%s11316_s5 + $0x78] sm:$0xff] }
 0x36a   : > { %3204 = vst.msk [vmem:[#allocation3 + $0x440] sm:$0xff] %vm2469_vm14, %v9671_v34  ;;  %v9684_v17 = vld [vmem:[#allocation2 + $0x1c9] sm:$0xff]  ;;  %3203 = vst.msk [vmem:[#allocation3 + $0x418] sm:$0xff] %vm2469_vm14, %v9682_v20  ;;  %6023 = vmatpush1.msra.mxu0 %v5862_v4 }
 0x36b   : > { %3841 = vst.msk [vmem:[#allocation3 + $0x3d0] sm:$0xff] %vm2469_vm14, %v9684_v17  ;;  %v2530_v36 = vld [vmem:[#allocation2 + $0x1c7] sm:$0xff]  ;;  %v2531_v2 = vld [vmem:[#allocation2 + $0x1cf] sm:$0xff]  ;;  %v3494_v29 = vpop.permute.xlu0 %3493  ;;  %2869 = vrot.lane.b32.xlu1 %v9478_v30, %s7625_s9  ;;  %6024 = vmatprep.subr.mxu0 %v7616_v0 }
 0x36c   : > { %3126 = vst.msk [vmem:[#allocation3 + $0x208] sm:$0xff] %vm3112_vm2, %v3043_v47  ;;  %v3889_v57 = vld [vmem:[#allocation3 + $0x210] sm:$0xff]  ;;  %v9698_v52 = vld [vmem:[#allocation2 + $0x1c7] sm:$0xff] }
 0x36d   : > { %2562 = vst.msk [vmem:[#allocation3 + $0x460] sm:$0xff] %vm2469_vm14, %v2530_v36  ;;  %2563 = vst.msk [vmem:[#allocation3 + $0x488] sm:$0xff] %vm2469_vm14, %v2531_v2  ;;  %4213 = vmatprep.mubr.f32.mxu1 %v3889_v57  ;;  %3321 = vrot.lane.b32.xlu0 %v9620_v12, %s7624_s13  ;;  %v2659_v63 = vpop.permute.xlu1 %2658  ;;  %v9730_v49 = vld [vmem:[#allocation2 + $0x1cf] sm:$0xff] }
 0x36e   : > { %3575 = vst.msk [vmem:[#allocation3 + $0x238] sm:$0xff] %vm2919_vm1, %v3494_v29 }
 0x36f   : > { %2741 = vst.msk [vmem:[#allocation3 + $0x230] sm:$0xff] %vm2726_vm15, %v2659_v63  ;;  %v3686_v9 = vpop.permute.xlu0 %3685  ;;  %3062 = vrot.lane.b32.xlu1 %v9600_v54, %s7626_s23  ;;  %v9808_v63 = vld [vmem:[#allocation6] ss:$0 sm:$0xff] }
 0x370   : > { %3767 = vst.msk [vmem:[#allocation3 + $0x238] sm:$0xff] %vm3112_vm2, %v3686_v9  ;;  %v3926_v38 = vld [vmem:[#allocation3 + $0x3f8] sm:$0xff]  ;;  %v5859_v9 = vld [vmem:[%s11316_s5 + $0x60] sm:$0xff] }
 0x371   : > { %3513 = vrot.lane.b32.xlu0 %v9698_v52, %s7625_s9  ;;  %v2852_v8 = vpop.permute.xlu1 %2851 }
 0x372   : > { %v3923_v30 = vld [vmem:[#allocation3 + $0x3d0] sm:$0xff]  ;;  %2934 = vst.msk [vmem:[#allocation3 + $0x230] sm:$0xff] %vm2919_vm1, %v2852_v8 }
 0x373   : > { %v3888_v39 = vld [vmem:[#allocation3 + $0x208] sm:$0xff]  ;;  %7373 = vmatprep.mubr.msk.f32.mxu0 %vm2469_vm14, %v3923_v30  ;;  %v3304_v35 = vpop.permute.xlu0 %3303  ;;  %v7325_v25 = vpop.f32.mrf.mxu0  ;;  %2678 = vrot.lane.b32.xlu1 %v9554_v42, %s7624_s13 }
 0x374   : > { %4214 = vmatmul.mubr.f32.gmra.mxu1 %v3888_v39  ;;  %7374 = vmatmul.mubr.msk.f32.gmra.mxu0 %vm2469_vm14, %v3926_v38  ;;  %3384 = vst.msk [vmem:[#allocation3 + $0x260] sm:$0xff] %vm2726_vm15, %v3304_v35  ;;  %v2424_v60 = vadd.f32 %v9712_v10, %v7325_v25 }
 0x375   : > { %3705 = vrot.lane.b32.xlu0 %v9682_v20, %s7626_s23  ;;  %v2418_v40 = vpop.f32.mrf.mxu0  ;;  %v3045_v19 = vpop.permute.xlu1 %3044 }
 0x376   : > { %v2466_v61 = vmax.f32 %v2424_v60, 0.0  ;;  %v2419_v54 = vadd.f32 %v9712_v10, %v2418_v40  ;;  %3127 = vst.msk [vmem:[#allocation3 + $0x230] sm:$0xff] %vm3112_vm2, %v3045_v19  ;;  %v5857_v19 = vld [vmem:[%s11316_s5 + $0x50] sm:$0xff] }
 0x377   : > { %v3496_v16 = vpop.permute.xlu0 %3495  ;;  %v3892_v18 = vld [vmem:[#allocation3 + $0x238] sm:$0xff]  ;;  %2871 = vrot.lane.b32.xlu1 %v9556_v31, %s7625_s9 }
 0x378   : > { %3576 = vst.msk [vmem:[#allocation3 + $0x260] sm:$0xff] %vm2919_vm1, %v3496_v16  ;;  %4218 = vmatprep.mubr.f32.mxu1 %v3892_v18  ;;  %v2465_v42 = vmax.f32 %v2419_v54, 0.0 }
 0x379   : > { %2499 = vst.msk [vmem:[#allocation2 + $0x1f0] sm:$0xff] %vm2469_vm14, %v2466_v61  ;;  %3323 = vrot.lane.b32.xlu0 %v9605_v56, %s7624_s13  ;;  %v2661_v23 = vpop.permute.xlu1 %2660 }
 0x37a   : > { %2498 = vst.msk [vmem:[#allocation2 + $0x1e8] sm:$0xff] %vm2469_vm14, %v2465_v42 }
 0x37b   : > { %2742 = vst.msk [vmem:[#allocation3 + $0x258] sm:$0xff] %vm2726_vm15, %v2661_v23  ;;  %v3688_v22 = vpop.permute.xlu0 %3687  ;;  %3064 = vrot.lane.b32.xlu1 %v9634_v3, %s7626_s23 }
 0x37c   : > { %3768 = vst.msk [vmem:[#allocation3 + $0x260] sm:$0xff] %vm3112_vm2, %v3688_v22  ;;  %v5856_v22 = vld [vmem:[%s11316_s5 + $0x48] sm:$0xff] }
 0x37d   : > { %3515 = vrot.lane.b32.xlu0 %v9730_v49, %s7625_s9  ;;  %v2854_v31 = vpop.permute.xlu1 %2853  ;;  %v3891_v32 = vld [vmem:[#allocation3 + $0x230] sm:$0xff] }
 0x37e   : > { %2935 = vst.msk [vmem:[#allocation3 + $0x258] sm:$0xff] %vm2919_vm1, %v2854_v31  ;;  %4219 = vmatmul.mubr.f32.gmra.mxu1 %v3891_v32  ;;  %v5855_v31 = vld [vmem:[%s11316_s5 + $0x40] sm:$0xff] }
 0x37f   : > { %v3306_v50 = vpop.permute.xlu0 %3305  ;;  %2680 = vrot.lane.b32.xlu1 %v9544_v33, %s7624_s13 }
 0x380   : > { %v9735_v15 = vld [vmem:[#allocation2 + $0x1f1] sm:$0xff]  ;;  %3385 = vst.msk [vmem:[#allocation3 + $0x288] sm:$0xff] %vm2726_vm15, %v3306_v50 }
 0x381   : > { %v9737_v41 = vld [vmem:[#allocation2 + $0x1f0] sm:$0xff]  ;;  %3844 = vst.msk [vmem:[#allocation3 + $0x448] sm:$0xff] %vm2469_vm14, %v9735_v15  ;;  %3707 = vrot.lane.b32.xlu0 %v9671_v34, %s7626_s23  ;;  %v9748_v3 = vld [vmem:[#allocation2 + $0x1e8] sm:$0xff]  ;;  %v3047_v14 = vpop.permute.xlu1 %3046 }
 0x382   : > { %3206 = vst.msk [vmem:[#allocation3 + $0x490] sm:$0xff] %vm2469_vm14, %v9737_v41  ;;  %v9750_v24 = vld [vmem:[#allocation2 + $0x1e9] sm:$0xff]  ;;  %3205 = vst.msk [vmem:[#allocation3 + $0x468] sm:$0xff] %vm2469_vm14, %v9748_v3 }
 0x383   : > { %3843 = vst.msk [vmem:[#allocation3 + $0x420] sm:$0xff] %vm2469_vm14, %v9750_v24  ;;  %v2532_v33 = vld [vmem:[#allocation2 + $0x1e7] sm:$0xff]  ;;  %v2533_v27 = vld [vmem:[#allocation2 + $0x1ef] sm:$0xff]  ;;  %v3498_v5 = vpop.permute.xlu0 %3497  ;;  %2873 = vrot.lane.b32.xlu1 %v9542_v43, %s7625_s9 }
 0x384   : > { %3128 = vst.msk [vmem:[#allocation3 + $0x258] sm:$0xff] %vm3112_vm2, %v3047_v14  ;;  %v3895_v26 = vld [vmem:[#allocation3 + $0x260] sm:$0xff]  ;;  %v9806_v57 = vld [vmem:[#allocation2 + $0x1ef] sm:$0xff] }
 0x385   : > { %2564 = vst.msk [vmem:[#allocation3 + $0x4b0] sm:$0xff] %vm2469_vm14, %v2532_v33  ;;  %2565 = vst.msk [vmem:[#allocation3 + $0x4d8] sm:$0xff] %vm2469_vm14, %v2533_v27  ;;  %4223 = vmatprep.mubr.f32.mxu1 %v3895_v26  ;;  %3325 = vrot.lane.b32.xlu0 %v9684_v17, %s7624_s13  ;;  %v2663_v11 = vpop.permute.xlu1 %2662  ;;  %v9764_v1 = vld [vmem:[#allocation2 + $0x1e7] sm:$0xff] }
 0x386   : > { %3577 = vst.msk [vmem:[#allocation3 + $0x288] sm:$0xff] %vm2919_vm1, %v3498_v5 }
 0x387   : > { %2743 = vst.msk [vmem:[#allocation3 + $0x280] sm:$0xff] %vm2726_vm15, %v2663_v11  ;;  %v3690_v21 = vpop.permute.xlu0 %3689  ;;  %3066 = vrot.lane.b32.xlu1 %v9664_v6, %s7626_s23 }
 0x388   : > { %3769 = vst.msk [vmem:[#allocation3 + $0x288] sm:$0xff] %vm3112_vm2, %v3690_v21  ;;  %v3932_v62 = vld [vmem:[#allocation3 + $0x448] sm:$0xff]  ;;  %v5853_v21 = vld [vmem:[%s11316_s5 + $0x30] sm:$0xff] }
 0x389   : > { %3517 = vrot.lane.b32.xlu0 %v9764_v1, %s7625_s9  ;;  %v2856_v46 = vpop.permute.xlu1 %2855 }
 0x38a   : > { %v3929_v43 = vld [vmem:[#allocation3 + $0x420] sm:$0xff]  ;;  %2936 = vst.msk [vmem:[#allocation3 + $0x280] sm:$0xff] %vm2919_vm1, %v2856_v46 }
 0x38b   : > { %v3894_v59 = vld [vmem:[#allocation3 + $0x258] sm:$0xff]  ;;  %7376 = vmatprep.mubr.msk.f32.mxu0 %vm2469_vm14, %v3929_v43  ;;  %v3308_v51 = vpop.permute.xlu0 %3307  ;;  %2682 = vrot.lane.b32.xlu1 %v9618_v55, %s7624_s13  ;;  %v5861_v55 = vld [vmem:[%s11316_s5 + $0x70] sm:$0xff] }
 0x38c   : > { %4224 = vmatmul.mubr.f32.gmra.mxu1 %v3894_v59  ;;  %v7328_v7 = vpop.f32.mrf.mxu0  ;;  %7377 = vmatmul.mubr.msk.f32.gmra.mxu0 %vm2469_vm14, %v3932_v62  ;;  %3386 = vst.msk [vmem:[#allocation3 + $0x2b0] sm:$0xff] %vm2726_vm15, %v3308_v51  ;;  %v5852_v59 = vld [vmem:[%s11316_s5 + $0x28] sm:$0xff] }
 0x38d   : > { %v2434_v37 = vadd.f32 %v9712_v10, %v7328_v7  ;;  %3709 = vrot.lane.b32.xlu0 %v9748_v3, %s7626_s23  ;;  %v3049_v6 = vpop.permute.xlu1 %3048  ;;  %6025 = vmatpush1.msra.mxu0 %v5861_v55  ;;  %v5848_v55 = vld [vmem:[%s11316_s5 + $0x8] sm:$0xff] }
 0x38e   : > { %v2428_v13 = vpop.f32.mrf.mxu0  ;;  %3129 = vst.msk [vmem:[#allocation3 + $0x280] sm:$0xff] %vm3112_vm2, %v3049_v6  ;;  %6026 = vmatprep.subr.mxu0 %v7616_v0  ;;  %v5850_v6 = vld [vmem:[%s11316_s5 + $0x18] sm:$0xff] }
 0x38f   : > { %v2468_v58 = vmax.f32 %v2434_v37, 0.0  ;;  %v2429_v53 = vadd.f32 %v9712_v10, %v2428_v13  ;;  %v3500_v45 = vpop.permute.xlu0 %3499  ;;  %v3898_v48 = vld [vmem:[#allocation3 + $0x288] sm:$0xff]  ;;  %2875 = vrot.lane.b32.xlu1 %v9620_v12, %s7625_s9  ;;  %v5858_v10 = vld [vmem:[%s11316_s5 + $0x58] sm:$0xff] }
 0x390   : > { %3578 = vst.msk [vmem:[#allocation3 + $0x2b0] sm:$0xff] %vm2919_vm1, %v3500_v45  ;;  %4228 = vmatprep.mubr.f32.mxu1 %v3898_v48  ;;  %v5860_v12 = vld [vmem:[%s11316_s5 + $0x68] sm:$0xff]  ;;  %v9801_v29 = vpop.f32.mrf.mxu0 }
 0x391   : > { %2501 = vst.msk [vmem:[#allocation2 + $0x210] sm:$0xff] %vm2469_vm14, %v2468_v58  ;;  %v2467_v47 = vmax.f32 %v2429_v53, 0.0  ;;  %3327 = vrot.lane.b32.xlu0 %v9669_v28, %s7624_s13  ;;  %v2665_v36 = vpop.permute.xlu1 %2664  ;;  %6027 = vmatpush1.msra.mxu0 %v5860_v12  ;;  %v5851_v53 = vld [vmem:[%s11316_s5 + $0x20] sm:$0xff] }
 0x392   : > { %2744 = vst.msk [vmem:[#allocation3 + $0x2a8] sm:$0xff] %vm2726_vm15, %v2665_v36  ;;  %6028 = vmatprep.subr.mxu0 %v7616_v0  ;;  %v4375_v60 = vpop.f32.mrf.mxu0 }
 0x393   : > { %2500 = vst.msk [vmem:[#allocation2 + $0x208] sm:$0xff] %vm2469_vm14, %v2467_v47  ;;  %v3692_v2 = vpop.permute.xlu0 %3691  ;;  %3068 = vrot.lane.b32.xlu1 %v9698_v52, %s7626_s23  ;;  %6029 = vmatpush1.msra.mxu0 %v5859_v9  ;;  %v5847_v9 = vld [vmem:[%s11316_s5] sm:$0xff] }
 0x394   : > { %3770 = vst.msk [vmem:[#allocation3 + $0x2b0] sm:$0xff] %vm3112_vm2, %v3692_v2  ;;  %6030 = vmatprep.subr.mxu0 %v7616_v0  ;;  %v9913_v4 = vpop.f32.mrf.mxu0 }
 0x395   : > { %3519 = vrot.lane.b32.xlu0 %v9806_v57, %s7625_s9  ;;  %v2858_v38 = vpop.permute.xlu1 %2857  ;;  %v3897_v8 = vld [vmem:[#allocation3 + $0x280] sm:$0xff]  ;;  %6031 = vmatpush1.msra.mxu0 %v5858_v10 }
 0x396   : > { %v4150_v30 = vpop.f32.mrf.mxu1  ;;  %2937 = vst.msk [vmem:[#allocation3 + $0x2a8] sm:$0xff] %vm2919_vm1, %v2858_v38  ;;  %4229 = vmatmul.mubr.f32.gmra.mxu1 %v3897_v8  ;;  %6032 = vmatprep.subr.mxu0 %v7616_v0  ;;  %v4385_v38 = vpop.f32.mrf.mxu0 }
 0x397   : > { %v3310_v52 = vpop.permute.xlu0 %3309  ;;  %v4151_v39 = vadd.f32 %v9808_v63, %v4150_v30  ;;  %2684 = vrot.lane.b32.xlu1 %v9607_v44, %s7624_s13  ;;  %6033 = vmatpush1.msra.mxu0 %v5857_v19 }
 0x398   : > { %v9819_v35 = vld [vmem:[#allocation2 + $0x211] sm:$0xff]  ;;  %3387 = vst.msk [vmem:[#allocation3 + $0x2d8] sm:$0xff] %vm2726_vm15, %v3310_v52  ;;  %v4152_v40 = vpop.f32.mrf.mxu1  ;;  %6034 = vmatprep.subr.mxu0 %v7616_v0 }
 0x399   : > { %v9821_v25 = vld [vmem:[#allocation2 + $0x210] sm:$0xff]  ;;  %3846 = vst.msk [vmem:[#allocation3 + $0x498] sm:$0xff] %vm2469_vm14, %v9819_v35  ;;  %v4376_v61 = vadd.f32 %v4375_v60, %v4151_v39  ;;  %3711 = vrot.lane.b32.xlu0 %v9737_v41, %s7626_s23  ;;  %v3051_v44 = vpop.permute.xlu1 %3050  ;;  %6035 = vmatpush1.msra.mxu0 %v5856_v22 }
 0x39a   : > { %3208 = vst.msk [vmem:[#allocation3 + $0x4e0] sm:$0xff] %vm2469_vm14, %v9821_v25  ;;  %v3621_v54 = vld [vmem:[#allocation2 + $0x208] sm:$0xff]  ;;  %6036 = vmatprep.subr.mxu0 %v7616_v0 }
 0x39b   : > { %v9839_v16 = vld [vmem:[#allocation2 + $0x209] sm:$0xff]  ;;  %3207 = vst.msk [vmem:[#allocation3 + $0x4b8] sm:$0xff] %vm2469_vm14, %v3621_v54  ;;  %v4534_v18 = vmax.f32 %v4376_v61, 0.0  ;;  %v3502_v42 = vpop.permute.xlu0 %3501  ;;  %2877 = vrot.lane.b32.xlu1 %v9605_v56, %s7625_s9  ;;  %v5854_v56 = vld [vmem:[%s11316_s5 + $0x38] sm:$0xff]  ;;  %6037 = vmatpush1.msra.mxu0 %v5855_v31 }
 0x39c   : > { %3845 = vst.msk [vmem:[#allocation3 + $0x470] sm:$0xff] %vm2469_vm14, %v9839_v16  ;;  %v3901_v23 = vld [vmem:[#allocation3 + $0x2b0] sm:$0xff]  ;;  %v9859_v50 = vld [vmem:[#allocation2 + $0x207] sm:$0xff]  ;;  %6038 = vmatprep.subr.mxu0 %v7616_v0 }
 0x39d   : > { %3130 = vst.msk [vmem:[#allocation3 + $0x2a8] sm:$0xff] %vm3112_vm2, %v3051_v44  ;;  %4233 = vmatprep.mubr.f32.mxu1 %v3901_v23  ;;  %3329 = vrot.lane.b32.xlu0 %v9750_v24, %s7624_s13  ;;  %v2667_v32 = vpop.permute.xlu1 %2666  ;;  %v9918_v47 = vld [vmem:[#allocation2 + $0x20f] sm:$0xff] }
 0x39e   : > { %3579 = vst.msk [vmem:[#allocation3 + $0x2d8] sm:$0xff] %vm2919_vm1, %v3502_v42  ;;  %6039 = vmatpush1.msra.mxu0 %v5854_v56  ;;  %v3815_v44 = vld [vmem:[#allocation2 + $0x229] sm:$0xff]  ;;  %v3816_v23 = vld [vmem:[#allocation2 + $0x231] sm:$0xff] }
 0x39f   : > { %4566 = vst.msk [vmem:[#allocation2 + $0x28] sm:$0xff] %vm317_vm0, %v4534_v18  ;;  %v3694_v14 = vpop.permute.xlu0 %3693  ;;  %3070 = vrot.lane.b32.xlu1 %v9730_v49, %s7626_s23  ;;  %6040 = vmatprep.subr.mxu0 %v7616_v0  ;;  %v3431_v42 = vld [vmem:[#allocation2 + $0x227] sm:$0xff] }
 0x3a0   : > { %2745 = vst.msk [vmem:[#allocation3 + $0x2d0] sm:$0xff] %vm2726_vm15, %v2667_v32  ;;  %v3938_v33 = vld [vmem:[#allocation3 + $0x498] sm:$0xff]  ;;  %6041 = vmatpush1.msra.mxu0 %v5853_v21  ;;  %v3623_v56 = vld [vmem:[#allocation2 + $0x228] sm:$0xff] }
 0x3a1   : > { %3771 = vst.msk [vmem:[#allocation3 + $0x2d8] sm:$0xff] %vm3112_vm2, %v3694_v14  ;;  %3521 = vrot.lane.b32.xlu0 %v9859_v50, %s7625_s9  ;;  %v2860_v5 = vpop.permute.xlu1 %2859  ;;  %6042 = vmatprep.subr.mxu0 %v7616_v0 }
 0x3a2   : > { %v4155_v26 = vpop.f32.mrf.mxu1  ;;  %2938 = vst.msk [vmem:[#allocation3 + $0x2d0] sm:$0xff] %vm2919_vm1, %v2860_v5  ;;  %6043 = vmatpush1.msra.mxu0 %v5852_v59 }
 0x3a3   : > { %v3935_v27 = vld [vmem:[#allocation3 + $0x470] sm:$0xff]  ;;  %v3312_v49 = vpop.permute.xlu0 %3311  ;;  %v4156_v62 = vadd.f32 %v9808_v63, %v4155_v26  ;;  %2686 = vrot.lane.b32.xlu1 %v9682_v20, %s7624_s13  ;;  %6044 = vmatprep.subr.mxu0 %v7616_v0  ;;  %3847 = vst.msk [vmem:[#allocation3 + $0x4c0] sm:$0xff] %vm2469_vm14, %v3815_v44  ;;  %3848 = vst.msk [vmem:[#allocation3 + $0x4e8] sm:$0xff] %vm2469_vm14, %v3816_v23 }
 0x3a4   : > { %v3900_v11 = vld [vmem:[#allocation3 + $0x2a8] sm:$0xff]  ;;  %7379 = vmatprep.mubr.msk.f32.mxu0 %vm2469_vm14, %v3935_v27  ;;  %3388 = vst.msk [vmem:[#allocation3 + $0x300] sm:$0xff] %vm2726_vm15, %v3312_v49  ;;  %v4157_v43 = vpop.f32.mrf.mxu1  ;;  %6045 = vmatpush1.msra.mxu0 %v5851_v53 }
 0x3a5   : > { %4234 = vmatmul.mubr.f32.gmra.mxu1 %v3900_v11  ;;  %7380 = vmatmul.mubr.msk.f32.gmra.mxu0 %vm2469_vm14, %v3938_v33  ;;  %v4381_v51 = vadd.f32 %v9801_v29, %v4156_v62  ;;  %v3053_v37 = vpop.permute.xlu1 %3052  ;;  %v5874_v33 = vld [vmem:[%s11316_s5 + $0xd8] sm:$0xff]  ;;  %v5873_v11 = vld [vmem:[%s11316_s5 + $0xd0] sm:$0xff] }
 0x3a6   : > { %v9882_v46 = vld [vmem:[#allocation2 + $0x27] sm:$0xff]  ;;  %3713 = vrot.lane.b32.xlu0 %v3621_v54, %s7626_s23  ;;  %3131 = vst.msk [vmem:[#allocation3 + $0x2d0] sm:$0xff] %vm3112_vm2, %v3053_v37  ;;  %6046 = vmatprep.subr.mxu0 %v7616_v0  ;;  %v5877_v54 = vld [vmem:[%s11316_s5 + $0xf0] sm:$0xff] }
 0x3a7   : > { %4632 = vst.msk [vmem:[#allocation3 + $0x50] sm:$0xff] %vm317_vm0, %v9882_v46  ;;  %v5111_v7 = vld [vmem:[#allocation2 + $0x28] sm:$0xff]  ;;  %v4535_v20 = vmax.f32 %v4381_v51, 0.0  ;;  %v3504_v13 = vpop.permute.xlu0 %3503  ;;  %2879 = vrot.lane.b32.xlu1 %v9684_v17, %s7625_s9  ;;  %v5849_v17 = vld [vmem:[%s11316_s5 + $0x10] sm:$0xff]  ;;  %6047 = vmatpush1.msra.mxu0 %v5850_v6 }
 0x3a8   : > { %5143 = vst.msk [vmem:[#allocation3 + $0x10] sm:$0xff] %vm317_vm0, %v5111_v7  ;;  %v3904_v58 = vld [vmem:[#allocation3 + $0x2d8] sm:$0xff]  ;;  %6048 = vmatprep.subr.mxu0 %v7616_v0  ;;  %v5872_v37 = vld [vmem:[%s11316_s5 + $0xc8] sm:$0xff] }
 0x3a9   : > { %3580 = vst.msk [vmem:[#allocation3 + $0x300] sm:$0xff] %vm2919_vm1, %v3504_v13  ;;  %4238 = vmatprep.mubr.f32.mxu1 %v3904_v58  ;;  %v2669_v45 = vpop.permute.xlu1 %2668  ;;  %6049 = vmatpush1.msra.mxu0 %v5849_v17  ;;  %v5871_v13 = vld [vmem:[%s11316_s5 + $0xc0] sm:$0xff]  ;;  %v3432_v53 = vld [vmem:[#allocation2 + $0x22f] sm:$0xff] }
 0x3aa   : > { %4567 = vst.msk [vmem:[#allocation2 + $0x30] sm:$0xff] %vm317_vm0, %v4535_v20  ;;  %3331 = vrot.lane.b32.xlu0 %v9735_v15, %s7624_s13  ;;  %6050 = vmatprep.subr.mxu0 %v7616_v0  ;;  %v3941_v49 = vld [vmem:[#allocation3 + $0x4c0] sm:$0xff]  ;;  %v3944_v20 = vld [vmem:[#allocation3 + $0x4e8] sm:$0xff]  ;;  %v4856_v6 = vld [vmem:[#allocation2 + $0x11] sm:$0xff] }
 0x3ab   : > { %2746 = vst.msk [vmem:[#allocation3 + $0x2f8] sm:$0xff] %vm2726_vm15, %v2669_v45  ;;  %v3696_v48 = vpop.permute.xlu0 %3695  ;;  %3072 = vrot.lane.b32.xlu1 %v9764_v1, %s7626_s23  ;;  %6051 = vmatpush1.msra.mxu0 %v5848_v55  ;;  %v10024_v45 = vpop.f32.mrf.mxu0  ;;  %v4598_v17 = vld [vmem:[#allocation2 + $0x7] sm:$0xff] }
 0x3ac   : > { %3772 = vst.msk [vmem:[#allocation3 + $0x300] sm:$0xff] %vm3112_vm2, %v3696_v48  ;;  %6052 = vmatprep.subr.mxu0 %v7616_v0  ;;  %7382 = vmatprep.mubr.msk.f32.mxu0 %vm2469_vm14, %v3941_v49  ;;  %v5869_v48 = vld [vmem:[%s11316_s5 + $0xb0] sm:$0xff] }
 0x3ad   : > { %v2862_v36 = vpop.permute.xlu1 %2861  ;;  %v3903_v12 = vld [vmem:[#allocation3 + $0x2d0] sm:$0xff]  ;;  %6053 = vmatpush1.msra.mxu0 %v5847_v9  ;;  %4888 = vst.msk [vmem:[#allocation3 + $0x30] sm:$0xff] %vm317_vm0, %v4856_v6  ;;  %4630 = vst.msk [vmem:[#allocation3] sm:$0xff] %vm317_vm0, %v4598_v17 }
 0x3ae   : > { %3523 = vrot.lane.b32.xlu0 %v9918_v47, %s7625_s9  ;;  %v4160_v2 = vpop.f32.mrf.mxu1  ;;  %2939 = vst.msk [vmem:[#allocation3 + $0x2f8] sm:$0xff] %vm2919_vm1, %v2862_v36  ;;  %4239 = vmatmul.mubr.f32.gmra.mxu1 %v3903_v12 }
 0x3af   : > { %v3314_v29 = vpop.permute.xlu0 %3313  ;;  %v4161_v1 = vadd.f32 %v9808_v63, %v4160_v2  ;;  %2688 = vrot.lane.b32.xlu1 %v9671_v34, %s7624_s13  ;;  %v5878_v34 = vld [vmem:[%s11316_s5 + $0xf8] sm:$0xff]  ;;  %6054 = vmatprep.subr.mxu0 %v7616_v0  ;;  %v3624_v2 = vld [vmem:[#allocation2 + $0x230] sm:$0xff] }
 0x3b0   : > { %3389 = vst.msk [vmem:[#allocation3 + $0x328] sm:$0xff] %vm2726_vm15, %v3314_v29  ;;  %v4162_v30 = vpop.f32.mrf.mxu1  ;;  %6055 = vmatpush2.msra.mxu0 %v5878_v34  ;;  %v5868_v29 = vld [vmem:[%s11316_s5 + $0xa8] sm:$0xff] }
 0x3b1   : > { %v9935_v8 = vld [vmem:[#allocation2 + $0x2f] sm:$0xff]  ;;  %v4386_v52 = vadd.f32 %v4385_v38, %v4161_v1  ;;  %v3055_v40 = vpop.permute.xlu1 %3054  ;;  %6056 = vmatprep.subr.mxu0 %v7616_v0  ;;  %7383 = vmatmul.mubr.msk.f32.gmra.mxu0 %vm2469_vm14, %v3944_v20  ;;  %v4395_v1 = vpop.f32.mrf.mxu0 }
 0x3b2   : > { %3715 = vrot.lane.b32.xlu0 %v9821_v25, %s7626_s23  ;;  %v9940_v39 = vld [vmem:[#allocation2 + $0x29] sm:$0xff]  ;;  %v9942_v10 = vld [vmem:[#allocation2 + $0x31] sm:$0xff]  ;;  %4633 = vst.msk [vmem:[#allocation3 + $0x78] sm:$0xff] %vm317_vm0, %v9935_v8  ;;  %6057 = vmatpush2.msra.mxu0 %v5877_v54 }
 0x3b3   : > { %v5112_v60 = vld [vmem:[#allocation2 + $0x30] sm:$0xff]  ;;  %4889 = vst.msk [vmem:[#allocation3 + $0x58] sm:$0xff] %vm317_vm0, %v9940_v39  ;;  %4890 = vst.msk [vmem:[#allocation3 + $0x80] sm:$0xff] %vm317_vm0, %v9942_v10  ;;  %v4536_v25 = vmax.f32 %v4386_v52, 0.0  ;;  %v3506_v19 = vpop.permute.xlu0 %3505  ;;  %v3907_v61 = vld [vmem:[#allocation3 + $0x300] sm:$0xff]  ;;  %2881 = vrot.lane.b32.xlu1 %v9669_v28, %s7625_s9  ;;  %6058 = vmatprep.subr.mxu0 %v7616_v0 }
 0x3b4   : > { %5144 = vst.msk [vmem:[#allocation3 + $0x38] sm:$0xff] %vm317_vm0, %v5112_v60  ;;  %4243 = vmatprep.mubr.f32.mxu1 %v3907_v61  ;;  %v5876_v28 = vld [vmem:[%s11316_s5 + $0xe8] sm:$0xff]  ;;  %v5867_v60 = vld [vmem:[%s11316_s5 + $0xa0] sm:$0xff]  ;;  %v4665_v6 = vld [vmem:[#allocation2 + $0x30] sm:$0xff] }
 0x3b5   : > { %3132 = vst.msk [vmem:[#allocation3 + $0x2f8] sm:$0xff] %vm3112_vm2, %v3055_v40  ;;  %v2671_v18 = vpop.permute.xlu1 %2670  ;;  %6059 = vmatpush2.msra.mxu0 %v5876_v28  ;;  %v4599_v40 = vld [vmem:[#allocation2 + $0xf] sm:$0xff]  ;;  %v5866_v28 = vld [vmem:[%s11316_s5 + $0x98] sm:$0xff] }
 0x3b6   : > { %3581 = vst.msk [vmem:[#allocation3 + $0x328] sm:$0xff] %vm2919_vm1, %v3506_v19  ;;  %3333 = vrot.lane.b32.xlu0 %v9839_v16, %s7624_s13  ;;  %v5875_v16 = vld [vmem:[%s11316_s5 + $0xe0] sm:$0xff]  ;;  %6060 = vmatprep.subr.mxu0 %v7616_v0 }
 0x3b7   : > { %4568 = vst.msk [vmem:[#allocation2 + $0x48] sm:$0xff] %vm317_vm0, %v4536_v25  ;;  %v3698_v22 = vpop.permute.xlu0 %3697  ;;  %3074 = vrot.lane.b32.xlu1 %v9806_v57, %s7626_s23  ;;  %6061 = vmatpush2.msra.mxu0 %v5875_v16  ;;  %4631 = vst.msk [vmem:[#allocation3 + $0x28] sm:$0xff] %vm317_vm0, %v4599_v40  ;;  %v4662_v16 = vld [vmem:[#allocation2 + $0x8] sm:$0xff] }
 0x3b8   : > { %2747 = vst.msk [vmem:[#allocation3 + $0x320] sm:$0xff] %vm2726_vm15, %v2671_v18  ;;  %6062 = vmatprep.subr.mxu0 %v7616_v0 }
 0x3b9   : > { %3773 = vst.msk [vmem:[#allocation3 + $0x328] sm:$0xff] %vm3112_vm2, %v3698_v22  ;;  %v2864_v31 = vpop.permute.xlu1 %2863  ;;  %6063 = vmatpush2.msra.mxu0 %v5874_v33 }
 0x3ba   : > { %3525 = vrot.lane.b32.xlu0 %v3431_v42, %s7625_s9  ;;  %v4165_v32 = vpop.f32.mrf.mxu1  ;;  %2940 = vst.msk [vmem:[#allocation3 + $0x320] sm:$0xff] %vm2919_vm1, %v2864_v31  ;;  %6064 = vmatprep.subr.mxu0 %v7616_v0 }
 0x3bb   : > { %v3316_v57 = vpop.permute.xlu0 %3315  ;;  %v4166_v27 = vadd.f32 %v9808_v63, %v4165_v32  ;;  %2690 = vrot.lane.b32.xlu1 %v9748_v3, %s7624_s13  ;;  %6065 = vmatpush2.msra.mxu0 %v5873_v11  ;;  %v4663_v11 = vld [vmem:[#allocation2 + $0x10] sm:$0xff] }
 0x3bc   : > { %v3906_v14 = vld [vmem:[#allocation3 + $0x2f8] sm:$0xff]  ;;  %3390 = vst.msk [vmem:[#allocation3 + $0x350] sm:$0xff] %vm2726_vm15, %v3316_v57  ;;  %v4167_v5 = vpop.f32.mrf.mxu1  ;;  %6066 = vmatprep.subr.mxu0 %v7616_v0 }
 0x3bd   : > { %4244 = vmatmul.mubr.f32.gmra.mxu1 %v3906_v14  ;;  %v4391_v21 = vadd.f32 %v9913_v4, %v4166_v27  ;;  %v3057_v43 = vpop.permute.xlu1 %3056  ;;  %6067 = vmatpush2.msra.mxu0 %v5872_v37 }
 0x3be   : > { %v9989_v26 = vld [vmem:[#allocation2 + $0x47] sm:$0xff]  ;;  %3717 = vrot.lane.b32.xlu0 %v3623_v56, %s7626_s23  ;;  %3133 = vst.msk [vmem:[#allocation3 + $0x320] sm:$0xff] %vm3112_vm2, %v3057_v43  ;;  %6068 = vmatprep.subr.mxu0 %v7616_v0 }
 0x3bf   : > { %4634 = vst.msk [vmem:[#allocation3 + $0xa0] sm:$0xff] %vm317_vm0, %v9989_v26  ;;  %v5367_v62 = vld [vmem:[#allocation2 + $0x47] sm:$0xff]  ;;  %v4537_v59 = vmax.f32 %v4391_v21, 0.0  ;;  %v3508_v51 = vpop.permute.xlu0 %3507  ;;  %2883 = vrot.lane.b32.xlu1 %v9750_v24, %s7625_s9  ;;  %6069 = vmatpush2.msra.mxu0 %v5871_v13 }
 0x3c0   : > { %v5113_v3 = vld [vmem:[#allocation2 + $0x48] sm:$0xff]  ;;  %5399 = vst.msk [vmem:[#allocation3 + $0x18] sm:$0xff] %vm317_vm0, %v5367_v62  ;;  %6070 = vmatprep.subr.mxu0 %v7616_v0 }
 0x3c1   : > { %5145 = vst.msk [vmem:[#allocation3 + $0x60] sm:$0xff] %vm317_vm0, %v5113_v3  ;;  %v3910_v7 = vld [vmem:[#allocation3 + $0x328] sm:$0xff]  ;;  %4569 = vst.msk [vmem:[#allocation2 + $0x50] sm:$0xff] %vm317_vm0, %v4537_v59  ;;  %v2673_v58 = vpop.permute.xlu1 %2672 }
 0x3c2   : > { %3582 = vst.msk [vmem:[#allocation3 + $0x350] sm:$0xff] %vm2919_vm1, %v3508_v51  ;;  %4248 = vmatprep.mubr.f32.mxu1 %v3910_v7  ;;  %3335 = vrot.lane.b32.xlu0 %v9819_v35, %s7624_s13  ;;  %v5870_v35 = vld [vmem:[%s11316_s5 + $0xb8] sm:$0xff]  ;;  %v4664_v51 = vld [vmem:[#allocation2 + $0x28] sm:$0xff]  ;;  %v7348_v7 = vpop.f32.mrf.mxu0 }
 0x3c3   : > { %2748 = vst.msk [vmem:[#allocation3 + $0x348] sm:$0xff] %vm2726_vm15, %v2673_v58  ;;  %v3700_v24 = vpop.permute.xlu0 %3699  ;;  %3076 = vrot.lane.b32.xlu1 %v9859_v50, %s7626_s23  ;;  %6071 = vmatpush2.msra.mxu0 %v5870_v35 }
 0x3c4   : > { %3774 = vst.msk [vmem:[#allocation3 + $0x350] sm:$0xff] %vm3112_vm2, %v3700_v24  ;;  %6072 = vmatprep.subr.mxu0 %v7616_v0  ;;  %v4405_v24 = vpop.f32.mrf.mxu0 }
 0x3c5   : > { %v2866_v4 = vpop.permute.xlu1 %2865  ;;  %v3909_v36 = vld [vmem:[#allocation3 + $0x320] sm:$0xff]  ;;  %6073 = vmatpush2.msra.mxu0 %v5869_v48 }
 0x3c6   : > { %3527 = vrot.lane.b32.xlu0 %v3432_v53, %s7625_s9  ;;  %v4170_v55 = vpop.f32.mrf.mxu1  ;;  %2941 = vst.msk [vmem:[#allocation3 + $0x348] sm:$0xff] %vm2919_vm1, %v2866_v4  ;;  %4249 = vmatmul.mubr.f32.gmra.mxu1 %v3909_v36 }
 0x3c7   : > { %v3318_v50 = vpop.permute.xlu0 %3317  ;;  %v4171_v12 = vadd.f32 %v9808_v63, %v4170_v55  ;;  %2692 = vrot.lane.b32.xlu1 %v9737_v41, %s7624_s13  ;;  %6074 = vmatprep.subr.mxu0 %v7616_v0 }
 0x3c8   : > { %3391 = vst.msk [vmem:[#allocation3 + $0x378] sm:$0xff] %vm2726_vm15, %v3318_v50  ;;  %v4172_v9 = vpop.f32.mrf.mxu1  ;;  %v10044_v38 = vld [vmem:[#allocation2 + $0x4f] sm:$0xff]  ;;  %6075 = vmatpush2.msra.mxu0 %v5868_v29 }
 0x3c9   : > { %v10046_v30 = vld [vmem:[#allocation2 + $0x49] sm:$0xff]  ;;  %v4396_v52 = vadd.f32 %v4395_v1, %v4171_v12  ;;  %v10053_v34 = vld [vmem:[#allocation2 + $0x51] sm:$0xff]  ;;  %4635 = vst.msk [vmem:[#allocation3 + $0xc8] sm:$0xff] %vm317_vm0, %v10044_v38  ;;  %v3059_v41 = vpop.permute.xlu1 %3058  ;;  %6076 = vmatprep.subr.mxu0 %v7616_v0 }
 0x3ca   : > { %3719 = vrot.lane.b32.xlu0 %v3624_v2, %s7626_s23  ;;  %4891 = vst.msk [vmem:[#allocation3 + $0xa8] sm:$0xff] %vm317_vm0, %v10046_v30  ;;  %4892 = vst.msk [vmem:[#allocation3 + $0xd0] sm:$0xff] %vm317_vm0, %v10053_v34  ;;  %v5368_v25 = vld [vmem:[#allocation2 + $0x4f] sm:$0xff]  ;;  %6077 = vmatpush2.msra.mxu0 %v5867_v60 }
 0x3cb   : > { %v5114_v19 = vld [vmem:[#allocation2 + $0x50] sm:$0xff]  ;;  %v4538_v54 = vmax.f32 %v4396_v52, 0.0  ;;  %3134 = vst.msk [vmem:[#allocation3 + $0x348] sm:$0xff] %vm3112_vm2, %v3059_v41  ;;  %v3510_v44 = vpop.permute.xlu0 %3509  ;;  %2885 = vrot.lane.b32.xlu1 %v9735_v15, %s7625_s9  ;;  %6078 = vmatprep.subr.mxu0 %v7616_v0 }
 0x3cc   : > { %v5623_v61 = vld [vmem:[#allocation2 + $0x49] sm:$0xff]  ;;  %5400 = vst.msk [vmem:[#allocation3 + $0x40] sm:$0xff] %vm317_vm0, %v5368_v25  ;;  %5146 = vst.msk [vmem:[#allocation3 + $0x88] sm:$0xff] %vm317_vm0, %v5114_v19  ;;  %v5624_v42 = vld [vmem:[#allocation2 + $0x51] sm:$0xff]  ;;  %6079 = vmatpush2.msra.mxu0 %v5866_v28 }
 0x3cd   : > { %v3913_v18 = vld [vmem:[#allocation3 + $0x350] sm:$0xff]  ;;  %5655 = vst.msk [vmem:[#allocation3 + $0x20] sm:$0xff] %vm317_vm0, %v5623_v61  ;;  %5656 = vst.msk [vmem:[#allocation3 + $0x48] sm:$0xff] %vm317_vm0, %v5624_v42  ;;  %v2675_v23 = vpop.permute.xlu1 %2674  ;;  %6080 = vmatprep.subr.mxu0 %v7616_v0  ;;  %v5894_v28 = vld [vmem:[%s11316_s5 + $0x178] sm:$0xff] }
 0x3ce   : > { %3583 = vst.msk [vmem:[#allocation3 + $0x378] sm:$0xff] %vm2919_vm1, %v3510_v44  ;;  %4253 = vmatprep.mubr.f32.mxu1 %v3913_v18  ;;  %4983 = vrot.lane.b32.xlu0 %v9882_v46, %s7625_s9  ;;  %v5865_v15 = vld [vmem:[%s11316_s5 + $0x90] sm:$0xff]  ;;  %v5864_v46 = vld [vmem:[%s11316_s5 + $0x88] sm:$0xff] }
 0x3cf   : > { %4570 = vst.msk [vmem:[#allocation2 + $0x68] sm:$0xff] %vm317_vm0, %v4538_v54  ;;  %v3702_v22 = vpop.permute.xlu0 %3701  ;;  %3078 = vrot.lane.b32.xlu1 %v9918_v47, %s7626_s23  ;;  %6081 = vmatpush2.msra.mxu0 %v5865_v15  ;;  %v5863_v47 = vld [vmem:[%s11316_s5 + $0x80] sm:$0xff]  ;;  %v10142_v40 = vld [vmem:[#allocation2 + $0x50] sm:$0xff] }
 0x3d0   : > { %2749 = vst.msk [vmem:[#allocation3 + $0x370] sm:$0xff] %vm2726_vm15, %v2675_v23  ;;  %6082 = vmatprep.subr.mxu0 %v7616_v0  ;;  %6248 = vmatpush1.msra.mxu1 %v5894_v28 }
 0x3d1   : > { %3775 = vst.msk [vmem:[#allocation3 + $0x378] sm:$0xff] %vm3112_vm2, %v3702_v22  ;;  %v2868_v31 = vpop.permute.xlu1 %2867  ;;  %6083 = vmatpush2.msra.mxu0 %v5864_v46  ;;  %6249 = vmatprep.subr.mxu1 %v7616_v0 }
 0x3d2   : > { %4985 = vrot.lane.b32.xlu0 %v9935_v8, %s7625_s9  ;;  %v4175_v32 = vpop.f32.mrf.mxu1  ;;  %v3912_v14 = vld [vmem:[#allocation3 + $0x348] sm:$0xff]  ;;  %2942 = vst.msk [vmem:[#allocation3 + $0x370] sm:$0xff] %vm2919_vm1, %v2868_v31  ;;  %6084 = vmatprep.subr.mxu0 %v7616_v0 }
 0x3d3   : > { %v3320_v56 = vpop.permute.xlu0 %3319  ;;  %v4176_v33 = vadd.f32 %v9808_v63, %v4175_v32  ;;  %4254 = vmatmul.mubr.f32.gmra.mxu1 %v3912_v14  ;;  %4726 = vrot.lane.b32.xlu1 %v4662_v16, %s7625_s9 }
 0x3d4   : > { %3392 = vst.msk [vmem:[#allocation3 + $0x3a0] sm:$0xff] %vm2726_vm15, %v3320_v56  ;;  %v4177_v8 = vpop.f32.mrf.mxu1  ;;  %6085 = vmatpush2.msra.mxu0 %v5863_v47  ;;  %v5893_v47 = vld [vmem:[%s11316_s5 + $0x170] sm:$0xff]  ;;  %v5892_v56 = vld [vmem:[%s11316_s5 + $0x168] sm:$0xff] }
 0x3d5   : > { %v4401_v5 = vadd.f32 %v10024_v45, %v4176_v33  ;;  %v3061_v49 = vpop.permute.xlu1 %3060  ;;  %6250 = vmatpush1.msra.mxu1 %v5893_v47 }
 0x3d6   : > { %v4923_v57 = vld [vmem:[#allocation2 + $0x67] sm:$0xff]  ;;  %4987 = vrot.lane.b32.xlu0 %v9989_v26, %s7625_s9  ;;  %3135 = vst.msk [vmem:[#allocation3 + $0x370] sm:$0xff] %vm3112_vm2, %v3061_v49  ;;  %6251 = vmatprep.subr.mxu1 %v7616_v0 }
 0x3d7   : > { %v5369_v27 = vld [vmem:[#allocation2 + $0x67] sm:$0xff]  ;;  %4636 = vst.msk [vmem:[#allocation3 + $0xf0] sm:$0xff] %vm317_vm0, %v4923_v57  ;;  %v4539_v62 = vmax.f32 %v4401_v5, 0.0  ;;  %v3512_v3 = vpop.permute.xlu0 %3511  ;;  %4728 = vrot.lane.b32.xlu1 %v4663_v11, %s7625_s9  ;;  %6252 = vmatpush1.msra.mxu1 %v5892_v56  ;;  %v10182_v5 = vpop.f32.mrf.mxu0  ;;  %v5890_v11 = vld [vmem:[%s11316_s5 + $0x158] sm:$0xff]  ;;  %v5881_v56 = vld [vmem:[%s11316_s5 + $0x110] sm:$0xff] }
 0x3d8   : > { %5401 = vst.msk [vmem:[#allocation3 + $0x68] sm:$0xff] %vm317_vm0, %v5369_v27  ;;  %v5115_v21 = vld [vmem:[#allocation2 + $0x68] sm:$0xff]  ;;  %v3916_v43 = vld [vmem:[#allocation3 + $0x378] sm:$0xff]  ;;  %v5891_v27 = vld [vmem:[%s11316_s5 + $0x160] sm:$0xff]  ;;  %6253 = vmatprep.subr.mxu1 %v7616_v0 }
 0x3d9   : > { %5147 = vst.msk [vmem:[#allocation3 + $0xb0] sm:$0xff] %vm317_vm0, %v5115_v21  ;;  %4258 = vmatprep.mubr.f32.mxu1 %v3916_v43  ;;  %4571 = vst.msk [vmem:[#allocation2 + $0x70] sm:$0xff] %vm317_vm0, %v4539_v62  ;;  %v2677_v26 = vpop.permute.xlu1 %2676  ;;  %v10149_v44 = vld [vmem:[#allocation2 + $0x68] sm:$0xff]  ;;  %6254 = vmatpush1.msra.mxu1 %v5891_v27 }
 0x3da   : > { %3584 = vst.msk [vmem:[#allocation3 + $0x3a0] sm:$0xff] %vm2919_vm1, %v3512_v3  ;;  %4989 = vrot.lane.b32.xlu0 %v10044_v38, %s7625_s9  ;;  %v10133_v38 = vld [vmem:[#allocation2 + $0x48] sm:$0xff]  ;;  %6255 = vmatprep.subr.mxu1 %v7616_v0 }
 0x3db   : > { %2750 = vst.msk [vmem:[#allocation3 + $0x398] sm:$0xff] %vm2726_vm15, %v2677_v26  ;;  %v3704_v59 = vpop.permute.xlu0 %3703  ;;  %4730 = vrot.lane.b32.xlu1 %v4664_v51, %s7625_s9  ;;  %v5889_v26 = vld [vmem:[%s11316_s5 + $0x150] sm:$0xff]  ;;  %6256 = vmatpush1.msra.mxu1 %v5890_v11  ;;  %v5880_v27 = vld [vmem:[%s11316_s5 + $0x108] sm:$0xff] }
 0x3dc   : > { %3776 = vst.msk [vmem:[#allocation3 + $0x3a0] sm:$0xff] %vm3112_vm2, %v3704_v59  ;;  %v4415_v59 = vpop.f32.mrf.mxu0  ;;  %6257 = vmatprep.subr.mxu1 %v7616_v0 }
 0x3dd   : > { %v2870_v37 = vpop.permute.xlu1 %2869  ;;  %v3915_v13 = vld [vmem:[#allocation3 + $0x370] sm:$0xff]  ;;  %6258 = vmatpush1.msra.mxu1 %v5889_v26 }
 0x3de   : > { %4991 = vrot.lane.b32.xlu0 %v4923_v57, %s7625_s9  ;;  %v4180_v20 = vpop.f32.mrf.mxu1  ;;  %2943 = vst.msk [vmem:[#allocation3 + $0x398] sm:$0xff] %vm2919_vm1, %v2870_v37  ;;  %4259 = vmatmul.mubr.f32.gmra.mxu1 %v3915_v13 }
 0x3df   : > { %v3322_v58 = vpop.permute.xlu0 %3321  ;;  %v4181_v53 = vadd.f32 %v9808_v63, %v4180_v20  ;;  %4732 = vrot.lane.b32.xlu1 %v4665_v6, %s7625_s9  ;;  %6259 = vmatprep.subr.mxu1 %v7616_v0 }
 0x3e0   : > { %3393 = vst.msk [vmem:[#allocation3 + $0x3c8] sm:$0xff] %vm2726_vm15, %v3322_v58  ;;  %v4182_v35 = vpop.f32.mrf.mxu1  ;;  %v4924_v45 = vld [vmem:[#allocation2 + $0x6f] sm:$0xff] }
 0x3e1   : > { %v10120_v48 = vld [vmem:[#allocation2 + $0x69] sm:$0xff]  ;;  %v4406_v17 = vadd.f32 %v4405_v24, %v4181_v53  ;;  %v10123_v4 = vld [vmem:[#allocation2 + $0x71] sm:$0xff]  ;;  %4637 = vst.msk [vmem:[#allocation3 + $0x118] sm:$0xff] %vm317_vm0, %v4924_v45  ;;  %v3063_v2 = vpop.permute.xlu1 %3062 }
 0x3e2   : > { %4993 = vrot.lane.b32.xlu0 %v4924_v45, %s7625_s9  ;;  %4893 = vst.msk [vmem:[#allocation3 + $0xf8] sm:$0xff] %vm317_vm0, %v10120_v48  ;;  %v5370_v55 = vld [vmem:[#allocation2 + $0x6f] sm:$0xff]  ;;  %4894 = vst.msk [vmem:[#allocation3 + $0x120] sm:$0xff] %vm317_vm0, %v10123_v4 }
 0x3e3   : > { %v5116_v36 = vld [vmem:[#allocation2 + $0x70] sm:$0xff]  ;;  %5402 = vst.msk [vmem:[#allocation3 + $0x90] sm:$0xff] %vm317_vm0, %v5370_v55  ;;  %v4540_v29 = vmax.f32 %v4406_v17, 0.0  ;;  %v3514_v1 = vpop.permute.xlu0 %3513  ;;  %v3919_v9 = vld [vmem:[#allocation3 + $0x3a0] sm:$0xff]  ;;  %4734 = vrot.lane.b32.xlu1 %v10133_v38, %s7625_s9  ;;  %v5888_v53 = vld [vmem:[%s11316_s5 + $0x148] sm:$0xff] }
 0x3e4   : > { %5148 = vst.msk [vmem:[#allocation3 + $0xd8] sm:$0xff] %vm317_vm0, %v5116_v36  ;;  %v5625_v50 = vld [vmem:[#allocation2 + $0x69] sm:$0xff]  ;;  %v5626_v12 = vld [vmem:[#allocation2 + $0x71] sm:$0xff]  ;;  %4263 = vmatprep.mubr.f32.mxu1 %v3919_v9  ;;  %6260 = vmatpush1.msra.mxu1 %v5888_v53 }
 0x3e5   : > { %3136 = vst.msk [vmem:[#allocation3 + $0x398] sm:$0xff] %vm3112_vm2, %v3063_v2  ;;  %v2679_v52 = vpop.permute.xlu1 %2678  ;;  %v10163_v14 = vld [vmem:[#allocation2 + $0x70] sm:$0xff]  ;;  %6261 = vmatprep.subr.mxu1 %v7616_v0 }
 0x3e6   : > { %5657 = vst.msk [vmem:[#allocation3 + $0x70] sm:$0xff] %vm317_vm0, %v5625_v50  ;;  %5658 = vst.msk [vmem:[#allocation3 + $0x98] sm:$0xff] %vm317_vm0, %v5626_v12  ;;  %v5887_v50 = vld [vmem:[%s11316_s5 + $0x140] sm:$0xff]  ;;  %v5885_v9 = vld [vmem:[%s11316_s5 + $0x130] sm:$0xff] }
 0x3e7   : > { %3585 = vst.msk [vmem:[#allocation3 + $0x3c8] sm:$0xff] %vm2919_vm1, %v3514_v1  ;;  %v3706_v60 = vpop.permute.xlu0 %3705  ;;  %4736 = vrot.lane.b32.xlu1 %v10142_v40, %s7625_s9  ;;  %6262 = vmatpush1.msra.mxu1 %v5887_v50 }
 0x3e8   : > { %4572 = vst.msk [vmem:[#allocation2 + $0x88] sm:$0xff] %vm317_vm0, %v4540_v29  ;;  %v5886_v29 = vld [vmem:[%s11316_s5 + $0x138] sm:$0xff]  ;;  %6263 = vmatprep.subr.mxu1 %v7616_v0 }
 0x3e9   : > { %2751 = vst.msk [vmem:[#allocation3 + $0x3c0] sm:$0xff] %vm2726_vm15, %v2679_v52  ;;  %v2872_v41 = vpop.permute.xlu1 %2871  ;;  %6264 = vmatpush1.msra.mxu1 %v5886_v29  ;;  %v5909_v29 = vld [vmem:[%s11316_s5 + $0x1f0] sm:$0xff] }
 0x3ea   : > { %3777 = vst.msk [vmem:[#allocation3 + $0x3c8] sm:$0xff] %vm3112_vm2, %v3706_v60  ;;  %6265 = vmatprep.subr.mxu1 %v7616_v0 }
 0x3eb   : > { %v4185_v25 = vpop.f32.mrf.mxu1  ;;  %2944 = vst.msk [vmem:[#allocation3 + $0x3c0] sm:$0xff] %vm2919_vm1, %v2872_v41  ;;  %v3324_v61 = vpop.permute.xlu0 %3323  ;;  %4738 = vrot.lane.b32.xlu1 %v10149_v44, %s7625_s9  ;;  %6266 = vmatpush1.msra.mxu1 %v5885_v9  ;;  %v5908_v9 = vld [vmem:[%s11316_s5 + $0x1e8] sm:$0xff] }
 0x3ec   : > { %v3918_v19 = vld [vmem:[#allocation3 + $0x398] sm:$0xff]  ;;  %v4186_v54 = vadd.f32 %v9808_v63, %v4185_v25  ;;  %3394 = vst.msk [vmem:[#allocation3 + $0x3f0] sm:$0xff] %vm2726_vm15, %v3324_v61  ;;  %6267 = vmatprep.subr.mxu1 %v7616_v0 }
 0x3ed   : > { %4264 = vmatmul.mubr.f32.gmra.mxu1 %v3918_v19  ;;  %v4187_v18 = vpop.f32.mrf.mxu1  ;;  %v3065_v46 = vpop.permute.xlu1 %3064 }
 0x3ee   : > { %v4411_v23 = vadd.f32 %v7348_v7, %v4186_v54  ;;  %3137 = vst.msk [vmem:[#allocation3 + $0x3c0] sm:$0xff] %vm3112_vm2, %v3065_v46 }
 0x3ef   : > { %v4925_v42 = vld [vmem:[#allocation2 + $0x87] sm:$0xff]  ;;  %v3516_v31 = vpop.permute.xlu0 %3515  ;;  %4740 = vrot.lane.b32.xlu1 %v10163_v14, %s7625_s9 }
 0x3f0   : > { %4995 = vrot.lane.b32.xlu0 %v4925_v42, %s7625_s9  ;;  %4638 = vst.msk [vmem:[#allocation3 + $0x140] sm:$0xff] %vm317_vm0, %v4925_v42  ;;  %v5371_v15 = vld [vmem:[#allocation2 + $0x87] sm:$0xff]  ;;  %v4541_v16 = vmax.f32 %v4411_v23, 0.0 }
 0x3f1   : > { %v5117_v22 = vld [vmem:[#allocation2 + $0x88] sm:$0xff]  ;;  %5403 = vst.msk [vmem:[#allocation3 + $0xb8] sm:$0xff] %vm317_vm0, %v5371_v15  ;;  %v2681_v33 = vpop.permute.xlu1 %2680 }
 0x3f2   : > { %5149 = vst.msk [vmem:[#allocation3 + $0x100] sm:$0xff] %vm317_vm0, %v5117_v22  ;;  %v3922_v32 = vld [vmem:[#allocation3 + $0x3c8] sm:$0xff]  ;;  %4573 = vst.msk [vmem:[#allocation2 + $0x90] sm:$0xff] %vm317_vm0, %v4541_v16  ;;  %v5883_v22 = vld [vmem:[%s11316_s5 + $0x120] sm:$0xff] }
 0x3f3   : > { %3586 = vst.msk [vmem:[#allocation3 + $0x3f0] sm:$0xff] %vm2919_vm1, %v3516_v31  ;;  %4268 = vmatprep.mubr.f32.mxu1 %v3922_v32  ;;  %v3708_v8 = vpop.permute.xlu0 %3707  ;;  %v10177_v57 = vld [vmem:[#allocation2 + $0x88] sm:$0xff]  ;;  %v5882_v32 = vld [vmem:[%s11316_s5 + $0x118] sm:$0xff] }
 0x3f4   : > { %2752 = vst.msk [vmem:[#allocation3 + $0x3e8] sm:$0xff] %vm2726_vm15, %v2681_v33  ;;  %4742 = vrot.lane.b32.xlu1 %v10177_v57, %s7625_s9  ;;  %v5884_v42 = vld [vmem:[%s11316_s5 + $0x128] sm:$0xff] }
 0x3f5   : > { %3778 = vst.msk [vmem:[#allocation3 + $0x3f0] sm:$0xff] %vm3112_vm2, %v3708_v8  ;;  %v2874_v21 = vpop.permute.xlu1 %2873  ;;  %v3921_v62 = vld [vmem:[#allocation3 + $0x3c0] sm:$0xff]  ;;  %6268 = vmatpush1.msra.mxu1 %v5884_v42  ;;  %v10271_v8 = vpop.f32.mrf.mxu0  ;;  %v5906_v42 = vld [vmem:[%s11316_s5 + $0x1d8] sm:$0xff] }
 0x3f6   : > { %v4190_v49 = vpop.f32.mrf.mxu1  ;;  %2945 = vst.msk [vmem:[#allocation3 + $0x3e8] sm:$0xff] %vm2919_vm1, %v2874_v21  ;;  %4269 = vmatmul.mubr.f32.gmra.mxu1 %v3921_v62  ;;  %6269 = vmatprep.subr.mxu1 %v7616_v0  ;;  %v5879_v62 = vld [vmem:[%s11316_s5 + $0x100] sm:$0xff] }
 0x3f7   : > { %v3326_v3 = vpop.permute.xlu0 %3325  ;;  %v4191_v43 = vadd.f32 %v9808_v63, %v4190_v49  ;;  %6270 = vmatpush1.msra.mxu1 %v5883_v22 }
 0x3f8   : > { %3395 = vst.msk [vmem:[#allocation3 + $0x418] sm:$0xff] %vm2726_vm15, %v3326_v3  ;;  %v4192_v51 = vpop.f32.mrf.mxu1  ;;  %6271 = vmatprep.subr.mxu1 %v7616_v0  ;;  %v10282_v3 = vld [vmem:[#allocation6] ss:$0 sm:$0xff] }
 0x3f9   : > { %v4926_v7 = vld [vmem:[#allocation2 + $0x8f] sm:$0xff]  ;;  %v4416_v13 = vadd.f32 %v4415_v59, %v4191_v43  ;;  %v3067_v24 = vpop.permute.xlu1 %3066  ;;  %6272 = vmatpush1.msra.mxu1 %v5882_v32 }
 0x3fa   : > { %v10198_v37 = vld [vmem:[#allocation2 + $0x90] sm:$0xff]  ;;  %4997 = vrot.lane.b32.xlu0 %v4926_v7, %s7625_s9  ;;  %4639 = vst.msk [vmem:[#allocation3 + $0x168] sm:$0xff] %vm317_vm0, %v4926_v7  ;;  %6273 = vmatprep.subr.mxu1 %v7616_v0  ;;  %v4425_v7 = vpop.f32.mrf.mxu0 }
 0x3fb   : > { %v10200_v20 = vld [vmem:[#allocation2 + $0x89] sm:$0xff]  ;;  %4744 = vrot.lane.b32.xlu1 %v10198_v37, %s7625_s9  ;;  %v10205_v58 = vld [vmem:[#allocation2 + $0x91] sm:$0xff]  ;;  %v4542_v55 = vmax.f32 %v4416_v13, 0.0  ;;  %3138 = vst.msk [vmem:[#allocation3 + $0x3e8] sm:$0xff] %vm3112_vm2, %v3067_v24  ;;  %v3518_v36 = vpop.permute.xlu0 %3517  ;;  %6274 = vmatpush1.msra.mxu1 %v5881_v56 }
 0x3fc   : > { %4895 = vst.msk [vmem:[#allocation3 + $0x148] sm:$0xff] %vm317_vm0, %v10200_v20  ;;  %v5372_v6 = vld [vmem:[#allocation2 + $0x8f] sm:$0xff]  ;;  %4896 = vst.msk [vmem:[#allocation3 + $0x170] sm:$0xff] %vm317_vm0, %v10205_v58  ;;  %6275 = vmatprep.subr.mxu1 %v7616_v0 }
 0x3fd   : > { %5404 = vst.msk [vmem:[#allocation3 + $0xe0] sm:$0xff] %vm317_vm0, %v5372_v6  ;;  %v5118_v35 = vld [vmem:[#allocation2 + $0x90] sm:$0xff]  ;;  %4574 = vst.msk [vmem:[#allocation2 + $0xa8] sm:$0xff] %vm317_vm0, %v4542_v55  ;;  %v2683_v12 = vpop.permute.xlu1 %2682  ;;  %6276 = vmatpush1.msra.mxu1 %v5880_v27  ;;  %v5910_v6 = vld [vmem:[%s11316_s5 + $0x1f8] sm:$0xff] }
 0x3fe   : > { %v5627_v45 = vld [vmem:[#allocation2 + $0x89] sm:$0xff]  ;;  %v5628_v17 = vld [vmem:[#allocation2 + $0x91] sm:$0xff]  ;;  %5150 = vst.msk [vmem:[#allocation3 + $0x128] sm:$0xff] %vm317_vm0, %v5118_v35  ;;  %6277 = vmatprep.subr.mxu1 %v7616_v0  ;;  %v5903_v27 = vld [vmem:[%s11316_s5 + $0x1c0] sm:$0xff] }
 0x3ff   : > { %v3925_v2 = vld [vmem:[#allocation3 + $0x3f0] sm:$0xff]  ;;  %5659 = vst.msk [vmem:[#allocation3 + $0xc0] sm:$0xff] %vm317_vm0, %v5627_v45  ;;  %5660 = vst.msk [vmem:[#allocation3 + $0xe8] sm:$0xff] %vm317_vm0, %v5628_v17  ;;  %v3710_v1 = vpop.permute.xlu0 %3709  ;;  %6278 = vmatpush1.msra.mxu1 %v5879_v62 }
 0x400   : > { %3587 = vst.msk [vmem:[#allocation3 + $0x418] sm:$0xff] %vm2919_vm1, %v3518_v36  ;;  %4273 = vmatprep.mubr.f32.mxu1 %v3925_v2  ;;  %6279 = vmatprep.subr.mxu1 %v7616_v0 }
 0x401   : > { %2753 = vst.msk [vmem:[#allocation3 + $0x410] sm:$0xff] %vm2726_vm15, %v2683_v12  ;;  %v2876_v52 = vpop.permute.xlu1 %2875  ;;  %6280 = vmatpush2.msra.mxu1 %v5910_v6 }
 0x402   : > { %3779 = vst.msk [vmem:[#allocation3 + $0x418] sm:$0xff] %vm3112_vm2, %v3710_v1  ;;  %v3924_v41 = vld [vmem:[#allocation3 + $0x3e8] sm:$0xff]  ;;  %6281 = vmatprep.subr.mxu1 %v7616_v0 }
 0x403   : > { %v4195_v60 = vpop.f32.mrf.mxu1  ;;  %2946 = vst.msk [vmem:[#allocation3 + $0x410] sm:$0xff] %vm2919_vm1, %v2876_v52  ;;  %v3328_v25 = vpop.permute.xlu0 %3327  ;;  %4274 = vmatmul.mubr.f32.gmra.mxu1 %v3924_v41 }
 0x404   : > { %v4196_v19 = vadd.f32 %v9808_v63, %v4195_v60  ;;  %3396 = vst.msk [vmem:[#allocation3 + $0x440] sm:$0xff] %vm2726_vm15, %v3328_v25  ;;  %v4927_v54 = vld [vmem:[#allocation2 + $0xa7] sm:$0xff]  ;;  %6282 = vmatpush2.msra.mxu1 %v5909_v29 }
 0x405   : > { %v4197_v61 = vpop.f32.mrf.mxu1  ;;  %v10241_v18 = vld [vmem:[#allocation2 + $0xa8] sm:$0xff]  ;;  %4999 = vrot.lane.b32.xlu0 %v4927_v54, %s7625_s9  ;;  %4640 = vst.msk [vmem:[#allocation3 + $0x190] sm:$0xff] %vm317_vm0, %v4927_v54  ;;  %v3069_v15 = vpop.permute.xlu1 %3068  ;;  %6283 = vmatprep.subr.mxu1 %v7616_v0  ;;  %v5907_v60 = vld [vmem:[%s11316_s5 + $0x1e0] sm:$0xff] }
 0x406   : > { %v4421_v28 = vadd.f32 %v10182_v5, %v4196_v19  ;;  %4746 = vrot.lane.b32.xlu1 %v10241_v18, %s7625_s9  ;;  %v5373_v63 = vld [vmem:[#allocation2 + $0xa7] sm:$0xff]  ;;  %3139 = vst.msk [vmem:[#allocation3 + $0x410] sm:$0xff] %vm3112_vm2, %v3069_v15  ;;  %6284 = vmatpush2.msra.mxu1 %v5908_v9 }
 0x407   : > { %v5119_v23 = vld [vmem:[#allocation2 + $0xa8] sm:$0xff]  ;;  %5405 = vst.msk [vmem:[#allocation3 + $0x108] sm:$0xff] %vm317_vm0, %v5373_v63  ;;  %v3520_v16 = vpop.permute.xlu0 %3519  ;;  %6285 = vmatprep.subr.mxu1 %v7616_v0 }
 0x408   : > { %5151 = vst.msk [vmem:[#allocation3 + $0x150] sm:$0xff] %vm317_vm0, %v5119_v23  ;;  %v4543_v46 = vmax.f32 %v4421_v28, 0.0  ;;  %6286 = vmatpush2.msra.mxu1 %v5907_v60 }
 0x409   : > { %v3928_v31 = vld [vmem:[#allocation3 + $0x418] sm:$0xff]  ;;  %3588 = vst.msk [vmem:[#allocation3 + $0x440] sm:$0xff] %vm2919_vm1, %v3520_v16  ;;  %v2685_v47 = vpop.permute.xlu1 %2684  ;;  %6287 = vmatprep.subr.mxu1 %v7616_v0 }
 0x40a   : > { %4278 = vmatprep.mubr.f32.mxu1 %v3928_v31  ;;  %4575 = vst.msk [vmem:[#allocation2 + $0xb0] sm:$0xff] %vm317_vm0, %v4543_v46  ;;  %v5905_v46 = vld [vmem:[%s11316_s5 + $0x1d0] sm:$0xff]  ;;  %6288 = vmatpush2.msra.mxu1 %v5906_v42 }
 0x40b   : > { %2754 = vst.msk [vmem:[#allocation3 + $0x438] sm:$0xff] %vm2726_vm15, %v2685_v47  ;;  %v3712_v33 = vpop.permute.xlu0 %3711  ;;  %6289 = vmatprep.subr.mxu1 %v7616_v0  ;;  %v5897_v42 = vld [vmem:[%s11316_s5 + $0x190] sm:$0xff] }
 0x40c   : > { %3780 = vst.msk [vmem:[#allocation3 + $0x440] sm:$0xff] %vm3112_vm2, %v3712_v33  ;;  %v5904_v33 = vld [vmem:[%s11316_s5 + $0x1c8] sm:$0xff]  ;;  %6290 = vmatpush2.msra.mxu1 %v5905_v46 }
 0x40d   : > { %v2878_v5 = vpop.permute.xlu1 %2877  ;;  %v3927_v11 = vld [vmem:[#allocation3 + $0x410] sm:$0xff]  ;;  %6291 = vmatprep.subr.mxu1 %v7616_v0  ;;  %v5896_v46 = vld [vmem:[%s11316_s5 + $0x188] sm:$0xff] }
 0x40e   : > { %2947 = vst.msk [vmem:[#allocation3 + $0x438] sm:$0xff] %vm2919_vm1, %v2878_v5  ;;  %v4200_v49 = vpop.f32.mrf.mxu1  ;;  %4279 = vmatmul.mubr.f32.gmra.mxu1 %v3927_v11  ;;  %v10358_v11 = vpop.f32.mrf.mxu0 }
 0x40f   : > { %v3330_v21 = vpop.permute.xlu0 %3329  ;;  %v4201_v43 = vadd.f32 %v10282_v3, %v4200_v49  ;;  %6292 = vmatpush2.msra.mxu1 %v5904_v33 }
 0x410   : > { %3397 = vst.msk [vmem:[#allocation3 + $0x468] sm:$0xff] %vm2726_vm15, %v3330_v21  ;;  %v4202_v13 = vpop.f32.mrf.mxu1  ;;  %6293 = vmatprep.subr.mxu1 %v7616_v0  ;;  %v5902_v21 = vld [vmem:[%s11316_s5 + $0x1b8] sm:$0xff]  ;;  %v4435_v6 = vpop.f32.mrf.mxu0 }
 0x411   : > { %v4928_v26 = vld [vmem:[#allocation2 + $0xaf] sm:$0xff]  ;;  %v4426_v35 = vadd.f32 %v4425_v7, %v4201_v43  ;;  %v3071_v45 = vpop.permute.xlu1 %3070  ;;  %6294 = vmatpush2.msra.mxu1 %v5903_v27 }
 0x412   : > { %v10285_v59 = vld [vmem:[#allocation2 + $0xb0] sm:$0xff]  ;;  %5001 = vrot.lane.b32.xlu0 %v4928_v26, %s7625_s9  ;;  %4641 = vst.msk [vmem:[#allocation3 + $0x1b8] sm:$0xff] %vm317_vm0, %v4928_v26  ;;  %6295 = vmatprep.subr.mxu1 %v7616_v0 }
 0x413   : > { %v10287_v51 = vld [vmem:[#allocation2 + $0xa9] sm:$0xff]  ;;  %4748 = vrot.lane.b32.xlu1 %v10285_v59, %s7625_s9  ;;  %v10292_v53 = vld [vmem:[#allocation2 + $0xb1] sm:$0xff]  ;;  %3140 = vst.msk [vmem:[#allocation3 + $0x438] sm:$0xff] %vm3112_vm2, %v3071_v45  ;;  %v3522_v2 = vpop.permute.xlu0 %3521  ;;  %v3931_v50 = vld [vmem:[#allocation3 + $0x440] sm:$0xff]  ;;  %v4544_v12 = vmax.f32 %v4426_v35, 0.0  ;;  %6296 = vmatpush2.msra.mxu1 %v5902_v21  ;;  %v7360_v21 = vpop.f32.mrf.mxu0 }
 0x414   : > { %4897 = vst.msk [vmem:[#allocation3 + $0x198] sm:$0xff] %vm317_vm0, %v10287_v51  ;;  %v5374_v24 = vld [vmem:[#allocation2 + $0xaf] sm:$0xff]  ;;  %4898 = vst.msk [vmem:[#allocation3 + $0x1c0] sm:$0xff] %vm317_vm0, %v10292_v53  ;;  %4283 = vmatprep.mubr.f32.mxu1 %v3931_v50  ;;  %6297 = vmatprep.subr.mxu1 %v7616_v0 }
 0x415   : > { %5406 = vst.msk [vmem:[#allocation3 + $0x130] sm:$0xff] %vm317_vm0, %v5374_v24  ;;  %v5120_v17 = vld [vmem:[#allocation2 + $0xb0] sm:$0xff]  ;;  %4576 = vst.msk [vmem:[#allocation2 + $0xc8] sm:$0xff] %vm317_vm0, %v4544_v12  ;;  %v2687_v1 = vpop.permute.xlu1 %2686  ;;  %v5900_v50 = vld [vmem:[%s11316_s5 + $0x1a8] sm:$0xff] }
 0x416   : > { %v5629_v55 = vld [vmem:[#allocation2 + $0xa9] sm:$0xff]  ;;  %v5630_v36 = vld [vmem:[#allocation2 + $0xb1] sm:$0xff]  ;;  %5152 = vst.msk [vmem:[#allocation3 + $0x178] sm:$0xff] %vm317_vm0, %v5120_v17 }
 0x417   : > { %5661 = vst.msk [vmem:[#allocation3 + $0x110] sm:$0xff] %vm317_vm0, %v5629_v55  ;;  %5662 = vst.msk [vmem:[#allocation3 + $0x138] sm:$0xff] %vm317_vm0, %v5630_v36  ;;  %v5901_v13 = vld [vmem:[%s11316_s5 + $0x1b0] sm:$0xff] }
 0x418   : > { %3589 = vst.msk [vmem:[#allocation3 + $0x468] sm:$0xff] %vm2919_vm1, %v3522_v2  ;;  %v3714_v52 = vpop.permute.xlu0 %3713  ;;  %6298 = vmatpush2.msra.mxu1 %v5901_v13 }
 0x419   : > { %2755 = vst.msk [vmem:[#allocation3 + $0x460] sm:$0xff] %vm2726_vm15, %v2687_v1  ;;  %v2880_v41 = vpop.permute.xlu1 %2879  ;;  %6299 = vmatprep.subr.mxu1 %v7616_v0 }
 0x41a   : > { %3781 = vst.msk [vmem:[#allocation3 + $0x468] sm:$0xff] %vm3112_vm2, %v3714_v52  ;;  %v3930_v25 = vld [vmem:[#allocation3 + $0x438] sm:$0xff]  ;;  %6300 = vmatpush2.msra.mxu1 %v5900_v50 }
 0x41b   : > { %2948 = vst.msk [vmem:[#allocation3 + $0x460] sm:$0xff] %vm2919_vm1, %v2880_v41  ;;  %4284 = vmatmul.mubr.f32.gmra.mxu1 %v3930_v25  ;;  %v5899_v41 = vld [vmem:[%s11316_s5 + $0x1a0] sm:$0xff]  ;;  %6301 = vmatprep.subr.mxu1 %v7616_v0 }
 0x41c   : > { %v3332_v19 = vpop.permute.xlu0 %3331  ;;  %v4205_v61 = vpop.f32.mrf.mxu1  ;;  %v4929_v63 = vld [vmem:[#allocation2 + $0xc7] sm:$0xff]  ;;  %6302 = vmatpush2.msra.mxu1 %v5899_v41 }
 0x41d   : > { %3398 = vst.msk [vmem:[#allocation3 + $0x490] sm:$0xff] %vm2726_vm15, %v3332_v19  ;;  %v4206_v54 = vadd.f32 %v10282_v3, %v4205_v61  ;;  %v10331_v23 = vld [vmem:[#allocation2 + $0xc8] sm:$0xff]  ;;  %v3073_v22 = vpop.permute.xlu1 %3072  ;;  %5003 = vrot.lane.b32.xlu0 %v4929_v63, %s7625_s9  ;;  %v5898_v61 = vld [vmem:[%s11316_s5 + $0x198] sm:$0xff]  ;;  %6303 = vmatprep.subr.mxu1 %v7616_v0 }
 0x41e   : > { %v4207_v28 = vpop.f32.mrf.mxu1  ;;  %4750 = vrot.lane.b32.xlu1 %v10331_v23, %s7625_s9  ;;  %4642 = vst.msk [vmem:[#allocation3 + $0x1e0] sm:$0xff] %vm317_vm0, %v4929_v63  ;;  %v5375_v16 = vld [vmem:[#allocation2 + $0xc7] sm:$0xff]  ;;  %6304 = vmatpush2.msra.mxu1 %v5898_v61 }
 0x41f   : > { %v4431_v15 = vadd.f32 %v10271_v8, %v4206_v54  ;;  %v5121_v31 = vld [vmem:[#allocation2 + $0xc8] sm:$0xff]  ;;  %3141 = vst.msk [vmem:[#allocation3 + $0x460] sm:$0xff] %vm3112_vm2, %v3073_v22  ;;  %6305 = vmatprep.subr.mxu1 %v7616_v0 }
 0x420   : > { %v3524_v32 = vpop.permute.xlu0 %3523  ;;  %5407 = vst.msk [vmem:[#allocation3 + $0x158] sm:$0xff] %vm317_vm0, %v5375_v16  ;;  %5153 = vst.msk [vmem:[#allocation3 + $0x1a0] sm:$0xff] %vm317_vm0, %v5121_v31  ;;  %6306 = vmatpush2.msra.mxu1 %v5897_v42 }
 0x421   : > { %v3934_v47 = vld [vmem:[#allocation3 + $0x468] sm:$0xff]  ;;  %v4545_v56 = vmax.f32 %v4431_v15, 0.0  ;;  %3590 = vst.msk [vmem:[#allocation3 + $0x490] sm:$0xff] %vm2919_vm1, %v3524_v32  ;;  %v2689_v8 = vpop.permute.xlu1 %2688  ;;  %6307 = vmatprep.subr.mxu1 %v7616_v0 }
 0x422   : > { %4288 = vmatprep.mubr.f32.mxu1 %v3934_v47  ;;  %2756 = vst.msk [vmem:[#allocation3 + $0x488] sm:$0xff] %vm2726_vm15, %v2689_v8  ;;  %6308 = vmatpush2.msra.mxu1 %v5896_v46 }
 0x423   : > { %4577 = vst.msk [vmem:[#allocation2 + $0xd0] sm:$0xff] %vm317_vm0, %v4545_v56  ;;  %v5895_v56 = vld [vmem:[%s11316_s5 + $0x180] sm:$0xff]  ;;  %6309 = vmatprep.subr.mxu1 %v7616_v0 }
 0x424   : > { %v3716_v5 = vpop.permute.xlu0 %3715  ;;  %6310 = vmatpush2.msra.mxu1 %v5895_v56 }
 0x425   : > { %3782 = vst.msk [vmem:[#allocation3 + $0x490] sm:$0xff] %vm3112_vm2, %v3716_v5  ;;  %v2882_v49 = vpop.permute.xlu1 %2881 }
 0x426   : > { %v3933_v62 = vld [vmem:[#allocation3 + $0x460] sm:$0xff]  ;;  %2949 = vst.msk [vmem:[#allocation3 + $0x488] sm:$0xff] %vm2919_vm1, %v2882_v49  ;;  %v4210_v26 = vpop.f32.mrf.mxu1 }
 0x427   : > { %4289 = vmatmul.mubr.f32.gmra.mxu1 %v3933_v62  ;;  %v4211_v7 = vadd.f32 %v10282_v3, %v4210_v26  ;;  %v4445_v26 = vpop.f32.mrf.mxu0 }
 0x428   : > { %v3334_v43 = vpop.permute.xlu0 %3333  ;;  %v4212_v24 = vpop.f32.mrf.mxu1 }
 0x429   : > { %3399 = vst.msk [vmem:[#allocation3 + $0x4b8] sm:$0xff] %vm2726_vm15, %v3334_v43  ;;  %v4436_v55 = vadd.f32 %v4435_v6, %v4211_v7  ;;  %v3075_v36 = vpop.permute.xlu1 %3074  ;;  %v7363_v56 = vpop.f32.mrf.mxu0 }
 0x42a   : > { %v4930_v35 = vld [vmem:[#allocation2 + $0xcf] sm:$0xff]  ;;  %3142 = vst.msk [vmem:[#allocation3 + $0x488] sm:$0xff] %vm3112_vm2, %v3075_v36 }
 0x42b   : > { %v10370_v45 = vld [vmem:[#allocation2 + $0xd0] sm:$0xff]  ;;  %5005 = vrot.lane.b32.xlu0 %v4930_v35, %s7625_s9  ;;  %4643 = vst.msk [vmem:[#allocation3 + $0x208] sm:$0xff] %vm317_vm0, %v4930_v35  ;;  %v4546_v60 = vmax.f32 %v4436_v55, 0.0 }
 0x42c   : > { %v10372_v17 = vld [vmem:[#allocation2 + $0xc9] sm:$0xff]  ;;  %4752 = vrot.lane.b32.xlu1 %v10370_v45, %s7625_s9  ;;  %v10378_v2 = vld [vmem:[#allocation2 + $0xd1] sm:$0xff]  ;;  %v3526_v29 = vpop.permute.xlu0 %3525 }
 0x42d   : > { %4899 = vst.msk [vmem:[#allocation3 + $0x1e8] sm:$0xff] %vm317_vm0, %v10372_v17  ;;  %v5376_v12 = vld [vmem:[#allocation2 + $0xcf] sm:$0xff]  ;;  %4900 = vst.msk [vmem:[#allocation3 + $0x210] sm:$0xff] %vm317_vm0, %v10378_v2  ;;  %v2691_v19 = vpop.permute.xlu1 %2690 }
 0x42e   : > { %v3937_v1 = vld [vmem:[#allocation3 + $0x490] sm:$0xff]  ;;  %5408 = vst.msk [vmem:[#allocation3 + $0x180] sm:$0xff] %vm317_vm0, %v5376_v12  ;;  %4578 = vst.msk [vmem:[#allocation2 + $0xe8] sm:$0xff] %vm317_vm0, %v4546_v60 }
 0x42f   : > { %v5122_v9 = vld [vmem:[#allocation2 + $0xd0] sm:$0xff]  ;;  %3591 = vst.msk [vmem:[#allocation3 + $0x4b8] sm:$0xff] %vm2919_vm1, %v3526_v29  ;;  %4293 = vmatprep.mubr.f32.mxu1 %v3937_v1 }
 0x430   : > { %v5631_v52 = vld [vmem:[#allocation2 + $0xc9] sm:$0xff]  ;;  %5154 = vst.msk [vmem:[#allocation3 + $0x1c8] sm:$0xff] %vm317_vm0, %v5122_v9  ;;  %v5632_v25 = vld [vmem:[#allocation2 + $0xd1] sm:$0xff]  ;;  %5495 = vrot.lane.b32.xlu1 %v10133_v38, %s7625_s9  ;;  %v3718_v54 = vpop.permute.xlu0 %3717 }
 0x431   : > { %5663 = vst.msk [vmem:[#allocation3 + $0x160] sm:$0xff] %vm317_vm0, %v5631_v52  ;;  %5664 = vst.msk [vmem:[#allocation3 + $0x188] sm:$0xff] %vm317_vm0, %v5632_v25  ;;  %v2884_v38 = vpop.permute.xlu1 %2883  ;;  %v3936_v28 = vld [vmem:[#allocation3 + $0x488] sm:$0xff] }
 0x432   : > { %2757 = vst.msk [vmem:[#allocation3 + $0x4b0] sm:$0xff] %vm2726_vm15, %v2691_v19  ;;  %4294 = vmatmul.mubr.f32.gmra.mxu1 %v3936_v28 }
 0x433   : > { %3783 = vst.msk [vmem:[#allocation3 + $0x4b8] sm:$0xff] %vm3112_vm2, %v3718_v54 }
 0x434   : > { %5239 = vrot.lane.b32.xlu1 %v9940_v39, %s7625_s9  ;;  %2950 = vst.msk [vmem:[#allocation3 + $0x4b0] sm:$0xff] %vm2919_vm1, %v2884_v38  ;;  %v3336_v63 = vpop.permute.xlu0 %3335  ;;  %v4215_v15 = vpop.f32.mrf.mxu1 }
 0x435   : > { %3400 = vst.msk [vmem:[#allocation3 + $0x4e0] sm:$0xff] %vm2726_vm15, %v3336_v63  ;;  %v4216_v22 = vadd.f32 %v10282_v3, %v4215_v15  ;;  %v4931_v31 = vld [vmem:[#allocation2 + $0xe7] sm:$0xff]  ;;  %v3077_v47 = vpop.permute.xlu1 %3076 }
 0x436   : > { %v4217_v16 = vpop.f32.mrf.mxu1  ;;  %v4612_v39 = vld [vmem:[#allocation2 + $0xe7] sm:$0xff]  ;;  %5007 = vrot.lane.b32.xlu0 %v4931_v31, %s7625_s9  ;;  %3143 = vst.msk [vmem:[#allocation3 + $0x4b0] sm:$0xff] %vm3112_vm2, %v3077_v47 }
 0x437   : > { %v4441_v32 = vadd.f32 %v10358_v11, %v4216_v22  ;;  %4644 = vst.msk [vmem:[#allocation3 + $0x230] sm:$0xff] %vm317_vm0, %v4612_v39  ;;  %5409 = vst.msk [vmem:[#allocation3 + $0x1a8] sm:$0xff] %vm317_vm0, %v4612_v39  ;;  %v5123_v33 = vld [vmem:[#allocation2 + $0xe8] sm:$0xff] }
 0x438   : > { %5497 = vrot.lane.b32.xlu1 %v10142_v40, %s7625_s9  ;;  %v3528_v8 = vpop.permute.xlu0 %3527  ;;  %5155 = vst.msk [vmem:[#allocation3 + $0x1f0] sm:$0xff] %vm317_vm0, %v5123_v33  ;;  %v10480_v31 = vld [vmem:[#allocation2 + $0xe8] sm:$0xff] }
 0x439   : > { %v4547_v5 = vmax.f32 %v4441_v32, 0.0  ;;  %3592 = vst.msk [vmem:[#allocation3 + $0x4e0] sm:$0xff] %vm2919_vm1, %v3528_v8  ;;  %v2693_v40 = vpop.permute.xlu1 %2692 }
 0x43a   : > { %v3940_v27 = vld [vmem:[#allocation3 + $0x4b8] sm:$0xff]  ;;  %2758 = vst.msk [vmem:[#allocation3 + $0x4d8] sm:$0xff] %vm2726_vm15, %v2693_v40  ;;  %v4455_v40 = vpop.f32.mrf.mxu0 }
 0x43b   : > { %4298 = vmatprep.mubr.f32.mxu1 %v3940_v27  ;;  %4579 = vst.msk [vmem:[#allocation2 + $0xf0] sm:$0xff] %vm317_vm0, %v4547_v5 }
 0x43c   : > { %5241 = vrot.lane.b32.xlu1 %v9942_v10, %s7625_s9  ;;  %v3720_v11 = vpop.permute.xlu0 %3719 }
 0x43d   : > { %3784 = vst.msk [vmem:[#allocation3 + $0x4e0] sm:$0xff] %vm3112_vm2, %v3720_v11  ;;  %v2886_v49 = vpop.permute.xlu1 %2885  ;;  %v3939_v62 = vld [vmem:[#allocation3 + $0x4b0] sm:$0xff] }
 0x43e   : > { %2951 = vst.msk [vmem:[#allocation3 + $0x4d8] sm:$0xff] %vm2919_vm1, %v2886_v49  ;;  %v4220_v43 = vpop.f32.mrf.mxu1  ;;  %4299 = vmatmul.mubr.f32.gmra.mxu1 %v3939_v62 }
 0x43f   : > { %v4221_v10 = vadd.f32 %v10282_v3, %v4220_v43 }
 0x440   : > { %5499 = vrot.lane.b32.xlu1 %v10149_v44, %s7625_s9  ;;  %v4984_v0 = vpop.permute.xlu0 %4983  ;;  %v4222_v7 = vpop.f32.mrf.mxu1 }
 0x441   : > { %5079 = vst.msk [vmem:[#allocation3 + $0x8] sm:$0xff] %vm4822_vm3, %v4984_v0  ;;  %v4446_v24 = vadd.f32 %v4445_v26, %v4221_v10  ;;  %v3079_v35 = vpop.permute.xlu1 %3078 }
 0x442   : > { %v4932_v13 = vld [vmem:[#allocation2 + $0xef] sm:$0xff]  ;;  %3144 = vst.msk [vmem:[#allocation3 + $0x4d8] sm:$0xff] %vm3112_vm2, %v3079_v35 }
 0x443   : > { %v10444_v6 = vld [vmem:[#allocation2 + $0xe9] sm:$0xff]  ;;  %5009 = vrot.lane.b32.xlu0 %v4932_v13, %s7625_s9  ;;  %v10449_v44 = vld [vmem:[#allocation2 + $0xf1] sm:$0xff]  ;;  %v4548_v1 = vmax.f32 %v4446_v24, 0.0 }
 0x444   : > { %5243 = vrot.lane.b32.xlu1 %v10046_v30, %s7625_s9  ;;  %4901 = vst.msk [vmem:[#allocation3 + $0x238] sm:$0xff] %vm317_vm0, %v10444_v6  ;;  %v4613_v55 = vld [vmem:[#allocation2 + $0xef] sm:$0xff]  ;;  %v4986_v50 = vpop.permute.xlu0 %4985  ;;  %v3943_v12 = vld [vmem:[#allocation3 + $0x4e0] sm:$0xff]  ;;  %4902 = vst.msk [vmem:[#allocation3 + $0x260] sm:$0xff] %vm317_vm0, %v10449_v44 }
 0x445   : > { %v5124_v36 = vld [vmem:[#allocation2 + $0xf0] sm:$0xff]  ;;  %4645 = vst.msk [vmem:[#allocation3 + $0x258] sm:$0xff] %vm317_vm0, %v4613_v55  ;;  %5410 = vst.msk [vmem:[#allocation3 + $0x1d0] sm:$0xff] %vm317_vm0, %v4613_v55  ;;  %4303 = vmatprep.mubr.f32.mxu1 %v3943_v12  ;;  %v4727_v9 = vpop.permute.xlu1 %4726 }
 0x446   : > { %5156 = vst.msk [vmem:[#allocation3 + $0x218] sm:$0xff] %vm317_vm0, %v5124_v36  ;;  %v5633_v30 = vld [vmem:[#allocation2 + $0xe9] sm:$0xff]  ;;  %v5634_v29 = vld [vmem:[#allocation2 + $0xf1] sm:$0xff]  ;;  %4580 = vst.msk [vmem:[#allocation2 + $0x108] sm:$0xff] %vm317_vm0, %v4548_v1 }
 0x447   : > { %5080 = vst.msk [vmem:[#allocation3 + $0x30] sm:$0xff] %vm4822_vm3, %v4986_v50  ;;  %4823 = vst.msk [vmem:[#allocation3] sm:$0xff] %vm4822_vm3, %v4727_v9  ;;  %v10509_v35 = vld [vmem:[#allocation2 + $0xf0] sm:$0xff] }
 0x448   : > { %5665 = vst.msk [vmem:[#allocation3 + $0x1b0] sm:$0xff] %vm317_vm0, %v5633_v30  ;;  %5666 = vst.msk [vmem:[#allocation3 + $0x1d8] sm:$0xff] %vm317_vm0, %v5634_v29  ;;  %5501 = vrot.lane.b32.xlu1 %v10163_v14, %s7625_s9  ;;  %v4988_v52 = vpop.permute.xlu0 %4987  ;;  %v5688_v60 = vld [vmem:[#allocation3 + $0x8] sm:$0xff] }
 0x449   : > { %5081 = vst.msk [vmem:[#allocation3 + $0x58] sm:$0xff] %vm4822_vm3, %v4988_v52  ;;  %6086 = vmatprep.mubr.f32.mxu0 %v5688_v60  ;;  %v4729_v41 = vpop.permute.xlu1 %4728  ;;  %v3942_v25 = vld [vmem:[#allocation3 + $0x4d8] sm:$0xff] }
 0x44a   : > { %4824 = vst.msk [vmem:[#allocation3 + $0x28] sm:$0xff] %vm4822_vm3, %v4729_v41  ;;  %4304 = vmatmul.mubr.f32.gmra.mxu1 %v3942_v25 }
 0x44c   : > { %5245 = vrot.lane.b32.xlu1 %v10053_v34, %s7625_s9  ;;  %v4225_v19 = vpop.f32.mrf.mxu1  ;;  %v4990_v61 = vpop.permute.xlu0 %4989 }
 0x44d   : > { %v4226_v54 = vadd.f32 %v10282_v3, %v4225_v19  ;;  %5082 = vst.msk [vmem:[#allocation3 + $0x80] sm:$0xff] %vm4822_vm3, %v4990_v61  ;;  %v4933_v42 = vld [vmem:[#allocation2 + $0x107] sm:$0xff]  ;;  %v4731_v63 = vpop.permute.xlu1 %4730 }
 0x44e   : > { %v4227_v14 = vpop.f32.mrf.mxu1  ;;  %v4614_v38 = vld [vmem:[#allocation2 + $0x107] sm:$0xff]  ;;  %5011 = vrot.lane.b32.xlu0 %v4933_v42, %s7625_s9  ;;  %4825 = vst.msk [vmem:[#allocation3 + $0x50] sm:$0xff] %vm4822_vm3, %v4731_v63  ;;  %v5693_v46 = vld [vmem:[#allocation3 + $0x30] sm:$0xff] }
 0x44f   : > { %v4451_v28 = vadd.f32 %v7360_v21, %v4226_v54  ;;  %v5687_v34 = vld [vmem:[#allocation3] sm:$0xff]  ;;  %4646 = vst.msk [vmem:[#allocation3 + $0x280] sm:$0xff] %vm317_vm0, %v4614_v38  ;;  %5411 = vst.msk [vmem:[#allocation3 + $0x1f8] sm:$0xff] %vm317_vm0, %v4614_v38  ;;  %v5125_v15 = vld [vmem:[#allocation2 + $0x108] sm:$0xff]  ;;  %v7366_v38 = vpop.f32.mrf.mxu0 }
 0x450   : > { %5503 = vrot.lane.b32.xlu1 %v10177_v57, %s7625_s9  ;;  %6087 = vmatmul.mubr.f32.vlgmr.msra.gmra.mxu0 %v5687_v34  ;;  %v4992_v22 = vpop.permute.xlu0 %4991  ;;  %5157 = vst.msk [vmem:[#allocation3 + $0x240] sm:$0xff] %vm317_vm0, %v5125_v15  ;;  %v5698_v32 = vld [vmem:[#allocation3 + $0x58] sm:$0xff]  ;;  %v10530_v14 = vld [vmem:[#allocation2 + $0x108] sm:$0xff] }
 0x451   : > { %v4549_v16 = vmax.f32 %v4451_v28, 0.0  ;;  %5083 = vst.msk [vmem:[#allocation3 + $0xa8] sm:$0xff] %vm4822_vm3, %v4992_v22  ;;  %6091 = vmatprep.mubr.f32.mxu0 %v5693_v46  ;;  %v4733_v57 = vpop.permute.xlu1 %4732  ;;  %v5692_v39 = vld [vmem:[#allocation3 + $0x28] sm:$0xff]  ;;  %v4465_v34 = vpop.f32.mrf.mxu0 }
 0x452   : > { %4754 = vrot.lane.b32.xlu0 %v10480_v31, %s7625_s9  ;;  %4826 = vst.msk [vmem:[#allocation3 + $0x78] sm:$0xff] %vm4822_vm3, %v4733_v57 }
 0x453   : > { %4581 = vst.msk [vmem:[#allocation2 + $0x110] sm:$0xff] %vm317_vm0, %v4549_v16 }
 0x454   : > { %5247 = vrot.lane.b32.xlu1 %v10120_v48, %s7625_s9  ;;  %6092 = vmatmul.mubr.f32.gmra.mxu0 %v5692_v39  ;;  %v4994_v47 = vpop.permute.xlu0 %4993  ;;  %v5703_v48 = vld [vmem:[#allocation3 + $0x80] sm:$0xff] }
 0x455   : > { %6096 = vmatprep.mubr.f32.mxu0 %v5698_v32  ;;  %5084 = vst.msk [vmem:[#allocation3 + $0xd0] sm:$0xff] %vm4822_vm3, %v4994_v47  ;;  %v4735_v33 = vpop.permute.xlu1 %4734  ;;  %v5697_v8 = vld [vmem:[#allocation3 + $0x50] sm:$0xff] }
 0x456   : > { %4827 = vst.msk [vmem:[#allocation3 + $0xa0] sm:$0xff] %vm4822_vm3, %v4735_v33  ;;  %v4230_v27 = vpop.f32.mrf.mxu1 }
 0x457   : > { %v4231_v5 = vadd.f32 %v10282_v3, %v4230_v27 }
 0x458   : > { %5505 = vrot.lane.b32.xlu1 %v10198_v37, %s7625_s9  ;;  %6097 = vmatmul.mubr.f32.gmra.mxu0 %v5697_v8  ;;  %v4232_v11 = vpop.f32.mrf.mxu1  ;;  %v5708_v26 = vld [vmem:[#allocation3 + $0xa8] sm:$0xff] }
 0x459   : > { %6101 = vmatprep.mubr.f32.mxu0 %v5703_v48  ;;  %v4456_v62 = vadd.f32 %v4455_v40, %v4231_v5  ;;  %v4737_v37 = vpop.permute.xlu1 %4736  ;;  %v5702_v0 = vld [vmem:[#allocation3 + $0x78] sm:$0xff] }
 0x45a   : > { %v4934_v21 = vld [vmem:[#allocation2 + $0x10f] sm:$0xff]  ;;  %4828 = vst.msk [vmem:[#allocation3 + $0xc8] sm:$0xff] %vm4822_vm3, %v4737_v37 }
 0x45b   : > { %v10493_v49 = vld [vmem:[#allocation2 + $0x109] sm:$0xff]  ;;  %5013 = vrot.lane.b32.xlu0 %v4934_v21, %s7625_s9  ;;  %v10498_v43 = vld [vmem:[#allocation2 + $0x111] sm:$0xff]  ;;  %v4550_v13 = vmax.f32 %v4456_v62, 0.0 }
 0x45c   : > { %5249 = vrot.lane.b32.xlu1 %v10123_v4, %s7625_s9  ;;  %4903 = vst.msk [vmem:[#allocation3 + $0x288] sm:$0xff] %vm317_vm0, %v10493_v49  ;;  %v4615_v10 = vld [vmem:[#allocation2 + $0x10f] sm:$0xff]  ;;  %6102 = vmatmul.mubr.f32.gmra.mxu0 %v5702_v0  ;;  %4904 = vst.msk [vmem:[#allocation3 + $0x2b0] sm:$0xff] %vm317_vm0, %v10498_v43 }
 0x45d   : > { %4647 = vst.msk [vmem:[#allocation3 + $0x2a8] sm:$0xff] %vm317_vm0, %v4615_v10  ;;  %5412 = vst.msk [vmem:[#allocation3 + $0x220] sm:$0xff] %vm317_vm0, %v4615_v10  ;;  %v5126_v4 = vld [vmem:[#allocation2 + $0x110] sm:$0xff]  ;;  %6106 = vmatprep.mubr.f32.mxu0 %v5708_v26  ;;  %v4739_v55 = vpop.permute.xlu1 %4738  ;;  %v5707_v36 = vld [vmem:[#allocation3 + $0xa0] sm:$0xff] }
 0x45e   : > { %v5635_v7 = vld [vmem:[#allocation2 + $0x109] sm:$0xff]  ;;  %5158 = vst.msk [vmem:[#allocation3 + $0x268] sm:$0xff] %vm317_vm0, %v5126_v4  ;;  %v5636_v24 = vld [vmem:[#allocation2 + $0x111] sm:$0xff]  ;;  %4582 = vst.msk [vmem:[#allocation2 + $0x128] sm:$0xff] %vm317_vm0, %v4550_v13  ;;  %v7369_v4 = vpop.f32.mrf.mxu0 }
 0x45f   : > { %5667 = vst.msk [vmem:[#allocation3 + $0x200] sm:$0xff] %vm317_vm0, %v5635_v7  ;;  %5668 = vst.msk [vmem:[#allocation3 + $0x228] sm:$0xff] %vm317_vm0, %v5636_v24  ;;  %4756 = vrot.lane.b32.xlu0 %v10509_v35, %s7625_s9  ;;  %v5713_v12 = vld [vmem:[#allocation3 + $0xd0] sm:$0xff] }
 0x460   : > { %5507 = vrot.lane.b32.xlu1 %v10241_v18, %s7625_s9  ;;  %4829 = vst.msk [vmem:[#allocation3 + $0xf0] sm:$0xff] %vm4822_vm3, %v4739_v55  ;;  %6107 = vmatmul.mubr.f32.gmra.mxu0 %v5707_v36  ;;  %v10557_v33 = vld [vmem:[#allocation2 + $0x110] sm:$0xff]  ;;  %v4475_v24 = vpop.f32.mrf.mxu0 }
 0x461   : > { %6111 = vmatprep.mubr.f32.mxu0 %v5713_v12  ;;  %v4741_v30 = vpop.permute.xlu1 %4740  ;;  %v5712_v29 = vld [vmem:[#allocation3 + $0xc8] sm:$0xff] }
 0x462   : > { %v4996_v50 = vpop.permute.xlu0 %4995  ;;  %4830 = vst.msk [vmem:[#allocation3 + $0x118] sm:$0xff] %vm4822_vm3, %v4741_v30 }
 0x463   : > { %5085 = vst.msk [vmem:[#allocation3 + $0xf8] sm:$0xff] %vm4822_vm3, %v4996_v50 }
 0x464   : > { %5251 = vrot.lane.b32.xlu1 %v10200_v20, %s7625_s9  ;;  %6112 = vmatmul.mubr.f32.gmra.mxu0 %v5712_v29 }
 0x465   : > { %v4235_v1 = vpop.f32.mrf.mxu1  ;;  %v4935_v52 = vld [vmem:[#allocation2 + $0x127] sm:$0xff] }
 0x466   : > { %v4236_v18 = vadd.f32 %v10282_v3, %v4235_v1  ;;  %v4616_v60 = vld [vmem:[#allocation2 + $0x127] sm:$0xff]  ;;  %5015 = vrot.lane.b32.xlu0 %v4935_v52, %s7625_s9  ;;  %v4743_v25 = vpop.permute.xlu1 %4742 }
 0x467   : > { %v4237_v9 = vpop.f32.mrf.mxu1  ;;  %4648 = vst.msk [vmem:[#allocation3 + $0x2d0] sm:$0xff] %vm317_vm0, %v4616_v60  ;;  %5413 = vst.msk [vmem:[#allocation3 + $0x248] sm:$0xff] %vm317_vm0, %v4616_v60  ;;  %v5127_v20 = vld [vmem:[#allocation2 + $0x128] sm:$0xff]  ;;  %v5717_v54 = vld [vmem:[#allocation3 + $0xf0] sm:$0xff] }
 0x468   : > { %v4461_v41 = vadd.f32 %v7363_v56, %v4236_v18  ;;  %5509 = vrot.lane.b32.xlu1 %v10285_v59, %s7625_s9  ;;  %4831 = vst.msk [vmem:[#allocation3 + $0x140] sm:$0xff] %vm4822_vm3, %v4743_v25  ;;  %v10576_v10 = vld [vmem:[#allocation2 + $0x128] sm:$0xff] }
 0x469   : > { %5159 = vst.msk [vmem:[#allocation3 + $0x290] sm:$0xff] %vm317_vm0, %v5127_v20 }
 0x46a   : > { %v5718_v19 = vld [vmem:[#allocation3 + $0xf8] sm:$0xff]  ;;  %v4551_v61 = vmax.f32 %v4461_v41, 0.0  ;;  %4758 = vrot.lane.b32.xlu0 %v10530_v14, %s7625_s9 }
 0x46b   : > { %6116 = vmatprep.mubr.f32.mxu0 %v5718_v19 }
 0x46c   : > { %6117 = vmatmul.mubr.f32.gmra.mxu0 %v5717_v54  ;;  %4583 = vst.msk [vmem:[#allocation2 + $0x130] sm:$0xff] %vm317_vm0, %v4551_v61  ;;  %5253 = vrot.lane.b32.xlu1 %v10205_v58, %s7625_s9  ;;  %v4998_v59 = vpop.permute.xlu0 %4997 }
 0x46d   : > { %v4745_v42 = vpop.permute.xlu1 %4744  ;;  %5086 = vst.msk [vmem:[#allocation3 + $0x120] sm:$0xff] %vm4822_vm3, %v4998_v59 }
 0x46e   : > { %4832 = vst.msk [vmem:[#allocation3 + $0x168] sm:$0xff] %vm4822_vm3, %v4745_v42  ;;  %v4240_v28 = vpop.f32.mrf.mxu1 }
 0x46f   : > { %v4241_v63 = vadd.f32 %v10282_v3, %v4240_v28  ;;  %v5727_v0 = vld [vmem:[#allocation3 + $0x140] sm:$0xff] }
 0x470   : > { %5511 = vrot.lane.b32.xlu1 %v10331_v23, %s7625_s9  ;;  %v4242_v15 = vpop.f32.mrf.mxu1 }
 0x471   : > { %v4466_v16 = vadd.f32 %v4465_v34, %v4241_v63  ;;  %v7372_v15 = vpop.f32.mrf.mxu0 }
 0x473   : > { %v4936_v22 = vld [vmem:[#allocation2 + $0x12f] sm:$0xff]  ;;  %v4552_v47 = vmax.f32 %v4466_v16, 0.0 }
 0x474   : > { %v10542_v46 = vld [vmem:[#allocation2 + $0x129] sm:$0xff]  ;;  %5017 = vrot.lane.b32.xlu0 %v4936_v22, %s7625_s9  ;;  %5255 = vrot.lane.b32.xlu1 %v10287_v51, %s7625_s9  ;;  %v10547_v58 = vld [vmem:[#allocation2 + $0x131] sm:$0xff]  ;;  %v5723_v39 = vld [vmem:[#allocation3 + $0x120] sm:$0xff] }
 0x475   : > { %4905 = vst.msk [vmem:[#allocation3 + $0x2d8] sm:$0xff] %vm317_vm0, %v10542_v46  ;;  %v4617_v23 = vld [vmem:[#allocation2 + $0x12f] sm:$0xff]  ;;  %4906 = vst.msk [vmem:[#allocation3 + $0x300] sm:$0xff] %vm317_vm0, %v10547_v58  ;;  %6121 = vmatprep.mubr.f32.mxu0 %v5723_v39  ;;  %v5722_v51 = vld [vmem:[#allocation3 + $0x118] sm:$0xff] }
 0x476   : > { %v5128_v57 = vld [vmem:[#allocation2 + $0x130] sm:$0xff]  ;;  %4649 = vst.msk [vmem:[#allocation3 + $0x2f8] sm:$0xff] %vm317_vm0, %v4617_v23  ;;  %5414 = vst.msk [vmem:[#allocation3 + $0x270] sm:$0xff] %vm317_vm0, %v4617_v23  ;;  %6122 = vmatmul.mubr.f32.gmra.mxu0 %v5722_v51  ;;  %v10637_v22 = vld [vmem:[%s11316_s5 + $0x238] sm:$0xff] }
 0x477   : > { %5160 = vst.msk [vmem:[#allocation3 + $0x2b8] sm:$0xff] %vm317_vm0, %v5128_v57  ;;  %v5637_v32 = vld [vmem:[#allocation2 + $0x129] sm:$0xff]  ;;  %v5638_v56 = vld [vmem:[#allocation2 + $0x131] sm:$0xff]  ;;  %4584 = vst.msk [vmem:[#allocation2 + $0x148] sm:$0xff] %vm317_vm0, %v4552_v47  ;;  %v5000_v8 = vpop.permute.xlu0 %4999  ;;  %7385 = vmatprep.subr.mxu0 %v10637_v22  ;;  %7449 = vmatprep.subr.mxu1 %v10637_v22  ;;  %v4485_v57 = vpop.f32.mrf.mxu0 }
 0x478   : > { %5669 = vst.msk [vmem:[#allocation3 + $0x250] sm:$0xff] %vm317_vm0, %v5637_v32  ;;  %5670 = vst.msk [vmem:[#allocation3 + $0x278] sm:$0xff] %vm317_vm0, %v5638_v56  ;;  %4760 = vrot.lane.b32.xlu0 %v10557_v33, %s7625_s9  ;;  %5513 = vrot.lane.b32.xlu1 %v10370_v45, %s7625_s9  ;;  %v4747_v27 = vpop.permute.xlu1 %4746  ;;  %v10603_v52 = vld [vmem:[#allocation2 + $0x130] sm:$0xff] }
 0x479   : > { %5087 = vst.msk [vmem:[#allocation3 + $0x148] sm:$0xff] %vm4822_vm3, %v5000_v8  ;;  %4833 = vst.msk [vmem:[#allocation3 + $0x190] sm:$0xff] %vm4822_vm3, %v4747_v27  ;;  %7386 = vmatpush3.msra.mxu0 %v10637_v22 }
 0x47c   : > { %5257 = vrot.lane.b32.xlu1 %v10292_v53, %s7625_s9 }
 0x47d   : > { %v4245_v48 = vpop.f32.mrf.mxu1 }
 0x47e   : > { %v4246_v5 = vadd.f32 %v10282_v3, %v4245_v48  ;;  %v4937_v11 = vld [vmem:[#allocation2 + $0x147] sm:$0xff] }
 0x47f   : > { %v4247_v40 = vpop.f32.mrf.mxu1  ;;  %v4618_v21 = vld [vmem:[#allocation2 + $0x147] sm:$0xff]  ;;  %5019 = vrot.lane.b32.xlu0 %v4937_v11, %s7625_s9 }
 0x480   : > { %v4471_v62 = vadd.f32 %v7366_v38, %v4246_v5  ;;  %5515 = vrot.lane.b32.xlu1 %v10480_v31, %s7625_s9  ;;  %4650 = vst.msk [vmem:[#allocation3 + $0x320] sm:$0xff] %vm317_vm0, %v4618_v21  ;;  %5415 = vst.msk [vmem:[#allocation3 + $0x298] sm:$0xff] %vm317_vm0, %v4618_v21  ;;  %v5129_v45 = vld [vmem:[#allocation2 + $0x148] sm:$0xff]  ;;  %v5737_v28 = vld [vmem:[#allocation3 + $0x190] sm:$0xff] }
 0x481   : > { %v5728_v37 = vld [vmem:[#allocation3 + $0x148] sm:$0xff]  ;;  %5161 = vst.msk [vmem:[#allocation3 + $0x2e0] sm:$0xff] %vm317_vm0, %v5129_v45 }
 0x482   : > { %v4553_v53 = vmax.f32 %v4471_v62, 0.0  ;;  %6126 = vmatprep.mubr.f32.mxu0 %v5728_v37  ;;  %v10625_v38 = vld [vmem:[#allocation2 + $0x148] sm:$0xff] }
 0x483   : > { %6127 = vmatmul.mubr.f32.gmra.mxu0 %v5727_v0  ;;  %4762 = vrot.lane.b32.xlu0 %v10576_v10, %s7625_s9 }
 0x484   : > { %4585 = vst.msk [vmem:[#allocation2 + $0x150] sm:$0xff] %vm317_vm0, %v4553_v53  ;;  %5259 = vrot.lane.b32.xlu1 %v10372_v17, %s7625_s9  ;;  %v5002_v31 = vpop.permute.xlu0 %5001  ;;  %v10674_v53 = vld [vmem:[#allocation6] ss:$0 sm:$0xff] }
 0x485   : > { %v4749_v26 = vpop.permute.xlu1 %4748  ;;  %5088 = vst.msk [vmem:[#allocation3 + $0x170] sm:$0xff] %vm4822_vm3, %v5002_v31 }
 0x486   : > { %4834 = vst.msk [vmem:[#allocation3 + $0x1b8] sm:$0xff] %vm4822_vm3, %v4749_v26  ;;  %v4250_v7 = vpop.f32.mrf.mxu1 }
 0x487   : > { %v4251_v13 = vadd.f32 %v10282_v3, %v4250_v7 }
 0x488   : > { %5517 = vrot.lane.b32.xlu1 %v10509_v35, %s7625_s9  ;;  %v4252_v55 = vpop.f32.mrf.mxu1 }
 0x489   : > { %v4476_v12 = vadd.f32 %v4475_v24, %v4251_v13  ;;  %v5917_v13 = vld [vmem:[%s11316_s5 + $0x230] sm:$0xff] }
 0x48a   : > { %7387 = vmatprep.subr.mxu0 %v5917_v13 }
 0x48b   : > { %v4938_v36 = vld [vmem:[#allocation2 + $0x14f] sm:$0xff]  ;;  %v4554_v18 = vmax.f32 %v4476_v12, 0.0  ;;  %7388 = vmatpush3.msra.mxu0 %v5917_v13 }
 0x48c   : > { %v10588_v50 = vld [vmem:[#allocation2 + $0x149] sm:$0xff]  ;;  %5021 = vrot.lane.b32.xlu0 %v4938_v36, %s7625_s9  ;;  %5261 = vrot.lane.b32.xlu1 %v10378_v2, %s7625_s9  ;;  %v10593_v17 = vld [vmem:[#allocation2 + $0x151] sm:$0xff] }
 0x48d   : > { %4907 = vst.msk [vmem:[#allocation3 + $0x328] sm:$0xff] %vm317_vm0, %v10588_v50  ;;  %v4619_v35 = vld [vmem:[#allocation2 + $0x14f] sm:$0xff]  ;;  %4908 = vst.msk [vmem:[#allocation3 + $0x350] sm:$0xff] %vm317_vm0, %v10593_v17  ;;  %v5742_v11 = vld [vmem:[#allocation3 + $0x1b8] sm:$0xff] }
 0x48e   : > { %v5130_v30 = vld [vmem:[#allocation2 + $0x150] sm:$0xff]  ;;  %4651 = vst.msk [vmem:[#allocation3 + $0x348] sm:$0xff] %vm317_vm0, %v4619_v35  ;;  %5416 = vst.msk [vmem:[#allocation3 + $0x2c0] sm:$0xff] %vm317_vm0, %v4619_v35  ;;  %v5732_v2 = vld [vmem:[#allocation3 + $0x168] sm:$0xff] }
 0x48f   : > { %v5733_v29 = vld [vmem:[#allocation3 + $0x170] sm:$0xff]  ;;  %5162 = vst.msk [vmem:[#allocation3 + $0x308] sm:$0xff] %vm317_vm0, %v5130_v30  ;;  %4586 = vst.msk [vmem:[#allocation2 + $0x168] sm:$0xff] %vm317_vm0, %v4554_v18  ;;  %v5004_v60 = vpop.permute.xlu0 %5003 }
 0x490   : > { %v5639_v1 = vld [vmem:[#allocation2 + $0x149] sm:$0xff]  ;;  %6131 = vmatprep.mubr.f32.mxu0 %v5733_v29  ;;  %v5640_v9 = vld [vmem:[#allocation2 + $0x151] sm:$0xff]  ;;  %4764 = vrot.lane.b32.xlu0 %v10603_v52, %s7625_s9  ;;  %v4751_v41 = vpop.permute.xlu1 %4750  ;;  %5089 = vst.msk [vmem:[#allocation3 + $0x198] sm:$0xff] %vm4822_vm3, %v5004_v60 }
 0x491   : > { %5671 = vst.msk [vmem:[#allocation3 + $0x2a0] sm:$0xff] %vm317_vm0, %v5639_v1  ;;  %6132 = vmatmul.mubr.f32.gmra.mxu0 %v5732_v2  ;;  %5672 = vst.msk [vmem:[#allocation3 + $0x2c8] sm:$0xff] %vm317_vm0, %v5640_v9  ;;  %5519 = vrot.lane.b32.xlu1 %v10530_v14, %s7625_s9  ;;  %v4683_v40 = vld [vmem:[#allocation2 + $0x150] sm:$0xff]  ;;  %v10697_v2 = vpop.f32.mrf.mxu0 }
 0x492   : > { %4835 = vst.msk [vmem:[#allocation3 + $0x1e0] sm:$0xff] %vm4822_vm3, %v4751_v41 }
 0x493   : > { %v4255_v25 = vpop.f32.mrf.mxu1  ;;  %v4495_v41 = vpop.f32.mrf.mxu0 }
 0x494   : > { %v4256_v20 = vadd.f32 %v10282_v3, %v4255_v25 }
 0x495   : > { %5263 = vrot.lane.b32.xlu1 %v10444_v6, %s7625_s9  ;;  %v4257_v19 = vpop.f32.mrf.mxu1 }
 0x496   : > { %v4939_v61 = vld [vmem:[#allocation2 + $0x167] sm:$0xff]  ;;  %v4481_v42 = vadd.f32 %v7369_v4, %v4256_v20 }
 0x497   : > { %v10616_v54 = vld [vmem:[#allocation2 + $0x168] sm:$0xff]  ;;  %5023 = vrot.lane.b32.xlu0 %v4939_v61, %s7625_s9  ;;  %v5738_v14 = vld [vmem:[#allocation3 + $0x198] sm:$0xff] }
 0x498   : > { %v4620_v59 = vld [vmem:[#allocation2 + $0x167] sm:$0xff]  ;;  %5163 = vst.msk [vmem:[#allocation3 + $0x330] sm:$0xff] %vm317_vm0, %v10616_v54  ;;  %v4555_v6 = vmax.f32 %v4481_v42, 0.0  ;;  %6136 = vmatprep.mubr.f32.mxu0 %v5738_v14 }
 0x499   : > { %5521 = vrot.lane.b32.xlu1 %v10557_v33, %s7625_s9  ;;  %4652 = vst.msk [vmem:[#allocation3 + $0x370] sm:$0xff] %vm317_vm0, %v4620_v59  ;;  %5417 = vst.msk [vmem:[#allocation3 + $0x2e8] sm:$0xff] %vm317_vm0, %v4620_v59  ;;  %6137 = vmatmul.mubr.f32.gmra.mxu0 %v5737_v28  ;;  %v5747_v30 = vld [vmem:[#allocation3 + $0x1e0] sm:$0xff] }
 0x49a   : > { %4587 = vst.msk [vmem:[#allocation2 + $0x170] sm:$0xff] %vm317_vm0, %v4555_v6 }
 0x49b   : > { %4766 = vrot.lane.b32.xlu0 %v10625_v38, %s7625_s9 }
 0x49d   : > { %5265 = vrot.lane.b32.xlu1 %v10449_v44, %s7625_s9  ;;  %v5006_v63 = vpop.permute.xlu0 %5005 }
 0x49e   : > { %v4753_v34 = vpop.permute.xlu1 %4752  ;;  %5090 = vst.msk [vmem:[#allocation3 + $0x1c0] sm:$0xff] %vm4822_vm3, %v5006_v63  ;;  %v4260_v44 = vpop.f32.mrf.mxu1 }
 0x49f   : > { %4836 = vst.msk [vmem:[#allocation3 + $0x208] sm:$0xff] %vm4822_vm3, %v4753_v34  ;;  %v4261_v16 = vadd.f32 %v10282_v3, %v4260_v44 }
 0x4a0   : > { %v4262_v39 = vpop.f32.mrf.mxu1 }
 0x4a1   : > { %5523 = vrot.lane.b32.xlu1 %v10576_v10, %s7625_s9  ;;  %v4940_v32 = vld [vmem:[#allocation2 + $0x16f] sm:$0xff]  ;;  %v4486_v56 = vadd.f32 %v4485_v57, %v4261_v16 }
 0x4a2   : > { %v5496_v23 = vpop.permute.xlu1 %5495  ;;  %v10646_v47 = vld [vmem:[#allocation2 + $0x170] sm:$0xff]  ;;  %5025 = vrot.lane.b32.xlu0 %v4940_v32, %s7625_s9 }
 0x4a3   : > { %5591 = vst.msk [vmem:[#allocation3 + $0x18] sm:$0xff] %vm4822_vm3, %v5496_v23  ;;  %v10648_v51 = vld [vmem:[#allocation2 + $0x169] sm:$0xff]  ;;  %v10653_v33 = vld [vmem:[#allocation2 + $0x171] sm:$0xff]  ;;  %v4556_v27 = vmax.f32 %v4486_v56, 0.0 }
 0x4a4   : > { %4909 = vst.msk [vmem:[#allocation3 + $0x378] sm:$0xff] %vm317_vm0, %v10648_v51  ;;  %v4621_v3 = vld [vmem:[#allocation2 + $0x16f] sm:$0xff]  ;;  %5164 = vst.msk [vmem:[#allocation3 + $0x358] sm:$0xff] %vm317_vm0, %v10646_v47 }
 0x4a5   : > { %5267 = vrot.lane.b32.xlu1 %v10493_v49, %s7625_s9  ;;  %v5641_v8 = vld [vmem:[#allocation2 + $0x169] sm:$0xff]  ;;  %4910 = vst.msk [vmem:[#allocation3 + $0x3a0] sm:$0xff] %vm317_vm0, %v10653_v33  ;;  %4653 = vst.msk [vmem:[#allocation3 + $0x398] sm:$0xff] %vm317_vm0, %v4621_v3  ;;  %v5642_v49 = vld [vmem:[#allocation2 + $0x171] sm:$0xff] }
 0x4a6   : > { %5418 = vst.msk [vmem:[#allocation3 + $0x310] sm:$0xff] %vm317_vm0, %v4621_v3  ;;  %5673 = vst.msk [vmem:[#allocation3 + $0x2f0] sm:$0xff] %vm317_vm0, %v5641_v8  ;;  %v5240_v48 = vpop.permute.xlu1 %5239  ;;  %v5743_v5 = vld [vmem:[#allocation3 + $0x1c0] sm:$0xff]  ;;  %4768 = vrot.lane.b32.xlu0 %v4683_v40, %s7625_s9 }
 0x4a7   : > { %5674 = vst.msk [vmem:[#allocation3 + $0x318] sm:$0xff] %vm317_vm0, %v5642_v49  ;;  %6141 = vmatprep.mubr.f32.mxu0 %v5743_v5  ;;  %4588 = vst.msk [vmem:[#allocation2 + $0x188] sm:$0xff] %vm317_vm0, %v4556_v27 }
 0x4a8   : > { %5335 = vst.msk [vmem:[#allocation3 + $0x10] sm:$0xff] %vm4822_vm3, %v5240_v48  ;;  %6142 = vmatmul.mubr.f32.gmra.mxu0 %v5742_v11  ;;  %v5008_v21 = vpop.permute.xlu0 %5007 }
 0x4a9   : > { %5525 = vrot.lane.b32.xlu1 %v10603_v52, %s7625_s9  ;;  %5091 = vst.msk [vmem:[#allocation3 + $0x1e8] sm:$0xff] %vm4822_vm3, %v5008_v21 }
 0x4aa   : > { %v5498_v62 = vpop.permute.xlu1 %5497  ;;  %v5690_v45 = vld [vmem:[#allocation3 + $0x18] sm:$0xff] }
 0x4ab   : > { %5592 = vst.msk [vmem:[#allocation3 + $0x40] sm:$0xff] %vm4822_vm3, %v5498_v62  ;;  %6311 = vmatprep.mubr.f32.mxu1 %v5690_v45 }
 0x4ad   : > { %5269 = vrot.lane.b32.xlu1 %v10498_v43, %s7625_s9  ;;  %v4265_v37 = vpop.f32.mrf.mxu1 }
 0x4ae   : > { %v4266_v0 = vadd.f32 %v10674_v53, %v4265_v37  ;;  %v5242_v10 = vpop.permute.xlu1 %5241  ;;  %v4941_v4 = vld [vmem:[#allocation2 + $0x187] sm:$0xff]  ;;  %v10755_v37 = vpop.f32.mrf.mxu0 }
 0x4af   : > { %v5689_v31 = vld [vmem:[#allocation3 + $0x10] sm:$0xff]  ;;  %5336 = vst.msk [vmem:[#allocation3 + $0x38] sm:$0xff] %vm4822_vm3, %v5242_v10  ;;  %v4267_v26 = vpop.f32.mrf.mxu1  ;;  %v10678_v7 = vld [vmem:[#allocation2 + $0x188] sm:$0xff]  ;;  %5027 = vrot.lane.b32.xlu0 %v4941_v4, %s7625_s9 }
 0x4b0   : > { %6312 = vmatmul.mubr.f32.vlgmr.msra.gmra.mxu1 %v5689_v31  ;;  %v4491_v24 = vadd.f32 %v7372_v15, %v4266_v0  ;;  %v4622_v43 = vld [vmem:[#allocation2 + $0x187] sm:$0xff]  ;;  %5165 = vst.msk [vmem:[#allocation3 + $0x380] sm:$0xff] %vm317_vm0, %v10678_v7 }
 0x4b1   : > { %5527 = vrot.lane.b32.xlu1 %v10625_v38, %s7625_s9  ;;  %4654 = vst.msk [vmem:[#allocation3 + $0x3c0] sm:$0xff] %vm317_vm0, %v4622_v43  ;;  %7457 = vmatpush3.msra.mxu1 %v10637_v22  ;;  %5419 = vst.msk [vmem:[#allocation3 + $0x338] sm:$0xff] %vm317_vm0, %v4622_v43  ;;  %v5748_v12 = vld [vmem:[#allocation3 + $0x1e8] sm:$0xff]  ;;  %v5915_v0 = vld [vmem:[%s11316_s5 + $0x220] sm:$0xff] }
 0x4b2   : > { %v4557_v55 = vmax.f32 %v4491_v24, 0.0  ;;  %v5500_v36 = vpop.permute.xlu1 %5499  ;;  %v5695_v35 = vld [vmem:[#allocation3 + $0x40] sm:$0xff]  ;;  %7450 = vmatprep.subr.mxu1 %v5917_v13  ;;  %6146 = vmatprep.mubr.f32.mxu0 %v5748_v12  ;;  %v5916_v15 = vld [vmem:[%s11316_s5 + $0x228] sm:$0xff] }
 0x4b3   : > { %5593 = vst.msk [vmem:[#allocation3 + $0x68] sm:$0xff] %vm4822_vm3, %v5500_v36  ;;  %6316 = vmatprep.mubr.f32.mxu1 %v5695_v35  ;;  %4770 = vrot.lane.b32.xlu0 %v10616_v54, %s7625_s9  ;;  %v5752_v22 = vld [vmem:[#allocation3 + $0x208] sm:$0xff] }
 0x4b4   : > { %4589 = vst.msk [vmem:[#allocation2 + $0x190] sm:$0xff] %vm317_vm0, %v4557_v55  ;;  %6147 = vmatmul.mubr.f32.gmra.mxu0 %v5747_v30  ;;  %7458 = vmatpush3.msra.mxu1 %v5917_v13  ;;  %v4505_v13 = vpop.f32.mrf.mxu0 }
 0x4b5   : > { %5271 = vrot.lane.b32.xlu1 %v10542_v46, %s7625_s9  ;;  %v5010_v29 = vpop.permute.xlu0 %5009  ;;  %7389 = vmatprep.subr.mxu0 %v5916_v15 }
 0x4b6   : > { %v5244_v1 = vpop.permute.xlu1 %5243  ;;  %v5694_v18 = vld [vmem:[#allocation3 + $0x38] sm:$0xff]  ;;  %5092 = vst.msk [vmem:[#allocation3 + $0x210] sm:$0xff] %vm4822_vm3, %v5010_v29  ;;  %v4270_v9 = vpop.f32.mrf.mxu1  ;;  %7390 = vmatpush3.msra.mxu0 %v5916_v15  ;;  %7451 = vmatprep.subr.mxu1 %v5916_v15 }
 0x4b7   : > { %5337 = vst.msk [vmem:[#allocation3 + $0x60] sm:$0xff] %vm4822_vm3, %v5244_v1  ;;  %6317 = vmatmul.mubr.f32.gmra.mxu1 %v5694_v18  ;;  %v4271_v52 = vadd.f32 %v10674_v53, %v4270_v9  ;;  %7391 = vmatprep.subr.mxu0 %v5915_v0 }
 0x4b8   : > { %v4272_v25 = vpop.f32.mrf.mxu1  ;;  %7459 = vmatpush3.msra.mxu1 %v5916_v15  ;;  %7392 = vmatpush3.msra.mxu0 %v5915_v0 }
 0x4b9   : > { %5529 = vrot.lane.b32.xlu1 %v4683_v40, %s7625_s9  ;;  %v4496_v59 = vadd.f32 %v4495_v41, %v4271_v52  ;;  %7452 = vmatprep.subr.mxu1 %v5915_v0 }
 0x4ba   : > { %v5502_v60 = vpop.permute.xlu1 %5501  ;;  %v5700_v46 = vld [vmem:[#allocation3 + $0x68] sm:$0xff]  ;;  %7460 = vmatpush3.msra.mxu1 %v5915_v0 }
 0x4bb   : > { %5594 = vst.msk [vmem:[#allocation3 + $0x90] sm:$0xff] %vm4822_vm3, %v5502_v60  ;;  %6321 = vmatprep.mubr.f32.mxu1 %v5700_v46  ;;  %v4942_v20 = vld [vmem:[#allocation2 + $0x18f] sm:$0xff]  ;;  %v4558_v38 = vmax.f32 %v4496_v59, 0.0 }
 0x4bc   : > { %v10704_v19 = vld [vmem:[#allocation2 + $0x189] sm:$0xff]  ;;  %v10706_v61 = vld [vmem:[#allocation2 + $0x191] sm:$0xff]  ;;  %5029 = vrot.lane.b32.xlu0 %v4942_v20, %s7625_s9  ;;  %4655 = vst.msk [vmem:[#allocation3 + $0x3e8] sm:$0xff] %vm317_vm0, %v4942_v20 }
 0x4bd   : > { %5273 = vrot.lane.b32.xlu1 %v10547_v58, %s7625_s9  ;;  %v10711_v42 = vld [vmem:[#allocation2 + $0x190] sm:$0xff]  ;;  %4911 = vst.msk [vmem:[#allocation3 + $0x3c8] sm:$0xff] %vm317_vm0, %v10704_v19  ;;  %4912 = vst.msk [vmem:[#allocation3 + $0x3f0] sm:$0xff] %vm317_vm0, %v10706_v61 }
 0x4be   : > { %v5388_v6 = vld [vmem:[#allocation2 + $0x18f] sm:$0xff]  ;;  %5166 = vst.msk [vmem:[#allocation3 + $0x3a8] sm:$0xff] %vm317_vm0, %v10711_v42  ;;  %v5246_v28 = vpop.permute.xlu1 %5245  ;;  %v5699_v34 = vld [vmem:[#allocation3 + $0x60] sm:$0xff]  ;;  %4590 = vst.msk [vmem:[#allocation2 + $0x1a8] sm:$0xff] %vm317_vm0, %v4558_v38 }
 0x4bf   : > { %v5643_v14 = vld [vmem:[#allocation2 + $0x189] sm:$0xff]  ;;  %5420 = vst.msk [vmem:[#allocation3 + $0x360] sm:$0xff] %vm317_vm0, %v5388_v6  ;;  %v5644_v58 = vld [vmem:[#allocation2 + $0x191] sm:$0xff]  ;;  %6322 = vmatmul.mubr.f32.gmra.mxu1 %v5699_v34 }
 0x4c0   : > { %5675 = vst.msk [vmem:[#allocation3 + $0x340] sm:$0xff] %vm317_vm0, %v5643_v14  ;;  %v5753_v63 = vld [vmem:[#allocation3 + $0x210] sm:$0xff]  ;;  %5676 = vst.msk [vmem:[#allocation3 + $0x368] sm:$0xff] %vm317_vm0, %v5644_v58  ;;  %4772 = vrot.lane.b32.xlu0 %v10646_v47, %s7625_s9  ;;  %v5012_v44 = vpop.permute.xlu0 %5011 }
 0x4c1   : > { %5338 = vst.msk [vmem:[#allocation3 + $0x88] sm:$0xff] %vm4822_vm3, %v5246_v28  ;;  %6151 = vmatprep.mubr.f32.mxu0 %v5753_v63  ;;  %5275 = vrot.lane.b32.xlu1 %v10588_v50, %s7625_s9  ;;  %5093 = vst.msk [vmem:[#allocation3 + $0x238] sm:$0xff] %vm4822_vm3, %v5012_v44  ;;  %v5914_v28 = vld [vmem:[%s11316_s5 + $0x218] sm:$0xff] }
 0x4c2   : > { %6152 = vmatmul.mubr.f32.gmra.mxu0 %v5752_v22  ;;  %v5504_v16 = vpop.permute.xlu1 %5503  ;;  %v5705_v23 = vld [vmem:[#allocation3 + $0x90] sm:$0xff]  ;;  %7393 = vmatprep.subr.mxu0 %v5914_v28 }
 0x4c3   : > { %5595 = vst.msk [vmem:[#allocation3 + $0xb8] sm:$0xff] %vm4822_vm3, %v5504_v16  ;;  %6326 = vmatprep.mubr.f32.mxu1 %v5705_v23  ;;  %v4275_v57 = vpop.f32.mrf.mxu1  ;;  %7394 = vmatpush3.msra.mxu0 %v5914_v28 }
 0x4c4   : > { %v4276_v50 = vadd.f32 %v10674_v53, %v4275_v57  ;;  %v4755_v39 = vpop.permute.xlu0 %4754  ;;  %7453 = vmatprep.subr.mxu1 %v5914_v28 }
 0x4c5   : > { %5277 = vrot.lane.b32.xlu1 %v10593_v17, %s7625_s9  ;;  %4837 = vst.msk [vmem:[#allocation3 + $0x230] sm:$0xff] %vm4822_vm3, %v4755_v39  ;;  %v4277_v3 = vpop.f32.mrf.mxu1  ;;  %v4943_v8 = vld [vmem:[#allocation2 + $0x1a7] sm:$0xff]  ;;  %7461 = vmatpush3.msra.mxu1 %v5914_v28 }
 0x4c6   : > { %v5248_v32 = vpop.permute.xlu1 %5247  ;;  %v10739_v49 = vld [vmem:[#allocation2 + $0x1a8] sm:$0xff]  ;;  %v4501_v48 = vadd.f32 %v10697_v2, %v4276_v50  ;;  %5031 = vrot.lane.b32.xlu0 %v4943_v8, %s7625_s9  ;;  %4656 = vst.msk [vmem:[#allocation3 + $0x410] sm:$0xff] %vm317_vm0, %v4943_v8 }
 0x4c7   : > { %5339 = vst.msk [vmem:[#allocation3 + $0xb0] sm:$0xff] %vm4822_vm3, %v5248_v32  ;;  %v5389_v27 = vld [vmem:[#allocation2 + $0x1a7] sm:$0xff]  ;;  %v10806_v32 = vpop.f32.mrf.mxu0 }
 0x4c8   : > { %v5704_v56 = vld [vmem:[#allocation3 + $0x88] sm:$0xff]  ;;  %5167 = vst.msk [vmem:[#allocation3 + $0x3d0] sm:$0xff] %vm317_vm0, %v10739_v49  ;;  %5421 = vst.msk [vmem:[#allocation3 + $0x388] sm:$0xff] %vm317_vm0, %v5389_v27  ;;  %v4559_v17 = vmax.f32 %v4501_v48, 0.0  ;;  %v5758_v40 = vld [vmem:[#allocation3 + $0x238] sm:$0xff] }
 0x4c9   : > { %6327 = vmatmul.mubr.f32.gmra.mxu1 %v5704_v56  ;;  %5279 = vrot.lane.b32.xlu1 %v10648_v51, %s7625_s9 }
 0x4ca   : > { %v5506_v5 = vpop.permute.xlu1 %5505  ;;  %v5710_v11 = vld [vmem:[#allocation3 + $0xb8] sm:$0xff]  ;;  %6156 = vmatprep.mubr.f32.mxu0 %v5758_v40  ;;  %4591 = vst.msk [vmem:[#allocation2 + $0x1b0] sm:$0xff] %vm317_vm0, %v4559_v17  ;;  %4774 = vrot.lane.b32.xlu0 %v10678_v7, %s7625_s9  ;;  %v4515_v17 = vpop.f32.mrf.mxu0 }
 0x4cb   : > { %5596 = vst.msk [vmem:[#allocation3 + $0xe0] sm:$0xff] %vm4822_vm3, %v5506_v5  ;;  %6331 = vmatprep.mubr.f32.mxu1 %v5710_v11 }
 0x4cc   : > { %v5757_v62 = vld [vmem:[#allocation3 + $0x230] sm:$0xff] }
 0x4cd   : > { %5281 = vrot.lane.b32.xlu1 %v10653_v33, %s7625_s9  ;;  %v5014_v51 = vpop.permute.xlu0 %5013  ;;  %6157 = vmatmul.mubr.f32.gmra.mxu0 %v5757_v62 }
 0x4ce   : > { %v5250_v21 = vpop.permute.xlu1 %5249  ;;  %v5709_v45 = vld [vmem:[#allocation3 + $0xb0] sm:$0xff]  ;;  %5094 = vst.msk [vmem:[#allocation3 + $0x260] sm:$0xff] %vm4822_vm3, %v5014_v51  ;;  %v4280_v33 = vpop.f32.mrf.mxu1 }
 0x4cf   : > { %5340 = vst.msk [vmem:[#allocation3 + $0xd8] sm:$0xff] %vm4822_vm3, %v5250_v21  ;;  %6332 = vmatmul.mubr.f32.gmra.mxu1 %v5709_v45  ;;  %v4281_v10 = vadd.f32 %v10674_v53, %v4280_v33 }
 0x4d0   : > { %v4282_v24 = vpop.f32.mrf.mxu1 }
 0x4d1   : > { %5283 = vrot.lane.b32.xlu1 %v10704_v19, %s7625_s9  ;;  %v4757_v31 = vpop.permute.xlu0 %4756  ;;  %v4944_v43 = vld [vmem:[#allocation2 + $0x1af] sm:$0xff]  ;;  %v4506_v12 = vadd.f32 %v4505_v13, %v4281_v10 }
 0x4d2   : > { %v5508_v26 = vpop.permute.xlu1 %5507  ;;  %v5715_v4 = vld [vmem:[#allocation3 + $0xe0] sm:$0xff]  ;;  %4838 = vst.msk [vmem:[#allocation3 + $0x258] sm:$0xff] %vm4822_vm3, %v4757_v31  ;;  %v5199_v55 = vld [vmem:[#allocation2 + $0x1a9] sm:$0xff]  ;;  %v5200_v36 = vld [vmem:[#allocation2 + $0x1b1] sm:$0xff]  ;;  %5033 = vrot.lane.b32.xlu0 %v4944_v43, %s7625_s9 }
 0x4d3   : > { %5597 = vst.msk [vmem:[#allocation3 + $0x108] sm:$0xff] %vm4822_vm3, %v5508_v26  ;;  %6336 = vmatprep.mubr.f32.mxu1 %v5715_v4  ;;  %v10770_v35 = vld [vmem:[#allocation2 + $0x1b0] sm:$0xff]  ;;  %v4560_v18 = vmax.f32 %v4506_v12, 0.0 }
 0x4d4   : > { %4913 = vst.msk [vmem:[#allocation3 + $0x418] sm:$0xff] %vm317_vm0, %v5199_v55  ;;  %4914 = vst.msk [vmem:[#allocation3 + $0x440] sm:$0xff] %vm317_vm0, %v5200_v36  ;;  %v5390_v30 = vld [vmem:[#allocation2 + $0x1af] sm:$0xff] }
 0x4d5   : > { %5285 = vrot.lane.b32.xlu1 %v10706_v61, %s7625_s9  ;;  %4657 = vst.msk [vmem:[#allocation3 + $0x438] sm:$0xff] %vm317_vm0, %v4944_v43  ;;  %5168 = vst.msk [vmem:[#allocation3 + $0x3f8] sm:$0xff] %vm317_vm0, %v10770_v35  ;;  %v5645_v29 = vld [vmem:[#allocation2 + $0x1a9] sm:$0xff]  ;;  %v5646_v1 = vld [vmem:[#allocation2 + $0x1b1] sm:$0xff] }
 0x4d6   : > { %5422 = vst.msk [vmem:[#allocation3 + $0x3b0] sm:$0xff] %vm317_vm0, %v5390_v30  ;;  %v5252_v2 = vpop.permute.xlu1 %5251  ;;  %v5763_v9 = vld [vmem:[#allocation3 + $0x260] sm:$0xff]  ;;  %v5714_v52 = vld [vmem:[#allocation3 + $0xd8] sm:$0xff]  ;;  %5677 = vst.msk [vmem:[#allocation3 + $0x390] sm:$0xff] %vm317_vm0, %v5645_v29  ;;  %4776 = vrot.lane.b32.xlu0 %v10711_v42, %s7625_s9 }
 0x4d7   : > { %5678 = vst.msk [vmem:[#allocation3 + $0x3b8] sm:$0xff] %vm317_vm0, %v5646_v1  ;;  %6161 = vmatprep.mubr.f32.mxu0 %v5763_v9  ;;  %6337 = vmatmul.mubr.f32.gmra.mxu1 %v5714_v52  ;;  %4592 = vst.msk [vmem:[#allocation2 + $0x1c8] sm:$0xff] %vm317_vm0, %v4560_v18  ;;  %v5913_v4 = vld [vmem:[%s11316_s5 + $0x210] sm:$0xff] }
 0x4d8   : > { %5341 = vst.msk [vmem:[#allocation3 + $0x100] sm:$0xff] %vm4822_vm3, %v5252_v2  ;;  %v5016_v60 = vpop.permute.xlu0 %5015  ;;  %7395 = vmatprep.subr.mxu0 %v5913_v4  ;;  %7454 = vmatprep.subr.mxu1 %v5913_v4 }
 0x4d9   : > { %5287 = vrot.lane.b32.xlu1 %v5199_v55, %s7625_s9  ;;  %v5762_v41 = vld [vmem:[#allocation3 + $0x258] sm:$0xff]  ;;  %5095 = vst.msk [vmem:[#allocation3 + $0x288] sm:$0xff] %vm4822_vm3, %v5016_v60  ;;  %7396 = vmatpush3.msra.mxu0 %v5913_v4 }
 0x4da   : > { %v5510_v46 = vpop.permute.xlu1 %5509  ;;  %v5720_v25 = vld [vmem:[#allocation3 + $0x108] sm:$0xff]  ;;  %6162 = vmatmul.mubr.f32.gmra.mxu0 %v5762_v41  ;;  %7462 = vmatpush3.msra.mxu1 %v5913_v4 }
 0x4db   : > { %5598 = vst.msk [vmem:[#allocation3 + $0x130] sm:$0xff] %vm4822_vm3, %v5510_v46  ;;  %6341 = vmatprep.mubr.f32.mxu1 %v5720_v25  ;;  %v4285_v20 = vpop.f32.mrf.mxu1 }
 0x4dc   : > { %v4286_v19 = vadd.f32 %v10674_v53, %v4285_v20  ;;  %v4759_v61 = vpop.permute.xlu0 %4758 }
 0x4dd   : > { %5289 = vrot.lane.b32.xlu1 %v5200_v36, %s7625_s9  ;;  %4839 = vst.msk [vmem:[#allocation3 + $0x280] sm:$0xff] %vm4822_vm3, %v4759_v61  ;;  %v4287_v14 = vpop.f32.mrf.mxu1 }
 0x4de   : > { %v5254_v59 = vpop.permute.xlu1 %5253  ;;  %v4945_v58 = vld [vmem:[#allocation2 + $0x1c7] sm:$0xff]  ;;  %v4511_v63 = vadd.f32 %v10755_v37, %v4286_v19  ;;  %v10850_v19 = vpop.f32.mrf.mxu0 }
 0x4df   : > { %v5719_v6 = vld [vmem:[#allocation3 + $0x100] sm:$0xff]  ;;  %5342 = vst.msk [vmem:[#allocation3 + $0x128] sm:$0xff] %vm4822_vm3, %v5254_v59  ;;  %v10791_v38 = vld [vmem:[#allocation2 + $0x1c8] sm:$0xff]  ;;  %5035 = vrot.lane.b32.xlu0 %v4945_v58, %s7625_s9 }
 0x4e0   : > { %6342 = vmatmul.mubr.f32.gmra.mxu1 %v5719_v6  ;;  %5169 = vst.msk [vmem:[#allocation3 + $0x420] sm:$0xff] %vm317_vm0, %v10791_v38  ;;  %4658 = vst.msk [vmem:[#allocation3 + $0x460] sm:$0xff] %vm317_vm0, %v4945_v58  ;;  %v5391_v34 = vld [vmem:[#allocation2 + $0x1c7] sm:$0xff]  ;;  %v4561_v15 = vmax.f32 %v4511_v63, 0.0  ;;  %v4525_v63 = vpop.f32.mrf.mxu0 }
 0x4e1   : > { %5423 = vst.msk [vmem:[#allocation3 + $0x3d8] sm:$0xff] %vm317_vm0, %v5391_v34  ;;  %v5768_v44 = vld [vmem:[#allocation3 + $0x288] sm:$0xff] }
 0x4e2   : > { %v5512_v22 = vpop.permute.xlu1 %5511  ;;  %v5725_v16 = vld [vmem:[#allocation3 + $0x130] sm:$0xff]  ;;  %6166 = vmatprep.mubr.f32.mxu0 %v5768_v44  ;;  %4593 = vst.msk [vmem:[#allocation2 + $0x1d0] sm:$0xff] %vm317_vm0, %v4561_v15  ;;  %v5912_v58 = vld [vmem:[%s11316_s5 + $0x208] sm:$0xff] }
 0x4e3   : > { %5599 = vst.msk [vmem:[#allocation3 + $0x158] sm:$0xff] %vm4822_vm3, %v5512_v22  ;;  %6346 = vmatprep.mubr.f32.mxu1 %v5725_v16  ;;  %4778 = vrot.lane.b32.xlu0 %v10739_v49, %s7625_s9 }
 0x4e4   : > { %v5767_v50 = vld [vmem:[#allocation3 + $0x280] sm:$0xff]  ;;  %7397 = vmatprep.subr.mxu0 %v5912_v58  ;;  %7455 = vmatprep.subr.mxu1 %v5912_v58 }
 0x4e5   : > { %6167 = vmatmul.mubr.f32.gmra.mxu0 %v5767_v50  ;;  %7463 = vmatpush3.msra.mxu1 %v5912_v58 }
 0x4e6   : > { %v5018_v23 = vpop.permute.xlu0 %5017  ;;  %v5256_v57 = vpop.permute.xlu1 %5255  ;;  %v5724_v39 = vld [vmem:[#allocation3 + $0x128] sm:$0xff]  ;;  %7398 = vmatpush3.msra.mxu0 %v5912_v58 }
 0x4e7   : > { %5096 = vst.msk [vmem:[#allocation3 + $0x2b0] sm:$0xff] %vm4822_vm3, %v5018_v23  ;;  %5343 = vst.msk [vmem:[#allocation3 + $0x150] sm:$0xff] %vm4822_vm3, %v5256_v57  ;;  %6347 = vmatmul.mubr.f32.gmra.mxu1 %v5724_v39  ;;  %v4290_v56 = vpop.f32.mrf.mxu1 }
 0x4e8   : > { %v4291_v3 = vadd.f32 %v10674_v53, %v4290_v56 }
 0x4e9   : > { %v4292_v5 = vpop.f32.mrf.mxu1  ;;  %v4946_v40 = vld [vmem:[#allocation2 + $0x1cf] sm:$0xff] }
 0x4ea   : > { %v4761_v8 = vpop.permute.xlu0 %4760  ;;  %v5514_v27 = vpop.permute.xlu1 %5513  ;;  %v5730_v48 = vld [vmem:[#allocation3 + $0x158] sm:$0xff]  ;;  %v5201_v11 = vld [vmem:[#allocation2 + $0x1c9] sm:$0xff]  ;;  %v4516_v21 = vadd.f32 %v4515_v17, %v4291_v3  ;;  %5037 = vrot.lane.b32.xlu0 %v4946_v40, %s7625_s9  ;;  %4659 = vst.msk [vmem:[#allocation3 + $0x488] sm:$0xff] %vm317_vm0, %v4946_v40 }
 0x4eb   : > { %4840 = vst.msk [vmem:[#allocation3 + $0x2a8] sm:$0xff] %vm4822_vm3, %v4761_v8  ;;  %5600 = vst.msk [vmem:[#allocation3 + $0x180] sm:$0xff] %vm4822_vm3, %v5514_v27  ;;  %6351 = vmatprep.mubr.f32.mxu1 %v5730_v48  ;;  %v5202_v51 = vld [vmem:[#allocation2 + $0x1d1] sm:$0xff]  ;;  %5291 = vrot.lane.b32.xlu1 %v5201_v11, %s7625_s9  ;;  %v5647_v37 = vld [vmem:[#allocation2 + $0x1c9] sm:$0xff] }
 0x4ec   : > { %v10815_v62 = vld [vmem:[#allocation2 + $0x1d0] sm:$0xff]  ;;  %4915 = vst.msk [vmem:[#allocation3 + $0x468] sm:$0xff] %vm317_vm0, %v5201_v11  ;;  %4916 = vst.msk [vmem:[#allocation3 + $0x490] sm:$0xff] %vm317_vm0, %v5202_v51  ;;  %v4562_v33 = vmax.f32 %v4516_v21, 0.0 }
 0x4ed   : > { %v5392_v45 = vld [vmem:[#allocation2 + $0x1cf] sm:$0xff]  ;;  %5170 = vst.msk [vmem:[#allocation3 + $0x448] sm:$0xff] %vm317_vm0, %v10815_v62  ;;  %5679 = vst.msk [vmem:[#allocation3 + $0x3e0] sm:$0xff] %vm317_vm0, %v5647_v37 }
 0x4ee   : > { %5424 = vst.msk [vmem:[#allocation3 + $0x400] sm:$0xff] %vm317_vm0, %v5392_v45  ;;  %v5648_v0 = vld [vmem:[#allocation2 + $0x1d1] sm:$0xff]  ;;  %v5258_v10 = vpop.permute.xlu1 %5257  ;;  %4594 = vst.msk [vmem:[#allocation2 + $0x1e8] sm:$0xff] %vm317_vm0, %v4562_v33  ;;  %4780 = vrot.lane.b32.xlu0 %v10770_v35, %s7625_s9 }
 0x4ef   : > { %v5773_v31 = vld [vmem:[#allocation3 + $0x2b0] sm:$0xff]  ;;  %5680 = vst.msk [vmem:[#allocation3 + $0x408] sm:$0xff] %vm317_vm0, %v5648_v0  ;;  %5293 = vrot.lane.b32.xlu1 %v5202_v51, %s7625_s9 }
 0x4f0   : > { %v5729_v26 = vld [vmem:[#allocation3 + $0x150] sm:$0xff]  ;;  %5344 = vst.msk [vmem:[#allocation3 + $0x178] sm:$0xff] %vm4822_vm3, %v5258_v10  ;;  %6171 = vmatprep.mubr.f32.mxu0 %v5773_v31 }
 0x4f1   : > { %6352 = vmatmul.mubr.f32.gmra.mxu1 %v5729_v26  ;;  %v5020_v13 = vpop.permute.xlu0 %5019 }
 0x4f2   : > { %v5516_v24 = vpop.permute.xlu1 %5515  ;;  %v5772_v43 = vld [vmem:[#allocation3 + $0x2a8] sm:$0xff]  ;;  %v5735_v55 = vld [vmem:[#allocation3 + $0x180] sm:$0xff]  ;;  %5097 = vst.msk [vmem:[#allocation3 + $0x2d8] sm:$0xff] %vm4822_vm3, %v5020_v13  ;;  %v4295_v36 = vpop.f32.mrf.mxu1 }
 0x4f3   : > { %5601 = vst.msk [vmem:[#allocation3 + $0x1a8] sm:$0xff] %vm4822_vm3, %v5516_v24  ;;  %6172 = vmatmul.mubr.f32.gmra.mxu0 %v5772_v43  ;;  %6356 = vmatprep.mubr.f32.mxu1 %v5735_v55  ;;  %v4296_v12 = vadd.f32 %v10674_v53, %v4295_v36 }
 0x4f4   : > { %v4297_v18 = vpop.f32.mrf.mxu1 }
 0x4f5   : > { %v4763_v30 = vpop.permute.xlu0 %4762  ;;  %v4947_v2 = vld [vmem:[#allocation2 + $0x1e7] sm:$0xff]  ;;  %v4521_v60 = vadd.f32 %v10806_v32, %v4296_v12 }
 0x4f6   : > { %v5260_v29 = vpop.permute.xlu1 %5259  ;;  %4841 = vst.msk [vmem:[#allocation3 + $0x2d0] sm:$0xff] %vm4822_vm3, %v4763_v30  ;;  %v10838_v9 = vld [vmem:[#allocation2 + $0x1e8] sm:$0xff]  ;;  %5039 = vrot.lane.b32.xlu0 %v4947_v2, %s7625_s9 }
 0x4f7   : > { %v5734_v1 = vld [vmem:[#allocation3 + $0x178] sm:$0xff]  ;;  %5345 = vst.msk [vmem:[#allocation3 + $0x1a0] sm:$0xff] %vm4822_vm3, %v5260_v29  ;;  %v5393_v52 = vld [vmem:[#allocation2 + $0x1e7] sm:$0xff]  ;;  %v4563_v46 = vmax.f32 %v4521_v60, 0.0 }
 0x4f8   : > { %6357 = vmatmul.mubr.f32.gmra.mxu1 %v5734_v1  ;;  %5171 = vst.msk [vmem:[#allocation3 + $0x470] sm:$0xff] %vm317_vm0, %v10838_v9  ;;  %4660 = vst.msk [vmem:[#allocation3 + $0x4b0] sm:$0xff] %vm317_vm0, %v4947_v2 }
 0x4f9   : > { %5425 = vst.msk [vmem:[#allocation3 + $0x428] sm:$0xff] %vm317_vm0, %v5393_v52  ;;  %v5778_v25 = vld [vmem:[#allocation3 + $0x2d8] sm:$0xff]  ;;  %4595 = vst.msk [vmem:[#allocation2 + $0x1f0] sm:$0xff] %vm317_vm0, %v4563_v46 }
 0x4fa   : > { %v5518_v41 = vpop.permute.xlu1 %5517  ;;  %v5740_v20 = vld [vmem:[#allocation3 + $0x1a8] sm:$0xff]  ;;  %6176 = vmatprep.mubr.f32.mxu0 %v5778_v25  ;;  %4782 = vrot.lane.b32.xlu0 %v10791_v38, %s7625_s9 }
 0x4fb   : > { %5602 = vst.msk [vmem:[#allocation3 + $0x1d0] sm:$0xff] %vm4822_vm3, %v5518_v41  ;;  %6361 = vmatprep.mubr.f32.mxu1 %v5740_v20 }
 0x4fd   : > { %v5777_v6 = vld [vmem:[#allocation3 + $0x2d0] sm:$0xff] }
 0x4fe   : > { %v5022_v61 = vpop.permute.xlu0 %5021  ;;  %v5262_v59 = vpop.permute.xlu1 %5261  ;;  %v5739_v14 = vld [vmem:[#allocation3 + $0x1a0] sm:$0xff]  ;;  %6177 = vmatmul.mubr.f32.gmra.mxu0 %v5777_v6 }
 0x4ff   : > { %5098 = vst.msk [vmem:[#allocation3 + $0x300] sm:$0xff] %vm4822_vm3, %v5022_v61  ;;  %5346 = vst.msk [vmem:[#allocation3 + $0x1c8] sm:$0xff] %vm4822_vm3, %v5262_v59  ;;  %6362 = vmatmul.mubr.f32.gmra.mxu1 %v5739_v14  ;;  %v4300_v28 = vpop.f32.mrf.mxu1 }
 0x500   : > { %v4301_v34 = vadd.f32 %v10674_v53, %v4300_v28  ;;  %v4948_v23 = vld [vmem:[#allocation2 + $0x1ef] sm:$0xff] }
 0x501   : > { %v4302_v16 = vpop.f32.mrf.mxu1  ;;  %v5203_v57 = vld [vmem:[#allocation2 + $0x1e9] sm:$0xff]  ;;  %v5204_v50 = vld [vmem:[#allocation2 + $0x1f1] sm:$0xff]  ;;  %5041 = vrot.lane.b32.xlu0 %v4948_v23, %s7625_s9  ;;  %4661 = vst.msk [vmem:[#allocation3 + $0x4d8] sm:$0xff] %vm317_vm0, %v4948_v23 }
 0x502   : > { %v4765_v15 = vpop.permute.xlu0 %4764  ;;  %v5745_v44 = vld [vmem:[#allocation3 + $0x1d0] sm:$0xff]  ;;  %v4526_v39 = vadd.f32 %v4525_v63, %v4301_v34  ;;  %5295 = vrot.lane.b32.xlu1 %v5203_v57, %s7625_s9  ;;  %4917 = vst.msk [vmem:[#allocation3 + $0x4b8] sm:$0xff] %vm317_vm0, %v5203_v57  ;;  %4918 = vst.msk [vmem:[#allocation3 + $0x4e0] sm:$0xff] %vm317_vm0, %v5204_v50 }
 0x503   : > { %v5520_v22 = vpop.permute.xlu1 %5519  ;;  %4842 = vst.msk [vmem:[#allocation3 + $0x2f8] sm:$0xff] %vm4822_vm3, %v4765_v15  ;;  %6366 = vmatprep.mubr.f32.mxu1 %v5745_v44  ;;  %v10862_v32 = vld [vmem:[#allocation2 + $0x1f0] sm:$0xff] }
 0x504   : > { %5603 = vst.msk [vmem:[#allocation3 + $0x1f8] sm:$0xff] %vm4822_vm3, %v5520_v22  ;;  %v5394_v56 = vld [vmem:[#allocation2 + $0x1ef] sm:$0xff]  ;;  %v4564_v27 = vmax.f32 %v4526_v39, 0.0 }
 0x505   : > { %v5649_v3 = vld [vmem:[#allocation2 + $0x1e9] sm:$0xff]  ;;  %5172 = vst.msk [vmem:[#allocation3 + $0x498] sm:$0xff] %vm317_vm0, %v10862_v32  ;;  %5426 = vst.msk [vmem:[#allocation3 + $0x450] sm:$0xff] %vm317_vm0, %v5394_v56  ;;  %v5650_v8 = vld [vmem:[#allocation2 + $0x1f1] sm:$0xff]  ;;  %4784 = vrot.lane.b32.xlu0 %v10815_v62, %s7625_s9 }
 0x506   : > { %5681 = vst.msk [vmem:[#allocation3 + $0x430] sm:$0xff] %vm317_vm0, %v5649_v3  ;;  %v5783_v17 = vld [vmem:[#allocation3 + $0x300] sm:$0xff]  ;;  %v5744_v5 = vld [vmem:[#allocation3 + $0x1c8] sm:$0xff]  ;;  %5682 = vst.msk [vmem:[#allocation3 + $0x458] sm:$0xff] %vm317_vm0, %v5650_v8  ;;  %5297 = vrot.lane.b32.xlu1 %v5204_v50, %s7625_s9 }
 0x507   : > { %v5264_v48 = vpop.permute.xlu1 %5263  ;;  %6181 = vmatprep.mubr.f32.mxu0 %v5783_v17  ;;  %6367 = vmatmul.mubr.f32.gmra.mxu1 %v5744_v5  ;;  %4596 = vst.msk [vmem:[#allocation2 + $0x208] sm:$0xff] %vm317_vm0, %v4564_v27 }
 0x508   : > { %5347 = vst.msk [vmem:[#allocation3 + $0x1f0] sm:$0xff] %vm4822_vm3, %v5264_v48 }
 0x509   : > { %v5024_v40 = vpop.permute.xlu0 %5023 }
 0x50a   : > { %v5782_v51 = vld [vmem:[#allocation3 + $0x2f8] sm:$0xff]  ;;  %5099 = vst.msk [vmem:[#allocation3 + $0x328] sm:$0xff] %vm4822_vm3, %v5024_v40  ;;  %v4305_v45 = vpop.f32.mrf.mxu1 }
 0x50b   : > { %v5522_v11 = vpop.permute.xlu1 %5521  ;;  %v5750_v21 = vld [vmem:[#allocation3 + $0x1f8] sm:$0xff]  ;;  %6182 = vmatmul.mubr.f32.gmra.mxu0 %v5782_v51  ;;  %v4306_v37 = vadd.f32 %v10674_v53, %v4305_v45  ;;  %v5911_v53 = vld [vmem:[%s11316_s5 + $0x200] sm:$0xff] }
 0x50c   : > { %5604 = vst.msk [vmem:[#allocation3 + $0x220] sm:$0xff] %vm4822_vm3, %v5522_v11  ;;  %6371 = vmatprep.mubr.f32.mxu1 %v5750_v21  ;;  %v4307_v31 = vpop.f32.mrf.mxu1  ;;  %7399 = vmatprep.subr.mxu0 %v5911_v53 }
 0x50d   : > { %v4767_v0 = vpop.permute.xlu0 %4766  ;;  %v4531_v24 = vadd.f32 %v10850_v19, %v4306_v37  ;;  %7456 = vmatprep.subr.mxu1 %v5911_v53  ;;  %7400 = vmatpush3.msra.mxu0 %v5911_v53 }
 0x50e   : > { %4843 = vst.msk [vmem:[#allocation3 + $0x320] sm:$0xff] %vm4822_vm3, %v4767_v0  ;;  %v4949_v26 = vld [vmem:[#allocation2 + $0x207] sm:$0xff]  ;;  %7464 = vmatpush3.msra.mxu1 %v5911_v53 }
 0x50f   : > { %v5266_v33 = vpop.permute.xlu1 %5265  ;;  %v5749_v10 = vld [vmem:[#allocation3 + $0x1f0] sm:$0xff]  ;;  %v10882_v4 = vld [vmem:[#allocation2 + $0x208] sm:$0xff]  ;;  %5043 = vrot.lane.b32.xlu0 %v4949_v26, %s7625_s9  ;;  %v4565_v55 = vmax.f32 %v4531_v24, 0.0 }
 0x510   : > { %5348 = vst.msk [vmem:[#allocation3 + $0x218] sm:$0xff] %vm4822_vm3, %v5266_v33  ;;  %6372 = vmatmul.mubr.f32.gmra.mxu1 %v5749_v10  ;;  %v5395_v13 = vld [vmem:[#allocation2 + $0x207] sm:$0xff]  ;;  %v10892_v43 = vpop.f32.mrf.mxu0 }
 0x511   : > { %5173 = vst.msk [vmem:[#allocation3 + $0x4c0] sm:$0xff] %vm317_vm0, %v10882_v4  ;;  %5427 = vst.msk [vmem:[#allocation3 + $0x478] sm:$0xff] %vm317_vm0, %v5395_v13  ;;  %v5788_v12 = vld [vmem:[#allocation3 + $0x328] sm:$0xff] }
 0x512   : > { %v6090_v29 = vpop.f32.mrf.mxu0  ;;  %6186 = vmatprep.mubr.f32.mxu0 %v5788_v12  ;;  %4597 = vst.msk [vmem:[#allocation2 + $0x210] sm:$0xff] %vm317_vm0, %v4565_v55 }
 0x513   : > { %v5524_v36 = vpop.permute.xlu1 %5523  ;;  %v5755_v30 = vld [vmem:[#allocation3 + $0x220] sm:$0xff]  ;;  %4786 = vrot.lane.b32.xlu0 %v10838_v9, %s7625_s9 }
 0x514   : > { %5605 = vst.msk [vmem:[#allocation3 + $0x248] sm:$0xff] %vm4822_vm3, %v5524_v36  ;;  %6376 = vmatprep.mubr.f32.mxu1 %v5755_v30  ;;  %v10898_v1 = vpop.f32.mrf.mxu0  ;;  %v5026_v18 = vpop.permute.xlu0 %5025 }
 0x515   : > { %v5787_v52 = vld [vmem:[#allocation3 + $0x320] sm:$0xff]  ;;  %5100 = vst.msk [vmem:[#allocation3 + $0x350] sm:$0xff] %vm4822_vm3, %v5026_v18 }
 0x516   : > { %v6095_v46 = vpop.f32.mrf.mxu0  ;;  %6187 = vmatmul.mubr.f32.gmra.mxu0 %v5787_v52 }
 0x517   : > { %v5268_v2 = vpop.permute.xlu1 %5267  ;;  %v5754_v60 = vld [vmem:[#allocation3 + $0x218] sm:$0xff] }
 0x518   : > { %5349 = vst.msk [vmem:[#allocation3 + $0x240] sm:$0xff] %vm4822_vm3, %v5268_v2  ;;  %6377 = vmatmul.mubr.f32.gmra.mxu1 %v5754_v60  ;;  %v10902_v41 = vpop.f32.mrf.mxu0  ;;  %v4769_v25 = vpop.permute.xlu0 %4768 }
 0x519   : > { %4844 = vst.msk [vmem:[#allocation3 + $0x348] sm:$0xff] %vm4822_vm3, %v4769_v25  ;;  %v4950_v59 = vld [vmem:[#allocation2 + $0x20f] sm:$0xff] }
 0x51a   : > { %v6100_v61 = vpop.f32.mrf.mxu0  ;;  %v5205_v6 = vld [vmem:[#allocation2 + $0x209] sm:$0xff]  ;;  %5045 = vrot.lane.b32.xlu0 %v4950_v59, %s7625_s9  ;;  %v5652_v34 = vld [vmem:[#allocation2 + $0x211] sm:$0xff] }
 0x51b   : > { %v5526_v20 = vpop.permute.xlu1 %5525  ;;  %v5760_v19 = vld [vmem:[#allocation3 + $0x248] sm:$0xff]  ;;  %5299 = vrot.lane.b32.xlu1 %v5205_v6, %s7625_s9  ;;  %v10908_v14 = vld [vmem:[#allocation2 + $0x210] sm:$0xff]  ;;  %5684 = vst.msk [vmem:[#allocation3 + $0x4a8] sm:$0xff] %vm317_vm0, %v5652_v34 }
 0x51c   : > { %5606 = vst.msk [vmem:[#allocation3 + $0x270] sm:$0xff] %vm4822_vm3, %v5526_v20  ;;  %6381 = vmatprep.mubr.f32.mxu1 %v5760_v19  ;;  %v5396_v58 = vld [vmem:[#allocation2 + $0x20f] sm:$0xff]  ;;  %v10910_v63 = vpop.f32.mrf.mxu0 }
 0x51d   : > { %v5651_v28 = vld [vmem:[#allocation2 + $0x209] sm:$0xff]  ;;  %5174 = vst.msk [vmem:[#allocation3 + $0x4e8] sm:$0xff] %vm317_vm0, %v10908_v14  ;;  %5428 = vst.msk [vmem:[#allocation3 + $0x4a0] sm:$0xff] %vm317_vm0, %v5396_v58  ;;  %v5206_v23 = vld [vmem:[#allocation2 + $0x211] sm:$0xff] }
 0x51e   : > { %5683 = vst.msk [vmem:[#allocation3 + $0x480] sm:$0xff] %vm317_vm0, %v5651_v28  ;;  %v5793_v22 = vld [vmem:[#allocation3 + $0x350] sm:$0xff]  ;;  %v6105_v16 = vpop.f32.mrf.mxu0  ;;  %4788 = vrot.lane.b32.xlu0 %v10862_v32, %s7625_s9  ;;  %v5461_v59 = vld [vmem:[#allocation2 + $0x228] sm:$0xff] }
 0x51f   : > { %v5270_v15 = vpop.permute.xlu1 %5269  ;;  %v5759_v44 = vld [vmem:[#allocation3 + $0x240] sm:$0xff]  ;;  %6191 = vmatprep.mubr.f32.mxu0 %v5793_v22  ;;  %5301 = vrot.lane.b32.xlu1 %v5206_v23, %s7625_s9  ;;  %v5653_v6 = vld [vmem:[#allocation2 + $0x229] sm:$0xff]  ;;  %v5654_v34 = vld [vmem:[#allocation2 + $0x231] sm:$0xff] }
 0x520   : > { %5350 = vst.msk [vmem:[#allocation3 + $0x268] sm:$0xff] %vm4822_vm3, %v5270_v15  ;;  %6382 = vmatmul.mubr.f32.gmra.mxu1 %v5759_v44  ;;  %v10921_v57 = vpop.f32.mrf.mxu0  ;;  %v5792_v56 = vld [vmem:[#allocation3 + $0x348] sm:$0xff] }
 0x521   : > { %v5028_v50 = vpop.permute.xlu0 %5027  ;;  %6192 = vmatmul.mubr.f32.gmra.mxu0 %v5792_v56  ;;  %5685 = vst.msk [vmem:[#allocation3 + $0x4d0] sm:$0xff] %vm317_vm0, %v5653_v6  ;;  %5686 = vst.msk [vmem:[#allocation3 + $0x4f8] sm:$0xff] %vm317_vm0, %v5654_v34 }
 0x522   : > { %5101 = vst.msk [vmem:[#allocation3 + $0x378] sm:$0xff] %vm4822_vm3, %v5028_v50  ;;  %v6110_v8 = vpop.f32.mrf.mxu0  ;;  %5531 = vrot.lane.b32.xlu0 %v10616_v54, %s7625_s9 }
 0x523   : > { %v5528_v39 = vpop.permute.xlu1 %5527  ;;  %v5765_v3 = vld [vmem:[#allocation3 + $0x270] sm:$0xff] }
 0x524   : > { %5607 = vst.msk [vmem:[#allocation3 + $0x298] sm:$0xff] %vm4822_vm3, %v5528_v39  ;;  %6386 = vmatprep.mubr.f32.mxu1 %v5765_v3  ;;  %v10927_v27 = vpop.f32.mrf.mxu0 }
 0x525   : > { %v4771_v48 = vpop.permute.xlu0 %4770 }
 0x526   : > { %4845 = vst.msk [vmem:[#allocation3 + $0x370] sm:$0xff] %vm4822_vm3, %v4771_v48  ;;  %v6115_v40 = vpop.f32.mrf.mxu0  ;;  %5533 = vrot.lane.b32.xlu0 %v10646_v47, %s7625_s9 }
 0x527   : > { %v5272_v17 = vpop.permute.xlu1 %5271  ;;  %v5764_v5 = vld [vmem:[#allocation3 + $0x268] sm:$0xff] }
 0x528   : > { %5351 = vst.msk [vmem:[#allocation3 + $0x290] sm:$0xff] %vm4822_vm3, %v5272_v17  ;;  %6387 = vmatmul.mubr.f32.gmra.mxu1 %v5764_v5  ;;  %v10993_v5 = vld [vmem:[#allocation8] ss:$0 sm:$0xff] }
 0x529   : > { %v5798_v51 = vld [vmem:[#allocation3 + $0x378] sm:$0xff] }
 0x52a   : > { %6196 = vmatprep.mubr.f32.mxu0 %v5798_v51  ;;  %5535 = vrot.lane.b32.xlu0 %v10678_v7, %s7625_s9 }
 0x52b   : > { %v5530_v11 = vpop.permute.xlu1 %5529  ;;  %v5770_v21 = vld [vmem:[#allocation3 + $0x298] sm:$0xff] }
 0x52c   : > { %5608 = vst.msk [vmem:[#allocation3 + $0x2c0] sm:$0xff] %vm4822_vm3, %v5530_v11  ;;  %6391 = vmatprep.mubr.f32.mxu1 %v5770_v21  ;;  %v10934_v54 = vpop.f32.mrf.mxu0  ;;  %v6089_v11 = vadd.f32 %v10993_v5, %v10892_v43 }
 0x52d   : > { %v5797_v33 = vld [vmem:[#allocation3 + $0x370] sm:$0xff] }
 0x52e   : > { %v6120_v45 = vpop.f32.mrf.mxu0  ;;  %v5030_v37 = vpop.permute.xlu0 %5029  ;;  %6197 = vmatmul.mubr.f32.gmra.mxu0 %v5797_v33  ;;  %5537 = vrot.lane.b32.xlu0 %v10711_v42, %s7625_s9  ;;  %v6094_v33 = vadd.f32 %v10993_v5, %v10898_v1  ;;  %v6099_v1 = vadd.f32 %v10993_v5, %v10902_v41 }
 0x52f   : > { %v5274_v0 = vpop.permute.xlu1 %5273  ;;  %v5769_v10 = vld [vmem:[#allocation3 + $0x290] sm:$0xff]  ;;  %5102 = vst.msk [vmem:[#allocation3 + $0x3a0] sm:$0xff] %vm4822_vm3, %v5030_v37 }
 0x530   : > { %5352 = vst.msk [vmem:[#allocation3 + $0x2b8] sm:$0xff] %vm4822_vm3, %v5274_v0  ;;  %6392 = vmatmul.mubr.f32.gmra.mxu1 %v5769_v10 }
 0x532   : > { %v4773_v47 = vpop.permute.xlu0 %4772  ;;  %5539 = vrot.lane.b32.xlu0 %v10739_v49, %s7625_s9 }
 0x533   : > { %v5276_v31 = vpop.permute.xlu1 %5275  ;;  %v5775_v26 = vld [vmem:[#allocation3 + $0x2c0] sm:$0xff]  ;;  %4846 = vst.msk [vmem:[#allocation3 + $0x398] sm:$0xff] %vm4822_vm3, %v4773_v47 }
 0x534   : > { %5353 = vst.msk [vmem:[#allocation3 + $0x2e0] sm:$0xff] %vm4822_vm3, %v5276_v31  ;;  %6396 = vmatprep.mubr.f32.mxu1 %v5775_v26 }
 0x536   : > { %v5803_v13 = vld [vmem:[#allocation3 + $0x3a0] sm:$0xff]  ;;  %v10947_v53 = vpop.f32.mrf.mxu0  ;;  %5541 = vrot.lane.b32.xlu0 %v10770_v35, %s7625_s9 }
 0x537   : > { %v5278_v7 = vpop.permute.xlu1 %5277  ;;  %v5774_v24 = vld [vmem:[#allocation3 + $0x2b8] sm:$0xff]  ;;  %6201 = vmatprep.mubr.f32.mxu0 %v5803_v13 }
 0x538   : > { %5354 = vst.msk [vmem:[#allocation3 + $0x308] sm:$0xff] %vm4822_vm3, %v5278_v7  ;;  %6397 = vmatmul.mubr.f32.gmra.mxu1 %v5774_v24  ;;  %v6125_v42 = vpop.f32.mrf.mxu0  ;;  %v5032_v55 = vpop.permute.xlu0 %5031 }
 0x539   : > { %5103 = vst.msk [vmem:[#allocation3 + $0x3c8] sm:$0xff] %vm4822_vm3, %v5032_v55 }
 0x53a   : > { %v5802_v12 = vld [vmem:[#allocation3 + $0x398] sm:$0xff]  ;;  %5543 = vrot.lane.b32.xlu0 %v10791_v38, %s7625_s9  ;;  %v5397_v38 = vld [vmem:[#allocation2 + $0x227] sm:$0xff] }
 0x53b   : > { %v5280_v36 = vpop.permute.xlu1 %5279  ;;  %6202 = vmatmul.mubr.f32.gmra.mxu0 %v5802_v12  ;;  %5429 = vst.msk [vmem:[#allocation3 + $0x4c8] sm:$0xff] %vm317_vm0, %v5397_v38 }
 0x53c   : > { %5355 = vst.msk [vmem:[#allocation3 + $0x330] sm:$0xff] %vm4822_vm3, %v5280_v36  ;;  %v4775_v49 = vpop.permute.xlu0 %4774 }
 0x53d   : > { %4847 = vst.msk [vmem:[#allocation3 + $0x3c0] sm:$0xff] %vm4822_vm3, %v4775_v49 }
 0x53e   : > { %5545 = vrot.lane.b32.xlu0 %v10815_v62, %s7625_s9  ;;  %v5398_v62 = vld [vmem:[#allocation2 + $0x22f] sm:$0xff] }
 0x53f   : > { %v5282_v30 = vpop.permute.xlu1 %5281  ;;  %5430 = vst.msk [vmem:[#allocation3 + $0x4f0] sm:$0xff] %vm317_vm0, %v5398_v62 }
 0x540   : > { %5356 = vst.msk [vmem:[#allocation3 + $0x358] sm:$0xff] %vm4822_vm3, %v5282_v30  ;;  %v5808_v29 = vld [vmem:[#allocation3 + $0x3c8] sm:$0xff] }
 0x541   : > { %6206 = vmatprep.mubr.f32.mxu0 %v5808_v29 }
 0x542   : > { %5547 = vrot.lane.b32.xlu0 %v10838_v9, %s7625_s9 }
 0x543   : > { %v5284_v35 = vpop.permute.xlu1 %5283  ;;  %v10960_v18 = vpop.f32.mrf.mxu0 }
 0x544   : > { %5357 = vst.msk [vmem:[#allocation3 + $0x380] sm:$0xff] %vm4822_vm3, %v5284_v35  ;;  %v5034_v52 = vpop.permute.xlu0 %5033  ;;  %v5807_v46 = vld [vmem:[#allocation3 + $0x3c0] sm:$0xff] }
 0x545   : > { %v6130_v2 = vpop.f32.mrf.mxu0  ;;  %5104 = vst.msk [vmem:[#allocation3 + $0x3f0] sm:$0xff] %vm4822_vm3, %v5034_v52  ;;  %6207 = vmatmul.mubr.f32.gmra.mxu0 %v5807_v46  ;;  %v6104_v52 = vadd.f32 %v10993_v5, %v10910_v63 }
 0x546   : > { %5549 = vrot.lane.b32.xlu0 %v10862_v32, %s7625_s9 }
 0x547   : > { %v5286_v60 = vpop.permute.xlu1 %5285 }
 0x548   : > { %5358 = vst.msk [vmem:[#allocation3 + $0x3a8] sm:$0xff] %vm4822_vm3, %v5286_v60  ;;  %v4777_v25 = vpop.permute.xlu0 %4776 }
 0x549   : > { %4848 = vst.msk [vmem:[#allocation3 + $0x3e8] sm:$0xff] %vm4822_vm3, %v4777_v25 }
 0x54a   : > { %5551 = vrot.lane.b32.xlu0 %v10882_v4, %s7625_s9  ;;  %v5462_v4 = vld [vmem:[#allocation2 + $0x230] sm:$0xff] }
 0x54b   : > { %v5288_v20 = vpop.permute.xlu1 %5287 }
 0x54c   : > { %5359 = vst.msk [vmem:[#allocation3 + $0x3d0] sm:$0xff] %vm4822_vm3, %v5288_v20  ;;  %v5813_v19 = vld [vmem:[#allocation3 + $0x3f0] sm:$0xff]  ;;  %v6109_v20 = vadd.f32 %v10993_v5, %v10921_v57  ;;  %v6114_v57 = vadd.f32 %v10993_v5, %v10927_v27 }
 0x54d   : > { %6211 = vmatprep.mubr.f32.mxu0 %v5813_v19 }
 0x54e   : > { %5553 = vrot.lane.b32.xlu0 %v10908_v14, %s7625_s9 }
 0x54f   : > { %v5290_v9 = vpop.permute.xlu1 %5289 }
 0x550   : > { %5360 = vst.msk [vmem:[#allocation3 + $0x3f8] sm:$0xff] %vm4822_vm3, %v5290_v9  ;;  %v5812_v28 = vld [vmem:[#allocation3 + $0x3e8] sm:$0xff] }
 0x551   : > { %v10975_v61 = vpop.f32.mrf.mxu0  ;;  %v5036_v58 = vpop.permute.xlu0 %5035  ;;  %6212 = vmatmul.mubr.f32.gmra.mxu0 %v5812_v28 }
 0x552   : > { %5105 = vst.msk [vmem:[#allocation3 + $0x418] sm:$0xff] %vm4822_vm3, %v5036_v58  ;;  %5555 = vrot.lane.b32.xlu0 %v5461_v59, %s7625_s9 }
 0x553   : > { %v6135_v32 = vpop.f32.mrf.mxu0 }
 0x555   : > { %v4779_v15 = vpop.permute.xlu0 %4778 }
 0x556   : > { %4849 = vst.msk [vmem:[#allocation3 + $0x410] sm:$0xff] %vm4822_vm3, %v4779_v15  ;;  %5557 = vrot.lane.b32.xlu0 %v5462_v4, %s7625_s9  ;;  %s7125_s9 = sshll.u32 %s11327_s25, 7 }
 0x557   : > { %s11173_s22 = scalar_lea.vmem %s11318_s7, %s7125_s9 }
 0x559   : > { %v5818_v14 = vld [vmem:[#allocation3 + $0x418] sm:$0xff]  ;;  %v10985_v22 = vpop.f32.mrf.mxu0 }
 0x55a   : > { %6216 = vmatprep.mubr.f32.mxu0 %v5818_v14 }
 0x55b   : > { %v6140_v50 = vpop.f32.mrf.mxu0 }
 0x55c   : > { %v5038_v44 = vpop.permute.xlu0 %5037 }
 0x55d   : > { %v5292_v16 = vpop.permute.xlu1 %5291  ;;  %v5817_v23 = vld [vmem:[#allocation3 + $0x410] sm:$0xff]  ;;  %5106 = vst.msk [vmem:[#allocation3 + $0x440] sm:$0xff] %vm4822_vm3, %v5038_v44 }
 0x55e   : > { %5361 = vst.msk [vmem:[#allocation3 + $0x420] sm:$0xff] %vm4822_vm3, %v5292_v16  ;;  %6217 = vmatmul.mubr.f32.gmra.mxu0 %v5817_v23 }
 0x560   : > { %v4781_v39 = vpop.permute.xlu0 %4780 }
 0x561   : > { %v5294_v56 = vpop.permute.xlu1 %5293  ;;  %4850 = vst.msk [vmem:[#allocation3 + $0x438] sm:$0xff] %vm4822_vm3, %v4781_v39 }
 0x562   : > { %5362 = vst.msk [vmem:[#allocation3 + $0x448] sm:$0xff] %vm4822_vm3, %v5294_v56 }
 0x564   : > { %v5823_v3 = vld [vmem:[#allocation3 + $0x440] sm:$0xff] }
 0x565   : > { %6221 = vmatprep.mubr.f32.mxu0 %v5823_v3  ;;  %v5691_v3 = vld [vmem:[#allocation3 + $0x20] sm:$0xff] }
 0x568   : > { %v10991_v8 = vpop.f32.mrf.mxu0  ;;  %v5040_v48 = vpop.permute.xlu0 %5039  ;;  %v5822_v17 = vld [vmem:[#allocation3 + $0x438] sm:$0xff] }
 0x569   : > { %5107 = vst.msk [vmem:[#allocation3 + $0x468] sm:$0xff] %vm4822_vm3, %v5040_v48  ;;  %6222 = vmatmul.mubr.f32.gmra.mxu0 %v5822_v17  ;;  %v6119_v48 = vadd.f32 %v10993_v5, %v10934_v54  ;;  %v5706_v54 = vld [vmem:[#allocation3 + $0x98] sm:$0xff] }
 0x56a   : > { %v6145_v40 = vpop.f32.mrf.mxu0 }
 0x56c   : > { %v4783_v51 = vpop.permute.xlu0 %4782 }
 0x56d   : > { %4851 = vst.msk [vmem:[#allocation3 + $0x460] sm:$0xff] %vm4822_vm3, %v4783_v51 }
 0x570   : > { %v6313_v21 = vpop.f32.mrf.mxu1  ;;  %v5828_v0 = vld [vmem:[#allocation3 + $0x468] sm:$0xff] }
 0x571   : > { %v10999_v45 = vadd.f32 %v6313_v21, %v6089_v11  ;;  %6226 = vmatprep.mubr.f32.mxu0 %v5828_v0  ;;  %v5696_v11 = vld [vmem:[#allocation3 + $0x48] sm:$0xff]  ;;  %v5779_v21 = vld [vmem:[#allocation3 + $0x2e0] sm:$0xff] }
 0x572   : > { %v6315_v37 = vpop.f32.mrf.mxu1 }
 0x573   : > { %v5042_v47 = vpop.permute.xlu0 %5041  ;;  %v5701_v37 = vld [vmem:[#allocation3 + $0x70] sm:$0xff] }
 0x574   : > { %v11003_v10 = vpop.f32.mrf.mxu0  ;;  %v5296_v31 = vpop.permute.xlu1 %5295  ;;  %v5827_v26 = vld [vmem:[#allocation3 + $0x460] sm:$0xff]  ;;  %5108 = vst.msk [vmem:[#allocation3 + $0x490] sm:$0xff] %vm4822_vm3, %v5042_v47 }
 0x575   : > { %5363 = vst.msk [vmem:[#allocation3 + $0x470] sm:$0xff] %vm4822_vm3, %v5296_v31  ;;  %6227 = vmatmul.mubr.f32.gmra.mxu0 %v5827_v26  ;;  %v5784_v26 = vld [vmem:[#allocation3 + $0x308] sm:$0xff] }
 0x576   : > { %v6150_v43 = vpop.f32.mrf.mxu0 }
 0x577   : > { %v6318_v7 = vpop.f32.mrf.mxu1  ;;  %v4785_v42 = vpop.permute.xlu0 %4784  ;;  %v5711_v43 = vld [vmem:[#allocation3 + $0xc0] sm:$0xff] }
 0x578   : > { %v11007_v13 = vadd.f32 %v6318_v7, %v6094_v33  ;;  %v5298_v55 = vpop.permute.xlu1 %5297  ;;  %4852 = vst.msk [vmem:[#allocation3 + $0x488] sm:$0xff] %vm4822_vm3, %v4785_v42  ;;  %v6124_v7 = vadd.f32 %v10993_v5, %v10947_v53 }
 0x579   : > { %v6320_v24 = vpop.f32.mrf.mxu1  ;;  %5364 = vst.msk [vmem:[#allocation3 + $0x498] sm:$0xff] %vm4822_vm3, %v5298_v55  ;;  %v5716_v55 = vld [vmem:[#allocation3 + $0xe8] sm:$0xff] }
 0x57b   : > { %v5833_v36 = vld [vmem:[#allocation3 + $0x490] sm:$0xff] }
 0x57c   : > { %6231 = vmatprep.mubr.f32.mxu0 %v5833_v36 }
 0x57f   : > { %v6323_v12 = vpop.f32.mrf.mxu1  ;;  %v5832_v38 = vld [vmem:[#allocation3 + $0x488] sm:$0xff] }
 0x580   : > { %v11013_v49 = vadd.f32 %v6323_v12, %v6099_v1  ;;  %6232 = vmatmul.mubr.f32.gmra.mxu0 %v5832_v38  ;;  %v5789_v12 = vld [vmem:[#allocation3 + $0x330] sm:$0xff] }
 0x581   : > { %v6325_v35 = vpop.f32.mrf.mxu1  ;;  %v5044_v29 = vpop.permute.xlu0 %5043 }
 0x582   : > { %v11015_v30 = vpop.f32.mrf.mxu0  ;;  %5109 = vst.msk [vmem:[#allocation3 + $0x4b8] sm:$0xff] %vm4822_vm3, %v5044_v29  ;;  %v5721_v35 = vld [vmem:[#allocation3 + $0x110] sm:$0xff] }
 0x584   : > { %v6155_v2 = vpop.f32.mrf.mxu0 }
 0x585   : > { %v4787_v60 = vpop.permute.xlu0 %4786 }
 0x586   : > { %4853 = vst.msk [vmem:[#allocation3 + $0x4b0] sm:$0xff] %vm4822_vm3, %v4787_v60  ;;  %v5726_v60 = vld [vmem:[#allocation3 + $0x138] sm:$0xff] }
 0x589   : > { %v6328_v41 = vpop.f32.mrf.mxu1  ;;  %v5838_v25 = vld [vmem:[#allocation3 + $0x4b8] sm:$0xff] }
 0x58a   : > { %v11021_v46 = vadd.f32 %v6328_v41, %v6104_v52  ;;  %6236 = vmatprep.mubr.f32.mxu0 %v5838_v25  ;;  %v5794_v41 = vld [vmem:[#allocation3 + $0x358] sm:$0xff]  ;;  %v6129_v25 = vadd.f32 %v10993_v5, %v10960_v18 }
 0x58b   : > { %v6330_v62 = vpop.f32.mrf.mxu1  ;;  %v5746_v18 = vld [vmem:[#allocation3 + $0x1d8] sm:$0xff] }
 0x58c   : > { %v5046_v9 = vpop.permute.xlu0 %5045  ;;  %v5731_v62 = vld [vmem:[#allocation3 + $0x160] sm:$0xff] }
 0x58d   : > { %v5300_v19 = vpop.permute.xlu1 %5299  ;;  %v5837_v32 = vld [vmem:[#allocation3 + $0x4b0] sm:$0xff]  ;;  %5110 = vst.msk [vmem:[#allocation3 + $0x4e0] sm:$0xff] %vm4822_vm3, %v5046_v9  ;;  %v11027_v63 = vpop.f32.mrf.mxu0 }
 0x58e   : > { %5365 = vst.msk [vmem:[#allocation3 + $0x4c0] sm:$0xff] %vm4822_vm3, %v5300_v19  ;;  %6237 = vmatmul.mubr.f32.gmra.mxu0 %v5837_v32  ;;  %v5736_v19 = vld [vmem:[#allocation3 + $0x188] sm:$0xff] }
 0x58f   : > { %v6333_v59 = vpop.f32.mrf.mxu1  ;;  %v6160_v58 = vpop.f32.mrf.mxu0 }
 0x590   : > { %v11029_v6 = vadd.f32 %v6333_v59, %v6109_v20  ;;  %v4789_v34 = vpop.permute.xlu0 %4788  ;;  %v5799_v59 = vld [vmem:[#allocation3 + $0x380] sm:$0xff]  ;;  %v5741_v58 = vld [vmem:[#allocation3 + $0x1b0] sm:$0xff] }
 0x591   : > { %v6335_v28 = vpop.f32.mrf.mxu1  ;;  %v5302_v4 = vpop.permute.xlu1 %5301  ;;  %4854 = vst.msk [vmem:[#allocation3 + $0x4d8] sm:$0xff] %vm4822_vm3, %v4789_v34 }
 0x592   : > { %5366 = vst.msk [vmem:[#allocation3 + $0x4e8] sm:$0xff] %vm4822_vm3, %v5302_v4 }
 0x594   : > { %v5532_v15 = vpop.permute.xlu0 %5531  ;;  %v5843_v14 = vld [vmem:[#allocation3 + $0x4e0] sm:$0xff] }
 0x595   : > { %5609 = vst.msk [vmem:[#allocation3 + $0x2e8] sm:$0xff] %vm4822_vm3, %v5532_v15  ;;  %6241 = vmatprep.mubr.f32.mxu0 %v5843_v14  ;;  %v5804_v14 = vld [vmem:[#allocation3 + $0x3a8] sm:$0xff] }
 0x597   : > { %v6338_v44 = vpop.f32.mrf.mxu1 }
 0x598   : > { %v11036_v16 = vadd.f32 %v6338_v44, %v6114_v57  ;;  %v5534_v50 = vpop.permute.xlu0 %5533  ;;  %v5842_v39 = vld [vmem:[#allocation3 + $0x4d8] sm:$0xff]  ;;  %v5751_v44 = vld [vmem:[#allocation3 + $0x200] sm:$0xff] }
 0x599   : > { %v6340_v23 = vpop.f32.mrf.mxu1  ;;  %5610 = vst.msk [vmem:[#allocation3 + $0x310] sm:$0xff] %vm4822_vm3, %v5534_v50  ;;  %6242 = vmatmul.mubr.f32.gmra.mxu0 %v5842_v39  ;;  %v6134_v50 = vadd.f32 %v10993_v5, %v10975_v61  ;;  %v5766_v61 = vld [vmem:[#allocation3 + $0x278] sm:$0xff] }
 0x59a   : > { %v11039_v56 = vpop.f32.mrf.mxu0  ;;  %7401 = vmatprep.mubr.msk.f32.mxu0 %vm317_vm0, %v5691_v3 }
 0x59c   : > { %v6165_v27 = vpop.f32.mrf.mxu0  ;;  %v5536_v17 = vpop.permute.xlu0 %5535  ;;  %v5780_v40 = vld [vmem:[#allocation3 + $0x2e8] sm:$0xff] }
 0x59d   : > { %5611 = vst.msk [vmem:[#allocation3 + $0x338] sm:$0xff] %vm4822_vm3, %v5536_v17  ;;  %6401 = vmatprep.mubr.f32.mxu1 %v5780_v40  ;;  %7402 = vmatmul.mubr.msk.f32.vlgmr.msra.gmra.mxu0 %vm317_vm0, %v5696_v11  ;;  %v5756_v27 = vld [vmem:[#allocation3 + $0x228] sm:$0xff]  ;;  %v5809_v17 = vld [vmem:[#allocation3 + $0x3d0] sm:$0xff] }
 0x59e   : > { %6402 = vmatmul.mubr.f32.gmra.mxu1 %v5779_v21  ;;  %7404 = vmatprep.mubr.msk.f32.mxu0 %vm317_vm0, %v5701_v37  ;;  %v5761_v40 = vld [vmem:[#allocation3 + $0x250] sm:$0xff] }
 0x5a0   : > { %v6343_v51 = vpop.f32.mrf.mxu1  ;;  %v5538_v47 = vpop.permute.xlu0 %5537  ;;  %v5785_v31 = vld [vmem:[#allocation3 + $0x310] sm:$0xff] }
 0x5a1   : > { %v11046_v0 = vadd.f32 %v6343_v51, %v6119_v48  ;;  %5612 = vst.msk [vmem:[#allocation3 + $0x360] sm:$0xff] %vm4822_vm3, %v5538_v47  ;;  %6406 = vmatprep.mubr.f32.mxu1 %v5785_v31  ;;  %7405 = vmatmul.mubr.msk.f32.gmra.mxu0 %vm317_vm0, %v5706_v54  ;;  %v5771_v47 = vld [vmem:[#allocation3 + $0x2a0] sm:$0xff]  ;;  %v6139_v31 = vadd.f32 %v10993_v5, %v10985_v22 }
 0x5a2   : > { %v6345_v33 = vpop.f32.mrf.mxu1  ;;  %6407 = vmatmul.mubr.f32.gmra.mxu1 %v5784_v26  ;;  %7407 = vmatprep.mubr.msk.f32.mxu0 %vm317_vm0, %v5711_v43  ;;  %v5776_v43 = vld [vmem:[#allocation3 + $0x2c8] sm:$0xff] }
 0x5a3   : > { %v5814_v33 = vld [vmem:[#allocation3 + $0x3f8] sm:$0xff] }
 0x5a4   : > { %v5540_v24 = vpop.permute.xlu0 %5539  ;;  %v5790_v42 = vld [vmem:[#allocation3 + $0x338] sm:$0xff] }
 0x5a5   : > { %5613 = vst.msk [vmem:[#allocation3 + $0x388] sm:$0xff] %vm4822_vm3, %v5540_v24  ;;  %v11055_v1 = vpop.f32.mrf.mxu0  ;;  %6411 = vmatprep.mubr.f32.mxu1 %v5790_v42  ;;  %7408 = vmatmul.mubr.msk.f32.gmra.mxu0 %vm317_vm0, %v5716_v55  ;;  %v5819_v42 = vld [vmem:[#allocation3 + $0x420] sm:$0xff]  ;;  %v5781_v55 = vld [vmem:[#allocation3 + $0x2f0] sm:$0xff] }
 0x5a6   : > { %6412 = vmatmul.mubr.f32.gmra.mxu1 %v5789_v12  ;;  %7410 = vmatprep.mubr.msk.f32.mxu0 %vm317_vm0, %v5721_v35 }
 0x5a7   : > { %v6348_v36 = vpop.f32.mrf.mxu1  ;;  %v6170_v38 = vpop.f32.mrf.mxu0 }
 0x5a8   : > { %v11058_v29 = vadd.f32 %v6348_v36, %v6124_v7  ;;  %v5542_v2 = vpop.permute.xlu0 %5541  ;;  %v5795_v52 = vld [vmem:[#allocation3 + $0x360] sm:$0xff] }
 0x5a9   : > { %v6350_v53 = vpop.f32.mrf.mxu1  ;;  %5614 = vst.msk [vmem:[#allocation3 + $0x3b0] sm:$0xff] %vm4822_vm3, %v5542_v2  ;;  %6416 = vmatprep.mubr.f32.mxu1 %v5795_v52  ;;  %7411 = vmatmul.mubr.msk.f32.gmra.mxu0 %vm317_vm0, %v5726_v60  ;;  %v5824_v2 = vld [vmem:[#allocation3 + $0x448] sm:$0xff]  ;;  %v5791_v52 = vld [vmem:[#allocation3 + $0x340] sm:$0xff]  ;;  %v6144_v60 = vadd.f32 %v10993_v5, %v10991_v8  ;;  %v5806_v8 = vld [vmem:[#allocation3 + $0x3b8] sm:$0xff] }
 0x5aa   : > { %6417 = vmatmul.mubr.f32.gmra.mxu1 %v5794_v41  ;;  %7413 = vmatprep.mubr.msk.f32.mxu0 %vm317_vm0, %v5731_v62  ;;  %v5786_v53 = vld [vmem:[#allocation3 + $0x318] sm:$0xff] }
 0x5ac   : > { %v5544_v20 = vpop.permute.xlu0 %5543  ;;  %v5800_v9 = vld [vmem:[#allocation3 + $0x388] sm:$0xff] }
 0x5ad   : > { %5615 = vst.msk [vmem:[#allocation3 + $0x3d8] sm:$0xff] %vm4822_vm3, %v5544_v20  ;;  %6421 = vmatprep.mubr.f32.mxu1 %v5800_v9  ;;  %7414 = vmatmul.mubr.msk.f32.gmra.mxu0 %vm317_vm0, %v5736_v19  ;;  %v5829_v9 = vld [vmem:[#allocation3 + $0x470] sm:$0xff] }
 0x5ae   : > { %6422 = vmatmul.mubr.f32.gmra.mxu1 %v5799_v59  ;;  %7416 = vmatprep.mubr.msk.f32.mxu0 %vm317_vm0, %v5741_v58  ;;  %v5801_v19 = vld [vmem:[#allocation3 + $0x390] sm:$0xff] }
 0x5b0   : > { %v5546_v4 = vpop.permute.xlu0 %5545  ;;  %v5805_v57 = vld [vmem:[#allocation3 + $0x3b0] sm:$0xff] }
 0x5b1   : > { %v6353_v32 = vpop.f32.mrf.mxu1  ;;  %5616 = vst.msk [vmem:[#allocation3 + $0x400] sm:$0xff] %vm4822_vm3, %v5546_v4  ;;  %6426 = vmatprep.mubr.f32.mxu1 %v5805_v57  ;;  %7417 = vmatmul.mubr.msk.f32.gmra.mxu0 %vm317_vm0, %v5746_v18  ;;  %v5834_v57 = vld [vmem:[#allocation3 + $0x498] sm:$0xff]  ;;  %v5811_v18 = vld [vmem:[#allocation3 + $0x3e0] sm:$0xff] }
 0x5b2   : > { %v11068_v28 = vadd.f32 %v6353_v32, %v6129_v25  ;;  %6427 = vmatmul.mubr.f32.gmra.mxu1 %v5804_v14  ;;  %7419 = vmatprep.mubr.msk.f32.mxu0 %vm317_vm0, %v5751_v44  ;;  %v5796_v25 = vld [vmem:[#allocation3 + $0x368] sm:$0xff]  ;;  %v6149_v44 = vadd.f32 %v10993_v5, %v11003_v10 }
 0x5b3   : > { %v6355_v34 = vpop.f32.mrf.mxu1  ;;  %v11072_v15 = vpop.f32.mrf.mxu0  ;;  %v5844_v10 = vld [vmem:[#allocation3 + $0x4e8] sm:$0xff] }
 0x5b4   : > { %v5548_v39 = vpop.permute.xlu0 %5547  ;;  %v5810_v3 = vld [vmem:[#allocation3 + $0x3d8] sm:$0xff] }
 0x5b5   : > { %v6175_v23 = vpop.f32.mrf.mxu0  ;;  %5617 = vst.msk [vmem:[#allocation3 + $0x428] sm:$0xff] %vm4822_vm3, %v5548_v39  ;;  %6431 = vmatprep.mubr.f32.mxu1 %v5810_v3  ;;  %7420 = vmatmul.mubr.msk.f32.gmra.mxu0 %vm317_vm0, %v5756_v27  ;;  %v5839_v3 = vld [vmem:[#allocation3 + $0x4c0] sm:$0xff]  ;;  %v5821_v27 = vld [vmem:[#allocation3 + $0x430] sm:$0xff] }
 0x5b6   : > { %6432 = vmatmul.mubr.f32.gmra.mxu1 %v5809_v17  ;;  %7422 = vmatprep.mubr.msk.f32.mxu0 %vm317_vm0, %v5761_v40 }
 0x5b8   : > { %v6358_v48 = vpop.f32.mrf.mxu1  ;;  %v5550_v21 = vpop.permute.xlu0 %5549  ;;  %v5815_v37 = vld [vmem:[#allocation3 + $0x400] sm:$0xff] }
 0x5b9   : > { %v11080_v11 = vadd.f32 %v6358_v48, %v6134_v50  ;;  %5618 = vst.msk [vmem:[#allocation3 + $0x450] sm:$0xff] %vm4822_vm3, %v5550_v21  ;;  %6436 = vmatprep.mubr.f32.mxu1 %v5815_v37  ;;  %7423 = vmatmul.mubr.msk.f32.gmra.mxu0 %vm317_vm0, %v5766_v61  ;;  %v5816_v50 = vld [vmem:[#allocation3 + $0x408] sm:$0xff]  ;;  %v5841_v21 = vld [vmem:[#allocation3 + $0x4d0] sm:$0xff]  ;;  %v5831_v37 = vld [vmem:[#allocation3 + $0x480] sm:$0xff] }
 0x5ba   : > { %v6360_v51 = vpop.f32.mrf.mxu1  ;;  %6437 = vmatmul.mubr.f32.gmra.mxu1 %v5814_v33  ;;  %7425 = vmatprep.mubr.msk.f32.mxu0 %vm317_vm0, %v5771_v47  ;;  %v5846_v61 = vld [vmem:[#allocation3 + $0x4f8] sm:$0xff]  ;;  %v6154_v33 = vadd.f32 %v10993_v5, %v11015_v30  ;;  %v5836_v47 = vld [vmem:[#allocation3 + $0x4a8] sm:$0xff] }
 0x5bb   : > { %v5826_v51 = vld [vmem:[#allocation3 + $0x458] sm:$0xff] }
 0x5bc   : > { %v5552_v54 = vpop.permute.xlu0 %5551  ;;  %v5820_v26 = vld [vmem:[#allocation3 + $0x428] sm:$0xff] }
 0x5bd   : > { %5619 = vst.msk [vmem:[#allocation3 + $0x478] sm:$0xff] %vm4822_vm3, %v5552_v54  ;;  %6441 = vmatprep.mubr.f32.mxu1 %v5820_v26  ;;  %7426 = vmatmul.mubr.msk.f32.gmra.mxu0 %vm317_vm0, %v5776_v43 }
 0x5be   : > { %v11089_v7 = vpop.f32.mrf.mxu0  ;;  %6442 = vmatmul.mubr.f32.gmra.mxu1 %v5819_v42  ;;  %7428 = vmatprep.mubr.msk.f32.mxu0 %vm317_vm0, %v5781_v55  ;;  %v6159_v42 = vadd.f32 %v10993_v5, %v11027_v63 }
 0x5bf   : > { %v6363_v24 = vpop.f32.mrf.mxu1 }
 0x5c0   : > { %v11092_v36 = vadd.f32 %v6363_v24, %v6139_v31  ;;  %v6180_v12 = vpop.f32.mrf.mxu0  ;;  %v5554_v35 = vpop.permute.xlu0 %5553  ;;  %v5825_v38 = vld [vmem:[#allocation3 + $0x450] sm:$0xff] }
 0x5c1   : > { %v6365_v22 = vpop.f32.mrf.mxu1  ;;  %5620 = vst.msk [vmem:[#allocation3 + $0x4a0] sm:$0xff] %vm4822_vm3, %v5554_v35  ;;  %6446 = vmatprep.mubr.f32.mxu1 %v5825_v38  ;;  %7429 = vmatmul.mubr.msk.f32.gmra.mxu0 %vm317_vm0, %v5786_v53  ;;  %v6164_v38 = vadd.f32 %v10993_v5, %v11039_v56 }
 0x5c2   : > { %6447 = vmatmul.mubr.f32.gmra.mxu1 %v5824_v2  ;;  %7431 = vmatprep.mubr.msk.f32.mxu0 %vm317_vm0, %v5791_v52 }
 0x5c4   : > { %v5556_v41 = vpop.permute.xlu0 %5555  ;;  %v5830_v62 = vld [vmem:[#allocation3 + $0x478] sm:$0xff] }
 0x5c5   : > { %5621 = vst.msk [vmem:[#allocation3 + $0x4c8] sm:$0xff] %vm4822_vm3, %v5556_v41  ;;  %6451 = vmatprep.mubr.f32.mxu1 %v5830_v62  ;;  %7432 = vmatmul.mubr.msk.f32.gmra.mxu0 %vm317_vm0, %v5796_v25 }
 0x5c6   : > { %6452 = vmatmul.mubr.f32.gmra.mxu1 %v5829_v9  ;;  %7434 = vmatprep.mubr.msk.f32.mxu0 %vm317_vm0, %v5801_v19  ;;  %v6174_v9 = vadd.f32 %v10993_v5, %v11072_v15 }
 0x5c7   : > { %v6368_v20 = vpop.f32.mrf.mxu1 }
 0x5c8   : > { %v11102_v32 = vadd.f32 %v6368_v20, %v6144_v60  ;;  %v5558_v58 = vpop.permute.xlu0 %5557  ;;  %v5835_v34 = vld [vmem:[#allocation3 + $0x4a0] sm:$0xff]  ;;  %v6169_v60 = vadd.f32 %v10993_v5, %v11055_v1 }
 0x5c9   : > { %v6370_v59 = vpop.f32.mrf.mxu1  ;;  %5622 = vst.msk [vmem:[#allocation3 + $0x4f0] sm:$0xff] %vm4822_vm3, %v5558_v58  ;;  %6456 = vmatprep.mubr.f32.mxu1 %v5835_v34  ;;  %7435 = vmatmul.mubr.msk.f32.gmra.mxu0 %vm317_vm0, %v5806_v8 }
 0x5ca   : > { %6457 = vmatmul.mubr.f32.gmra.mxu1 %v5834_v57  ;;  %7437 = vmatprep.mubr.msk.f32.mxu0 %vm317_vm0, %v5811_v18 }
 0x5cb   : > { %v11106_v4 = vpop.f32.mrf.mxu0 }
 0x5cc   : > { %v5840_v23 = vld [vmem:[#allocation3 + $0x4c8] sm:$0xff] }
 0x5cd   : > { %v6185_v14 = vpop.f32.mrf.mxu0  ;;  %6461 = vmatprep.mubr.f32.mxu1 %v5840_v23  ;;  %7438 = vmatmul.mubr.msk.f32.gmra.mxu0 %vm317_vm0, %v5816_v50 }
 0x5ce   : > { %6462 = vmatmul.mubr.f32.gmra.mxu1 %v5839_v3  ;;  %7440 = vmatprep.mubr.msk.f32.mxu0 %vm317_vm0, %v5821_v27 }
 0x5d0   : > { %v6373_v39 = vpop.f32.mrf.mxu1  ;;  %v5845_v40 = vld [vmem:[#allocation3 + $0x4f0] sm:$0xff] }
 0x5d1   : > { %v11113_v48 = vadd.f32 %v6373_v39, %v6149_v44  ;;  %6466 = vmatprep.mubr.f32.mxu1 %v5845_v40  ;;  %7441 = vmatmul.mubr.msk.f32.gmra.mxu0 %vm317_vm0, %v5826_v51 }
 0x5d2   : > { %v6375_v17 = vpop.f32.mrf.mxu1  ;;  %6467 = vmatmul.mubr.f32.gmra.mxu1 %v5844_v10  ;;  %7443 = vmatprep.mubr.msk.f32.mxu0 %vm317_vm0, %v5831_v37 }
 0x5d3   : > { %7446 = vmatprep.mubr.msk.f32.mxu1 %vm317_vm0, %v5841_v21 }
 0x5d5   : > { %7444 = vmatmul.mubr.msk.f32.gmra.mxu0 %vm317_vm0, %v5836_v47 }
 0x5d6   : > { %v11121_v31 = vpop.f32.mrf.mxu0  ;;  %7447 = vmatmul.mubr.msk.f32.vlgmr.msra.gmra.mxu1 %vm317_vm0, %v5846_v61  ;;  %vm6857_vm0 = vcmask 519168  }
 0x5d8   : > { %v6378_v54 = vpop.f32.mrf.mxu1  ;;  %v6190_v43 = vpop.f32.mrf.mxu0 }
 0x5d9   : > { %v11124_v26 = vadd.f32 %v6378_v54, %v6154_v33 }
 0x5da   : > { %v6380_v24 = vpop.f32.mrf.mxu1 }
 0x5e0   : > { %v6383_v55 = vpop.f32.mrf.mxu1 }
 0x5e1   : > { %v11129_v12 = vadd.f32 %v6383_v55, %v6159_v42  ;;  %v11131_v30 = vpop.f32.mrf.mxu0 }
 0x5e2   : > { %v6385_v22 = vpop.f32.mrf.mxu1 }
 0x5e3   : > { %v6195_v35 = vpop.f32.mrf.mxu0 }
 0x5e8   : > { %v6388_v53 = vpop.f32.mrf.mxu1 }
 0x5e9   : > { %v11135_v2 = vadd.f32 %v6388_v53, %v6164_v38 }
 0x5ea   : > { %v6390_v52 = vpop.f32.mrf.mxu1 }
 0x5ee   : > { %v11139_v41 = vpop.f32.mrf.mxu0 }
 0x5f0   : > { %v6393_v63 = vpop.f32.mrf.mxu1  ;;  %v6200_v25 = vpop.f32.mrf.mxu0 }
 0x5f1   : > { %v11141_v62 = vadd.f32 %v6393_v63, %v6169_v60 }
 0x5f2   : > { %v6395_v20 = vpop.f32.mrf.mxu1 }
 0x5f8   : > { %v6398_v19 = vpop.f32.mrf.mxu1 }
 0x5f9   : > { %v11145_v59 = vadd.f32 %v6398_v19, %v6174_v9 }
 0x5fa   : > { %v6400_v56 = vpop.f32.mrf.mxu1 }
 0x5fb   : > { %v11147_v58 = vpop.f32.mrf.mxu0 }
 0x5fd   : > { %v6205_v34 = vpop.f32.mrf.mxu0 }
 0x605   : > { %v11149_v8 = vpop.f32.mrf.mxu0 }
 0x607   : > { %v6210_v1 = vpop.f32.mrf.mxu0 }
 0x611   : > { %v11151_v57 = vpop.f32.mrf.mxu0 }
 0x613   : > { %v6215_v18 = vpop.f32.mrf.mxu0 }
 0x61e   : > { %v11153_v14 = vpop.f32.mrf.mxu0 }
 0x620   : > { %v6220_v44 = vpop.f32.mrf.mxu0 }
 0x629   : > { %v11155_v23 = vpop.f32.mrf.mxu0 }
 0x62b   : > { %v6225_v15 = vpop.f32.mrf.mxu0 }
 0x635   : > { %v11157_v50 = vpop.f32.mrf.mxu0 }
 0x637   : > { %v6230_v39 = vpop.f32.mrf.mxu0 }
 0x640   : > { %v11159_v3 = vpop.f32.mrf.mxu0 }
 0x642   : > { %v6235_v27 = vpop.f32.mrf.mxu0 }
 0x64e   : > { %v11161_v17 = vpop.f32.mrf.mxu0 }
 0x650   : > { %v6240_v40 = vpop.f32.mrf.mxu0 }
 0x659   : > { %v11163_v51 = vpop.f32.mrf.mxu0 }
 0x65b   : > { %v6245_v21 = vpop.f32.mrf.mxu0 }
 0x65d   : > { %v7403_v10 = vpop.f32.mrf.mxu0 }
 0x65e   : > { %v6544_v37 = vadd.f32 %v7403_v10, %v11007_v13  ;;  %v11167_v61 = vpop.f32.mrf.mxu1 }
 0x65f   : > { %v6538_v33 = vpop.f32.mrf.mxu0 }
 0x660   : > { %v6698_v47 = vmax.f32 %v6544_v37, 0.0  ;;  %v6539_v54 = vadd.f32 %v6538_v33, %v10999_v45  ;;  %v6405_v43 = vpop.f32.mrf.mxu1 }
 0x661   : > { %v7406_v24 = vpop.f32.mrf.mxu0 }
 0x662   : > { %v7127_v42 = vpack.c.bf16 %v6698_v47, %v6698_v47  ;;  %v6697_v55 = vmax.f32 %v6539_v54, 0.0  ;;  %v6554_v13 = vadd.f32 %v7406_v24, %v11021_v46  ;;  %v11176_v22 = vpop.f32.mrf.mxu1 }
 0x663   : > { %v6548_v35 = vpop.f32.mrf.mxu0 }
 0x664   : > { %6859 = vst.msk [vmem:[%s11173_s22 + $0x4] sm:$0xf] %vm6857_vm0, %v7127_v42  ;;  %v7126_v45 = vpack.c.bf16 %v6697_v55, %v6697_v55  ;;  %v6700_v38 = vmax.f32 %v6554_v13, 0.0  ;;  %v6549_v53 = vadd.f32 %v6548_v35, %v11013_v49  ;;  %v6410_v52 = vpop.f32.mrf.mxu1 }
 0x665   : > { %v7409_v60 = vpop.f32.mrf.mxu0 }
 0x666   : > { %6858 = vst.msk [vmem:[%s11173_s22] sm:$0xf] %vm6857_vm0, %v7126_v45  ;;  %v7129_v63 = vpack.c.bf16 %v6700_v38, %v6700_v38  ;;  %v6699_v25 = vmax.f32 %v6549_v53, 0.0  ;;  %v6564_v20 = vadd.f32 %v7409_v60, %v11036_v16  ;;  %v11184_v46 = vpop.f32.mrf.mxu1 }
 0x667   : > { %v6558_v9 = vpop.f32.mrf.mxu0 }
 0x668   : > { %6861 = vst.msk [vmem:[%s11173_s22 + $0xc] sm:$0xf] %vm6857_vm0, %v7129_v63  ;;  %v7128_v19 = vpack.c.bf16 %v6699_v25, %v6699_v25  ;;  %v6702_v56 = vmax.f32 %v6564_v20, 0.0  ;;  %v6559_v34 = vadd.f32 %v6558_v9, %v11029_v6  ;;  %v6415_v49 = vpop.f32.mrf.mxu1 }
 0x669   : > { %v7412_v1 = vpop.f32.mrf.mxu0 }
 0x66a   : > { %6860 = vst.msk [vmem:[%s11173_s22 + $0x8] sm:$0xf] %vm6857_vm0, %v7128_v19  ;;  %v7131_v18 = vpack.c.bf16 %v6702_v56, %v6702_v56  ;;  %v6701_v44 = vmax.f32 %v6559_v34, 0.0  ;;  %v6574_v15 = vadd.f32 %v7412_v1, %v11058_v29  ;;  %v11192_v16 = vpop.f32.mrf.mxu1 }
 0x66b   : > { %v6568_v39 = vpop.f32.mrf.mxu0 }
 0x66c   : > { %6863 = vst.msk [vmem:[%s11173_s22 + $0x14] sm:$0xf] %vm6857_vm0, %v7131_v18  ;;  %v7130_v27 = vpack.c.bf16 %v6701_v44, %v6701_v44  ;;  %v6704_v40 = vmax.f32 %v6574_v15, 0.0  ;;  %v6569_v21 = vadd.f32 %v6568_v39, %v11046_v0  ;;  %v6420_v6 = vpop.f32.mrf.mxu1 }
 0x66d   : > { %v7415_v10 = vpop.f32.mrf.mxu0 }
 0x66e   : > { %6862 = vst.msk [vmem:[%s11173_s22 + $0x10] sm:$0xf] %vm6857_vm0, %v7130_v27  ;;  %v7133_v37 = vpack.c.bf16 %v6704_v40, %v6704_v40  ;;  %v6703_v33 = vmax.f32 %v6569_v21, 0.0  ;;  %v6584_v47 = vadd.f32 %v7415_v10, %v11080_v11  ;;  %v11200_v29 = vpop.f32.mrf.mxu1  ;;  %v6184_v10 = vadd.f32 %v10993_v5, %v11106_v4 }
 0x66f   : > { %v6578_v54 = vpop.f32.mrf.mxu0 }
 0x670   : > { %6865 = vst.msk [vmem:[%s11173_s22 + $0x1c] sm:$0xf] %vm6857_vm0, %v7133_v37  ;;  %v7132_v43 = vpack.c.bf16 %v6703_v33, %v6703_v33  ;;  %v6706_v24 = vmax.f32 %v6584_v47, 0.0  ;;  %v6579_v42 = vadd.f32 %v6578_v54, %v11068_v28  ;;  %v6425_v0 = vpop.f32.mrf.mxu1  ;;  %v6179_v54 = vadd.f32 %v10993_v5, %v11089_v7 }
 0x671   : > { %v7418_v55 = vpop.f32.mrf.mxu0 }
 0x672   : > { %6864 = vst.msk [vmem:[%s11173_s22 + $0x18] sm:$0xf] %vm6857_vm0, %v7132_v43  ;;  %v7135_v13 = vpack.c.bf16 %v6706_v24, %v6706_v24  ;;  %v6705_v35 = vmax.f32 %v6579_v42, 0.0  ;;  %v6594_v45 = vadd.f32 %v7418_v55, %v11102_v32  ;;  %v11208_v11 = vpop.f32.mrf.mxu1  ;;  %v6194_v55 = vadd.f32 %v10993_v5, %v11131_v30 }
 0x673   : > { %v6588_v38 = vpop.f32.mrf.mxu0 }
 0x674   : > { %6867 = vst.msk [vmem:[%s11173_s22 + $0x24] sm:$0xf] %vm6857_vm0, %v7135_v13  ;;  %v7134_v53 = vpack.c.bf16 %v6705_v35, %v6705_v35  ;;  %v6708_v52 = vmax.f32 %v6594_v45, 0.0  ;;  %v6589_v60 = vadd.f32 %v6588_v38, %v11092_v36  ;;  %v6430_v28 = vpop.f32.mrf.mxu1  ;;  %v6404_v13 = vadd.f32 %v11167_v61, %v6179_v54 }
 0x675   : > { %v7421_v63 = vpop.f32.mrf.mxu0  ;;  %v6189_v38 = vadd.f32 %v10993_v5, %v11121_v31  ;;  %v6204_v28 = vadd.f32 %v10993_v5, %v11147_v58 }
 0x676   : > { %6866 = vst.msk [vmem:[%s11173_s22 + $0x20] sm:$0xf] %vm6857_vm0, %v7134_v53  ;;  %v7137_v25 = vpack.c.bf16 %v6708_v52, %v6708_v52  ;;  %v6707_v20 = vmax.f32 %v6589_v60, 0.0  ;;  %v6604_v9 = vadd.f32 %v7421_v63, %v11124_v26  ;;  %v11216_v32 = vpop.f32.mrf.mxu1 }
 0x677   : > { %v6598_v19 = vpop.f32.mrf.mxu0 }
 0x678   : > { %6869 = vst.msk [vmem:[%s11173_s22 + $0x2c] sm:$0xf] %vm6857_vm0, %v7137_v25  ;;  %v7136_v56 = vpack.c.bf16 %v6707_v20, %v6707_v20  ;;  %v6710_v34 = vmax.f32 %v6604_v9, 0.0  ;;  %v6599_v49 = vadd.f32 %v6598_v19, %v11113_v48  ;;  %v6435_v36 = vpop.f32.mrf.mxu1  ;;  %v6414_v25 = vadd.f32 %v11184_v46, %v6189_v38 }
 0x679   : > { %v7424_v1 = vpop.f32.mrf.mxu0  ;;  %v6199_v19 = vadd.f32 %v10993_v5, %v11139_v41 }
 0x67a   : > { %6868 = vst.msk [vmem:[%s11173_s22 + $0x28] sm:$0xf] %vm6857_vm0, %v7136_v56  ;;  %v7139_v18 = vpack.c.bf16 %v6710_v34, %v6710_v34  ;;  %v6709_v44 = vmax.f32 %v6599_v49, 0.0  ;;  %v6614_v15 = vadd.f32 %v7424_v1, %v11135_v2  ;;  %v11224_v39 = vpop.f32.mrf.mxu1  ;;  %v6429_v34 = vadd.f32 %v11208_v11, %v6204_v28 }
 0x67b   : > { %v6608_v26 = vpop.f32.mrf.mxu0  ;;  %v6214_v1 = vadd.f32 %v10993_v5, %v11151_v57 }
 0x67c   : > { %6871 = vst.msk [vmem:[%s11173_s22 + $0x34] sm:$0xf] %vm6857_vm0, %v7139_v18  ;;  %v7138_v27 = vpack.c.bf16 %v6709_v44, %v6709_v44  ;;  %v6712_v40 = vmax.f32 %v6614_v15, 0.0  ;;  %v6609_v21 = vadd.f32 %v6608_v26, %v11129_v12  ;;  %v6440_v48 = vpop.f32.mrf.mxu1  ;;  %v6409_v12 = vadd.f32 %v11176_v22, %v6184_v10 }
 0x67d   : > { %v7427_v6 = vpop.f32.mrf.mxu0  ;;  %v6424_v44 = vadd.f32 %v11200_v29, %v6199_v19  ;;  %v6224_v10 = vadd.f32 %v10993_v5, %v11155_v23 }
 0x67e   : > { %6870 = vst.msk [vmem:[%s11173_s22 + $0x30] sm:$0xf] %vm6857_vm0, %v7138_v27  ;;  %v7141_v37 = vpack.c.bf16 %v6712_v40, %v6712_v40  ;;  %v6711_v2 = vmax.f32 %v6609_v21, 0.0  ;;  %v6624_v33 = vadd.f32 %v7427_v6, %v11145_v59  ;;  %v11234_v47 = vpop.f32.mrf.mxu1  ;;  %v6209_v27 = vadd.f32 %v10993_v5, %v11149_v8 }
 0x67f   : > { %v6618_v43 = vpop.f32.mrf.mxu0  ;;  %v6439_v21 = vadd.f32 %v11224_v39, %v6214_v1 }
 0x680   : > { %6873 = vst.msk [vmem:[%s11173_s22 + $0x3c] sm:$0xf] %vm6857_vm0, %v7141_v37  ;;  %v7140_v24 = vpack.c.bf16 %v6711_v2, %v6711_v2  ;;  %v6714_v4 = vmax.f32 %v6624_v33, 0.0  ;;  %v6619_v42 = vadd.f32 %v6618_v43, %v11141_v62  ;;  %v6445_v0 = vpop.f32.mrf.mxu1  ;;  %v6419_v62 = vadd.f32 %v11192_v16, %v6194_v55 }
 0x681   : > { %v7430_v59 = vpop.f32.mrf.mxu0  ;;  %v6434_v2 = vadd.f32 %v11216_v32, %v6209_v27  ;;  %v6219_v43 = vadd.f32 %v10993_v5, %v11153_v14  ;;  %v6234_v32 = vadd.f32 %v10993_v5, %v11159_v3 }
 0x682   : > { %6872 = vst.msk [vmem:[%s11173_s22 + $0x38] sm:$0xf] %vm6857_vm0, %v7140_v24  ;;  %v7143_v7 = vpack.c.bf16 %v6714_v4, %v6714_v4  ;;  %v6713_v35 = vmax.f32 %v6619_v42, 0.0  ;;  %v6634_v22 = vadd.f32 %v7430_v59, %v6409_v12  ;;  %v6448_v45 = vpop.f32.mrf.mxu1 }
 0x683   : > { %v6628_v53 = vpop.f32.mrf.mxu0  ;;  %v6449_v24 = vadd.f32 %v6448_v45, %v6224_v10  ;;  %v6444_v59 = vadd.f32 %v11234_v47, %v6219_v43  ;;  %v6244_v45 = vadd.f32 %v10993_v5, %v11163_v51 }
 0x684   : > { %6875 = vst.msk [vmem:[%s11173_s22 + $0x44] sm:$0xf] %vm6857_vm0, %v7143_v7  ;;  %v7142_v30 = vpack.c.bf16 %v6713_v35, %v6713_v35  ;;  %v6716_v52 = vmax.f32 %v6634_v22, 0.0  ;;  %v6629_v60 = vadd.f32 %v6628_v53, %v6404_v13  ;;  %v6450_v61 = vpop.f32.mrf.mxu1  ;;  %v6229_v22 = vadd.f32 %v10993_v5, %v11157_v50 }
 0x685   : > { %v7433_v63 = vpop.f32.mrf.mxu0 }
 0x686   : > { %6874 = vst.msk [vmem:[%s11173_s22 + $0x40] sm:$0xf] %vm6857_vm0, %v7142_v30  ;;  %v7145_v31 = vpack.c.bf16 %v6716_v52, %v6716_v52  ;;  %v6715_v20 = vmax.f32 %v6629_v60, 0.0  ;;  %v6644_v9 = vadd.f32 %v7433_v63, %v6419_v62  ;;  %v6453_v16 = vpop.f32.mrf.mxu1  ;;  %v6239_v52 = vadd.f32 %v10993_v5, %v11161_v17 }
 0x687   : > { %v6638_v56 = vpop.f32.mrf.mxu0  ;;  %v6454_v28 = vadd.f32 %v6453_v16, %v6229_v22 }
 0x688   : > { %6877 = vst.msk [vmem:[%s11173_s22 + $0x4c] sm:$0xf] %vm6857_vm0, %v7145_v31  ;;  %v7144_v58 = vpack.c.bf16 %v6715_v20, %v6715_v20  ;;  %v6718_v49 = vmax.f32 %v6644_v9, 0.0  ;;  %v6639_v36 = vadd.f32 %v6638_v56, %v6414_v25  ;;  %v6455_v46 = vpop.f32.mrf.mxu1 }
 0x689   : > { %v7436_v18 = vpop.f32.mrf.mxu0 }
 0x68a   : > { %6876 = vst.msk [vmem:[%s11173_s22 + $0x48] sm:$0xf] %vm6857_vm0, %v7144_v58  ;;  %v7147_v41 = vpack.c.bf16 %v6718_v49, %v6718_v49  ;;  %v6717_v15 = vmax.f32 %v6639_v36, 0.0  ;;  %v6654_v26 = vadd.f32 %v7436_v18, %v6429_v34  ;;  %v6458_v11 = vpop.f32.mrf.mxu1 }
 0x68b   : > { %v6648_v40 = vpop.f32.mrf.mxu0  ;;  %v6459_v53 = vadd.f32 %v6458_v11, %v6234_v32 }
 0x68c   : > { %6879 = vst.msk [vmem:[%s11173_s22 + $0x54] sm:$0xf] %vm6857_vm0, %v7147_v41  ;;  %v7146_v57 = vpack.c.bf16 %v6717_v15, %v6717_v15  ;;  %v6720_v48 = vmax.f32 %v6654_v26, 0.0  ;;  %v6649_v6 = vadd.f32 %v6648_v40, %v6424_v44  ;;  %v6460_v29 = vpop.f32.mrf.mxu1 }
 0x68d   : > { %v7439_v37 = vpop.f32.mrf.mxu0 }
 0x68e   : > { %6878 = vst.msk [vmem:[%s11173_s22 + $0x50] sm:$0xf] %vm6857_vm0, %v7146_v57  ;;  %v7149_v8 = vpack.c.bf16 %v6720_v48, %v6720_v48  ;;  %v6719_v33 = vmax.f32 %v6649_v6, 0.0  ;;  %v6664_v54 = vadd.f32 %v7439_v37, %v6439_v21  ;;  %v6463_v39 = vpop.f32.mrf.mxu1 }
 0x68f   : > { %v6658_v12 = vpop.f32.mrf.mxu0  ;;  %v6464_v31 = vadd.f32 %v6463_v39, %v6239_v52 }
 0x690   : > { %6881 = vst.msk [vmem:[%s11173_s22 + $0x5c] sm:$0xf] %vm6857_vm0, %v7149_v8  ;;  %v7148_v4 = vpack.c.bf16 %v6719_v33, %v6719_v33  ;;  %v6722_v23 = vmax.f32 %v6664_v54, 0.0  ;;  %v6659_v42 = vadd.f32 %v6658_v12, %v6434_v2  ;;  %v6465_v0 = vpop.f32.mrf.mxu1 }
 0x691   : > { %v7442_v55 = vpop.f32.mrf.mxu0 }
 0x692   : > { %6880 = vst.msk [vmem:[%s11173_s22 + $0x58] sm:$0xf] %vm6857_vm0, %v7148_v4  ;;  %v7151_v13 = vpack.c.bf16 %v6722_v23, %v6722_v23  ;;  %v6721_v7 = vmax.f32 %v6659_v42, 0.0  ;;  %v6674_v14 = vadd.f32 %v7442_v55, %v6449_v24  ;;  %v6468_v35 = vpop.f32.mrf.mxu1 }
 0x693   : > { %v6668_v38 = vpop.f32.mrf.mxu0  ;;  %v6469_v60 = vadd.f32 %v6468_v35, %v6244_v45 }
 0x694   : > { %6883 = vst.msk [vmem:[%s11173_s22 + $0x64] sm:$0xf] %vm6857_vm0, %v7151_v13  ;;  %v7150_v3 = vpack.c.bf16 %v6721_v7, %v6721_v7  ;;  %v6724_v47 = vmax.f32 %v6674_v14, 0.0  ;;  %v6669_v62 = vadd.f32 %v6668_v38, %v6444_v59  ;;  %v6470_v30 = vpop.f32.mrf.mxu1 }
 0x695   : > { %v7445_v61 = vpop.f32.mrf.mxu0 }
 0x696   : > { %6882 = vst.msk [vmem:[%s11173_s22 + $0x60] sm:$0xf] %vm6857_vm0, %v7150_v3  ;;  %v7153_v50 = vpack.c.bf16 %v6724_v47, %v6724_v47  ;;  %v6723_v51 = vmax.f32 %v6669_v62, 0.0  ;;  %v6684_v63 = vadd.f32 %v7445_v61, %v6459_v53  ;;  %v7448_v25 = vpop.f32.mrf.mxu1 }
 0x697   : > { %v6694_v20 = vadd.f32 %v7448_v25, %v6469_v60  ;;  %v6678_v9 = vpop.f32.mrf.mxu0 }
 0x698   : > { %6885 = vst.msk [vmem:[%s11173_s22 + $0x6c] sm:$0xf] %vm6857_vm0, %v7153_v50  ;;  %v7152_v19 = vpack.c.bf16 %v6723_v51, %v6723_v51  ;;  %v6726_v5 = vmax.f32 %v6684_v63, 0.0  ;;  %v6679_v17 = vadd.f32 %v6678_v9, %v6454_v28  ;;  %v6688_v16 = vpop.f32.mrf.mxu1 }
 0x699   : > { %v6728_v56 = vmax.f32 %v6694_v20, 0.0  ;;  %v6689_v34 = vadd.f32 %v6688_v16, %v6464_v31 }
 0x69a   : > { %6884 = vst.msk [vmem:[%s11173_s22 + $0x68] sm:$0xf] %vm6857_vm0, %v7152_v19  ;;  %v7155_v58 = vpack.c.bf16 %v6726_v5, %v6726_v5  ;;  %v6725_v49 = vmax.f32 %v6679_v17, 0.0 }
 0x69b   : > { %v7157_v36 = vpack.c.bf16 %v6728_v56, %v6728_v56  ;;  %v6727_v46 = vmax.f32 %v6689_v34, 0.0 }
 0x69c   : > { %6887 = vst.msk [vmem:[%s11173_s22 + $0x74] sm:$0xf] %vm6857_vm0, %v7155_v58  ;;  %v7154_v1 = vpack.c.bf16 %v6725_v49, %v6725_v49 }
 0x69d   : > { %6889 = vst.msk [vmem:[%s11173_s22 + $0x7c] sm:$0xf] %vm6857_vm0, %v7157_v36  ;;  %v7156_v18 = vpack.c.bf16 %v6727_v46, %v6727_v46 }
 0x69e   : > { %6886 = vst.msk [vmem:[%s11173_s22 + $0x70] sm:$0xf] %vm6857_vm0, %v7154_v1 }
 0x69f   : > { %6888 = vst.msk [vmem:[%s11173_s22 + $0x78] sm:$0xf] %vm6857_vm0, %v7156_v18 }
 0x6a0 PF: > { %s19_s24 = sadd.s32 1, %s7611_s24  }
 0x6a1   : > { %p16_p5 = scmp.ge.s32.totalorder %s19_s24, 4  }
 0x6a3   :  { %18 = sbr.rel (!%p16_p5) target bundleno = 2 (0x2), region = 94 }
 0x6a8   :  { %6911 = vsyncpa [#allocation5], 1 }
 0x6a9   :  { %6913 = vsyncpa [#allocation5 + $0x1], 1 }
 0x6aa   :  { %6914 = vsyncpa [#allocation7], 1 }

</bundles_post_ra>
